<compile_context>
chip_gen: v6e
topology: v6e:2x2x1
jax: 0.10.0
libtpu: 0.0.40
codegen_flags: <defaults>
</compile_context>

<pallas_src>
import functools
import math

import jax
import jax.numpy as jnp
from jax.experimental import pallas as pl
from jax.experimental.pallas import tpu as pltpu

# ------------- cfg.RPN defaults (torchvision-style), eval/test values ----------
ANCHOR_SIZES = ((32,), (64,), (128,), (256,), (512,))
ASPECT_RATIOS = (0.5, 1.0, 2.0)
NUM_ANCHORS = len(ASPECT_RATIOS)            # A = 3 anchors / location
POST_NMS_TOP_N_TEST = 1000
MIN_SIZE = 1e-3
BBOX_XFORM_CLIP = math.log(1000.0 / 16.0)
IN_CHANNELS = 256
CO_PAD = 16                                 # 3 cls + 12 bbox + 1 pad lanes


# =============================== Pallas kernel =================================
def _rpn_fused_kernel(top_ref, mid_ref, bot_ref, anch_ref,
                      w1_ref, b1_ref, w2_ref, b2_ref, out_ref,
                      *, W, img_h, img_w, bbox_clip, min_size):
    """Fused 3x3 conv (9 shifted matmul taps) + ReLU + 1x1 heads + box decode.

    Blocks:
      top/mid/bot : (1, trh, W+2, C)  bf16   row-shifted, zero-padded NHWC views
      anch        : (trh*W, 16)       f32    [x1(a)|y1(a)|x2(a)|y2(a)|pad]
      w1          : (9, C, C)         bf16   tap = 3*dy + dx
      b1          : (1, C)            f32
      w2          : (C, 16)           bf16   cols [cls(a)|dx(a)|dy(a)|dw(a)|dh(a)|pad]
      b2          : (1, 16)           f32
      out         : (1, trh*W, 16)    f32    [score(a)|x1(a)|y1(a)|x2(a)|y2(a)|pad]
    """
    A = NUM_ANCHORS
    trh = top_ref.shape[1]
    C = w1_ref.shape[1]
    m = trh * W
    views = (top_ref, mid_ref, bot_ref)

    # ---- 3x3 conv as 9 accumulated matmuls (bf16 in, f32 accumulate) ----
    acc = None
    for t in range(3):
        xt = views[t][0]                                     # (trh, W+2, C)
        for s in range(3):
            xs = xt[:, s:s + W, :].reshape(m, C)
            part = jnp.dot(xs, w1_ref[3 * t + s],
                           preferred_element_type=jnp.float32)
            acc = part if acc is None else acc + part
    hidden = jnp.maximum(acc + b1_ref[...], 0.0).astype(jnp.bfloat16)

    # ---- 1x1 cls + bbox heads (single fused matmul) ----
    head = jnp.dot(hidden, w2_ref[...],
                   preferred_element_type=jnp.float32) + b2_ref[...]   # (m, 16)

    # ---- anchor decode + clip + min-size mask + sigmoid (fused epilogue) ----
    a = anch_ref[...]
    ax1, ay1 = a[:, 0:A], a[:, A:2 * A]
    ax2, ay2 = a[:, 2 * A:3 * A], a[:, 3 * A:4 * A]
    aw = ax2 - ax1
    ah = ay2 - ay1
    acx = ax1 + 0.5 * aw
    acy = ay1 + 0.5 * ah

    logits = head[:, 0:A]
    dx = head[:, A:2 * A]
    dy = head[:, 2 * A:3 * A]
    dw = jnp.minimum(head[:, 3 * A:4 * A], bbox_clip)
    dh = jnp.minimum(head[:, 4 * A:5 * A], bbox_clip)

    pcx = dx * aw + acx
    pcy = dy * ah + acy
    pw = jnp.exp(dw) * aw
    ph = jnp.exp(dh) * ah
    bx1 = jnp.clip(pcx - 0.5 * pw, 0.0, img_w)
    by1 = jnp.clip(pcy - 0.5 * ph, 0.0, img_h)
    bx2 = jnp.clip(pcx + 0.5 * pw, 0.0, img_w)
    by2 = jnp.clip(pcy + 0.5 * ph, 0.0, img_h)

    valid = ((bx2 - bx1) >= min_size) & ((by2 - by1) >= min_size)
    scores = jnp.where(valid, jax.nn.sigmoid(logits), -jnp.inf)

    out_ref[0, :, 0:A] = scores
    out_ref[0, :, A:2 * A] = bx1
    out_ref[0, :, 2 * A:3 * A] = by1
    out_ref[0, :, 3 * A:4 * A] = bx2
    out_ref[0, :, 4 * A:5 * A] = by2
    out_ref[0, :, 5 * A:CO_PAD] = jnp.zeros((m, CO_PAD - 5 * A), jnp.float32)


# ================================ wrappers ======================================
def _pick_trh(H, W):
    """Rows per block: whole image if small, else ~2048 matmul rows with the
    out-block lane dim (trh*W) kept a multiple of 128."""
    if H * W <= 2048:
        return H
    g = 128 // math.gcd(W, 128)
    trh = max(1, 2048 // W)
    return max(g, (trh // g) * g)


def base_anchors(scales, aspect_ratios):
    scales = jnp.asarray(scales, jnp.float32)
    ars = jnp.asarray(aspect_ratios, jnp.float32)
    h_ratios = jnp.sqrt(ars)
    w_ratios = 1.0 / h_ratios
    ws = (w_ratios[:, None] * scales[None, :]).reshape(-1)
    hs = (h_ratios[:, None] * scales[None, :]).reshape(-1)
    return jnp.round(jnp.stack([-ws, -hs, ws, hs], axis=1) / 2.0)   # (A, 4)


def _anchors_locmajor(base, Hp, W, stride_h, stride_w):
    """Location-major anchors: (Hp*W, 16) = [x1(a)|y1(a)|x2(a)|y2(a)|pad]."""
    sx = jnp.arange(W, dtype=jnp.float32) * stride_w
    sy = jnp.arange(Hp, dtype=jnp.float32) * stride_h
    shift_x = jnp.tile(sx[None, :], (Hp, 1)).reshape(-1)            # (Hp*W,)
    shift_y = jnp.repeat(sy, W)                                     # (Hp*W,)
    cols = [sh[:, None] + base[None, :, c]
            for c, sh in enumerate((shift_x, shift_y, shift_x, shift_y))]
    pad = jnp.zeros((Hp * W, CO_PAD - 4 * NUM_ANCHORS), jnp.float32)
    return jnp.concatenate(cols + [pad], axis=1)                    # (Hp*W, 16)


def rpn_level_pallas(feat_nchw, base, stride_h, stride_w, params, img_h, img_w):
    """One FPN level: fused conv3x3 + heads + decode.  Returns (N, H*W, 16) f32."""
    N, C, H, W = feat_nchw.shape
    trh = _pick_trh(H, W)
    Hp = ((H + trh - 1) // trh) * trh
    Wp = W + 2

    x = jnp.transpose(feat_nchw, (0, 2, 3, 1)).astype(jnp.bfloat16)   # NHWC bf16
    xp = jnp.pad(x, ((0, 0), (1, 1 + (Hp - H)), (1, 1), (0, 0)))      # (N, Hp+2, Wp, C)
    top, mid, bot = xp[:, 0:Hp], xp[:, 1:Hp + 1], xp[:, 2:Hp + 2]

    anch = _anchors_locmajor(base, Hp, W, stride_h, stride_w)         # (Hp*W, 16)

    kernel = functools.partial(
        _rpn_fused_kernel, W=W, img_h=float(img_h), img_w=float(img_w),
        bbox_clip=BBOX_XFORM_CLIP, min_size=MIN_SIZE)

    feat_spec = pl.BlockSpec((1, trh, Wp, C), lambda n, t: (n, t, 0, 0))
    out = pl.pallas_call(
        kernel,
        out_shape=jax.ShapeDtypeStruct((N, Hp * W, CO_PAD), jnp.float32),
        grid_spec=pl.GridSpec(
            grid=(N, Hp // trh),
            in_specs=[
                feat_spec, feat_spec, feat_spec,
                pl.BlockSpec((trh * W, CO_PAD), lambda n, t: (t, 0)),   # anchors: shared over n
                pl.BlockSpec((9, C, C), lambda n, t: (0, 0, 0)),
                pl.BlockSpec((1, C), lambda n, t: (0, 0)),
                pl.BlockSpec((C, CO_PAD), lambda n, t: (0, 0)),
                pl.BlockSpec((1, CO_PAD), lambda n, t: (0, 0)),
            ],
            out_specs=pl.BlockSpec((1, trh * W, CO_PAD), lambda n, t: (n, t, 0)),
        ),
        compiler_params=pltpu.CompilerParams(
            dimension_semantics=("parallel", "parallel")),
    )(top, mid, bot, anch, params["conv_w"], params["conv_b"],
      params["head_w"], params["head_b"])
    return out[:, :H * W, :]


def init_rpn_params(key, c=IN_CHANNELS, a=NUM_ANCHORS):
    k1, k2, k3 = jax.random.split(key, 3)
    # 3x3 conv: w1[3*dy+dx, cin, cout]  (== torch Conv2d weight[cout, cin, dy, dx])
    conv_w = 0.01 * jax.random.normal(k1, (9, c, c), jnp.float32)
    conv_b = jnp.zeros((1, c), jnp.float32)
    # 1x1 heads; column layout: [cls(a) | dx(a) | dy(a) | dw(a) | dh(a) | pad]
    cls_w = 0.01 * jax.random.normal(k2, (c, a), jnp.float32)
    bbox_w = 0.01 * jax.random.normal(k3, (c, 4 * a), jnp.float32)
    head_w = jnp.concatenate(
        [cls_w, bbox_w, jnp.zeros((c, CO_PAD - 5 * a), jnp.float32)], axis=1)
    head_b = jnp.zeros((1, CO_PAD), jnp.float32)
    return dict(conv_w=conv_w.astype(jnp.bfloat16), conv_b=conv_b,
                head_w=head_w.astype(jnp.bfloat16), head_b=head_b)


def rpn_forward(images, fpn_feature_maps, params):
    """Eval-mode RPN forward: returns (boxes_per_image, losses, fpn_feature_maps)."""
    N = images.shape[0]
    img_h, img_w = images.shape[2], images.shape[3]
    A = NUM_ANCHORS

    scores_l, x1_l, y1_l, x2_l, y2_l = [], [], [], [], []
    for feat, (size,) in zip(fpn_feature_maps, ANCHOR_SIZES):
        _, _, H, W = feat.shape
        base = base_anchors((size,), ASPECT_RATIOS)
        out = rpn_level_pallas(feat, base, img_h // H, img_w // W,
                               params, img_h, img_w)        # (N, H*W, 16)
        hw = H * W
        scores_l.append(out[..., 0:A].reshape(N, hw * A))   # ordering (h, w, a)
        x1_l.append(out[..., A:2 * A].reshape(N, hw * A))
        y1_l.append(out[..., 2 * A:3 * A].reshape(N, hw * A))
        x2_l.append(out[..., 3 * A:4 * A].reshape(N, hw * A))
        y2_l.append(out[..., 4 * A:5 * A].reshape(N, hw * A))

    scores = jnp.concatenate(scores_l, axis=1)              # (N, At)
    x1 = jnp.concatenate(x1_l, axis=1)
    y1 = jnp.concatenate(y1_l, axis=1)
    x2 = jnp.concatenate(x2_l, axis=1)
    y2 = jnp.concatenate(y2_l, axis=1)
    At = scores.shape[1]

    # TODO(synk): per-level NMS (nms_thresh=0.7, data-dependent output size) has no
    # clean Pallas equivalent; proposals are ranked by objectness score only.
    k = min(POST_NMS_TOP_N_TEST, At)
    _, top_idx = jax.lax.top_k(scores, k)
    gather = lambda v: jnp.take_along_axis(v, top_idx, axis=1)
    top_boxes = jnp.stack([gather(x1), gather(y1), gather(x2), gather(y2)],
                          axis=-1)                          # (N, k, 4)

    proposals = [top_boxes[i] for i in range(N)]
    losses = {}  # eval mode (self.training == False): RPN returns empty losses
    return proposals, losses, fpn_feature_maps


# ===================================== main =====================================
if __name__ == "__main__":
    key = jax.random.PRNGKey(0)
    kp, ki, *kf = jax.random.split(key, 2 + len(ANCHOR_SIZES))

    params = init_rpn_params(kp)

    N, IMG = 2, 64
    images = jax.random.normal(ki, (N, 3, IMG, IMG), jnp.float32)
    fpn_sizes = (16, 8, 4, 2, 1)                 # strides 4, 8, 16, 32, 64
    fpn_feature_maps = [
        jax.random.normal(k, (N, IN_CHANNELS, s, s), jnp.float32)
        for k, s in zip(kf, fpn_sizes)
    ]

    boxes, losses, feats = rpn_forward(images, fpn_feature_maps, params)
    jax.block_until_ready(boxes)
    jax.block_until_ready(feats)

    assert len(boxes) == N and boxes[0].shape == (min(POST_NMS_TOP_N_TEST,
                                                      1023), 4)
    assert losses == {}
    print("KERNEL_OK")
</pallas_src>

<mosaic_0001>
module attributes {stable_mosaic.version = 11 : i64} {
  func.func @_rpn_fused_kernel(%arg0: i32, %arg1: i32, %arg2: memref<1x16x18x256xbf16, #tpu.memory_space<vmem>>, %arg3: memref<1x16x18x256xbf16, #tpu.memory_space<vmem>>, %arg4: memref<1x16x18x256xbf16, #tpu.memory_space<vmem>>, %arg5: memref<256x16xf32, #tpu.memory_space<vmem>>, %arg6: memref<9x256x256xbf16, #tpu.memory_space<vmem>>, %arg7: memref<1x256xf32, #tpu.memory_space<vmem>>, %arg8: memref<256x16xbf16, #tpu.memory_space<vmem>>, %arg9: memref<1x16xf32, #tpu.memory_space<vmem>>, %arg10: memref<1x256x16xf32, #tpu.memory_space<vmem>>) attributes {dimension_semantics = [#tpu.dimension_semantics<parallel>, #tpu.dimension_semantics<parallel>], iteration_bounds = array<i64: 2, 1>, scalar_prefetch = 0 : i64, scratch_operands = 0 : i64, tpu.core_type = #tpu.core_type<tc>, window_params = [{transform_indices = @transform_0, window_bounds = array<i64: 1, 16, 18, 256>}, {transform_indices = @transform_1, window_bounds = array<i64: 1, 16, 18, 256>}, {transform_indices = @transform_2, window_bounds = array<i64: 1, 16, 18, 256>}, {transform_indices = @transform_3, window_bounds = array<i64: 256, 16>}, {pipeline_mode = #tpu.pipeline_mode<synchronous>, transform_indices = @transform_4, window_bounds = array<i64: 9, 256, 256>}, {pipeline_mode = #tpu.pipeline_mode<synchronous>, transform_indices = @transform_5, window_bounds = array<i64: 1, 256>}, {pipeline_mode = #tpu.pipeline_mode<synchronous>, transform_indices = @transform_6, window_bounds = array<i64: 256, 16>}, {pipeline_mode = #tpu.pipeline_mode<synchronous>, transform_indices = @transform_7, window_bounds = array<i64: 1, 16>}, {transform_indices = @transform_8, window_bounds = array<i64: 1, 256, 16>}]} {
    %c0 = arith.constant 0 : index
    %c0_0 = arith.constant 0 : index
    %c0_1 = arith.constant 0 : index
    %c0_2 = arith.constant 0 : index
    %0 = vector.load %arg2[%c0, %c0_0, %c0_1, %c0_2] : memref<1x16x18x256xbf16, #tpu.memory_space<vmem>>, vector<1x16x18x256xbf16>
    %1 = vector.shape_cast %0 : vector<1x16x18x256xbf16> to vector<16x18x256xbf16>
    %2 = vector.extract_strided_slice %1 {offsets = [0, 0, 0], sizes = [16, 16, 256], strides = [1, 1, 1]} : vector<16x18x256xbf16> to vector<16x16x256xbf16>
    %3 = vector.shape_cast %2 : vector<16x16x256xbf16> to vector<256x256xbf16>
    %c0_3 = arith.constant 0 : index
    %c0_4 = arith.constant 0 : index
    %c0_5 = arith.constant 0 : index
    %4 = vector.load %arg6[%c0_3, %c0_4, %c0_5] : memref<9x256x256xbf16, #tpu.memory_space<vmem>>, vector<1x256x256xbf16>
    %5 = vector.shape_cast %4 : vector<1x256x256xbf16> to vector<256x256xbf16>
    %cst = arith.constant dense<0.000000e+00> : vector<256x256xf32>
    %6 = tpu.matmul %3, %5, %cst {dimension_numbers = #tpu.dot_dimension_numbers<[1], [0], [0], [1], [0, 0, 1, 1], [], []>} : vector<256x256xbf16>, vector<256x256xbf16>, vector<256x256xf32> -> vector<256x256xf32>
    %7 = vector.extract_strided_slice %1 {offsets = [0, 1, 0], sizes = [16, 16, 256], strides = [1, 1, 1]} : vector<16x18x256xbf16> to vector<16x16x256xbf16>
    %8 = vector.shape_cast %7 : vector<16x16x256xbf16> to vector<256x256xbf16>
    %c1 = arith.constant 1 : index
    %c0_6 = arith.constant 0 : index
    %c0_7 = arith.constant 0 : index
    %9 = vector.load %arg6[%c1, %c0_6, %c0_7] : memref<9x256x256xbf16, #tpu.memory_space<vmem>>, vector<1x256x256xbf16>
    %10 = vector.shape_cast %9 : vector<1x256x256xbf16> to vector<256x256xbf16>
    %cst_8 = arith.constant dense<0.000000e+00> : vector<256x256xf32>
    %11 = tpu.matmul %8, %10, %cst_8 {dimension_numbers = #tpu.dot_dimension_numbers<[1], [0], [0], [1], [0, 0, 1, 1], [], []>} : vector<256x256xbf16>, vector<256x256xbf16>, vector<256x256xf32> -> vector<256x256xf32>
    %12 = arith.addf %6, %11 : vector<256x256xf32>
    %13 = vector.extract_strided_slice %1 {offsets = [0, 2, 0], sizes = [16, 16, 256], strides = [1, 1, 1]} : vector<16x18x256xbf16> to vector<16x16x256xbf16>
    %14 = vector.shape_cast %13 : vector<16x16x256xbf16> to vector<256x256xbf16>
    %c2 = arith.constant 2 : index
    %c0_9 = arith.constant 0 : index
    %c0_10 = arith.constant 0 : index
    %15 = vector.load %arg6[%c2, %c0_9, %c0_10] : memref<9x256x256xbf16, #tpu.memory_space<vmem>>, vector<1x256x256xbf16>
    %16 = vector.shape_cast %15 : vector<1x256x256xbf16> to vector<256x256xbf16>
    %cst_11 = arith.constant dense<0.000000e+00> : vector<256x256xf32>
    %17 = tpu.matmul %14, %16, %cst_11 {dimension_numbers = #tpu.dot_dimension_numbers<[1], [0], [0], [1], [0, 0, 1, 1], [], []>} : vector<256x256xbf16>, vector<256x256xbf16>, vector<256x256xf32> -> vector<256x256xf32>
    %18 = arith.addf %12, %17 : vector<256x256xf32>
    %c0_12 = arith.constant 0 : index
    %c0_13 = arith.constant 0 : index
    %c0_14 = arith.constant 0 : index
    %c0_15 = arith.constant 0 : index
    %19 = vector.load %arg3[%c0_12, %c0_13, %c0_14, %c0_15] : memref<1x16x18x256xbf16, #tpu.memory_space<vmem>>, vector<1x16x18x256xbf16>
    %20 = vector.shape_cast %19 : vector<1x16x18x256xbf16> to vector<16x18x256xbf16>
    %21 = vector.extract_strided_slice %20 {offsets = [0, 0, 0], sizes = [16, 16, 256], strides = [1, 1, 1]} : vector<16x18x256xbf16> to vector<16x16x256xbf16>
    %22 = vector.shape_cast %21 : vector<16x16x256xbf16> to vector<256x256xbf16>
    %c3 = arith.constant 3 : index
    %c0_16 = arith.constant 0 : index
    %c0_17 = arith.constant 0 : index
    %23 = vector.load %arg6[%c3, %c0_16, %c0_17] : memref<9x256x256xbf16, #tpu.memory_space<vmem>>, vector<1x256x256xbf16>
    %24 = vector.shape_cast %23 : vector<1x256x256xbf16> to vector<256x256xbf16>
    %cst_18 = arith.constant dense<0.000000e+00> : vector<256x256xf32>
    %25 = tpu.matmul %22, %24, %cst_18 {dimension_numbers = #tpu.dot_dimension_numbers<[1], [0], [0], [1], [0, 0, 1, 1], [], []>} : vector<256x256xbf16>, vector<256x256xbf16>, vector<256x256xf32> -> vector<256x256xf32>
    %26 = arith.addf %18, %25 : vector<256x256xf32>
    %27 = vector.extract_strided_slice %20 {offsets = [0, 1, 0], sizes = [16, 16, 256], strides = [1, 1, 1]} : vector<16x18x256xbf16> to vector<16x16x256xbf16>
    %28 = vector.shape_cast %27 : vector<16x16x256xbf16> to vector<256x256xbf16>
    %c4 = arith.constant 4 : index
    %c0_19 = arith.constant 0 : index
    %c0_20 = arith.constant 0 : index
    %29 = vector.load %arg6[%c4, %c0_19, %c0_20] : memref<9x256x256xbf16, #tpu.memory_space<vmem>>, vector<1x256x256xbf16>
    %30 = vector.shape_cast %29 : vector<1x256x256xbf16> to vector<256x256xbf16>
    %cst_21 = arith.constant dense<0.000000e+00> : vector<256x256xf32>
    %31 = tpu.matmul %28, %30, %cst_21 {dimension_numbers = #tpu.dot_dimension_numbers<[1], [0], [0], [1], [0, 0, 1, 1], [], []>} : vector<256x256xbf16>, vector<256x256xbf16>, vector<256x256xf32> -> vector<256x256xf32>
    %32 = arith.addf %26, %31 : vector<256x256xf32>
    %33 = vector.extract_strided_slice %20 {offsets = [0, 2, 0], sizes = [16, 16, 256], strides = [1, 1, 1]} : vector<16x18x256xbf16> to vector<16x16x256xbf16>
    %34 = vector.shape_cast %33 : vector<16x16x256xbf16> to vector<256x256xbf16>
    %c5 = arith.constant 5 : index
    %c0_22 = arith.constant 0 : index
    %c0_23 = arith.constant 0 : index
    %35 = vector.load %arg6[%c5, %c0_22, %c0_23] : memref<9x256x256xbf16, #tpu.memory_space<vmem>>, vector<1x256x256xbf16>
    %36 = vector.shape_cast %35 : vector<1x256x256xbf16> to vector<256x256xbf16>
    %cst_24 = arith.constant dense<0.000000e+00> : vector<256x256xf32>
    %37 = tpu.matmul %34, %36, %cst_24 {dimension_numbers = #tpu.dot_dimension_numbers<[1], [0], [0], [1], [0, 0, 1, 1], [], []>} : vector<256x256xbf16>, vector<256x256xbf16>, vector<256x256xf32> -> vector<256x256xf32>
    %38 = arith.addf %32, %37 : vector<256x256xf32>
    %c0_25 = arith.constant 0 : index
    %c0_26 = arith.constant 0 : index
    %c0_27 = arith.constant 0 : index
    %c0_28 = arith.constant 0 : index
    %39 = vector.load %arg4[%c0_25, %c0_26, %c0_27, %c0_28] : memref<1x16x18x256xbf16, #tpu.memory_space<vmem>>, vector<1x16x18x256xbf16>
    %40 = vector.shape_cast %39 : vector<1x16x18x256xbf16> to vector<16x18x256xbf16>
    %41 = vector.extract_strided_slice %40 {offsets = [0, 0, 0], sizes = [16, 16, 256], strides = [1, 1, 1]} : vector<16x18x256xbf16> to vector<16x16x256xbf16>
    %42 = vector.shape_cast %41 : vector<16x16x256xbf16> to vector<256x256xbf16>
    %c6 = arith.constant 6 : index
    %c0_29 = arith.constant 0 : index
    %c0_30 = arith.constant 0 : index
    %43 = vector.load %arg6[%c6, %c0_29, %c0_30] : memref<9x256x256xbf16, #tpu.memory_space<vmem>>, vector<1x256x256xbf16>
    %44 = vector.shape_cast %43 : vector<1x256x256xbf16> to vector<256x256xbf16>
    %cst_31 = arith.constant dense<0.000000e+00> : vector<256x256xf32>
    %45 = tpu.matmul %42, %44, %cst_31 {dimension_numbers = #tpu.dot_dimension_numbers<[1], [0], [0], [1], [0, 0, 1, 1], [], []>} : vector<256x256xbf16>, vector<256x256xbf16>, vector<256x256xf32> -> vector<256x256xf32>
    %46 = arith.addf %38, %45 : vector<256x256xf32>
    %47 = vector.extract_strided_slice %40 {offsets = [0, 1, 0], sizes = [16, 16, 256], strides = [1, 1, 1]} : vector<16x18x256xbf16> to vector<16x16x256xbf16>
    %48 = vector.shape_cast %47 : vector<16x16x256xbf16> to vector<256x256xbf16>
    %c7 = arith.constant 7 : index
    %c0_32 = arith.constant 0 : index
    %c0_33 = arith.constant 0 : index
    %49 = vector.load %arg6[%c7, %c0_32, %c0_33] : memref<9x256x256xbf16, #tpu.memory_space<vmem>>, vector<1x256x256xbf16>
    %50 = vector.shape_cast %49 : vector<1x256x256xbf16> to vector<256x256xbf16>
    %cst_34 = arith.constant dense<0.000000e+00> : vector<256x256xf32>
    %51 = tpu.matmul %48, %50, %cst_34 {dimension_numbers = #tpu.dot_dimension_numbers<[1], [0], [0], [1], [0, 0, 1, 1], [], []>} : vector<256x256xbf16>, vector<256x256xbf16>, vector<256x256xf32> -> vector<256x256xf32>
    %52 = arith.addf %46, %51 : vector<256x256xf32>
    %53 = vector.extract_strided_slice %40 {offsets = [0, 2, 0], sizes = [16, 16, 256], strides = [1, 1, 1]} : vector<16x18x256xbf16> to vector<16x16x256xbf16>
    %54 = vector.shape_cast %53 : vector<16x16x256xbf16> to vector<256x256xbf16>
    %c8 = arith.constant 8 : index
    %c0_35 = arith.constant 0 : index
    %c0_36 = arith.constant 0 : index
    %55 = vector.load %arg6[%c8, %c0_35, %c0_36] : memref<9x256x256xbf16, #tpu.memory_space<vmem>>, vector<1x256x256xbf16>
    %56 = vector.shape_cast %55 : vector<1x256x256xbf16> to vector<256x256xbf16>
    %cst_37 = arith.constant dense<0.000000e+00> : vector<256x256xf32>
    %57 = tpu.matmul %54, %56, %cst_37 {dimension_numbers = #tpu.dot_dimension_numbers<[1], [0], [0], [1], [0, 0, 1, 1], [], []>} : vector<256x256xbf16>, vector<256x256xbf16>, vector<256x256xf32> -> vector<256x256xf32>
    %58 = arith.addf %52, %57 : vector<256x256xf32>
    %c0_38 = arith.constant 0 : index
    %c0_39 = arith.constant 0 : index
    %59 = vector.load %arg7[%c0_38, %c0_39] : memref<1x256xf32, #tpu.memory_space<vmem>>, vector<1x256xf32>
    %60 = vector.broadcast %59 : vector<1x256xf32> to vector<256x256xf32>
    %61 = arith.addf %58, %60 : vector<256x256xf32>
    %cst_40 = arith.constant 0.000000e+00 : f32
    %62 = vector.broadcast %cst_40 : f32 to vector<256x256xf32>
    %63 = arith.maximumf %61, %62 : vector<256x256xf32>
    %64 = arith.truncf %63 : vector<256x256xf32> to vector<256x256xbf16>
    %c0_41 = arith.constant 0 : index
    %c0_42 = arith.constant 0 : index
    %65 = vector.load %arg8[%c0_41, %c0_42] : memref<256x16xbf16, #tpu.memory_space<vmem>>, vector<256x16xbf16>
    %cst_43 = arith.constant dense<0.000000e+00> : vector<256x16xf32>
    %66 = tpu.matmul %64, %65, %cst_43 {dimension_numbers = #tpu.dot_dimension_numbers<[1], [0], [0], [1], [0, 0, 1, 1], [], []>} : vector<256x256xbf16>, vector<256x16xbf16>, vector<256x16xf32> -> vector<256x16xf32>
    %c0_44 = arith.constant 0 : index
    %c0_45 = arith.constant 0 : index
    %67 = vector.load %arg9[%c0_44, %c0_45] : memref<1x16xf32, #tpu.memory_space<vmem>>, vector<1x16xf32>
    %68 = vector.broadcast %67 : vector<1x16xf32> to vector<256x16xf32>
    %69 = arith.addf %66, %68 : vector<256x16xf32>
    %c0_46 = arith.constant 0 : index
    %c0_47 = arith.constant 0 : index
    %70 = vector.load %arg5[%c0_46, %c0_47] : memref<256x16xf32, #tpu.memory_space<vmem>>, vector<256x16xf32>
    %71 = vector.extract_strided_slice %70 {offsets = [0, 0], sizes = [256, 3], strides = [1, 1]} : vector<256x16xf32> to vector<256x3xf32>
    %72 = vector.extract_strided_slice %70 {offsets = [0, 3], sizes = [256, 3], strides = [1, 1]} : vector<256x16xf32> to vector<256x3xf32>
    %73 = vector.extract_strided_slice %70 {offsets = [0, 6], sizes = [256, 3], strides = [1, 1]} : vector<256x16xf32> to vector<256x3xf32>
    %74 = vector.extract_strided_slice %70 {offsets = [0, 9], sizes = [256, 3], strides = [1, 1]} : vector<256x16xf32> to vector<256x3xf32>
    %75 = arith.subf %73, %71 : vector<256x3xf32>
    %76 = arith.subf %74, %72 : vector<256x3xf32>
    %cst_48 = arith.constant 5.000000e-01 : f32
    %77 = vector.broadcast %cst_48 : f32 to vector<256x3xf32>
    %78 = arith.mulf %77, %75 : vector<256x3xf32>
    %79 = arith.addf %71, %78 : vector<256x3xf32>
    %cst_49 = arith.constant 5.000000e-01 : f32
    %80 = vector.broadcast %cst_49 : f32 to vector<256x3xf32>
    %81 = arith.mulf %80, %76 : vector<256x3xf32>
    %82 = arith.addf %72, %81 : vector<256x3xf32>
    %83 = vector.extract_strided_slice %69 {offsets = [0, 0], sizes = [256, 3], strides = [1, 1]} : vector<256x16xf32> to vector<256x3xf32>
    %84 = vector.extract_strided_slice %69 {offsets = [0, 3], sizes = [256, 3], strides = [1, 1]} : vector<256x16xf32> to vector<256x3xf32>
    %85 = vector.extract_strided_slice %69 {offsets = [0, 6], sizes = [256, 3], strides = [1, 1]} : vector<256x16xf32> to vector<256x3xf32>
    %86 = vector.extract_strided_slice %69 {offsets = [0, 9], sizes = [256, 3], strides = [1, 1]} : vector<256x16xf32> to vector<256x3xf32>
    %cst_50 = arith.constant 4.13516665 : f32
    %87 = vector.broadcast %cst_50 : f32 to vector<256x3xf32>
    %88 = arith.minimumf %86, %87 : vector<256x3xf32>
    %89 = vector.extract_strided_slice %69 {offsets = [0, 12], sizes = [256, 3], strides = [1, 1]} : vector<256x16xf32> to vector<256x3xf32>
    %cst_51 = arith.constant 4.13516665 : f32
    %90 = vector.broadcast %cst_51 : f32 to vector<256x3xf32>
    %91 = arith.minimumf %89, %90 : vector<256x3xf32>
    %92 = arith.mulf %84, %75 : vector<256x3xf32>
    %93 = arith.addf %92, %79 : vector<256x3xf32>
    %94 = arith.mulf %85, %76 : vector<256x3xf32>
    %95 = arith.addf %94, %82 : vector<256x3xf32>
    %96 = math.exp %88 : vector<256x3xf32>
    %97 = arith.mulf %96, %75 : vector<256x3xf32>
    %98 = math.exp %91 : vector<256x3xf32>
    %99 = arith.mulf %98, %76 : vector<256x3xf32>
    %cst_52 = arith.constant 5.000000e-01 : f32
    %100 = vector.broadcast %cst_52 : f32 to vector<256x3xf32>
    %101 = arith.mulf %100, %97 : vector<256x3xf32>
    %102 = arith.subf %93, %101 : vector<256x3xf32>
    %cst_53 = arith.constant 0.000000e+00 : f32
    %cst_54 = arith.constant 6.400000e+01 : f32
    %103 = vector.broadcast %cst_53 : f32 to vector<256x3xf32>
    %104 = arith.maximumf %103, %102 : vector<256x3xf32>
    %105 = vector.broadcast %cst_54 : f32 to vector<256x3xf32>
    %106 = arith.minimumf %105, %104 : vector<256x3xf32>
    %cst_55 = arith.constant 5.000000e-01 : f32
    %107 = vector.broadcast %cst_55 : f32 to vector<256x3xf32>
    %108 = arith.mulf %107, %99 : vector<256x3xf32>
    %109 = arith.subf %95, %108 : vector<256x3xf32>
    %cst_56 = arith.constant 0.000000e+00 : f32
    %cst_57 = arith.constant 6.400000e+01 : f32
    %110 = vector.broadcast %cst_56 : f32 to vector<256x3xf32>
    %111 = arith.maximumf %110, %109 : vector<256x3xf32>
    %112 = vector.broadcast %cst_57 : f32 to vector<256x3xf32>
    %113 = arith.minimumf %112, %111 : vector<256x3xf32>
    %cst_58 = arith.constant 5.000000e-01 : f32
    %114 = vector.broadcast %cst_58 : f32 to vector<256x3xf32>
    %115 = arith.mulf %114, %97 : vector<256x3xf32>
    %116 = arith.addf %93, %115 : vector<256x3xf32>
    %cst_59 = arith.constant 0.000000e+00 : f32
    %cst_60 = arith.constant 6.400000e+01 : f32
    %117 = vector.broadcast %cst_59 : f32 to vector<256x3xf32>
    %118 = arith.maximumf %117, %116 : vector<256x3xf32>
    %119 = vector.broadcast %cst_60 : f32 to vector<256x3xf32>
    %120 = arith.minimumf %119, %118 : vector<256x3xf32>
    %cst_61 = arith.constant 5.000000e-01 : f32
    %121 = vector.broadcast %cst_61 : f32 to vector<256x3xf32>
    %122 = arith.mulf %121, %99 : vector<256x3xf32>
    %123 = arith.addf %95, %122 : vector<256x3xf32>
    %cst_62 = arith.constant 0.000000e+00 : f32
    %cst_63 = arith.constant 6.400000e+01 : f32
    %124 = vector.broadcast %cst_62 : f32 to vector<256x3xf32>
    %125 = arith.maximumf %124, %123 : vector<256x3xf32>
    %126 = vector.broadcast %cst_63 : f32 to vector<256x3xf32>
    %127 = arith.minimumf %126, %125 : vector<256x3xf32>
    %128 = arith.subf %120, %106 : vector<256x3xf32>
    %cst_64 = arith.constant 1.000000e-03 : f32
    %129 = vector.broadcast %cst_64 : f32 to vector<256x3xf32>
    %130 = arith.cmpf oge, %128, %129 : vector<256x3xf32>
    %131 = arith.subf %127, %113 : vector<256x3xf32>
    %cst_65 = arith.constant 1.000000e-03 : f32
    %132 = vector.broadcast %cst_65 : f32 to vector<256x3xf32>
    %133 = arith.cmpf oge, %131, %132 : vector<256x3xf32>
    %134 = arith.andi %130, %133 : vector<256x3xi1>
    %135 = arith.negf %83 : vector<256x3xf32>
    %136 = math.exp %135 : vector<256x3xf32>
    %cst_66 = arith.constant 1.000000e+00 : f32
    %137 = vector.broadcast %cst_66 : f32 to vector<256x3xf32>
    %138 = arith.addf %137, %136 : vector<256x3xf32>
    %139 = arith.divf %137, %138 : vector<256x3xf32>
    %cst_67 = arith.constant 0xFF800000 : f32
    %140 = vector.broadcast %cst_67 : f32 to vector<256x3xf32>
    %141 = arith.select %134, %139, %140 : vector<256x3xi1>, vector<256x3xf32>
    %c0_68 = arith.constant 0 : index
    %c0_69 = arith.constant 0 : index
    %c0_70 = arith.constant 0 : index
    %142 = vector.load %arg10[%c0_68, %c0_69, %c0_70] : memref<1x256x16xf32, #tpu.memory_space<vmem>>, vector<1x256x3xf32>
    %143 = vector.shape_cast %142 : vector<1x256x3xf32> to vector<256x3xf32>
    %144 = vector.shape_cast %141 : vector<256x3xf32> to vector<1x256x3xf32>
    tpu.vector_store %arg10[%c0_68, %c0_69, %c0_70], %144 {strides = array<i32>} : memref<1x256x16xf32, #tpu.memory_space<vmem>>, vector<1x256x3xf32>,
    %c0_71 = arith.constant 0 : index
    %c0_72 = arith.constant 0 : index
    %c3_73 = arith.constant 3 : index
    %145 = vector.load %arg10[%c0_71, %c0_72, %c3_73] : memref<1x256x16xf32, #tpu.memory_space<vmem>>, vector<1x256x3xf32>
    %146 = vector.shape_cast %145 : vector<1x256x3xf32> to vector<256x3xf32>
    %147 = vector.shape_cast %106 : vector<256x3xf32> to vector<1x256x3xf32>
    tpu.vector_store %arg10[%c0_71, %c0_72, %c3_73], %147 {strides = array<i32>} : memref<1x256x16xf32, #tpu.memory_space<vmem>>, vector<1x256x3xf32>,
    %c0_74 = arith.constant 0 : index
    %c0_75 = arith.constant 0 : index
    %c6_76 = arith.constant 6 : index
    %148 = vector.load %arg10[%c0_74, %c0_75, %c6_76] : memref<1x256x16xf32, #tpu.memory_space<vmem>>, vector<1x256x3xf32>
    %149 = vector.shape_cast %148 : vector<1x256x3xf32> to vector<256x3xf32>
    %150 = vector.shape_cast %113 : vector<256x3xf32> to vector<1x256x3xf32>
    tpu.vector_store %arg10[%c0_74, %c0_75, %c6_76], %150 {strides = array<i32>} : memref<1x256x16xf32, #tpu.memory_space<vmem>>, vector<1x256x3xf32>,
    %c0_77 = arith.constant 0 : index
    %c0_78 = arith.constant 0 : index
    %c9 = arith.constant 9 : index
    %151 = vector.load %arg10[%c0_77, %c0_78, %c9] : memref<1x256x16xf32, #tpu.memory_space<vmem>>, vector<1x256x3xf32>
    %152 = vector.shape_cast %151 : vector<1x256x3xf32> to vector<256x3xf32>
    %153 = vector.shape_cast %120 : vector<256x3xf32> to vector<1x256x3xf32>
    tpu.vector_store %arg10[%c0_77, %c0_78, %c9], %153 {strides = array<i32>} : memref<1x256x16xf32, #tpu.memory_space<vmem>>, vector<1x256x3xf32>,
    %c0_79 = arith.constant 0 : index
    %c0_80 = arith.constant 0 : index
    %c12 = arith.constant 12 : index
    %154 = vector.load %arg10[%c0_79, %c0_80, %c12] : memref<1x256x16xf32, #tpu.memory_space<vmem>>, vector<1x256x3xf32>
    %155 = vector.shape_cast %154 : vector<1x256x3xf32> to vector<256x3xf32>
    %156 = vector.shape_cast %127 : vector<256x3xf32> to vector<1x256x3xf32>
    tpu.vector_store %arg10[%c0_79, %c0_80, %c12], %156 {strides = array<i32>} : memref<1x256x16xf32, #tpu.memory_space<vmem>>, vector<1x256x3xf32>,
    %cst_81 = arith.constant 0.000000e+00 : f32
    %157 = vector.broadcast %cst_81 : f32 to vector<256x1xf32>
    %c0_82 = arith.constant 0 : index
    %c0_83 = arith.constant 0 : index
    %c15 = arith.constant 15 : index
    %158 = vector.load %arg10[%c0_82, %c0_83, %c15] : memref<1x256x16xf32, #tpu.memory_space<vmem>>, vector<1x256x1xf32>
    %159 = vector.shape_cast %158 : vector<1x256x1xf32> to vector<256x1xf32>
    %160 = vector.shape_cast %157 : vector<256x1xf32> to vector<1x256x1xf32>
    tpu.vector_store %arg10[%c0_82, %c0_83, %c15], %160 {strides = array<i32>} : memref<1x256x16xf32, #tpu.memory_space<vmem>>, vector<1x256x1xf32>,
    return
  }
  func.func @transform_0(%arg0: i32, %arg1: i32) -> (i32, i32, i32, i32) {
    %c0_i32 = arith.constant 0 : i32
    %c0_i32_0 = arith.constant 0 : i32
    %c0_i32_1 = arith.constant 0 : i32
    return %arg0, %arg1, %c0_i32, %c0_i32_0 : i32, i32, i32, i32
  }
  func.func @transform_1(%arg0: i32, %arg1: i32) -> (i32, i32, i32, i32) {
    %c0_i32 = arith.constant 0 : i32
    %c0_i32_0 = arith.constant 0 : i32
    %c0_i32_1 = arith.constant 0 : i32
    return %arg0, %arg1, %c0_i32, %c0_i32_0 : i32, i32, i32, i32
  }
  func.func @transform_2(%arg0: i32, %arg1: i32) -> (i32, i32, i32, i32) {
    %c0_i32 = arith.constant 0 : i32
    %c0_i32_0 = arith.constant 0 : i32
    %c0_i32_1 = arith.constant 0 : i32
    return %arg0, %arg1, %c0_i32, %c0_i32_0 : i32, i32, i32, i32
  }
  func.func @transform_3(%arg0: i32, %arg1: i32) -> (i32, i32) {
    %c0_i32 = arith.constant 0 : i32
    %c0_i32_0 = arith.constant 0 : i32
    return %arg1, %c0_i32 : i32, i32
  }
  func.func @transform_4(%arg0: i32, %arg1: i32) -> (i32, i32, i32) {
    %c0_i32 = arith.constant 0 : i32
    %c0_i32_0 = arith.constant 0 : i32
    %c0_i32_1 = arith.constant 0 : i32
    %c0_i32_2 = arith.constant 0 : i32
    return %c0_i32, %c0_i32_0, %c0_i32_1 : i32, i32, i32
  }
  func.func @transform_5(%arg0: i32, %arg1: i32) -> (i32, i32) {
    %c0_i32 = arith.constant 0 : i32
    %c0_i32_0 = arith.constant 0 : i32
    %c0_i32_1 = arith.constant 0 : i32
    return %c0_i32, %c0_i32_0 : i32, i32
  }
  func.func @transform_6(%arg0: i32, %arg1: i32) -> (i32, i32) {
    %c0_i32 = arith.constant 0 : i32
    %c0_i32_0 = arith.constant 0 : i32
    %c0_i32_1 = arith.constant 0 : i32
    return %c0_i32, %c0_i32_0 : i32, i32
  }
  func.func @transform_7(%arg0: i32, %arg1: i32) -> (i32, i32) {
    %c0_i32 = arith.constant 0 : i32
    %c0_i32_0 = arith.constant 0 : i32
    %c0_i32_1 = arith.constant 0 : i32
    return %c0_i32, %c0_i32_0 : i32, i32
  }
  func.func @transform_8(%arg0: i32, %arg1: i32) -> (i32, i32, i32) {
    %c0_i32 = arith.constant 0 : i32
    %c0_i32_0 = arith.constant 0 : i32
    return %arg0, %arg1, %c0_i32 : i32, i32, i32
  }
}

</mosaic_0001>

<bundles_post_ra>
// kernel: tpu_custom_call.1
= control target key start
LH: loop header
LB: loop body
LE: loop exit
PB: predicated region body
PF: predicated region fallthrough
CT: control target
= control target key end

     0   :  { %s12286_s27 = smov 0   ;;  %s12288_s28 = smov 0   ;;  %s19025_s0 = inlined_call_operand.vmem [shape: bf16[2,16,18,256], index: 0, kind: input, shape index: {}]   ;;  %s19026_s1 = inlined_call_operand.vmem [shape: bf16[2,16,18,256], index: 1, kind: input, shape index: {}]   ;;  %s19027_s2 = inlined_call_operand.vmem [shape: bf16[2,16,18,256], index: 2, kind: input, shape index: {}]   ;;  %s19028_s3 = inlined_call_operand.vmem [shape: f32[256,16], index: 3, kind: input, shape index: {}]   ;;  %s19029_s4 = inlined_call_operand.vmem [shape: bf16[9,256,256], index: 4, kind: input, shape index: {}]   ;;  %s19030_s5 = inlined_call_operand.vmem [shape: f32[1,256], index: 5, kind: input, shape index: {}]   ;;  %s19031_s6 = inlined_call_operand.vmem [shape: bf16[256,16], index: 6, kind: input, shape index: {}]   ;;  %s19032_s7 = inlined_call_operand.vmem [shape: f32[1,16], index: 7, kind: input, shape index: {}]   ;;  %s19033_s8 = inlined_call_operand.vmem [shape: f32[2,256,16], index: 8, kind: output, shape index: {}]  }
   0x1   :  { %s12290_s29 = smov 0  }
   0x2 LB: > { %s30_s30 = sadd.s32 1, %s12229_s28  ;;  %p10234_p0 = scmp.ge.s32.totalorder %s12233_s29, 1  ;;  %s12233_s29 = sphi %s12290_s29, %s18_s29   ;;  %s12229_s28 = sphi %s12288_s28, %s20000_s28   ;;  %s12225_s27 = sphi %s12286_s27, %s19999_s27  }
   0x3   : > { %p32_p1 = scmp.ge.s32.totalorder %s30_s30, 2  ;;  %p331_p2 = scmp.lt.s32.totalorder %s12233_s29, 3 }
   0x5   : > { %s20002_s30 = smov (%p32_p1, %s30_s30), 0  ;;  %p332_p3 = pnand %p10234_p0, %p331_p2 }
   0x7   : > { %335 = sbr.rel (%p332_p3) target bundleno = 1529 (0x5f9), region = 52 }
   0xc   : > { %v11315_v0 = vld [vmem:[%s19029_s4 + $0x174] ss:$8 sps:$4 sm:$0xff]   ;;  %v11319_v2 = vld [vmem:[%s19029_s4 + $0x170] ss:$8 sps:$4 sm:$0xff]   ;;  %v11321_v4 = vld [vmem:[%s19029_s4 + $0x164] ss:$8 sps:$4 sm:$0xff]  }
   0xd   : > { %v11317_v1 = vld [vmem:[%s19029_s4 + $0x74] ss:$8 sps:$4 sm:$0xff]   ;;  %1237 = vmatprep.subr.bf16.mxu0 %v11315_v0  ;;  %v11320_v3 = vld [vmem:[%s19029_s4 + $0x70] ss:$8 sps:$4 sm:$0xff]   ;;  %v11323_v5 = vld [vmem:[%s19029_s4 + $0x64] ss:$8 sps:$4 sm:$0xff]  }
   0xe   : > { %1750 = vmatprep.subr.bf16.mxu1 %v11317_v1  ;;  %1238 = vmatpush1.bf16.msra.mxu0 %v11319_v2  ;;  %v11325_v6 = vld [vmem:[%s19029_s4 + $0x160] ss:$8 sps:$4 sm:$0xff]   ;;  %v11327_v8 = vld [vmem:[%s19029_s4 + $0x154] ss:$8 sps:$4 sm:$0xff]   ;;  %v11331_v10 = vld [vmem:[%s19029_s4 + $0x150] ss:$8 sps:$4 sm:$0xff]  }
   0xf   : > { %1751 = vmatpush1.bf16.msra.mxu1 %v11320_v3  ;;  %1239 = vmatprep.subr.bf16.mxu0 %v11321_v4  ;;  %v11326_v7 = vld [vmem:[%s19029_s4 + $0x60] ss:$8 sps:$4 sm:$0xff]   ;;  %v11329_v9 = vld [vmem:[%s19029_s4 + $0x54] ss:$8 sps:$4 sm:$0xff]   ;;  %v11332_v11 = vld [vmem:[%s19029_s4 + $0x50] ss:$8 sps:$4 sm:$0xff]  }
  0x10   : > { %1752 = vmatprep.subr.bf16.mxu1 %v11323_v5  ;;  %v11333_v12 = vld [vmem:[%s19029_s4 + $0x144] ss:$8 sps:$4 sm:$0xff]   ;;  %v11337_v14 = vld [vmem:[%s19029_s4 + $0x140] ss:$8 sps:$4 sm:$0xff]   ;;  %v11339_v16 = vld [vmem:[%s19029_s4 + $0x134] ss:$8 sps:$4 sm:$0xff]  }
  0x11   : > { %v11335_v13 = vld [vmem:[%s19029_s4 + $0x44] ss:$8 sps:$4 sm:$0xff]   ;;  %v11338_v15 = vld [vmem:[%s19029_s4 + $0x40] ss:$8 sps:$4 sm:$0xff]   ;;  %v11341_v17 = vld [vmem:[%s19029_s4 + $0x34] ss:$8 sps:$4 sm:$0xff]  }
  0x12   : > { %1240 = vmatpush1.bf16.msra.mxu0 %v11325_v6  ;;  %v11343_v18 = vld [vmem:[%s19029_s4 + $0x130] ss:$8 sps:$4 sm:$0xff]   ;;  %v11345_v20 = vld [vmem:[%s19029_s4 + $0x124] ss:$8 sps:$4 sm:$0xff]   ;;  %v11349_v22 = vld [vmem:[%s19029_s4 + $0x120] ss:$8 sps:$4 sm:$0xff]  }
  0x13   : > { %1753 = vmatpush1.bf16.msra.mxu1 %v11326_v7  ;;  %1241 = vmatprep.subr.bf16.mxu0 %v11327_v8  ;;  %v11344_v19 = vld [vmem:[%s19029_s4 + $0x30] ss:$8 sps:$4 sm:$0xff]   ;;  %v11347_v21 = vld [vmem:[%s19029_s4 + $0x24] ss:$8 sps:$4 sm:$0xff]   ;;  %v11350_v23 = vld [vmem:[%s19029_s4 + $0x20] ss:$8 sps:$4 sm:$0xff]  }
  0x14   : > { %1754 = vmatprep.subr.bf16.mxu1 %v11329_v9  ;;  %v11351_v24 = vld [vmem:[%s19029_s4 + $0x114] ss:$8 sps:$4 sm:$0xff]   ;;  %v11355_v26 = vld [vmem:[%s19029_s4 + $0x110] ss:$8 sps:$4 sm:$0xff]   ;;  %v11357_v28 = vld [vmem:[%s19029_s4 + $0x104] ss:$8 sps:$4 sm:$0xff]  }
  0x15   : > { %v11353_v25 = vld [vmem:[%s19029_s4 + $0x14] ss:$8 sps:$4 sm:$0xff]   ;;  %v11356_v27 = vld [vmem:[%s19029_s4 + $0x10] ss:$8 sps:$4 sm:$0xff]   ;;  %v11359_v29 = vld [vmem:[%s19029_s4 + $0x4] ss:$8 sps:$4 sm:$0xff]  }
  0x16   : > { %1242 = vmatpush1.bf16.msra.mxu0 %v11331_v10  ;;  %v11361_v30 = vld [vmem:[%s19029_s4 + $0x100] ss:$8 sps:$4 sm:$0xff]   ;;  %p400_p4 = scmp.lt.s32.totalorder %s12225_s27, 1  ;;  %v11363_v32 = vld [vmem:[%s19029_s4 + $0x1f4] ss:$8 sps:$4 sm:$0xff]   ;;  %vm1959_vm3 = vcmask 1042432  }
  0x17   : > { %1755 = vmatpush1.bf16.msra.mxu1 %v11332_v11  ;;  %1243 = vmatprep.subr.bf16.mxu0 %v11333_v12  ;;  %v11362_v31 = vld [vmem:[%s19029_s4] ss:$8 sps:$4 sm:$0xff]   ;;  %v11365_v33 = vld [vmem:[%s19029_s4 + $0xf4] ss:$8 sps:$4 sm:$0xff]   ;;  %v11367_v34 = vld [vmem:[%s19029_s4 + $0x1f0] ss:$8 sps:$4 sm:$0xff]  }
  0x18   : > { %1756 = vmatprep.subr.bf16.mxu1 %v11335_v13  ;;  %v11368_v35 = vld [vmem:[%s19029_s4 + $0xf0] ss:$8 sps:$4 sm:$0xff]   ;;  %s20004_s27 = smov (!%p400_p4, %s12225_s27), 1  ;;  %v11369_v36 = vld [vmem:[%s19029_s4 + $0x1e4] ss:$8 sps:$4 sm:$0xff]   ;;  %vm1960_vm4 = vcmask 1046532  }
  0x19   : > { %v11371_v37 = vld [vmem:[%s19029_s4 + $0xe4] ss:$8 sps:$4 sm:$0xff]   ;;  %v11373_v38 = vld [vmem:[%s19029_s4 + $0x1e0] ss:$8 sps:$4 sm:$0xff]   ;;  %s12428_s15 = smul.u32 384, %s20004_s27  ;;  %vm13126_vm5 = vmor %vm1959_vm3, %vm1960_vm4  ;;  %s12235_s17 = smov 6  }
  0x1a   : > { %1244 = vmatpush1.bf16.msra.mxu0 %v11337_v14  ;;  %v11374_v39 = vld [vmem:[%s19029_s4 + $0xe0] ss:$8 sps:$4 sm:$0xff]   ;;  %v11375_v40 = vld [vmem:[%s19029_s4 + $0x1d4] ss:$8 sps:$4 sm:$0xff]   ;;  %v11379_v42 = vld [vmem:[%s19029_s4 + $0x1d0] ss:$8 sps:$4 sm:$0xff]  }
  0x1b   : > { %1757 = vmatpush1.bf16.msra.mxu1 %v11338_v15  ;;  %1245 = vmatprep.subr.bf16.mxu0 %v11339_v16  ;;  %v11377_v41 = vld [vmem:[%s19029_s4 + $0xd4] ss:$8 sps:$4 sm:$0xff]   ;;  %v11380_v43 = vld [vmem:[%s19029_s4 + $0xd0] ss:$8 sps:$4 sm:$0xff]   ;;  %s12449_s10 = scalar_lea.vmem %s19025_s0, %s12428_s15  ;;  %v11381_v44 = vld [vmem:[%s19029_s4 + $0x1c4] ss:$8 sps:$4 sm:$0xff]   ;;  %s13320_s26 = scalar_lea.vmem %s19026_s1, %s12428_s15 }
  0x1c   : > { %1758 = vmatprep.subr.bf16.mxu1 %v11341_v17  ;;  %vm529_vm0 = vsmask.f32 3328  ;;  %v11383_v45 = vld [vmem:[%s19029_s4 + $0xc4] ss:$8 sps:$4 sm:$0xff]   ;;  %vm530_vm1 = vsmask.f32 7440  ;;  %s15161_s13 = scalar_lea.vmem %s19027_s2, %s12428_s15 }
  0x1d   : > { %v11385_v46 = vld [vmem:[%s19029_s4 + $0x1c0] ss:$8 sps:$4 sm:$0xff]   ;;  %v451_v50 = vld [vmem:[%s12449_s10 + $0x10] sm:$0x11]  ;;  %v12489_v1 = vld [vmem:[%s12449_s10 + $0x18] sm:$0xff]  ;;  %s12236_s16 = smov 122  }
  0x1e   : > { %1246 = vmatpush1.bf16.msra.mxu0 %v11343_v18  ;;  %v11386_v47 = vld [vmem:[%s19029_s4 + $0xc0] ss:$8 sps:$4 sm:$0xff]   ;;  %v552_v55 = vshll.u32 %v451_v50, 16  ;;  %v11387_v56 = vld [vmem:[%s19029_s4 + $0x1b4] ss:$8 sps:$4 sm:$0xff]   ;;  %v557_v5 = vshrl.u32 %v12489_v1, 16  ;;  %vm12506_vm2 = vmor %vm529_vm0, %vm530_vm1 }
  0x1f   : > { %1759 = vmatpush1.bf16.msra.mxu1 %v11344_v19  ;;  %1247 = vmatprep.subr.bf16.mxu0 %v11345_v20  ;;  %v12464_v48 = vld [vmem:[%s12449_s10] sm:$0xff]  ;;  %v12467_v49 = vld [vmem:[%s12449_s10 + $0x8] sm:$0xff]  ;;  %v11389_v57 = vld [vmem:[%s19029_s4 + $0xb4] ss:$8 sps:$4 sm:$0xff]   ;;  %v560_v6 = vshll.u32 %v12489_v1, 16  ;;  %s12237_s22 = smov 125  }
  0x20   : > { %1760 = vmatprep.subr.bf16.mxu1 %v11347_v21  ;;  %v533_v51 = vshrl.u32 %v12464_v48, 16  ;;  %v536_v52 = vshll.u32 %v12464_v48, 16  ;;  %v542_v53 = vshll.u32 %v12467_v49, 16  ;;  %v546_v54 = vshrl.u32 %v12467_v49, 16  ;;  %v11391_v61 = vld [vmem:[%s19029_s4 + $0x1b0] ss:$8 sps:$4 sm:$0xff]  }
  0x21   : > { %v10337_v60 = vcombine.high %v12464_v48, %v12467_v49  ;;  %v11392_v62 = vld [vmem:[%s19029_s4 + $0xb0] ss:$8 sps:$4 sm:$0xff]   ;;  %v12492_v2 = vld [vmem:[%s12449_s10 + $0x20] sm:$0xff]  ;;  %v454_v4 = vld [vmem:[%s12449_s10 + $0x28] sm:$0x11]  ;;  %v554_v12 = vrot.slane %v552_v55, 5 }
  0x22   : > { %1248 = vmatpush1.bf16.msra.mxu0 %v11349_v22  ;;  %v535_v58 = vrot.slane %v533_v51, 4  ;;  %v538_v59 = vrot.slane %v536_v52, 5  ;;  %v544_v63 = vrot.slane %v542_v53, 5  ;;  %v548_v0 = vrot.slane %v546_v54, 4  ;;  %v11393_v8 = vld [vmem:[%s19029_s4 + $0x1a4] ss:$8 sps:$4 sm:$0xff]  }
  0x23   : > { %1761 = vmatpush1.bf16.msra.mxu1 %v11350_v23  ;;  %1249 = vmatprep.subr.bf16.mxu0 %v11351_v24  ;;  %v566_v7 = vshll.u32 %v12492_v2, 16  ;;  %v11395_v9 = vld [vmem:[%s19029_s4 + $0xa4] ss:$8 sps:$4 sm:$0xff]   ;;  %v570_v13 = vshrl.u32 %v12492_v2, 16  ;;  %v559_v15 = vrot.slane %v557_v5, 4  ;;  %v562_v16 = vrot.slane %v560_v6, 5 }
  0x24   : > { %1762 = vmatprep.subr.bf16.mxu1 %v11353_v25  ;;  %v539_v3 = vor.u32 %v538_v59, %v535_v58  ;;  %1782 = vmatprep.mubr.bf16.mxu1 %v10337_v60  ;;  %v549_v11 = vor.u32 %v548_v0, %v544_v63  ;;  %v12512_v18 = vld [vmem:[%s12449_s10 + $0x30] sm:$0xff]  ;;  %v12515_v19 = vld [vmem:[%s12449_s10 + $0x38] sm:$0xff]  ;;  %v576_v22 = vshll.u32 %v454_v4, 16  ;;  %v11397_v23 = vld [vmem:[%s19029_s4 + $0x1a0] ss:$8 sps:$4 sm:$0xff]  }
  0x25   : > { %v568_v17 = vrot.slane %v566_v7, 5  ;;  %v572_v21 = vrot.slane %v570_v13, 4  ;;  %v563_v25 = vor.u32 %v562_v16, %v559_v15  ;;  %v11407_v50 = vld [vmem:[%s19029_s4 + $0x84] ss:$8 sps:$4 sm:$0xff]   ;;  %v12560_v51 = vld [vmem:[%s12449_s10 + $0x50] sm:$0xff]  ;;  %v10339_v15 = vcombine.high %v12489_v1, %v12492_v2  ;;  %v12154_v10 = vld [vmem:[%s19028_s3 + $0xb8] sm:$0xff] }
  0x26   : > { %1250 = vmatpush1.bf16.msra.mxu0 %v11355_v26  ;;  %v540_v14 = vrot.slane %v539_v3, 4  ;;  %v550_v20 = vrot.slane %v549_v11, 4  ;;  %v581_v26 = vshrl.u32 %v12512_v18, 16  ;;  %v11410_v58 = vld [vmem:[%s19029_s4 + $0x80] ss:$8 sps:$4 sm:$0xff]   ;;  %v10336_v3 = vcombine.low %v12464_v48, %v12467_v49 }
  0x27   : > { %1763 = vmatpush1.bf16.msra.mxu1 %v11356_v27  ;;  %1251 = vmatprep.subr.bf16.mxu0 %v11357_v28  ;;  %v584_v27 = vshll.u32 %v12512_v18, 16  ;;  %v11398_v28 = vld [vmem:[%s19029_s4 + $0xa0] ss:$8 sps:$4 sm:$0xff]   ;;  %v11413_v4 = vld [vmem:[%s19029_s4 + $0x270] ss:$8 sps:$4 sm:$0xff]  }
  0x28   : > { %1764 = vmatprep.subr.bf16.mxu1 %v11359_v29  ;;  %v12522_v24 = vsel %vm12506_vm2, %v540_v14, %v544_v63  ;;  %v12531_v29 = vsel %vm12506_vm2, %v550_v20, %v554_v12  ;;  %v11415_v63 = vld [vmem:[%s19029_s4 + $0x274] ss:$8 sps:$4 sm:$0xff]   ;;  %v11420_v6 = vld [vmem:[%s19029_s4 + $0x264] ss:$8 sps:$4 sm:$0xff]  }
  0x29   : > { %v10272_v0 = vcombine.low %v12522_v24, %v12531_v29  ;;  %v12597_v14 = vld [vmem:[%s12449_s10 + $0x60] sm:$0xff]  ;;  %v12602_v16 = vld [vmem:[%s12449_s10 + $0x68] sm:$0xff] }
  0x2a   : > { %1252 = vmatpush1.bf16.msra.mxu0 %v11361_v30  ;;  %v573_v30 = vor.u32 %v572_v21, %v568_v17 }
  0x2b   : > { %1765 = vmatpush1.bf16.msra.mxu1 %v11362_v31  ;;  %1253 = vmatprep.subr.bf16.mxu0 %v11363_v32  ;;  %v590_v31 = vshll.u32 %v12515_v19, 16  ;;  %v594_v32 = vshrl.u32 %v12515_v19, 16 }
  0x2c   : > { %1766 = vmatprep.subr.bf16.mxu1 %v11365_v33  ;;  %v11399_v33 = vld [vmem:[%s19029_s4 + $0x194] ss:$8 sps:$4 sm:$0xff]  }
  0x2e   : > { %1254 = vmatpush2.bf16.msra.mxu0 %v11367_v34  ;;  %v11401_v34 = vld [vmem:[%s19029_s4 + $0x94] ss:$8 sps:$4 sm:$0xff]  }
  0x2f   : > { %1767 = vmatpush2.bf16.msra.mxu1 %v11368_v35  ;;  %1255 = vmatprep.subr.bf16.mxu0 %v11369_v36  ;;  %v10273_v35 = vcombine.high %v12522_v24, %v12531_v29  ;;  %v11403_v36 = vld [vmem:[%s19029_s4 + $0x190] ss:$8 sps:$4 sm:$0xff]   ;;  %v11418_v24 = vld [vmem:[%s19029_s4 + $0x260] ss:$8 sps:$4 sm:$0xff]   ;;  %v11425_v29 = vld [vmem:[%s19029_s4 + $0x254] ss:$8 sps:$4 sm:$0xff]  }
  0x30   : > { %1768 = vmatprep.subr.bf16.mxu1 %v11371_v37  ;;  %v11404_v37 = vld [vmem:[%s19029_s4 + $0x90] ss:$8 sps:$4 sm:$0xff]  }
  0x31   : > { %1269 = vmatprep.mubr.bf16.mxu0 %v10273_v35  ;;  %v11458_v35 = vld [vmem:[%s19029_s4 + $0x374] ss:$8 sps:$4 sm:$0xff]  }
  0x32   : > { %1256 = vmatpush2.bf16.msra.mxu0 %v11373_v38  ;;  %v564_v38 = vrot.slane %v563_v25, 4 }
  0x33   : > { %1769 = vmatpush2.bf16.msra.mxu1 %v11374_v39  ;;  %1257 = vmatprep.subr.bf16.mxu0 %v11375_v40  ;;  %v578_v39 = vrot.slane %v576_v22, 5  ;;  %v457_v40 = vld [vmem:[%s12449_s10 + $0x40] sm:$0x11]  ;;  %v629_v22 = vshrl.u32 %v12597_v14, 16 }
  0x34   : > { %1770 = vmatprep.subr.bf16.mxu1 %v11377_v41  ;;  %v583_v41 = vrot.slane %v581_v26, 4  ;;  %v12564_v52 = vsel %vm12506_vm2, %v564_v38, %v568_v17  ;;  %v600_v54 = vshll.u32 %v457_v40, 16 }
  0x36   : > { %1258 = vmatpush2.bf16.msra.mxu0 %v11379_v42  ;;  %v586_v42 = vrot.slane %v584_v27, 5  ;;  %v602_v48 = vrot.slane %v600_v54, 5  ;;  %v638_v27 = vshll.u32 %v12602_v16, 16 }
  0x37   : > { %1771 = vmatpush2.bf16.msra.mxu1 %v11380_v43  ;;  %1259 = vmatprep.subr.bf16.mxu0 %v11381_v44  ;;  %v574_v43 = vrot.slane %v573_v30, 4  ;;  %v592_v44 = vrot.slane %v590_v31, 5  ;;  %v463_v30 = vld [vmem:[%s12449_s10 + $0x70] sm:$0x11] }
  0x38   : > { %1772 = vmatprep.subr.bf16.mxu1 %v11383_v45  ;;  %v596_v45 = vrot.slane %v594_v32, 4  ;;  %v587_v53 = vor.u32 %v586_v42, %v583_v41  ;;  %v10338_v32 = vcombine.low %v12489_v1, %v12492_v2  ;;  %v631_v2 = vrot.slane %v629_v22, 4 }
  0x39   : > { %v12576_v59 = vsel %vm12506_vm2, %v574_v43, %v578_v39  ;;  %v12641_v39 = vld [vmem:[%s12449_s10 + $0x78] sm:$0xff]  ;;  %v640_v42 = vrot.slane %v638_v27, 5 }
  0x3a   : > { %1260 = vmatpush2.bf16.msra.mxu0 %v11385_v46  ;;  %v12551_v46 = vld [vmem:[%s12449_s10 + $0x48] sm:$0xff]  ;;  %v597_v60 = vor.u32 %v596_v45, %v592_v44  ;;  %v10275_v5 = vcombine.high %v12564_v52, %v12576_v59  ;;  %v588_v7 = vrot.slane %v587_v53, 4  ;;  %v10274_v31 = vcombine.low %v12564_v52, %v12576_v59 }
  0x3b   : > { %1773 = vmatpush2.bf16.msra.mxu1 %v11386_v47  ;;  %1261 = vmatprep.subr.bf16.mxu0 %v11387_v56  ;;  %v11405_v47 = vld [vmem:[%s19029_s4 + $0x184] ss:$8 sps:$4 sm:$0xff]   ;;  %v605_v55 = vshrl.u32 %v12551_v46, 16  ;;  %v608_v56 = vshll.u32 %v12551_v46, 16  ;;  %v648_v52 = vshll.u32 %v463_v30, 16 }
  0x3c   : > { %1774 = vmatprep.subr.bf16.mxu1 %v11389_v57  ;;  %v11409_v57 = vld [vmem:[%s19029_s4 + $0x180] ss:$8 sps:$4 sm:$0xff]   ;;  %v598_v12 = vrot.slane %v597_v60, 4  ;;  %v12606_v20 = vsel %vm12506_vm2, %v588_v7, %v592_v44  ;;  %v11461_v44 = vld [vmem:[%s19029_s4 + $0x364] ss:$8 sps:$4 sm:$0xff]  }
  0x3d   : > { %v610_v11 = vrot.slane %v608_v56, 5  ;;  %v11430_v45 = vld [vmem:[%s19029_s4 + $0x244] ss:$8 sps:$4 sm:$0xff]   ;;  %v656_v56 = vshll.u32 %v12641_v39, 16  ;;  %v11445_v30 = vld [vmem:[%s19029_s4 + $0x214] ss:$8 sps:$4 sm:$0xff]  }
  0x3e   : > { %1262 = vmatpush2.bf16.msra.mxu0 %v11391_v61  ;;  %v614_v61 = vshll.u32 %v12560_v51, 16  ;;  %v12615_v25 = vsel %vm12506_vm2, %v598_v12, %v602_v48 }
  0x3f   : > { %1775 = vmatpush2.bf16.msra.mxu1 %v11392_v62  ;;  %1263 = vmatprep.subr.bf16.mxu0 %v11393_v8  ;;  %v618_v62 = vshrl.u32 %v12560_v51, 16  ;;  %v460_v8 = vld [vmem:[%s12449_s10 + $0x58] sm:$0x11]  ;;  %v658_v48 = vrot.slane %v656_v56, 5 }
  0x40   : > { %1776 = vmatprep.subr.bf16.mxu1 %v11395_v9  ;;  %v607_v9 = vrot.slane %v605_v55, 4  ;;  %v616_v49 = vrot.slane %v614_v61, 5  ;;  %v624_v17 = vshll.u32 %v460_v8, 16  ;;  %v653_v55 = vshrl.u32 %v12641_v39, 16  ;;  %v11469_v61 = vld [vmem:[%s19029_s4 + $0x354] ss:$8 sps:$4 sm:$0xff]  }
  0x41   : > { %v620_v13 = vrot.slane %v618_v62, 4  ;;  %v11428_v62 = vld [vmem:[%s19029_s4 + $0x240] ss:$8 sps:$4 sm:$0xff]  }
  0x42   : > { %1264 = vmatpush2.bf16.msra.mxu0 %v11397_v23  ;;  %v611_v21 = vor.u32 %v610_v11, %v607_v9  ;;  %v632_v23 = vshll.u32 %v12597_v14, 16  ;;  %v626_v41 = vrot.slane %v624_v17, 5  ;;  %v650_v9 = vrot.slane %v648_v52, 5  ;;  %v11472_v11 = vld [vmem:[%s19029_s4 + $0x344] ss:$8 sps:$4 sm:$0xff]   ;;  %v12700_v17 = vld [vmem:[%s12449_s10 + $0x90] sm:$0xff] }
  0x43   : > { %1777 = vmatpush2.bf16.msra.mxu1 %v11398_v28  ;;  %1265 = vmatprep.subr.bf16.mxu0 %v11399_v33  ;;  %v621_v26 = vor.u32 %v620_v13, %v616_v49  ;;  %v642_v28 = vshrl.u32 %v12602_v16, 16  ;;  %v10341_v33 = vcombine.high %v12512_v18, %v12515_v19 }
  0x44   : > { %1778 = vmatprep.subr.bf16.mxu1 %v11401_v34  ;;  %v11456_v34 = vld [vmem:[%s19029_s4 + $0x370] ss:$8 sps:$4 sm:$0xff]   ;;  %v612_v1 = vrot.slane %v611_v21, 4  ;;  %v634_v38 = vrot.slane %v632_v23, 5 }
  0x45   : > { %v622_v40 = vrot.slane %v621_v26, 4  ;;  %v644_v43 = vrot.slane %v642_v28, 4  ;;  %v12706_v21 = vld [vmem:[%s12449_s10 + $0x98] sm:$0xff]  ;;  %v11438_v28 = vld [vmem:[%s19029_s4 + $0x220] ss:$8 sps:$4 sm:$0xff]  }
  0x46   : > { %1266 = vmatpush2.bf16.msra.mxu0 %v11403_v36  ;;  %v10277_v36 = vcombine.high %v12606_v20, %v12615_v25  ;;  %v12657_v53 = vsel %vm12506_vm2, %v612_v1, %v616_v49  ;;  %v635_v54 = vor.u32 %v634_v38, %v631_v2  ;;  %v10345_v2 = vcombine.high %v12597_v14, %v12602_v16  ;;  %v469_v38 = vld [vmem:[%s12449_s10 + $0xa0] sm:$0x11] }
  0x47   : > { %1779 = vmatpush2.bf16.msra.mxu1 %v11404_v37  ;;  %1267 = vmatprep.subr.bf16.mxu0 %v11405_v47  ;;  %v11423_v37 = vld [vmem:[%s19029_s4 + $0x250] ss:$8 sps:$4 sm:$0xff]   ;;  %v12650_v47 = vld [vmem:[%s12449_s10 + $0x80] sm:$0xff] }
  0x48   : > { %1780 = vmatprep.subr.bf16.mxu1 %v11407_v50  ;;  %v11459_v50 = vld [vmem:[%s19029_s4 + $0x360] ss:$8 sps:$4 sm:$0xff]   ;;  %v662_v59 = vshll.u32 %v12650_v47, 16  ;;  %v666_v60 = vshrl.u32 %v12650_v47, 16  ;;  %v636_v8 = vrot.slane %v635_v54, 4 }
  0x49   : > { %v11481_v54 = vld [vmem:[%s19029_s4 + $0x320] ss:$8 sps:$4 sm:$0xff]  }
  0x4a   : > { %1268 = vmatpush2.bf16.msra.mxu0 %v11409_v57  ;;  %v12663_v57 = vsel %vm12506_vm2, %v622_v40, %v626_v41  ;;  %v12694_v49 = vrot.slane %v662_v59, 5  ;;  %v668_v13 = vrot.slane %v666_v60, 4  ;;  %v12710_v22 = vsel %vm12506_vm2, %v636_v8, %v640_v42  ;;  %v11443_v40 = vld [vmem:[%s19029_s4 + $0x210] ss:$8 sps:$4 sm:$0xff]   ;;  %v12749_v41 = vld [vmem:[%s12449_s10 + $0xa8] sm:$0xff] }
  0x4b   : > { %1781 = vmatpush2.bf16.msra.mxu1 %v11410_v58  ;;  %2395 = vmatprep.subr.bf16.mxu0 %v11415_v63  ;;  %v645_v58 = vor.u32 %v644_v43, %v640_v42  ;;  %v11467_v63 = vld [vmem:[%s19029_s4 + $0x350] ss:$8 sps:$4 sm:$0xff]   ;;  %v10279_v7 = vcombine.high %v12657_v53, %v12663_v57  ;;  %v704_v56 = vshll.u32 %v12749_v41, 16  ;;  %v11448_v60 = vld [vmem:[%s19029_s4 + $0x200] ss:$8 sps:$4 sm:$0xff]  }
  0x4c   : > { %3053 = vmatprep.subr.bf16.mxu1 %v11458_v35  ;;  %v669_v27 = vor.u32 %v668_v13, %v12694_v49  ;;  %v11483_v35 = vld [vmem:[%s19029_s4 + $0x324] ss:$8 sps:$4 sm:$0xff]   ;;  %v12752_v42 = vld [vmem:[%s12449_s10 + $0xb0] sm:$0xff]  ;;  %v10347_v13 = vcombine.high %v12641_v39, %v12650_v47 }
  0x4d   : > { %1270 = vmatmul.mubr.bf16.vlgmr.msra.gmra.mxu0 %v10272_v0  ;;  %v10276_v0 = vcombine.low %v12606_v20, %v12615_v25  ;;  %v646_v12 = vrot.slane %v645_v58, 4  ;;  %v11470_v20 = vld [vmem:[%s19029_s4 + $0x340] ss:$8 sps:$4 sm:$0xff]   ;;  %v710_v58 = vshll.u32 %v12752_v42, 16  ;;  %v714_v59 = vshrl.u32 %v12752_v42, 16 }
  0x4e   : > { %1783 = vmatmul.mubr.bf16.vlgmr.msra.gmra.mxu1 %v10336_v3  ;;  %2396 = vmatpush1.bf16.msra.mxu0 %v11413_v4  ;;  %v10340_v3 = vcombine.low %v12512_v18, %v12515_v19  ;;  %v10343_v4 = vcombine.high %v12551_v46, %v12560_v51  ;;  %v11433_v18 = vld [vmem:[%s19029_s4 + $0x230] ss:$8 sps:$4 sm:$0xff]   ;;  %v655_v19 = vrot.slane %v653_v55, 4  ;;  %v701_v55 = vshrl.u32 %v12749_v41, 16 }
  0x4f   : > { %1279 = vmatprep.mubr.bf16.mxu0 %v10275_v5  ;;  %1792 = vmatprep.mubr.bf16.mxu1 %v10339_v15  ;;  %v11435_v5 = vld [vmem:[%s19029_s4 + $0x234] ss:$8 sps:$4 sm:$0xff]   ;;  %v11440_v15 = vld [vmem:[%s19029_s4 + $0x224] ss:$8 sps:$4 sm:$0xff]   ;;  %v12717_v25 = vsel %vm12506_vm2, %v646_v12, %v650_v9  ;;  %v706_v8 = vrot.slane %v704_v56, 5  ;;  %v716_v12 = vrot.slane %v714_v59, 4 }
  0x50   : > { %2397 = vmatprep.subr.bf16.mxu0 %v11420_v6  ;;  %3054 = vmatpush1.bf16.msra.mxu1 %v11456_v34  ;;  %v466_v6 = vld [vmem:[%s12449_s10 + $0x88] sm:$0x11]  ;;  %v659_v26 = vor.u32 %v658_v48, %v655_v19  ;;  %v11478_v34 = vld [vmem:[%s19029_s4 + $0x330] ss:$8 sps:$4 sm:$0xff]   ;;  %v10281_v1 = vcombine.high %v12710_v22, %v12717_v25  ;;  %v10344_v19 = vcombine.low %v12597_v14, %v12602_v16  ;;  %v12799_v48 = vld [vmem:[%s12449_s10 + $0xc0] sm:$0xff] }
  0x51   : > { %3055 = vmatprep.subr.bf16.mxu1 %v11461_v44  ;;  %v672_v23 = vshll.u32 %v466_v6, 16  ;;  %v670_v44 = vrot.slane %v669_v27, 4  ;;  %v11494_v9 = vld [vmem:[%s19029_s4 + $0x304] ss:$8 sps:$4 sm:$0xff]   ;;  %v11492_v16 = vld [vmem:[%s19029_s4 + $0x300] ss:$8 sps:$4 sm:$0xff]  }
  0x52   : > { %2398 = vmatpush1.bf16.msra.mxu0 %v11418_v24  ;;  %v11480_v24 = vld [vmem:[%s19029_s4 + $0x334] ss:$8 sps:$4 sm:$0xff]   ;;  %v660_v43 = vrot.slane %v659_v26, 4  ;;  %v725_v26 = vshrl.u32 %v12799_v48, 16  ;;  %v11466_v27 = vld [vmem:[%s19029_s4 + $0x2e4] ss:$8 sps:$4 sm:$0xff]  }
  0x53   : > { %2399 = vmatprep.subr.bf16.mxu0 %v11425_v29  ;;  %v677_v29 = vshrl.u32 %v12700_v17, 16  ;;  %v11503_v56 = vld [vmem:[%s19029_s4 + $0x3e0] ss:$8 sps:$4 sm:$0xff]   ;;  %v11513_v59 = vld [vmem:[%s19029_s4 + $0x3d4] ss:$8 sps:$4 sm:$0xff]  }
  0x54   : > { %3056 = vmatpush1.bf16.msra.mxu1 %v11459_v50 }
  0x55   : > { %1280 = vmatmul.mubr.bf16.gmra.mxu0 %v10274_v31  ;;  %3057 = vmatprep.subr.bf16.mxu1 %v11469_v61  ;;  %v680_v31 = vshll.u32 %v12700_v17, 16  ;;  %v679_v50 = vrot.slane %v677_v29, 4  ;;  %v12775_v61 = vsel %vm12506_vm2, %v660_v43, %v12694_v49  ;;  %v727_v43 = vrot.slane %v725_v26, 4  ;;  %v11497_v26 = vld [vmem:[%s19029_s4 + $0x2b0] ss:$8 sps:$4 sm:$0xff]  }
  0x56   : > { %1793 = vmatmul.mubr.bf16.gmra.mxu1 %v10338_v32  ;;  %1289 = vmatprep.mubr.bf16.mxu0 %v10277_v36  ;;  %v686_v32 = vshll.u32 %v12706_v21, 16  ;;  %v10278_v36 = vcombine.low %v12657_v53, %v12663_v57  ;;  %v11491_v57 = vld [vmem:[%s19029_s4 + $0x314] ss:$8 sps:$4 sm:$0xff]  }
  0x57   : > { %1802 = vmatprep.mubr.bf16.mxu1 %v10341_v33  ;;  %2400 = vmatpush1.bf16.msra.mxu0 %v11423_v37  ;;  %v690_v33 = vshrl.u32 %v12706_v21, 16  ;;  %v10342_v37 = vcombine.low %v12551_v46, %v12560_v51  ;;  %v11450_v46 = vld [vmem:[%s19029_s4 + $0x204] ss:$8 sps:$4 sm:$0xff]   ;;  %v682_v51 = vrot.slane %v680_v31, 5 }
  0x58   : > { %2401 = vmatprep.subr.bf16.mxu0 %v11430_v45  ;;  %3058 = vmatpush1.bf16.msra.mxu1 %v11467_v63  ;;  %v674_v45 = vrot.slane %v672_v23, 5  ;;  %v12757_v52 = vrot.slane %v686_v32, 5  ;;  %v12778_v63 = vld [vmem:[%s12449_s10 + $0xb8] sm:$0x11] }
  0x59   : > { %3059 = vmatprep.subr.bf16.mxu1 %v11472_v11  ;;  %v692_v53 = vrot.slane %v690_v33, 4  ;;  %v712_v11 = vrot.slane %v710_v58, 5  ;;  %v720_v14 = vshll.u32 %v12778_v63, 16  ;;  %v11464_v33 = vld [vmem:[%s19029_s4 + $0x2e0] ss:$8 sps:$4 sm:$0xff]  }
  0x5a   : > { %v11488_v58 = vld [vmem:[%s19029_s4 + $0x2c4] ss:$8 sps:$4 sm:$0xff]  }
  0x5b   : > { %2402 = vmatpush1.bf16.msra.mxu0 %v11428_v62  ;;  %v696_v62 = vshll.u32 %v469_v38, 16  ;;  %v693_v6 = vor.u32 %v692_v53, %v12757_v52  ;;  %v717_v29 = vor.u32 %v716_v12, %v712_v11  ;;  %v10346_v38 = vcombine.low %v12641_v39, %v12650_v47  ;;  %v12857_v39 = vld [vmem:[%s12449_s10 + $0xd0] sm:$0x11]  ;;  %v12860_v47 = vld [vmem:[%s12449_s10 + $0xd8] sm:$0xff]  ;;  %v11516_v12 = vld [vmem:[%s19029_s4 + $0x3c4] ss:$8 sps:$4 sm:$0xff]  }
  0x5c   : > { %2403 = vmatprep.subr.bf16.mxu0 %v11435_v5  ;;  %3060 = vmatpush1.bf16.msra.mxu1 %v11470_v20  ;;  %v683_v5 = vor.u32 %v682_v51, %v679_v50  ;;  %v12806_v20 = vld [vmem:[%s12449_s10 + $0xc8] sm:$0xff]  ;;  %v10349_v53 = vcombine.high %v12700_v17, %v12706_v21 }
  0x5d   : > { %1290 = vmatmul.mubr.bf16.gmra.mxu0 %v10276_v0  ;;  %3061 = vmatprep.subr.bf16.mxu1 %v11480_v24  ;;  %v11455_v0 = vld [vmem:[%s19029_s4 + $0x2f4] ss:$8 sps:$4 sm:$0xff]   ;;  %v694_v24 = vrot.slane %v693_v6, 4  ;;  %v734_v31 = vshll.u32 %v12806_v20, 16  ;;  %v738_v32 = vshrl.u32 %v12806_v20, 16 }
  0x5e   : > { %1803 = vmatmul.mubr.bf16.gmra.mxu1 %v10340_v3  ;;  %1299 = vmatprep.mubr.bf16.mxu0 %v10279_v7  ;;  %v11489_v3 = vld [vmem:[%s19029_s4 + $0x310] ss:$8 sps:$4 sm:$0xff]   ;;  %v703_v7 = vrot.slane %v701_v55, 4  ;;  %v684_v23 = vrot.slane %v683_v5, 4 }
  0x5f   : > { %1812 = vmatprep.mubr.bf16.mxu1 %v10343_v4  ;;  %2404 = vmatpush1.bf16.msra.mxu0 %v11433_v18  ;;  %v12788_v4 = vsel %vm12506_vm2, %v670_v44, %v674_v45  ;;  %v10280_v18 = vcombine.low %v12710_v22, %v12717_v25  ;;  %v11453_v22 = vld [vmem:[%s19029_s4 + $0x2f0] ss:$8 sps:$4 sm:$0xff]   ;;  %v11505_v44 = vld [vmem:[%s19029_s4 + $0x3e4] ss:$8 sps:$4 sm:$0xff]   ;;  %v718_v45 = vrot.slane %v717_v29, 4  ;;  %v740_v51 = vrot.slane %v738_v32, 4 }
  0x60   : > { %2405 = vmatprep.subr.bf16.mxu0 %v11440_v15  ;;  %3062 = vmatpush1.bf16.msra.mxu1 %v11478_v34  ;;  %v10283_v49 = vcombine.high %v12775_v61, %v12788_v4  ;;  %v698_v15 = vrot.slane %v696_v62, 5  ;;  %v707_v25 = vor.u32 %v706_v8, %v703_v7  ;;  %v11477_v34 = vld [vmem:[%s19029_s4 + $0x2d4] ss:$8 sps:$4 sm:$0xff]   ;;  %v11475_v55 = vld [vmem:[%s19029_s4 + $0x2d0] ss:$8 sps:$4 sm:$0xff]  }
  0x61   : > { %3063 = vmatprep.subr.bf16.mxu1 %v11483_v35  ;;  %v12834_v35 = vsel %vm12506_vm2, %v684_v23, %v12757_v52  ;;  %v11486_v7 = vld [vmem:[%s19029_s4 + $0x2c0] ss:$8 sps:$4 sm:$0xff]   ;;  %v11511_v8 = vld [vmem:[%s19029_s4 + $0x3d0] ss:$8 sps:$4 sm:$0xff]  }
  0x62   : > { %v12918_v23 = vld [vmem:[%s12449_s10 + $0xf8] sm:$0xff] }
  0x63   : > { %2406 = vmatpush1.bf16.msra.mxu0 %v11438_v28  ;;  %v11502_v28 = vld [vmem:[%s19029_s4 + $0x3f4] ss:$8 sps:$4 sm:$0xff]  }
  0x64   : > { %2407 = vmatprep.subr.bf16.mxu0 %v11445_v30  ;;  %3064 = vmatpush1.bf16.msra.mxu1 %v11481_v54  ;;  %v728_v30 = vshll.u32 %v12799_v48, 16  ;;  %v12863_v54 = vld [vmem:[%s12449_s10 + $0xe0] sm:$0xff] }
  0x65   : > { %1300 = vmatmul.mubr.bf16.gmra.mxu0 %v10278_v36  ;;  %3065 = vmatprep.subr.bf16.mxu1 %v11491_v57  ;;  %v12838_v36 = vsel %vm12506_vm2, %v694_v24, %v698_v15  ;;  %v758_v5 = vshll.u32 %v12863_v54, 16  ;;  %v762_v6 = vshrl.u32 %v12863_v54, 16 }
  0x66   : > { %1813 = vmatmul.mubr.bf16.gmra.mxu1 %v10342_v37  ;;  %1309 = vmatprep.mubr.bf16.mxu0 %v10281_v1  ;;  %v722_v37 = vrot.slane %v720_v14, 5  ;;  %v11500_v1 = vld [vmem:[%s19029_s4 + $0x3f0] ss:$8 sps:$4 sm:$0xff]   ;;  %v730_v50 = vrot.slane %v728_v30, 5  ;;  %v10285_v52 = vcombine.high %v12834_v35, %v12838_v36 }
  0x67   : > { %1822 = vmatprep.mubr.bf16.mxu1 %v10345_v2  ;;  %2408 = vmatpush1.bf16.msra.mxu0 %v11443_v40  ;;  %v10282_v2 = vcombine.low %v12775_v61, %v12788_v4  ;;  %v708_v40 = vrot.slane %v707_v25, 4  ;;  %v752_v4 = vshll.u32 %v12860_v47, 16  ;;  %v764_v25 = vrot.slane %v762_v6, 4 }
  0x68   : > { %2409 = vmatprep.subr.bf16.mxu0 %v11450_v46  ;;  %3066 = vmatpush1.bf16.msra.mxu1 %v11489_v3  ;;  %v12850_v46 = vrot.slane %v734_v31, 5  ;;  %v731_v61 = vor.u32 %v730_v50, %v727_v43  ;;  %v749_v3 = vshrl.u32 %v12860_v47, 16  ;;  %v11524_v31 = vld [vmem:[%s19029_s4 + $0x3b4] ss:$8 sps:$4 sm:$0xff]   ;;  %v10353_v43 = vcombine.high %v12799_v48, %v12806_v20  ;;  %v11522_v50 = vld [vmem:[%s19029_s4 + $0x3b0] ss:$8 sps:$4 sm:$0xff]  }
  0x69   : > { %3067 = vmatprep.subr.bf16.mxu1 %v11494_v9  ;;  %v12873_v57 = vsel %vm12506_vm2, %v708_v40, %v712_v11  ;;  %v10284_v9 = vcombine.low %v12834_v35, %v12838_v36  ;;  %v11499_v11 = vld [vmem:[%s19029_s4 + $0x2b4] ss:$8 sps:$4 sm:$0xff]   ;;  %v754_v14 = vrot.slane %v752_v4, 5  ;;  %v12947_v36 = vld [vmem:[%s12449_s10 + $0x100] sm:$0x11]  ;;  %v10350_v40 = vcombine.low %v12749_v41, %v12752_v42 }
  0x6a   : > { %v741_v62 = vor.u32 %v740_v51, %v12850_v46  ;;  %v751_v24 = vrot.slane %v749_v3, 4 }
  0x6b   : > { %2410 = vmatpush1.bf16.msra.mxu0 %v11448_v60  ;;  %v12883_v60 = vsel %vm12506_vm2, %v718_v45, %v722_v37  ;;  %v782_v37 = vshll.u32 %v12918_v23, 16  ;;  %v11508_v45 = vld [vmem:[%s19029_s4 + $0x2a0] ss:$8 sps:$4 sm:$0xff]  }
  0x6c   : > { %2411 = vmatprep.subr.bf16.mxu0 %v11455_v0  ;;  %3068 = vmatpush1.bf16.msra.mxu1 %v11492_v16  ;;  %v744_v0 = vshll.u32 %v12857_v39, 16  ;;  %v742_v15 = vrot.slane %v741_v62, 4  ;;  %v12920_v16 = vrot.slane %v758_v5, 5  ;;  %v11519_v5 = vld [vmem:[%s19029_s4 + $0x290] ss:$8 sps:$4 sm:$0xff]  }
  0x6d   : > { %1310 = vmatmul.mubr.bf16.gmra.mxu0 %v10280_v18  ;;  %3069 = vmatprep.subr.bf16.mxu1 %v11502_v28  ;;  %v10348_v18 = vcombine.low %v12700_v17, %v12706_v21  ;;  %v12912_v17 = vld [vmem:[%s12449_s10 + $0xe8] sm:$0x11]  ;;  %v12915_v21 = vld [vmem:[%s12449_s10 + $0xf0] sm:$0xff]  ;;  %v784_v3 = vrot.slane %v782_v37, 5 }
  0x6e   : > { %1823 = vmatmul.mubr.bf16.gmra.mxu1 %v10344_v19  ;;  %1319 = vmatprep.mubr.bf16.mxu0 %v10283_v49  ;;  %v10351_v19 = vcombine.high %v12749_v41, %v12752_v42  ;;  %v10287_v49 = vcombine.high %v12873_v57, %v12883_v60  ;;  %v11514_v28 = vld [vmem:[%s19029_s4 + $0x3c0] ss:$8 sps:$4 sm:$0xff]   ;;  %v773_v29 = vshrl.u32 %v12915_v21, 16  ;;  %v776_v30 = vshll.u32 %v12915_v21, 16 }
  0x6f   : > { %1832 = vmatprep.mubr.bf16.mxu1 %v10347_v13  ;;  %2412 = vmatpush2.bf16.msra.mxu0 %v11453_v22  ;;  %v732_v13 = vrot.slane %v731_v61, 4  ;;  %v746_v22 = vrot.slane %v744_v0, 5  ;;  %v768_v35 = vshll.u32 %v12912_v17, 16  ;;  %v12983_v61 = vld [vmem:[%s12449_s10 + $0x120] sm:$0xff] }
  0x70   : > { %2413 = vmatprep.subr.bf16.mxu0 %v11466_v27  ;;  %3070 = vmatpush2.bf16.msra.mxu1 %v11500_v1  ;;  %v11510_v27 = vld [vmem:[%s19029_s4 + $0x2a4] ss:$8 sps:$4 sm:$0xff]   ;;  %v786_v1 = vshrl.u32 %v12918_v23, 16 }
  0x71   : > { %3071 = vmatprep.subr.bf16.mxu1 %v11505_v44  ;;  %v12939_v32 = vsel %vm12506_vm2, %v732_v13, %v12850_v46  ;;  %v765_v44 = vor.u32 %v764_v25, %v12920_v16  ;;  %v10286_v46 = vcombine.low %v12873_v57, %v12883_v60  ;;  %v770_v0 = vrot.slane %v768_v35, 5 }
  0x72   : > { %v788_v4 = vrot.slane %v786_v1, 4  ;;  %v824_v25 = vshll.u32 %v12983_v61, 16  ;;  %v10355_v35 = vcombine.high %v12860_v47, %v12863_v54  ;;  %v11538_v1 = vld [vmem:[%s19029_s4 + $0x384] ss:$8 sps:$4 sm:$0xff]  }
  0x73   : > { %2414 = vmatpush2.bf16.msra.mxu0 %v11464_v33  ;;  %v12943_v33 = vsel %vm12506_vm2, %v742_v15, %v746_v22  ;;  %v766_v6 = vrot.slane %v765_v44, 4 }
  0x74   : > { %2415 = vmatprep.subr.bf16.mxu0 %v11477_v34  ;;  %3072 = vmatpush2.bf16.msra.mxu1 %v11503_v56  ;;  %v755_v34 = vor.u32 %v754_v14, %v751_v24  ;;  %v10289_v51 = vcombine.high %v12939_v32, %v12943_v33  ;;  %v11527_v56 = vld [vmem:[%s19029_s4 + $0x3a4] ss:$8 sps:$4 sm:$0xff]   ;;  %v789_v22 = vor.u32 %v788_v4, %v784_v3  ;;  %v13004_v24 = vld [vmem:[%s12449_s10 + $0x118] sm:$0x11]  ;;  %v821_v14 = vshrl.u32 %v12983_v61, 16 }
  0x75   : > { %1320 = vmatmul.mubr.bf16.gmra.mxu0 %v10282_v2  ;;  %3073 = vmatprep.subr.bf16.mxu1 %v11513_v59  ;;  %v12952_v2 = vld [vmem:[%s12449_s10 + $0x108] sm:$0xff]  ;;  %v816_v44 = vshll.u32 %v13004_v24, 16 }
  0x76   : > { %1833 = vmatmul.mubr.bf16.gmra.mxu1 %v10346_v38  ;;  %1329 = vmatprep.mubr.bf16.mxu0 %v10285_v52  ;;  %v12955_v38 = vld [vmem:[%s12449_s10 + $0x110] sm:$0xff]  ;;  %v775_v52 = vrot.slane %v773_v29, 4  ;;  %v800_v57 = vshll.u32 %v12952_v2, 16  ;;  %v756_v62 = vrot.slane %v755_v34, 4  ;;  %v10352_v34 = vcombine.low %v12799_v48, %v12806_v20 }
  0x77   : > { %1842 = vmatprep.mubr.bf16.mxu1 %v10349_v53  ;;  %2416 = vmatpush2.bf16.msra.mxu0 %v11475_v55  ;;  %v778_v53 = vrot.slane %v776_v30, 5  ;;  %v11521_v55 = vld [vmem:[%s19029_s4 + $0x294] ss:$8 sps:$4 sm:$0xff]   ;;  %v806_v59 = vshll.u32 %v12955_v38, 16  ;;  %v810_v60 = vshrl.u32 %v12955_v38, 16 }
  0x78   : > { %2417 = vmatprep.subr.bf16.mxu0 %v11488_v58  ;;  %3074 = vmatpush2.bf16.msra.mxu1 %v11511_v8  ;;  %v797_v58 = vshrl.u32 %v12952_v2, 16  ;;  %v11525_v8 = vld [vmem:[%s19029_s4 + $0x3a0] ss:$8 sps:$4 sm:$0xff]  }
  0x79   : > { %3075 = vmatprep.subr.bf16.mxu1 %v11516_v12  ;;  %v13001_v13 = vrot.slane %v806_v59, 5  ;;  %v812_v15 = vrot.slane %v810_v60, 4  ;;  %v11530_v30 = vld [vmem:[%s19029_s4 + $0x280] ss:$8 sps:$4 sm:$0xff]  }
  0x7a   : > { %v799_v12 = vrot.slane %v797_v58, 4 }
  0x7b   : > { %2418 = vmatpush2.bf16.msra.mxu0 %v11486_v7  ;;  %v792_v7 = vshll.u32 %v12947_v36, 16 }
  0x7c   : > { %2419 = vmatprep.subr.bf16.mxu0 %v11499_v11  ;;  %3076 = vmatpush2.bf16.msra.mxu1 %v11514_v28  ;;  %v11535_v11 = vld [vmem:[%s19029_s4 + $0x394] ss:$8 sps:$4 sm:$0xff]  }
  0x7d   : > { %1330 = vmatmul.mubr.bf16.gmra.mxu0 %v10284_v9  ;;  %3077 = vmatprep.subr.bf16.mxu1 %v11524_v31  ;;  %v779_v9 = vor.u32 %v778_v53, %v775_v52  ;;  %v794_v28 = vrot.slane %v792_v7, 5  ;;  %v11533_v31 = vld [vmem:[%s19029_s4 + $0x390] ss:$8 sps:$4 sm:$0xff]   ;;  %v11536_v53 = vld [vmem:[%s19029_s4 + $0x380] ss:$8 sps:$4 sm:$0xff]  }
  0x7e   : > { %1843 = vmatmul.mubr.bf16.gmra.mxu1 %v10348_v18  ;;  %1339 = vmatprep.mubr.bf16.mxu0 %v10287_v49  ;;  %v12993_v18 = vld [vmem:[%s12449_s10 + $0x128] sm:$0xff]  ;;  %v802_v49 = vrot.slane %v800_v57, 5  ;;  %v13042_v52 = vld [vmem:[%s12449_s10 + $0x138] sm:$0xff] }
  0x7f   : > { %1852 = vmatprep.mubr.bf16.mxu1 %v10351_v19  ;;  %2420 = vmatpush2.bf16.msra.mxu0 %v11497_v26  ;;  %v11532_v19 = vld [vmem:[%s19029_s4 + $0x284] ss:$8 sps:$4 sm:$0xff]   ;;  %v13011_v26 = vsel %vm12506_vm2, %v756_v62, %v12920_v16  ;;  %v830_v29 = vshll.u32 %v12993_v18, 16  ;;  %v10288_v16 = vcombine.low %v12939_v32, %v12943_v33  ;;  %v834_v37 = vshrl.u32 %v12993_v18, 16  ;;  %v11541_v32 = vld [vmem:[%s19029_s4 + $0x474] ss:$8 sps:$4 sm:$0xff]  }
  0x80   : > { %2421 = vmatprep.subr.bf16.mxu0 %v11510_v27  ;;  %3078 = vmatpush2.bf16.msra.mxu1 %v11522_v50  ;;  %v13015_v27 = vsel %vm12506_vm2, %v766_v6, %v770_v0  ;;  %v780_v33 = vrot.slane %v779_v9, 4  ;;  %v790_v50 = vrot.slane %v789_v22, 4  ;;  %v818_v62 = vrot.slane %v816_v44, 5  ;;  %v13055_v0 = vld [vmem:[%s12449_s10 + $0x140] sm:$0xff]  ;;  %v13068_v9 = vld [vmem:[%s12449_s10 + $0x148] sm:$0x11] }
  0x81   : > { %3079 = vmatprep.subr.bf16.mxu1 %v11527_v56  ;;  %v832_v56 = vrot.slane %v830_v29, 5  ;;  %v836_v58 = vrot.slane %v834_v37, 4  ;;  %v845_v6 = vshrl.u32 %v13042_v52, 16  ;;  %v848_v7 = vshll.u32 %v13042_v52, 16 }
  0x82   : > { %v13052_v57 = vsel %vm12506_vm2, %v780_v33, %v784_v3  ;;  %v13059_v4 = vsel %vm12506_vm2, %v790_v50, %v794_v28  ;;  %v10354_v3 = vcombine.low %v12860_v47, %v12863_v54  ;;  %v13112_v50 = vld [vmem:[%s12449_s10 + $0x158] sm:$0xff] }
  0x83   : > { %2422 = vmatpush2.bf16.msra.mxu0 %v11508_v45  ;;  %v10291_v45 = vcombine.high %v13011_v26, %v13015_v27  ;;  %v10293_v22 = vcombine.high %v13052_v57, %v13059_v4  ;;  %v847_v29 = vrot.slane %v845_v6, 4  ;;  %v10292_v33 = vcombine.low %v13052_v57, %v13059_v4 }
  0x84   : > { %2423 = vmatprep.subr.bf16.mxu0 %v11521_v55  ;;  %3080 = vmatpush2.bf16.msra.mxu1 %v11525_v8  ;;  %v13048_v55 = vld [vmem:[%s12449_s10 + $0x130] sm:$0x11]  ;;  %v10357_v8 = vcombine.high %v12915_v21, %v12918_v23  ;;  %v2016_v57 = vrot.slane %v12778_v63, 5  ;;  %v882_v63 = vshrl.u32 %v13112_v50, 16 }
  0x85   : > { %1340 = vmatmul.mubr.bf16.gmra.mxu0 %v10286_v46  ;;  %3081 = vmatprep.subr.bf16.mxu1 %v11535_v11  ;;  %v823_v46 = vrot.slane %v821_v14, 4  ;;  %v840_v11 = vshll.u32 %v13048_v55, 16 }
  0x86   : > { %1853 = vmatmul.mubr.bf16.gmra.mxu1 %v10350_v40  ;;  %1349 = vmatprep.mubr.bf16.mxu0 %v10289_v51  ;;  %v803_v40 = vor.u32 %v802_v49, %v799_v12  ;;  %v826_v51 = vrot.slane %v824_v25, 5  ;;  %v854_v12 = vshll.u32 %v13055_v0, 16  ;;  %v858_v49 = vshrl.u32 %v13055_v0, 16 }
  0x87   : > { %1862 = vmatprep.mubr.bf16.mxu1 %v10353_v43  ;;  %2424 = vmatpush2.bf16.msra.mxu0 %v11519_v5  ;;  %v813_v43 = vor.u32 %v812_v15, %v13001_v13  ;;  %v10290_v15 = vcombine.low %v13011_v26, %v13015_v27  ;;  %v10356_v26 = vcombine.low %v12915_v21, %v12918_v23  ;;  %v842_v37 = vrot.slane %v840_v11, 5 }
  0x88   : > { %2425 = vmatprep.subr.bf16.mxu0 %v11532_v19  ;;  %3082 = vmatpush2.bf16.msra.mxu1 %v11533_v31  ;;  %v804_v59 = vrot.slane %v803_v40, 4  ;;  %v827_v5 = vor.u32 %v826_v51, %v823_v46  ;;  %v837_v19 = vor.u32 %v836_v58, %v832_v56  ;;  %v864_v31 = vshll.u32 %v13068_v9, 16 }
  0x89   : > { %3083 = vmatprep.subr.bf16.mxu1 %v11538_v1  ;;  %v814_v60 = vrot.slane %v813_v43, 4  ;;  %v10359_v27 = vcombine.high %v12952_v2, %v12955_v38  ;;  %v13099_v1 = vrot.slane %v854_v12, 5  ;;  %v2013_v58 = vrot.slane %v12752_v42, 5 }
  0x8a   : > { %v13080_v14 = vsel %vm12506_vm2, %v804_v59, %v13001_v13  ;;  %v828_v28 = vrot.slane %v827_v5, 4  ;;  %v13094_v13 = vld [vmem:[%s12449_s10 + $0x150] sm:$0xff]  ;;  %v878_v42 = vshll.u32 %v13112_v50, 16  ;;  %v2027_v11 = vrot.slane %v12863_v54, 5 }
  0x8b   : > { %2426 = vmatpush2.bf16.msra.mxu0 %v11530_v30  ;;  %v13084_v25 = vsel %vm12506_vm2, %v814_v60, %v818_v62  ;;  %v850_v30 = vrot.slane %v848_v7, 5  ;;  %v869_v46 = vshrl.u32 %v13094_v13, 16  ;;  %v872_v51 = vshll.u32 %v13094_v13, 16 }
  0x8c   : > { %4015 = vmatprep.subr.bf16.mxu0 %v11541_v32  ;;  %3084 = vmatpush2.bf16.msra.mxu1 %v11536_v53  ;;  %v860_v32 = vrot.slane %v858_v49, 4  ;;  %v10295_v40 = vcombine.high %v13080_v14, %v13084_v25  ;;  %v13107_v43 = vsel %vm12506_vm2, %v828_v28, %v832_v56  ;;  %v10407_v53 = vrot.slane %v12749_v41, 9 }
  0x8d   : > { %1350 = vmatmul.mubr.bf16.gmra.mxu0 %v10288_v16  ;;  %v10358_v16 = vcombine.low %v12952_v2, %v12955_v38  ;;  %v851_v44 = vor.u32 %v850_v30, %v847_v29  ;;  %v19179_v60 = vmov 0  ;;  %v10408_v62 = vrot.slane %v12799_v48, 9 }
  0x8e   : > { %1863 = vmatmul.mubr.bf16.gmra.mxu1 %v10352_v34  ;;  %1359 = vmatprep.mubr.bf16.mxu0 %v10291_v45  ;;  %v11586_v34 = vld [vmem:[%s19029_s4 + $0x574] ss:$8 sps:$4 sm:$0xff]   ;;  %v13109_v45 = vrot.slane %v864_v31, 5  ;;  %v861_v59 = vor.u32 %v860_v32, %v13099_v1  ;;  %v19180_v60 = vsel %vm13126_vm5, 4294967295, %v19179_v60  ;;  %v2020_v41 = vrot.slane %v12806_v20, 5 }
  0x8f   : > { %1872 = vmatprep.mubr.bf16.mxu1 %v10355_v35  ;;  %v838_v35 = vrot.slane %v837_v19, 4  ;;  %4721 = vmatprep.subr.bf16.mxu1 %v11586_v34  ;;  %19181 = vst [vmem:[#allocation2_spill] sm:$0xff] %v19180_v60  ;;  %v13136_v4 = vsel %vm13126_vm5, %v10407_v53, %v2013_v58  ;;  %v2015_v5 = vrot.slane %v2013_v58, 4  ;;  %v852_v6 = vrot.slane %v851_v44, 4 }
  0x90   : > { %v13140_v7 = vsel %vm13126_vm5, %v10408_v62, %v2020_v41  ;;  %v13143_v48 = vrot.slane %v869_v46, 4  ;;  %v10409_v19 = vrot.slane %v12860_v47, 9  ;;  %v2029_v28 = vrot.slane %v2027_v11, 4 }
  0x91   : > { %v13121_v56 = vsel %vm12506_vm2, %v838_v35, %v842_v37  ;;  %v13147_v20 = vsel %vm13126_vm5, %v2015_v5, %v2016_v57  ;;  %v862_v29 = vrot.slane %v861_v59, 4  ;;  %v874_v30 = vrot.slane %v872_v51, 5  ;;  %v13210_v57 = vld [vmem:[%s12449_s10 + $0x170] sm:$0xff] }
  0x92   : > { %v10463_v12 = vcombine.high %v13136_v4, %v13147_v20  ;;  %v10462_v49 = vcombine.low %v13136_v4, %v13147_v20  ;;  %v13166_v54 = vsel %vm13126_vm5, %v10409_v19, %v2027_v11  ;;  %v2034_v31 = vrot.slane %v12918_v23, 5  ;;  %v11664_v4 = vld [vmem:[%s19029_s4 + $0x580] ss:$8 sps:$4 sm:$0xff]   ;;  %v11669_v20 = vld [vmem:[%s19029_s4 + $0x674] ss:$8 sps:$4 sm:$0xff]  }
  0x93   : > { %v884_v34 = vrot.slane %v882_v63, 4  ;;  %v2037_v37 = vrot.slane %v12947_v36, 5  ;;  %v10411_v44 = vrot.slane %v12952_v2, 9  ;;  %v2041_v36 = vrot.slane %v12955_v38, 5 }
  0x94   : > { %v2036_v23 = vrot.slane %v2034_v31, 4  ;;  %v2044_v46 = vrot.slane %v13004_v24, 5  ;;  %v10297_v51 = vcombine.high %v13107_v43, %v13121_v56  ;;  %v10361_v53 = vcombine.high %v12983_v61, %v12993_v18 }
  0x95   : > { %1360 = vmatmul.mubr.bf16.gmra.mxu0 %v10290_v15  ;;  %v13200_v58 = vsel %vm12506_vm2, %v852_v6, %v13099_v1  ;;  %v13218_v62 = vsel %vm13126_vm5, %v10411_v44, %v2041_v36  ;;  %v2043_v1 = vrot.slane %v2041_v36, 4  ;;  %v906_v19 = vshrl.u32 %v13210_v57, 16 }
  0x96   : > { %1873 = vmatmul.mubr.bf16.gmra.mxu1 %v10354_v3  ;;  %1369 = vmatprep.mubr.bf16.mxu0 %v10293_v22  ;;  %v2022_v3 = vrot.slane %v2020_v41, 4  ;;  %v867_v41 = vsel %vm12506_vm2, %v862_v29, %v13109_v45  ;;  %v2048_v45 = vrot.slane %v12993_v18, 5  ;;  %v10360_v29 = vcombine.low %v12983_v61, %v12993_v18  ;;  %v13262_v18 = vld [vmem:[%s12449_s10 + $0x178] sm:$0x11] }
  0x97   : > { %1882 = vmatprep.mubr.bf16.mxu1 %v10357_v8  ;;  %v2023_v8 = vrot.slane %v12857_v39, 5  ;;  %v2030_v39 = vrot.slane %v12912_v17, 5  ;;  %v10410_v17 = vrot.slane %v12915_v21, 9  ;;  %v908_v44 = vrot.slane %v906_v19, 4 }
  0x98   : > { %v2050_v11 = vrot.slane %v2048_v45, 4 }
  0x99   : > { %v13157_v15 = vsel %vm13126_vm5, %v2022_v3, %v2023_v8  ;;  %v13174_v35 = vsel %vm13126_vm5, %v2029_v28, %v2030_v39  ;;  %v13183_v21 = vsel %vm13126_vm5, %v10410_v17, %v2034_v31  ;;  %v13233_v8 = vsel %vm13126_vm5, %v2043_v1, %v2044_v46 }
  0x9a   : > { %v10465_v22 = vcombine.high %v13140_v7, %v13157_v15  ;;  %v10464_v47 = vcombine.low %v13140_v7, %v13157_v15  ;;  %v10466_v32 = vcombine.low %v13166_v54, %v13174_v35  ;;  %v10471_v2 = vcombine.high %v13218_v62, %v13233_v8  ;;  %v7774_v15 = vld [vmem:[%s19028_s3 + $0x10] sm:$0xff] }
  0x9b   : > { %v10470_v38 = vcombine.low %v13218_v62, %v13233_v8  ;;  %v2051_v39 = vrot.slane %v13048_v55, 5  ;;  %v10296_v28 = vcombine.low %v13107_v43, %v13121_v56  ;;  %v10363_v17 = vcombine.high %v13042_v52, %v13055_v0  ;;  %7840 = vrot.lane.b32.xlu1 %v7774_v15, %s12235_s17  ;;  %v13803_v62 = vld [vmem:[%s13320_s26 + $0x150] sm:$0xff] }
  0x9c   : > { %v2055_v46 = vrot.slane %v13055_v0, 5 }
  0x9d   : > { %1370 = vmatmul.mubr.bf16.gmra.mxu0 %v10292_v33  ;;  %v10294_v33 = vcombine.low %v13080_v14, %v13084_v25  ;;  %v13203_v14 = vld [vmem:[%s12449_s10 + $0x168] sm:$0xff]  ;;  %v13207_v25 = vsel %vm13126_vm5, %v2036_v23, %v2037_v37  ;;  %v13257_v55 = vsel %vm13126_vm5, %v2050_v11, %v2051_v39  ;;  %v10365_v11 = vcombine.high %v13094_v13, %v13112_v50 }
  0x9e   : > { %1883 = vmatmul.mubr.bf16.gmra.mxu1 %v10356_v26  ;;  %1379 = vmatprep.mubr.bf16.mxu0 %v10295_v40  ;;  %v13170_v26 = vrot.slane %v878_v42, 5  ;;  %v13188_v40 = vld [vmem:[%s12449_s10 + $0x160] sm:$0x11]  ;;  %v10469_v24 = vcombine.high %v13183_v21, %v13207_v25  ;;  %v10468_v59 = vcombine.low %v13183_v21, %v13207_v25  ;;  %v875_v42 = vor.u32 %v874_v30, %v13143_v48 }
  0x9f   : > { %1892 = vmatprep.mubr.bf16.mxu1 %v10359_v27  ;;  %v10467_v27 = vcombine.high %v13166_v54, %v13174_v35  ;;  %v888_v5 = vshll.u32 %v13188_v40, 16  ;;  %v893_v6 = vshrl.u32 %v13203_v14, 16  ;;  %v896_v3 = vshll.u32 %v13203_v14, 16  ;;  %v7777_v54 = vld [vmem:[%s19028_s3 + $0x28] sm:$0xff]  ;;  %v7778_v35 = vld [vmem:[%s19028_s3 + $0x30] sm:$0xff] }
  0xa0   : > { %v885_v63 = vor.u32 %v884_v34, %v13170_v26  ;;  %v902_v48 = vshll.u32 %v13210_v57, 16  ;;  %v10299_v30 = vcombine.high %v13200_v58, %v867_v41  ;;  %v876_v31 = vrot.slane %v875_v42, 4 }
  0xa1   : > { %v890_v34 = vrot.slane %v888_v5, 5  ;;  %v895_v43 = vrot.slane %v893_v6, 4  ;;  %v898_v56 = vrot.slane %v896_v3, 5  ;;  %v912_v42 = vshll.u32 %v13262_v18, 16 }
  0xa2   : > { %v886_v23 = vrot.slane %v885_v63, 4  ;;  %v10413_v5 = vrot.slane %v13042_v52, 9  ;;  %v2057_v6 = vrot.slane %v2055_v46, 4  ;;  %v2058_v3 = vrot.slane %v13068_v9, 5 }
  0xa3   : > { %v899_v1 = vor.u32 %v898_v56, %v895_v43  ;;  %v10364_v56 = vcombine.low %v13094_v13, %v13112_v50 }
  0xa4   : > { %v13284_v19 = vsel %vm13126_vm5, %v2057_v6, %v2058_v3  ;;  %v13328_v3 = vld [vmem:[%s13320_s26] sm:$0xff] }
  0xa5   : > { %1380 = vmatmul.mubr.bf16.gmra.mxu0 %v10294_v33  ;;  %v904_v33 = vrot.slane %v902_v48, 5  ;;  %v10362_v48 = vcombine.low %v13042_v52, %v13055_v0  ;;  %v900_v39 = vrot.slane %v899_v1, 4  ;;  %v2062_v0 = vrot.slane %v13112_v50, 5 }
  0xa6   : > { %1893 = vmatmul.mubr.bf16.gmra.mxu1 %v10358_v16  ;;  %1389 = vmatprep.mubr.bf16.mxu0 %v10297_v51  ;;  %v10412_v16 = vrot.slane %v12983_v61, 9  ;;  %v881_v51 = vsel %vm12506_vm2, %v876_v31, %v13170_v26  ;;  %v13280_v26 = vsel %vm13126_vm5, %v10413_v5, %v2055_v46  ;;  %v10414_v31 = vrot.slane %v13094_v13, 9 }
  0xa7   : > { %1902 = vmatprep.mubr.bf16.mxu1 %v10361_v53  ;;  %v891_v53 = vsel %vm12506_vm2, %v886_v23, %v890_v34  ;;  %v909_v63 = vor.u32 %v908_v44, %v904_v33  ;;  %v2064_v34 = vrot.slane %v2062_v0, 4  ;;  %v2065_v23 = vrot.slane %v13188_v40, 5 }
  0xa8   : > { %v13253_v37 = vsel %vm13126_vm5, %v10412_v16, %v2048_v45  ;;  %v10298_v45 = vcombine.low %v13200_v58, %v867_v41  ;;  %v10301_v16 = vcombine.high %v881_v51, %v891_v53  ;;  %v914_v41 = vrot.slane %v912_v42, 5  ;;  %v12052_v42 = vld [vmem:[%s12449_s10] sm:$0xff] }
  0xa9   : > { %v10473_v61 = vcombine.high %v13253_v37, %v13257_v55  ;;  %v910_v58 = vrot.slane %v909_v63, 4  ;;  %v10300_v43 = vcombine.low %v881_v51, %v891_v53  ;;  %v13304_v44 = vsel %vm13126_vm5, %v10414_v31, %v2062_v0  ;;  %v12053_v51 = vld [vmem:[%s12449_s10 + $0x10] sm:$0x11] }
  0xaa   : > { %v10367_v1 = vcombine.high %v13203_v14, %v13210_v57  ;;  %v10400_v63 = vrot.slane %v12052_v42, 9  ;;  %v1967_v13 = vrot.slane %v12053_v51, 5  ;;  %v2069_v5 = vrot.slane %v13210_v57, 5  ;;  %v12057_v51 = vld [vmem:[%s12449_s10 + $0x38] sm:$0xff] }
  0xad   : > { %1390 = vmatmul.mubr.bf16.gmra.mxu0 %v10296_v28  ;;  %v905_v28 = vsel %vm12506_vm2, %v900_v39, %v904_v33  ;;  %v13308_v33 = vsel %vm13126_vm5, %v2064_v34, %v2065_v23  ;;  %v10415_v39 = vrot.slane %v13203_v14, 9 }
  0xae   : > { %1903 = vmatmul.mubr.bf16.gmra.mxu1 %v10360_v29  ;;  %1399 = vmatprep.mubr.bf16.mxu0 %v10299_v30  ;;  %v12051_v29 = vld [vmem:[%s12449_s10 + $0x8] sm:$0xff] }
  0xaf   : > { %1912 = vmatprep.mubr.bf16.mxu1 %v10363_v17  ;;  %v1964_v30 = vrot.slane %v12051_v29, 5  ;;  %v915_v17 = vsel %vm12506_vm2, %v910_v58, %v914_v41  ;;  %v2071_v58 = vrot.slane %v2069_v5, 4  ;;  %v2072_v41 = vrot.slane %v13262_v18, 5  ;;  %v11598_v18 = vld [vmem:[%s19029_s4 + $0x540] ss:$8 sps:$4 sm:$0xff]  }
  0xb0   : > { %v10303_v46 = vcombine.high %v905_v28, %v915_v17  ;;  %v10302_v0 = vcombine.low %v905_v28, %v915_v17  ;;  %v10366_v29 = vcombine.low %v13203_v14, %v13210_v57  ;;  %v12055_v28 = vld [vmem:[%s12449_s10 + $0x18] sm:$0xff]  ;;  %v12056_v17 = vld [vmem:[%s12449_s10 + $0x28] sm:$0x11] }
  0xb1   : > { %v1966_v50 = vrot.slane %v1964_v30, 4  ;;  %v1965_v6 = vsel %vm13126_vm5, %v10400_v63, %v1964_v30  ;;  %v13342_v30 = vsel %vm13126_vm5, %v10415_v39, %v2069_v5  ;;  %v13346_v31 = vsel %vm13126_vm5, %v2071_v58, %v2072_v41  ;;  %v11546_v58 = vld [vmem:[%s19029_s4 + $0x464] ss:$8 sps:$4 sm:$0xff]   ;;  %v12058_v41 = vld [vmem:[%s12449_s10 + $0x30] sm:$0xff] }
  0xb2   : > { %v10401_v14 = vrot.slane %v12055_v28, 9  ;;  %v11589_v28 = vld [vmem:[%s19029_s4 + $0x564] ss:$8 sps:$4 sm:$0xff]  }
  0xb5   : > { %1400 = vmatmul.mubr.bf16.gmra.mxu0 %v10298_v45  ;;  %v13331_v45 = vld [vmem:[%s13320_s26 + $0x8] sm:$0xff] }
  0xb6   : > { %1913 = vmatmul.mubr.bf16.gmra.mxu1 %v10362_v48  ;;  %1409 = vmatprep.mubr.bf16.mxu0 %v10301_v16  ;;  %v12054_v48 = vld [vmem:[%s12449_s10 + $0x20] sm:$0xff]  ;;  %v10545_v23 = vcombine.high %v13328_v3, %v13331_v45  ;;  %v10544_v5 = vcombine.low %v13328_v3, %v13331_v45 }
  0xb7   : > { %1922 = vmatprep.mubr.bf16.mxu1 %v10365_v11  ;;  %v1971_v16 = vrot.slane %v12054_v48, 5  ;;  %v1968_v11 = vsel %vm13126_vm5, %v1966_v50, %v1967_v13  ;;  %v1978_v13 = vrot.slane %v12057_v51, 5  ;;  %v11539_v48 = vld [vmem:[%s19029_s4 + $0x470] ss:$8 sps:$4 sm:$0xff]  }
  0xb8   : > { %v10449_v34 = vcombine.high %v1965_v6, %v1968_v11  ;;  %v10448_v50 = vcombine.low %v1965_v6, %v1968_v11  ;;  %v12059_v11 = vld [vmem:[%s12449_s10 + $0x40] sm:$0x11] }
  0xb9   : > { %v1973_v57 = vrot.slane %v1971_v16, 4  ;;  %v1972_v42 = vsel %vm13126_vm5, %v10401_v14, %v1971_v16  ;;  %v1980_v6 = vrot.slane %v1978_v13, 4  ;;  %v11551_v14 = vld [vmem:[%s19029_s4 + $0x454] ss:$8 sps:$4 sm:$0xff]  }
  0xbd   : > { %1410 = vmatmul.mubr.bf16.gmra.mxu0 %v10300_v43  ;;  %v1974_v43 = vrot.slane %v12056_v17, 5  ;;  %v13395_v17 = vld [vmem:[%s13320_s26 + $0x38] sm:$0xff] }
  0xbe   : > { %1923 = vmatmul.mubr.bf16.gmra.mxu1 %v10364_v56  ;;  %1419 = vmatprep.mubr.bf16.mxu0 %v10303_v46  ;;  %v13357_v46 = vld [vmem:[%s13320_s26 + $0x18] sm:$0xff]  ;;  %v11600_v56 = vld [vmem:[%s19029_s4 + $0x544] ss:$8 sps:$4 sm:$0xff]  }
  0xbf   : > { %1932 = vmatprep.mubr.bf16.mxu1 %v10367_v1  ;;  %v13360_v1 = vld [vmem:[%s13320_s26 + $0x20] sm:$0xff]  ;;  %v1975_v63 = vsel %vm13126_vm5, %v1973_v57, %v1974_v43  ;;  %v13392_v57 = vld [vmem:[%s13320_s26 + $0x30] sm:$0xff] }
  0xc0   : > { %v10451_v39 = vcombine.high %v1972_v42, %v1975_v63  ;;  %v10547_v16 = vcombine.high %v13357_v46, %v13360_v1  ;;  %v11587_v43 = vld [vmem:[%s19029_s4 + $0x560] ss:$8 sps:$4 sm:$0xff]   ;;  %v3348_v36 = vshrl.u32 %v13360_v1, 16 }
  0xc5   : > { %1420 = vmatmul.mubr.bf16.gmra.mxu0 %v10302_v0  ;;  %v10402_v0 = vrot.slane %v12058_v41, 9 }
  0xc6   : > { %1933 = vmatmul.mubr.bf16.gmra.mxu1 %v10366_v29  ;;  %2427 = vmatprep.mubr.bf16.mxu0 %v10449_v34  ;;  %v1981_v29 = vrot.slane %v12059_v11, 5  ;;  %v11544_v34 = vld [vmem:[%s19029_s4 + $0x460] ss:$8 sps:$4 sm:$0xff]  }
  0xc7   : > { %3085 = vmatprep.mubr.bf16.mxu1 %v10545_v23  ;;  %v11584_v23 = vld [vmem:[%s19029_s4 + $0x570] ss:$8 sps:$4 sm:$0xff]   ;;  %v1979_v51 = vsel %vm13126_vm5, %v10402_v0, %v1978_v13  ;;  %v11597_v13 = vld [vmem:[%s19029_s4 + $0x554] ss:$8 sps:$4 sm:$0xff]   ;;  %v10549_v0 = vcombine.high %v13392_v57, %v13395_v17 }
  0xcd   : > { %2428 = vmatmul.mubr.bf16.vlgmr.msra.gmra.mxu0 %v10448_v50  ;;  %v1982_v50 = vsel %vm13126_vm5, %v1980_v6, %v1981_v29  ;;  %v12062_v29 = vld [vmem:[%s12449_s10 + $0x58] sm:$0x11] }
  0xce   : > { %3086 = vmatmul.mubr.bf16.vlgmr.msra.gmra.mxu1 %v10544_v5  ;;  %4016 = vmatpush1.bf16.msra.mxu0 %v11539_v48  ;;  %v12060_v5 = vld [vmem:[%s12449_s10 + $0x50] sm:$0xff]  ;;  %v10450_v48 = vcombine.low %v1972_v42, %v1975_v63  ;;  %v11556_v42 = vld [vmem:[%s19029_s4 + $0x444] ss:$8 sps:$4 sm:$0xff]  }
  0xcf   : > { %2437 = vmatprep.mubr.bf16.mxu0 %v10451_v39  ;;  %4017 = vmatprep.subr.bf16.mxu0 %v11546_v58  ;;  %v1985_v41 = vrot.slane %v12060_v5, 5  ;;  %v10546_v39 = vcombine.low %v13357_v46, %v13360_v1  ;;  %v11549_v58 = vld [vmem:[%s19029_s4 + $0x450] ss:$8 sps:$4 sm:$0xff]   ;;  %v12061_v63 = vld [vmem:[%s12449_s10 + $0x48] sm:$0xff] }
  0xd0   : > { %3095 = vmatprep.mubr.bf16.mxu1 %v10547_v16  ;;  %4722 = vmatpush1.bf16.msra.mxu1 %v11584_v23  ;;  %v10453_v16 = vcombine.high %v1979_v51, %v1982_v50  ;;  %v10403_v6 = vrot.slane %v12061_v63, 9  ;;  %v1988_v23 = vrot.slane %v12062_v29, 5  ;;  %v13424_v5 = vld [vmem:[%s13320_s26 + $0x50] sm:$0xff]  ;;  %v12063_v63 = vld [vmem:[%s12449_s10 + $0x68] sm:$0xff] }
  0xd1   : > { %4723 = vmatprep.subr.bf16.mxu1 %v11589_v28  ;;  %v1987_v11 = vrot.slane %v1985_v41, 4  ;;  %v13421_v28 = vld [vmem:[%s13320_s26 + $0x48] sm:$0xff]  ;;  %v1992_v29 = vrot.slane %v12063_v63, 5 }
  0xd2   : > { %4018 = vmatpush1.bf16.msra.mxu0 %v11544_v34  ;;  %v11595_v34 = vld [vmem:[%s19029_s4 + $0x550] ss:$8 sps:$4 sm:$0xff]   ;;  %v10551_v63 = vcombine.high %v13421_v28, %v13424_v5 }
  0xd3   : > { %4019 = vmatprep.subr.bf16.mxu0 %v11551_v14  ;;  %v11554_v14 = vld [vmem:[%s19029_s4 + $0x440] ss:$8 sps:$4 sm:$0xff]  }
  0xd4   : > { %4724 = vmatpush1.bf16.msra.mxu1 %v11587_v43  ;;  %v11561_v43 = vld [vmem:[%s19029_s4 + $0x434] ss:$8 sps:$4 sm:$0xff]  }
  0xd5   : > { %2438 = vmatmul.mubr.bf16.gmra.mxu0 %v10450_v48  ;;  %v1986_v48 = vsel %vm13126_vm5, %v10403_v6, %v1985_v41  ;;  %4725 = vmatprep.subr.bf16.mxu1 %v11597_v13  ;;  %v12064_v41 = vld [vmem:[%s12449_s10 + $0x60] sm:$0xff]  ;;  %v1994_v13 = vrot.slane %v1992_v29, 4 }
  0xd6   : > { %3096 = vmatmul.mubr.bf16.gmra.mxu1 %v10546_v39  ;;  %2447 = vmatprep.mubr.bf16.mxu0 %v10453_v16  ;;  %v1989_v39 = vsel %vm13126_vm5, %v1987_v11, %v1988_v23  ;;  %v10452_v16 = vcombine.low %v1979_v51, %v1982_v50  ;;  %v10404_v6 = vrot.slane %v12064_v41, 9  ;;  %v11608_v50 = vld [vmem:[%s19029_s4 + $0x534] ss:$8 sps:$4 sm:$0xff]   ;;  %v11566_v11 = vld [vmem:[%s19029_s4 + $0x424] ss:$8 sps:$4 sm:$0xff]  }
  0xd7   : > { %3105 = vmatprep.mubr.bf16.mxu1 %v10549_v0  ;;  %4020 = vmatpush1.bf16.msra.mxu0 %v11549_v58  ;;  %v10548_v0 = vcombine.low %v13392_v57, %v13395_v17  ;;  %v11559_v58 = vld [vmem:[%s19029_s4 + $0x430] ss:$8 sps:$4 sm:$0xff]   ;;  %v10455_v53 = vcombine.high %v1986_v48, %v1989_v39  ;;  %v11611_v23 = vld [vmem:[%s19029_s4 + $0x524] ss:$8 sps:$4 sm:$0xff]  }
  0xd8   : > { %4021 = vmatprep.subr.bf16.mxu0 %v11556_v42  ;;  %4726 = vmatpush1.bf16.msra.mxu1 %v11595_v34  ;;  %v12065_v42 = vld [vmem:[%s12449_s10 + $0x70] sm:$0x11]  ;;  %v13468_v34 = vld [vmem:[%s13320_s26 + $0x60] sm:$0xff] }
  0xd9   : > { %4727 = vmatprep.subr.bf16.mxu1 %v11600_v56  ;;  %v1995_v51 = vrot.slane %v12065_v42, 5  ;;  %v11606_v56 = vld [vmem:[%s19029_s4 + $0x530] ss:$8 sps:$4 sm:$0xff]   ;;  %v10454_v42 = vcombine.low %v1986_v48, %v1989_v39  ;;  %v11619_v39 = vld [vmem:[%s19029_s4 + $0x514] ss:$8 sps:$4 sm:$0xff]  }
  0xdb   : > { %4022 = vmatpush1.bf16.msra.mxu0 %v11554_v14  ;;  %v13471_v14 = vld [vmem:[%s13320_s26 + $0x68] sm:$0xff] }
  0xdc   : > { %4023 = vmatprep.subr.bf16.mxu0 %v11561_v43  ;;  %4728 = vmatpush1.bf16.msra.mxu1 %v11598_v18  ;;  %v12066_v43 = vld [vmem:[%s12449_s10 + $0x80] sm:$0xff] }
  0xdd   : > { %2448 = vmatmul.mubr.bf16.gmra.mxu0 %v10452_v16  ;;  %v1999_v41 = vrot.slane %v12066_v43, 5  ;;  %v11564_v18 = vld [vmem:[%s19029_s4 + $0x420] ss:$8 sps:$4 sm:$0xff]   ;;  %v1993_v16 = vsel %vm13126_vm5, %v10404_v6, %v1992_v29  ;;  %4729 = vmatprep.subr.bf16.mxu1 %v11608_v50  ;;  %v10550_v29 = vcombine.low %v13421_v28, %v13424_v5  ;;  %v10553_v6 = vcombine.high %v13468_v34, %v13471_v14  ;;  %v11576_v43 = vld [vmem:[%s19029_s4 + $0x404] ss:$8 sps:$4 sm:$0xff]  }
  0xde   : > { %3106 = vmatmul.mubr.bf16.gmra.mxu1 %v10548_v0  ;;  %2457 = vmatprep.mubr.bf16.mxu0 %v10455_v53  ;;  %v1996_v0 = vsel %vm13126_vm5, %v1994_v13, %v1995_v51  ;;  %v11571_v53 = vld [vmem:[%s19029_s4 + $0x414] ss:$8 sps:$4 sm:$0xff]  }
  0xdf   : > { %3115 = vmatprep.mubr.bf16.mxu1 %v10551_v63  ;;  %4024 = vmatpush1.bf16.msra.mxu0 %v11559_v58  ;;  %v11609_v63 = vld [vmem:[%s19029_s4 + $0x520] ss:$8 sps:$4 sm:$0xff]   ;;  %v11569_v58 = vld [vmem:[%s19029_s4 + $0x410] ss:$8 sps:$4 sm:$0xff]   ;;  %v10457_v13 = vcombine.high %v1993_v16, %v1996_v0 }
  0xe0   : > { %4025 = vmatprep.subr.bf16.mxu0 %v11566_v11  ;;  %4730 = vmatpush1.bf16.msra.mxu1 %v11606_v56  ;;  %v12067_v51 = vld [vmem:[%s12449_s10 + $0x78] sm:$0xff]  ;;  %v2001_v11 = vrot.slane %v1999_v41, 4  ;;  %v12068_v56 = vld [vmem:[%s12449_s10 + $0x88] sm:$0x11] }
  0xe1   : > { %4731 = vmatprep.subr.bf16.mxu1 %v11611_v23  ;;  %v10405_v50 = vrot.slane %v12067_v51, 9  ;;  %v2002_v48 = vrot.slane %v12068_v56, 5  ;;  %v11617_v23 = vld [vmem:[%s19029_s4 + $0x510] ss:$8 sps:$4 sm:$0xff]  }
  0xe2   : > { %v13509_v51 = vld [vmem:[%s13320_s26 + $0x78] sm:$0xff] }
  0xe3   : > { %4026 = vmatpush1.bf16.msra.mxu0 %v11564_v18  ;;  %v11622_v18 = vld [vmem:[%s19029_s4 + $0x504] ss:$8 sps:$4 sm:$0xff]   ;;  %v12069_v56 = vld [vmem:[%s12449_s10 + $0x98] sm:$0xff] }
  0xe4   : > { %4027 = vmatprep.subr.bf16.mxu0 %v11571_v53  ;;  %4732 = vmatpush1.bf16.msra.mxu1 %v11609_v63  ;;  %v13512_v53 = vld [vmem:[%s13320_s26 + $0x80] sm:$0xff]  ;;  %v2006_v40 = vrot.slane %v12069_v56, 5  ;;  %v10456_v56 = vcombine.low %v1993_v16, %v1996_v0  ;;  %v11630_v16 = vld [vmem:[%s19029_s4 + $0x5f4] ss:$8 sps:$4 sm:$0xff]  }
  0xe5   : > { %2458 = vmatmul.mubr.bf16.gmra.mxu0 %v10454_v42  ;;  %v11574_v63 = vld [vmem:[%s19029_s4 + $0x400] ss:$8 sps:$4 sm:$0xff]   ;;  %v2000_v42 = vsel %vm13126_vm5, %v10405_v50, %v1999_v41  ;;  %4733 = vmatprep.subr.bf16.mxu1 %v11619_v39  ;;  %v10552_v41 = vcombine.low %v13468_v34, %v13471_v14  ;;  %v10555_v50 = vcombine.high %v13509_v51, %v13512_v53  ;;  %v11592_v0 = vld [vmem:[%s19029_s4 + $0x4e4] ss:$8 sps:$4 sm:$0xff]  }
  0xe6   : > { %3116 = vmatmul.mubr.bf16.gmra.mxu1 %v10550_v29  ;;  %2467 = vmatprep.mubr.bf16.mxu0 %v10457_v13  ;;  %v2003_v29 = vsel %vm13126_vm5, %v2001_v11, %v2002_v48  ;;  %v11620_v13 = vld [vmem:[%s19029_s4 + $0x500] ss:$8 sps:$4 sm:$0xff]   ;;  %v12070_v48 = vld [vmem:[%s12449_s10 + $0x90] sm:$0xff]  ;;  %v10554_v9 = vcombine.low %v13509_v51, %v13512_v53 }
  0xe7   : > { %3125 = vmatprep.mubr.bf16.mxu1 %v10553_v6  ;;  %4028 = vmatpush1.bf16.msra.mxu0 %v11569_v58  ;;  %v11581_v6 = vld [vmem:[%s19029_s4 + $0x4f4] ss:$8 sps:$4 sm:$0xff]   ;;  %v11579_v58 = vld [vmem:[%s19029_s4 + $0x4f0] ss:$8 sps:$4 sm:$0xff]   ;;  %v10459_v11 = vcombine.high %v2000_v42, %v2003_v29  ;;  %v10406_v39 = vrot.slane %v12070_v48, 9 }
  0xe8   : > { %4029 = vmatprep.subr.bf16.mxu0 %v11576_v43  ;;  %4734 = vmatpush1.bf16.msra.mxu1 %v11617_v23  ;;  %v2008_v43 = vrot.slane %v2006_v40, 4  ;;  %v12071_v23 = vld [vmem:[%s12449_s10 + $0xa0] sm:$0x11]  ;;  %v13550_v48 = vld [vmem:[%s13320_s26 + $0x90] sm:$0xff] }
  0xe9   : > { %4735 = vmatprep.subr.bf16.mxu1 %v11622_v18  ;;  %v2009_v52 = vrot.slane %v12071_v23, 5  ;;  %v11628_v18 = vld [vmem:[%s19029_s4 + $0x5f0] ss:$8 sps:$4 sm:$0xff]   ;;  %v2007_v23 = vsel %vm13126_vm5, %v10406_v39, %v2006_v40  ;;  %v11641_v39 = vld [vmem:[%s19029_s4 + $0x5d4] ss:$8 sps:$4 sm:$0xff]  }
  0xeb   : > { %4030 = vmatpush1.bf16.msra.mxu0 %v11574_v63  ;;  %v11633_v63 = vld [vmem:[%s19029_s4 + $0x5e4] ss:$8 sps:$4 sm:$0xff]  }
  0xec   : > { %4031 = vmatprep.subr.bf16.mxu0 %v11581_v6  ;;  %4736 = vmatpush1.bf16.msra.mxu1 %v11620_v13  ;;  %v13553_v6 = vld [vmem:[%s13320_s26 + $0x98] sm:$0xff]  ;;  %v11590_v13 = vld [vmem:[%s19029_s4 + $0x4e0] ss:$8 sps:$4 sm:$0xff]  }
  0xed   : > { %2468 = vmatmul.mubr.bf16.gmra.mxu0 %v10456_v56  ;;  %v2010_v56 = vsel %vm13126_vm5, %v2008_v43, %v2009_v52  ;;  %4737 = vmatprep.subr.bf16.mxu1 %v11630_v16  ;;  %v10557_v40 = vcombine.high %v13550_v48, %v13553_v6  ;;  %v11644_v43 = vld [vmem:[%s19029_s4 + $0x5c4] ss:$8 sps:$4 sm:$0xff]  }
  0xee   : > { %3126 = vmatmul.mubr.bf16.gmra.mxu1 %v10552_v41  ;;  %2477 = vmatprep.mubr.bf16.mxu0 %v10459_v11  ;;  %v11603_v41 = vld [vmem:[%s19029_s4 + $0x4d4] ss:$8 sps:$4 sm:$0xff]   ;;  %v10458_v11 = vcombine.low %v2000_v42, %v2003_v29  ;;  %v10461_v52 = vcombine.high %v2007_v23, %v2010_v56  ;;  %v11614_v42 = vld [vmem:[%s19029_s4 + $0x4c4] ss:$8 sps:$4 sm:$0xff]   ;;  %v11639_v29 = vld [vmem:[%s19029_s4 + $0x5d0] ss:$8 sps:$4 sm:$0xff]  }
  0xef   : > { %3135 = vmatprep.mubr.bf16.mxu1 %v10555_v50  ;;  %4032 = vmatpush2.bf16.msra.mxu0 %v11579_v58  ;;  %v11631_v50 = vld [vmem:[%s19029_s4 + $0x5e0] ss:$8 sps:$4 sm:$0xff]   ;;  %v11601_v58 = vld [vmem:[%s19029_s4 + $0x4d0] ss:$8 sps:$4 sm:$0xff]  }
  0xf0   : > { %4033 = vmatprep.subr.bf16.mxu0 %v11592_v0  ;;  %4738 = vmatpush2.bf16.msra.mxu1 %v11628_v18  ;;  %v13588_v16 = vld [vmem:[%s13320_s26 + $0xa8] sm:$0xff]  ;;  %v13591_v0 = vld [vmem:[%s13320_s26 + $0xb0] sm:$0xff] }
  0xf1   : > { %4739 = vmatprep.subr.bf16.mxu1 %v11633_v63  ;;  %v11612_v18 = vld [vmem:[%s19029_s4 + $0x4c0] ss:$8 sps:$4 sm:$0xff]  }
  0xf2   : > { %v11642_v63 = vld [vmem:[%s19029_s4 + $0x5c0] ss:$8 sps:$4 sm:$0xff]  }
  0xf3   : > { %4034 = vmatpush2.bf16.msra.mxu0 %v11590_v13  ;;  %v10460_v13 = vcombine.low %v2007_v23, %v2010_v56  ;;  %v11636_v23 = vld [vmem:[%s19029_s4 + $0x4a4] ss:$8 sps:$4 sm:$0xff]   ;;  %v11650_v56 = vld [vmem:[%s19029_s4 + $0x5b0] ss:$8 sps:$4 sm:$0xff]  }
  0xf4   : > { %4035 = vmatprep.subr.bf16.mxu0 %v11603_v41  ;;  %4740 = vmatpush2.bf16.msra.mxu1 %v11631_v50  ;;  %v10556_v41 = vcombine.low %v13550_v48, %v13553_v6  ;;  %v10559_v50 = vcombine.high %v13588_v16, %v13591_v0 }
  0xf5   : > { %2478 = vmatmul.mubr.bf16.gmra.mxu0 %v10458_v11  ;;  %4741 = vmatprep.subr.bf16.mxu1 %v11641_v39  ;;  %v11623_v11 = vld [vmem:[%s19029_s4 + $0x4b0] ss:$8 sps:$4 sm:$0xff]   ;;  %v2677_v39 = vld [vmem:[%s13320_s26 + $0xc8] sm:$0xff] }
  0xf6   : > { %3136 = vmatmul.mubr.bf16.gmra.mxu1 %v10554_v9  ;;  %2487 = vmatprep.mubr.bf16.mxu0 %v10461_v52  ;;  %v11625_v9 = vld [vmem:[%s19029_s4 + $0x4b4] ss:$8 sps:$4 sm:$0xff]  }
  0xf7   : > { %3145 = vmatprep.mubr.bf16.mxu1 %v10557_v40  ;;  %4036 = vmatpush2.bf16.msra.mxu0 %v11601_v58  ;;  %v11652_v52 = vld [vmem:[%s19029_s4 + $0x5b4] ss:$8 sps:$4 sm:$0xff]   ;;  %v11655_v40 = vld [vmem:[%s19029_s4 + $0x5a4] ss:$8 sps:$4 sm:$0xff]  }
  0xf8   : > { %4037 = vmatprep.subr.bf16.mxu0 %v11614_v42  ;;  %4742 = vmatpush2.bf16.msra.mxu1 %v11639_v29  ;;  %v13625_v58 = vld [vmem:[%s13320_s26 + $0xc0] sm:$0xff]  ;;  %v11647_v29 = vld [vmem:[%s19029_s4 + $0x494] ss:$8 sps:$4 sm:$0xff]  }
  0xf9   : > { %4743 = vmatprep.subr.bf16.mxu1 %v11644_v43  ;;  %v11634_v42 = vld [vmem:[%s19029_s4 + $0x4a0] ss:$8 sps:$4 sm:$0xff]   ;;  %v10558_v43 = vcombine.low %v13588_v16, %v13591_v0 }
  0xfb   : > { %4038 = vmatpush2.bf16.msra.mxu0 %v11612_v18  ;;  %v10561_v18 = vcombine.high %v13625_v58, %v2677_v39 }
  0xfc   : > { %4039 = vmatprep.subr.bf16.mxu0 %v11625_v9  ;;  %4744 = vmatpush2.bf16.msra.mxu1 %v11642_v63  ;;  %v11645_v9 = vld [vmem:[%s19029_s4 + $0x490] ss:$8 sps:$4 sm:$0xff]   ;;  %v11663_v63 = vld [vmem:[%s19029_s4 + $0x594] ss:$8 sps:$4 sm:$0xff]  }
  0xfd   : > { %2488 = vmatmul.mubr.bf16.gmra.mxu0 %v10460_v13  ;;  %4745 = vmatprep.subr.bf16.mxu1 %v11652_v52  ;;  %v11658_v13 = vld [vmem:[%s19029_s4 + $0x484] ss:$8 sps:$4 sm:$0xff]  }
  0xfe   : > { %3146 = vmatmul.mubr.bf16.gmra.mxu1 %v10556_v41  ;;  %2497 = vmatprep.mubr.bf16.mxu0 %v10463_v12  ;;  %v11653_v12 = vld [vmem:[%s19029_s4 + $0x5a0] ss:$8 sps:$4 sm:$0xff]   ;;  %v11661_v41 = vld [vmem:[%s19029_s4 + $0x590] ss:$8 sps:$4 sm:$0xff]  }
  0xff   : > { %3155 = vmatprep.mubr.bf16.mxu1 %v10559_v50  ;;  %4040 = vmatpush2.bf16.msra.mxu0 %v11623_v11  ;;  %v11666_v50 = vld [vmem:[%s19029_s4 + $0x584] ss:$8 sps:$4 sm:$0xff]   ;;  %v2679_v11 = vld [vmem:[%s13320_s26 + $0xd8] sm:$0xff] }
 0x100   : > { %4041 = vmatprep.subr.bf16.mxu0 %v11636_v23  ;;  %4746 = vmatpush2.bf16.msra.mxu1 %v11650_v56  ;;  %v2680_v52 = vld [vmem:[%s13320_s26 + $0xe0] sm:$0xff] }
 0x101   : > { %4747 = vmatprep.subr.bf16.mxu1 %v11655_v40  ;;  %v11656_v23 = vld [vmem:[%s19029_s4 + $0x480] ss:$8 sps:$4 sm:$0xff]  }
 0x102   : > { %v7772_v56 = vld [vmem:[%s19028_s3] sm:$0xff] }
 0x103   : > { %4042 = vmatpush2.bf16.msra.mxu0 %v11634_v42  ;;  %7836 = vrot.lane.b32.xlu0 %v7772_v56, %s12235_s17 }
 0x104   : > { %4043 = vmatprep.subr.bf16.mxu0 %v11647_v29  ;;  %4748 = vmatpush2.bf16.msra.mxu1 %v11653_v12 }
 0x105   : > { %2498 = vmatmul.mubr.bf16.gmra.mxu0 %v10462_v49  ;;  %4749 = vmatprep.subr.bf16.mxu1 %v11663_v63  ;;  %v10560_v49 = vcombine.low %v13625_v58, %v2677_v39  ;;  %v11696_v39 = vld [vmem:[%s19029_s4 + $0x774] ss:$8 sps:$4 sm:$0xff]  }
 0x106   : > { %3156 = vmatmul.mubr.bf16.gmra.mxu1 %v10558_v43  ;;  %2507 = vmatprep.mubr.bf16.mxu0 %v10465_v22  ;;  %v10563_v22 = vcombine.high %v2679_v11, %v2680_v52 }
 0x107   : > { %3165 = vmatprep.mubr.bf16.mxu1 %v10561_v18  ;;  %4044 = vmatpush2.bf16.msra.mxu0 %v11645_v9  ;;  %v2682_v18 = vld [vmem:[%s13320_s26 + $0xf0] sm:$0xff]  ;;  %v2683_v9 = vld [vmem:[%s13320_s26 + $0xf8] sm:$0xff] }
 0x108   : > { %4045 = vmatprep.subr.bf16.mxu0 %v11658_v13  ;;  %4750 = vmatpush2.bf16.msra.mxu1 %v11661_v41  ;;  %v10562_v13 = vcombine.low %v2679_v11, %v2680_v52  ;;  %v7776_v11 = vld [vmem:[%s19028_s3 + $0x20] sm:$0xff]  ;;  %v10564_v15 = vcombine.low %v2682_v18, %v2683_v9 }
 0x109   : > { %4751 = vmatprep.subr.bf16.mxu1 %v11666_v50  ;;  %v10565_v50 = vcombine.high %v2682_v18, %v2683_v9  ;;  %v7779_v18 = vld [vmem:[%s19028_s3 + $0x38] sm:$0xff]  ;;  %v7780_v9 = vld [vmem:[%s19028_s3 + $0x40] sm:$0xff] }
 0x10b   : > { %4046 = vmatpush2.bf16.msra.mxu0 %v11656_v23 }
 0x10c   : > { %4752 = vmatpush2.bf16.msra.mxu1 %v11664_v4  ;;  %5379 = vmatprep.subr.bf16.mxu0 %v11669_v20 }
 0x10d   : > { %v1271_v40 = vpop.f32.mrf.mxu0  ;;  %2508 = vmatmul.mubr.bf16.gmra.mxu0 %v10464_v47  ;;  %6341 = vmatprep.subr.bf16.mxu1 %v11696_v39  ;;  %v7773_v47 = vld [vmem:[%s19028_s3 + $0x8] sm:$0xff] }
 0x10e   : > { %v1784_v42 = vpop.f32.mrf.mxu1  ;;  %3166 = vmatmul.mubr.bf16.gmra.mxu1 %v10560_v49  ;;  %2517 = vmatprep.mubr.bf16.mxu0 %v10467_v27  ;;  %v7775_v49 = vld [vmem:[%s19028_s3 + $0x18] sm:$0xff]  ;;  %v2685_v39 = vld [vmem:[%s13320_s26 + $0x108] sm:$0xff] }
 0x10f   : > { %v13682_v29 = vadd.f32 %v1784_v42, %v1271_v40  ;;  %3175 = vmatprep.mubr.bf16.mxu1 %v10563_v22  ;;  %v1273_v12 = vpop.f32.mrf.mxu0  ;;  %7838 = vrot.lane.b32.xlu0 %v7773_v47, %s12235_s17 }
 0x110   : > { %v1786_v43 = vpop.f32.mrf.mxu1  ;;  %7842 = vrot.lane.b32.xlu1 %v7775_v49, %s12235_s17 }
 0x111   : > { %v13690_v7 = vadd.f32 %v1786_v43, %v1273_v12  ;;  %v1275_v27 = vpop.f32.mrf.mxu0  ;;  %v2686_v12 = vld [vmem:[%s13320_s26 + $0x110] sm:$0xff] }
 0x112   : > { %v1788_v63 = vpop.f32.mrf.mxu1 }
 0x113   : > { %v13699_v41 = vadd.f32 %v1788_v63, %v1275_v27  ;;  %v1277_v23 = vpop.f32.mrf.mxu0  ;;  %7844 = vrot.lane.b32.xlu0 %v7776_v11, %s12235_s17  ;;  %v10567_v27 = vcombine.high %v2685_v39, %v2686_v12 }
 0x114   : > { %v1790_v4 = vpop.f32.mrf.mxu1  ;;  %7846 = vrot.lane.b32.xlu1 %v7777_v54, %s12235_s17 }
 0x115   : > { %v13702_v20 = vadd.f32 %v1790_v4, %v1277_v23  ;;  %v1281_v52 = vpop.f32.mrf.mxu0  ;;  %2518 = vmatmul.mubr.bf16.gmra.mxu0 %v10466_v32  ;;  %v3311_v23 = vshrl.u32 %v13328_v3, 16  ;;  %v3314_v4 = vshll.u32 %v13328_v3, 16 }
 0x116   : > { %v1794_v22 = vpop.f32.mrf.mxu1  ;;  %3176 = vmatmul.mubr.bf16.gmra.mxu1 %v10562_v13  ;;  %2527 = vmatprep.mubr.bf16.mxu0 %v10469_v24 }
 0x117   : > { %v13713_v56 = vadd.f32 %v1794_v22, %v1281_v52  ;;  %3185 = vmatprep.mubr.bf16.mxu1 %v10565_v50  ;;  %v1283_v40 = vpop.f32.mrf.mxu0  ;;  %7848 = vrot.lane.b32.xlu0 %v7778_v35, %s12235_s17  ;;  %v3320_v22 = vshll.u32 %v13331_v45, 16  ;;  %v13755_v35 = vld [vmem:[%s13320_s26 + $0x120] sm:$0xff]  ;;  %v3313_v25 = vrot.slane %v3311_v23, 4 }
 0x118   : > { %v1796_v42 = vpop.f32.mrf.mxu1  ;;  %7850 = vrot.lane.b32.xlu1 %v7779_v18, %s12235_s17 }
 0x119   : > { %v13722_v43 = vadd.f32 %v1796_v42, %v1283_v40  ;;  %v1285_v32 = vpop.f32.mrf.mxu0  ;;  %v3324_v40 = vshrl.u32 %v13331_v45, 16  ;;  %v3322_v23 = vrot.slane %v3320_v22, 5 }
 0x11a   : > { %v1798_v24 = vpop.f32.mrf.mxu1 }
 0x11b   : > { %v13730_v47 = vadd.f32 %v1798_v24, %v1285_v32  ;;  %v1287_v63 = vpop.f32.mrf.mxu0  ;;  %v13758_v32 = vld [vmem:[%s13320_s26 + $0x128] sm:$0xff]  ;;  %7852 = vrot.lane.b32.xlu0 %v7780_v9, %s12235_s17  ;;  %v7782_v24 = vld [vmem:[%s19028_s3 + $0x50] sm:$0xff] }
 0x11c   : > { %v1800_v13 = vpop.f32.mrf.mxu1  ;;  %v10569_v18 = vcombine.high %v13755_v35, %v13758_v32  ;;  %v13775_v9 = vld [vmem:[%s13320_s26 + $0x10] sm:$0x11] }
 0x11d   : > { %19182 = vst [vmem:[#allocation3_spill] sm:$0xff] %v13730_v47  ;;  %v13734_v50 = vadd.f32 %v1800_v13, %v1287_v63  ;;  %v1291_v49 = vpop.f32.mrf.mxu0  ;;  %2528 = vmatmul.mubr.bf16.gmra.mxu0 %v10468_v59  ;;  %v3316_v59 = vrot.slane %v3314_v4, 5  ;;  %v10566_v63 = vcombine.low %v2685_v39, %v2686_v12  ;;  %v3326_v4 = vrot.slane %v3324_v40, 4  ;;  %v7783_v12 = vld [vmem:[%s19028_s3 + $0x58] sm:$0xff] }
 0x11e   : > { %v1804_v11 = vpop.f32.mrf.mxu1  ;;  %3186 = vmatmul.mubr.bf16.gmra.mxu1 %v10564_v15  ;;  %2537 = vmatprep.mubr.bf16.mxu0 %v10471_v2  ;;  %v7781_v2 = vld [vmem:[%s19028_s3 + $0x48] sm:$0xff] }
 0x11f   : > { %19183 = vst [vmem:[#allocation4_spill] sm:$0xff] %v13734_v50  ;;  %v13747_v52 = vadd.f32 %v1804_v11, %v1291_v49  ;;  %3195 = vmatprep.mubr.bf16.mxu1 %v10567_v27  ;;  %v1293_v42 = vpop.f32.mrf.mxu0  ;;  %7854 = vrot.lane.b32.xlu1 %v7781_v2, %s12235_s17  ;;  %v3317_v39 = vor.u32 %v3316_v59, %v3313_v25  ;;  %v13791_v2 = vld [vmem:[%s13320_s26 + $0x138] sm:$0xff]  ;;  %v13794_v25 = vld [vmem:[%s13320_s26 + $0x140] sm:$0xff]  ;;  %v3330_v59 = vshll.u32 %v13775_v9, 16 }
 0x120   : > { %v1806_v54 = vpop.f32.mrf.mxu1  ;;  %7856 = vrot.lane.b32.xlu0 %v7782_v24, %s12235_s17 }
 0x121   : > { %19184 = vst [vmem:[#allocation5_spill] sm:$0xff] %v13747_v52  ;;  %v13762_v21 = vadd.f32 %v1806_v54, %v1293_v42  ;;  %v1295_v15 = vpop.f32.mrf.mxu0  ;;  %v7784_v54 = vld [vmem:[%s19028_s3 + $0x60] sm:$0xff] }
 0x122   : > { %v1808_v27 = vpop.f32.mrf.mxu1 }
 0x123   : > { %19185 = vst [vmem:[#allocation6_spill] sm:$0xff] %v13762_v21  ;;  %v13770_v13 = vadd.f32 %v1808_v27, %v1295_v15  ;;  %v1297_v49 = vpop.f32.mrf.mxu0  ;;  %v3327_v15 = vor.u32 %v3326_v4, %v3322_v23  ;;  %7858 = vrot.lane.b32.xlu1 %v7783_v12, %s12235_s17  ;;  %v7786_v4 = vld [vmem:[%s19028_s3 + $0x70] sm:$0xff] }
 0x124   : > { %v1810_v11 = vpop.f32.mrf.mxu1  ;;  %7860 = vrot.lane.b32.xlu0 %v7784_v54, %s12235_s17 }
 0x125   : > { %19186 = vst [vmem:[#allocation7_spill] sm:$0xff] %v13770_v13  ;;  %v13779_v42 = vadd.f32 %v1810_v11, %v1297_v49  ;;  %v1301_v22 = vpop.f32.mrf.mxu0  ;;  %2538 = vmatmul.mubr.bf16.gmra.mxu0 %v10470_v38  ;;  %v10568_v38 = vcombine.low %v13755_v35, %v13758_v32  ;;  %v13814_v11 = vld [vmem:[%s13320_s26 + $0x158] sm:$0xff]  ;;  %v4290_v35 = vrot.slane %v13331_v45, 5  ;;  %v3335_v32 = vshrl.u32 %v13357_v46, 16 }
 0x126   : > { %v1814_v40 = vpop.f32.mrf.mxu1  ;;  %3196 = vmatmul.mubr.bf16.gmra.mxu1 %v10566_v63  ;;  %2547 = vmatprep.mubr.bf16.mxu0 %v10473_v61  ;;  %v10571_v63 = vcombine.high %v13791_v2, %v13794_v25  ;;  %v3318_v61 = vrot.slane %v3317_v39, 4  ;;  %v7787_v45 = vld [vmem:[%s19028_s3 + $0x78] sm:$0xff]  ;;  %v19194_v13 = vcombine.high %v13280_v26, %v13284_v19 }
 0x127   : > { %19187 = vst [vmem:[#allocation8_spill] sm:$0xff] %v13779_v42  ;;  %v13797_v24 = vadd.f32 %v1814_v40, %v1301_v22  ;;  %3205 = vmatprep.mubr.bf16.mxu1 %v10569_v18  ;;  %v1303_v27 = vpop.f32.mrf.mxu0  ;;  %v7785_v18 = vld [vmem:[%s19028_s3 + $0x68] sm:$0xff]  ;;  %v3332_v22 = vrot.slane %v3330_v59, 5  ;;  %v3338_v40 = vshll.u32 %v13357_v46, 16  ;;  %v10704_v42 = vrot.slane %v13328_v3, 9 }
 0x128   : > { %v1816_v49 = vpop.f32.mrf.mxu1  ;;  %v13834_v59 = vld [vmem:[%s13320_s26 + $0x168] sm:$0xff]  ;;  %7862 = vrot.lane.b32.xlu1 %v7785_v18, %s12235_s17  ;;  %7864 = vrot.lane.b32.xlu0 %v7786_v4, %s12235_s17  ;;  %v19192_v4 = vcombine.low %v13253_v37, %v13257_v55  ;;  %v3337_v3 = vrot.slane %v3335_v32, 4  ;;  %v3350_v55 = vrot.slane %v3348_v36, 4  ;;  %v3362_v36 = vshll.u32 %v13392_v57, 16 }
 0x129   : > { %19188 = vst [vmem:[#allocation9_spill] sm:$0xff] %v13797_v24  ;;  %v13807_v8 = vadd.f32 %v1816_v49, %v1303_v27  ;;  %v1305_v12 = vpop.f32.mrf.mxu0  ;;  %v3328_v27 = vrot.slane %v3327_v15, 4  ;;  %v3344_v49 = vshll.u32 %v13360_v1, 16  ;;  %v3340_v15 = vrot.slane %v3338_v40, 5  ;;  %v2657_v40 = vld [vmem:[%s13320_s26 + $0x28] sm:$0x11] }
 0x12a   : > { %v1818_v54 = vpop.f32.mrf.mxu1 }
 0x12b   : > { %19189 = vst [vmem:[#allocation10_spill] sm:$0xff] %v13807_v8  ;;  %v13825_v39 = vadd.f32 %v1818_v54, %v1305_v12  ;;  %v1307_v8 = vpop.f32.mrf.mxu0  ;;  %v13843_v54 = vld [vmem:[%s13320_s26 + $0x170] sm:$0xff]  ;;  %v13867_v21 = vsel %vm12506_vm2, %v3328_v27, %v3332_v22  ;;  %v13869_v37 = vrot.slane %v3344_v49, 5  ;;  %v3368_v22 = vshll.u32 %v13395_v17, 16  ;;  %v7789_v49 = vld [vmem:[%s19028_s3 + $0x88] sm:$0xff] }
 0x12c   : > { %v1820_v24 = vpop.f32.mrf.mxu1  ;;  %7866 = vrot.lane.b32.xlu1 %v7787_v45, %s12235_s17  ;;  %v3372_v27 = vshrl.u32 %v13395_v17, 16  ;;  %v3341_v17 = vor.u32 %v3340_v15, %v3337_v3 }
 0x12d   : > { %19190 = vst [vmem:[#allocation11_spill] sm:$0xff] %v13825_v39  ;;  %v13838_v12 = vadd.f32 %v1820_v24, %v1307_v8  ;;  %v13847_v39 = vsel %vm12506_vm2, %v3318_v61, %v3322_v23  ;;  %v7788_v24 = vld [vmem:[%s19028_s3 + $0x80] sm:$0xff]  ;;  %v1311_v8 = vpop.f32.mrf.mxu0  ;;  %2548 = vmatmul.mubr.bf16.gmra.mxu0 %v19192_v4  ;;  %v4292_v23 = vrot.slane %v4290_v35, 4  ;;  %v4293_v61 = vrot.slane %v13775_v9, 5 }
 0x12e   : > { %v1824_v18 = vpop.f32.mrf.mxu1  ;;  %3206 = vmatmul.mubr.bf16.gmra.mxu1 %v10568_v38  ;;  %2557 = vmatprep.mubr.bf16.mxu0 %v19194_v13  ;;  %v3359_v13 = vshrl.u32 %v13392_v57, 16  ;;  %v3351_v9 = vor.u32 %v3350_v55, %v13869_v37  ;;  %v4300_v57 = vrot.slane %v2657_v40, 5  ;;  %v13911_v15 = vrot.slane %v3368_v22, 5 }
 0x12f   : > { %19191 = vst [vmem:[#allocation12_spill] sm:$0xff] %v13838_v12  ;;  %v13860_v12 = vadd.f32 %v1824_v18, %v1311_v8  ;;  %3215 = vmatprep.mubr.bf16.mxu1 %v10571_v63  ;;  %v1313_v38 = vpop.f32.mrf.mxu0  ;;  %v4297_v8 = vrot.slane %v13360_v1, 5  ;;  %7868 = vrot.lane.b32.xlu0 %v7788_v24, %s12235_s17  ;;  %v7790_v1 = vld [vmem:[%s19028_s3 + $0x90] sm:$0xff]  ;;  %v13903_v32 = vsel %vm13126_vm5, %v4292_v23, %v4293_v61  ;;  %v10705_v24 = vrot.slane %v13357_v46, 9  ;;  %v7791_v61 = vld [vmem:[%s19028_s3 + $0x98] sm:$0xff]  ;;  %v7792_v46 = vld [vmem:[%s19028_s3 + $0xa0] sm:$0xff] }
 0x130   : > { %v1826_v4 = vpop.f32.mrf.mxu1  ;;  %v3361_v47 = vrot.slane %v3359_v13, 4  ;;  %7870 = vrot.lane.b32.xlu1 %v7789_v49, %s12235_s17  ;;  %v3374_v23 = vrot.slane %v3372_v27, 4  ;;  %v13926_v13 = vld [vmem:[%s13320_s26 + $0x40] sm:$0x11]  ;;  %v3386_v22 = vshll.u32 %v13421_v28, 16  ;;  %v3392_v27 = vshll.u32 %v13424_v5, 16 }
 0x131   : > { %19193 = vst [vmem:[#allocation13_spill] sm:$0xff] %v13860_v12  ;;  %v13880_v63 = vadd.f32 %v1826_v4, %v1313_v38  ;;  %v1315_v18 = vpop.f32.mrf.mxu0  ;;  %v13897_v38 = vsel %vm13126_vm5, %v10704_v42, %v4290_v35  ;;  %v4299_v50 = vrot.slane %v4297_v8, 4  ;;  %v3364_v35 = vrot.slane %v3362_v36, 5 }
 0x132   : > { %v1828_v45 = vpop.f32.mrf.mxu1  ;;  %v3383_v36 = vshrl.u32 %v13421_v28, 16  ;;  %v3396_v28 = vshrl.u32 %v13424_v5, 16 }
 0x133   : > { %19195 = vst [vmem:[#allocation14_spill] sm:$0xff] %v13880_v63  ;;  %v13899_v4 = vadd.f32 %v1828_v45, %v1315_v18  ;;  %v3354_v63 = vshll.u32 %v2657_v40, 16  ;;  %v1317_v12 = vpop.f32.mrf.mxu0  ;;  %7872 = vrot.lane.b32.xlu0 %v7790_v1, %s12235_s17  ;;  %v19196_v40 = vcombine.low %v13280_v26, %v13284_v19  ;;  %v19199_v1 = vcombine.high %v13304_v44, %v13308_v33 }
 0x134   : > { %v1830_v52 = vpop.f32.mrf.mxu1  ;;  %v19200_v26 = vcombine.high %v13803_v62, %v13814_v11  ;;  %v3352_v45 = vrot.slane %v3351_v9, 4  ;;  %7874 = vrot.lane.b32.xlu1 %v7791_v61, %s12235_s17  ;;  %v3365_v5 = vor.u32 %v3364_v35, %v3361_v47  ;;  %v3378_v9 = vshll.u32 %v13926_v13, 16 }
 0x135   : > { %v13909_v42 = vadd.f32 %v1830_v52, %v1317_v12  ;;  %v1321_v3 = vpop.f32.mrf.mxu0  ;;  %2558 = vmatmul.mubr.bf16.gmra.mxu0 %v19196_v40  ;;  %v19197_v52 = vcombine.low %v13791_v2, %v13794_v25  ;;  %v3342_v12 = vrot.slane %v3341_v17, 4  ;;  %v3356_v17 = vrot.slane %v3354_v63, 5 }
 0x136   : > { %v1834_v55 = vpop.f32.mrf.mxu1  ;;  %2567 = vmatprep.mubr.bf16.mxu0 %v19199_v1  ;;  %v3385_v47 = vrot.slane %v3383_v36, 4  ;;  %v3388_v35 = vrot.slane %v3386_v22, 5  ;;  %v3398_v1 = vrot.slane %v3396_v28, 4  ;;  %v12072_v36 = vld [vmem:[%s13320_s26 + $0x38] sm:$0xff]  ;;  %v3366_v28 = vrot.slane %v3365_v5, 4 }
 0x137   : > { %3216 = vmatmul.mubr.bf16.gmra.mxu1 %v19197_v52  ;;  %v13931_v49 = vadd.f32 %v1834_v55, %v1321_v3  ;;  %v1323_v25 = vpop.f32.mrf.mxu0  ;;  %v13946_v3 = vsel %vm13126_vm5, %v10705_v24, %v4297_v8  ;;  %v13950_v55 = vsel %vm13126_vm5, %v4299_v50, %v4300_v57  ;;  %7876 = vrot.lane.b32.xlu0 %v7792_v46, %s12235_s17  ;;  %v7793_v8 = vld [vmem:[%s19028_s3 + $0xa8] sm:$0xff]  ;;  %v7794_v50 = vld [vmem:[%s19028_s3 + $0xb0] sm:$0xff]  ;;  %v13974_v46 = vld [vmem:[%s13320_s26 + $0x58] sm:$0x11]  ;;  %v4304_v22 = vrot.slane %v12072_v36, 5 }
 0x138   : > { %3225 = vmatprep.mubr.bf16.mxu1 %v19200_v26  ;;  %v1836_v18 = vpop.f32.mrf.mxu1  ;;  %v3375_v52 = vor.u32 %v3374_v23, %v13911_v15  ;;  %v13967_v57 = vsel %vm12506_vm2, %v3342_v12, %v13869_v37  ;;  %v13969_v23 = vrot.slane %v3392_v27, 5  ;;  %v3407_v26 = vshrl.u32 %v13468_v34, 16  ;;  %7878 = vrot.lane.b32.xlu1 %v7793_v8, %s12235_s17 }
 0x139   : > { %19198 = vst [vmem:[#allocation15_spill] sm:$0xff] %v13931_v49  ;;  %v13954_v40 = vadd.f32 %v1836_v18, %v1323_v25  ;;  %v1325_v63 = vpop.f32.mrf.mxu0  ;;  %v3410_v25 = vshll.u32 %v13468_v34, 16  ;;  %v13980_v2 = vsel %vm12506_vm2, %v3352_v45, %v3356_v17  ;;  %v7795_v45 = vld [vmem:[%s19028_s3 + $0xb8] sm:$0xff]  ;;  %v7796_v17 = vld [vmem:[%s19028_s3 + $0xc0] sm:$0xff]  ;;  %v19204_v8 = vcombine.low %v13304_v44, %v13308_v33 }
 0x13a   : > { %v1838_v24 = vpop.f32.mrf.mxu1  ;;  %v3389_v5 = vor.u32 %v3388_v35, %v3385_v47  ;;  %v19207_v36 = vcombine.high %v13342_v30, %v13346_v31  ;;  %v19208_v44 = vcombine.high %v13834_v59, %v13843_v54  ;;  %v3399_v33 = vor.u32 %v3398_v1, %v13969_v23 }
 0x13b   : > { %19201 = vst [vmem:[#allocation16_spill] sm:$0xff] %v13954_v40  ;;  %v13971_v61 = vadd.f32 %v1838_v24, %v1325_v63  ;;  %v1327_v18 = vpop.f32.mrf.mxu0  ;;  %7880 = vrot.lane.b32.xlu0 %v7794_v50, %s12235_s17  ;;  %v3376_v63 = vrot.slane %v3375_v52, 4  ;;  %v3380_v24 = vrot.slane %v3378_v9, 5  ;;  %v3402_v52 = vshll.u32 %v13974_v46, 16 }
 0x13c   : > { %v1840_v19 = vpop.f32.mrf.mxu1  ;;  %v3416_v9 = vshll.u32 %v13471_v14, 16  ;;  %v3420_v50 = vshrl.u32 %v13471_v14, 16  ;;  %7882 = vrot.lane.b32.xlu1 %v7795_v45, %s12235_s17  ;;  %v14026_v1 = vsel %vm12506_vm2, %v3366_v28, %v13911_v15  ;;  %v7797_v45 = vld [vmem:[%s19028_s3 + $0xc8] sm:$0xff]  ;;  %v10643_v15 = vcombine.high %v13967_v57, %v13980_v2 }
 0x13d   : > { %19202 = vst [vmem:[#allocation17_spill] sm:$0xff] %v13971_v61  ;;  %v13989_v27 = vadd.f32 %v1840_v19, %v1327_v18  ;;  %v1331_v37 = vpop.f32.mrf.mxu0  ;;  %2568 = vmatmul.mubr.bf16.gmra.mxu0 %v19204_v8  ;;  %v19205_v19 = vcombine.low %v13803_v62, %v13814_v11  ;;  %v3409_v62 = vrot.slane %v3407_v26, 4  ;;  %v3412_v11 = vrot.slane %v3410_v25, 5  ;;  %v14033_v25 = vld [vmem:[%s13320_s26 + $0x50] sm:$0xff] }
 0x13e   : > { %v1844_v12 = vpop.f32.mrf.mxu1  ;;  %2577 = vmatprep.mubr.bf16.mxu0 %v19207_v36  ;;  %v14030_v26 = vsel %vm12506_vm2, %v3376_v63, %v3380_v24  ;;  %v3390_v28 = vrot.slane %v3389_v5, 4  ;;  %v3418_v63 = vrot.slane %v3416_v9, 5  ;;  %v3422_v24 = vrot.slane %v3420_v50, 4  ;;  %v2666_v8 = vld [vmem:[%s13320_s26 + $0x70] sm:$0x11] }
 0x13f   : > { %19203 = vst [vmem:[#allocation18_spill] sm:$0xff] %v13989_v27  ;;  %3226 = vmatmul.mubr.bf16.gmra.mxu1 %v19205_v19  ;;  %v14006_v18 = vadd.f32 %v1844_v12, %v1331_v37  ;;  %v1333_v47 = vpop.f32.mrf.mxu0  ;;  %v12073_v37 = vld [vmem:[%s13320_s26 + $0x30] sm:$0xff]  ;;  %v4306_v19 = vrot.slane %v4304_v22, 4  ;;  %7884 = vrot.lane.b32.xlu0 %v7796_v17, %s12235_s17  ;;  %v4318_v9 = vrot.slane %v13471_v14, 5  ;;  %v7800_v14 = vld [vmem:[%s19028_s3 + $0xe0] sm:$0xff] }
 0x140   : > { %3235 = vmatprep.mubr.bf16.mxu1 %v19208_v44  ;;  %v1846_v35 = vpop.f32.mrf.mxu1  ;;  %v10706_v12 = vrot.slane %v12073_v37, 9  ;;  %v7798_v17 = vld [vmem:[%s19028_s3 + $0xd0] sm:$0xff]  ;;  %v3400_v37 = vrot.slane %v3399_v33, 4  ;;  %7886 = vrot.lane.b32.xlu1 %v7797_v45, %s12235_s17  ;;  %v12075_v33 = vld [vmem:[%s13320_s26 + $0x48] sm:$0xff]  ;;  %v4314_v45 = vrot.slane %v13974_v46, 5 }
 0x141   : > { %19206 = vst [vmem:[#allocation19_spill] sm:$0xff] %v14006_v18  ;;  %v4307_v18 = vrot.slane %v13926_v13, 5  ;;  %v14021_v36 = vadd.f32 %v1846_v35, %v1333_v47  ;;  %v4311_v13 = vrot.slane %v14033_v25, 5  ;;  %v1335_v44 = vpop.f32.mrf.mxu0  ;;  %v3404_v25 = vrot.slane %v3402_v52, 5 }
 0x142   : > { %v1848_v47 = vpop.f32.mrf.mxu1  ;;  %v14051_v49 = vsel %vm13126_vm5, %v10706_v12, %v4304_v22  ;;  %v7799_v22 = vld [vmem:[%s19028_s3 + $0xd8] sm:$0xff] }
 0x143   : > { %19209 = vst [vmem:[#allocation20_spill] sm:$0xff] %v14021_v36  ;;  %v14044_v35 = vadd.f32 %v1848_v47, %v1335_v44  ;;  %v3413_v36 = vor.u32 %v3412_v11, %v3409_v62  ;;  %v1337_v27 = vpop.f32.mrf.mxu0  ;;  %v14055_v5 = vsel %vm13126_vm5, %v4306_v19, %v4307_v18  ;;  %7888 = vrot.lane.b32.xlu0 %v7798_v17, %s12235_s17  ;;  %v10707_v62 = vrot.slane %v12075_v33, 9 }
 0x144   : > { %v1850_v61 = vpop.f32.mrf.mxu1  ;;  %v4313_v11 = vrot.slane %v4311_v13, 4  ;;  %v14080_v19 = vsel %vm12506_vm2, %v3390_v28, %v13969_v23  ;;  %v3423_v17 = vor.u32 %v3422_v24, %v3418_v63  ;;  %v3426_v44 = vshll.u32 %v2666_v8, 16  ;;  %7890 = vrot.lane.b32.xlu1 %v7799_v22, %s12235_s17 }
 0x145   : > { %v14060_v52 = vadd.f32 %v1850_v61, %v1337_v27  ;;  %v1341_v18 = vpop.f32.mrf.mxu0  ;;  %v19210_v61 = vcombine.low %v13342_v30, %v13346_v31  ;;  %v19211_v27 = vcombine.low %v13834_v59, %v13843_v54  ;;  %v19212_v33 = vcombine.high %v13847_v39, %v13867_v21 }
 0x146   : > { %v1854_v12 = vpop.f32.mrf.mxu1  ;;  %v19213_v30 = vcombine.high %v13897_v38, %v13903_v32  ;;  %v14093_v31 = vsel %vm12506_vm2, %v3400_v37, %v3404_v25  ;;  %v3414_v59 = vrot.slane %v3413_v36, 4  ;;  %v10708_v54 = vrot.slane %v13468_v34, 9 }
 0x147   : > { %2578 = vmatmul.mubr.bf16.gmra.mxu0 %v19210_v61  ;;  %3236 = vmatmul.mubr.bf16.gmra.mxu1 %v19211_v27  ;;  %v14083_v47 = vadd.f32 %v1854_v12, %v1341_v18  ;;  %v1343_v23 = vpop.f32.mrf.mxu0  ;;  %v4320_v28 = vrot.slane %v4318_v9, 4  ;;  %v4321_v24 = vrot.slane %v2666_v8, 5  ;;  %v3431_v18 = vshrl.u32 %v13509_v51, 16  ;;  %v7801_v8 = vld [vmem:[%s19028_s3 + $0xe8] sm:$0xff] }
 0x148   : > { %4047 = vmatprep.mubr.bf16.mxu0 %v19212_v33  ;;  %4753 = vmatprep.mubr.bf16.mxu1 %v19213_v30  ;;  %v1856_v46 = vpop.f32.mrf.mxu1  ;;  %v3434_v12 = vshll.u32 %v13509_v51, 16  ;;  %v3440_v36 = vshll.u32 %v13512_v53, 16  ;;  %v3444_v34 = vshrl.u32 %v13512_v53, 16  ;;  %v7802_v51 = vld [vmem:[%s19028_s3 + $0xf0] sm:$0xff]  ;;  %v14116_v27 = vsel %vm13126_vm5, %v10707_v62, %v4311_v13 }
 0x149   : > { %7892 = vrot.lane.b32.xlu0 %v7800_v14, %s12235_s17  ;;  %v14100_v61 = vadd.f32 %v1856_v46, %v1343_v23  ;;  %v1345_v25 = vpop.f32.mrf.mxu0  ;;  %v3424_v33 = vrot.slane %v3423_v17, 4  ;;  %v3428_v53 = vrot.slane %v3426_v44, 5  ;;  %v11667_v23 = vld [vmem:[%s19029_s4 + $0x670] ss:$8 sps:$4 sm:$0xff]   ;;  %v14127_v40 = vsel %vm13126_vm5, %v4313_v11, %v4314_v45  ;;  %v11672_v17 = vld [vmem:[%s19029_s4 + $0x664] ss:$8 sps:$4 sm:$0xff]   ;;  %7894 = vrot.lane.b32.xlu1 %v7801_v8, %s12235_s17 }
 0x14a   : > { %v1858_v22 = vpop.f32.mrf.mxu1  ;;  %v14131_v14 = vsel %vm12506_vm2, %v3414_v59, %v3418_v63  ;;  %v14138_v44 = vsel %vm13126_vm5, %v10708_v54, %v4318_v9  ;;  %v14145_v11 = vld [vmem:[%s13320_s26 + $0x88] sm:$0x11]  ;;  %v3433_v45 = vrot.slane %v3431_v18, 4  ;;  %v14151_v59 = vrot.slane %v3440_v36, 5  ;;  %v11694_v54 = vld [vmem:[%s19029_s4 + $0x770] ss:$8 sps:$4 sm:$0xff]  }
 0x14b   : > { %v14118_v30 = vadd.f32 %v1858_v22, %v1345_v25  ;;  %v1347_v13 = vpop.f32.mrf.mxu0  ;;  %v14142_v25 = vsel %vm13126_vm5, %v4320_v28, %v4321_v24  ;;  %v3436_v22 = vrot.slane %v3434_v12, 5  ;;  %v3446_v46 = vrot.slane %v3444_v34, 4 }
 0x14c   : > { %v1860_v62 = vpop.f32.mrf.mxu1  ;;  %v3455_v9 = vshrl.u32 %v13550_v48, 16  ;;  %v19215_v18 = vcombine.low %v13847_v39, %v13867_v21  ;;  %v19216_v12 = vcombine.low %v13897_v38, %v13903_v32  ;;  %v14165_v36 = vsel %vm12506_vm2, %v3424_v33, %v3428_v53  ;;  %v7803_v21 = vld [vmem:[%s19028_s3 + $0xf8] sm:$0xff]  ;;  %v12076_v38 = vld [vmem:[%s13320_s26 + $0x80] sm:$0xff] }
 0x14d   : > { %7896 = vrot.lane.b32.xlu0 %v7802_v51, %s12235_s17  ;;  %v14149_v63 = vadd.f32 %v1860_v62, %v1347_v13  ;;  %v1351_v28 = vpop.f32.mrf.mxu0  ;;  %v3458_v34 = vshll.u32 %v13550_v48, 16  ;;  %v3464_v8 = vshll.u32 %v13553_v6, 16  ;;  %v3468_v51 = vshrl.u32 %v13553_v6, 16  ;;  %v11699_v13 = vld [vmem:[%s19029_s4 + $0x764] ss:$8 sps:$4 sm:$0xff]   ;;  %7898 = vrot.lane.b32.xlu1 %v7803_v21, %s12235_s17 }
 0x14e   : > { %v1864_v24 = vpop.f32.mrf.mxu1  ;;  %v11670_v48 = vld [vmem:[%s19029_s4 + $0x660] ss:$8 sps:$4 sm:$0xff]   ;;  %v4325_v33 = vrot.slane %v12076_v38, 5  ;;  %v11678_v21 = vld [vmem:[%s19029_s4 + $0x644] ss:$8 sps:$4 sm:$0xff]   ;;  %v4328_v50 = vrot.slane %v14145_v11, 5 }
 0x14f   : > { %19214 = vst [vmem:[#allocation21_spill] sm:$0xff] %v14149_v63  ;;  %4048 = vmatmul.mubr.bf16.vlgmr.msra.gmra.mxu0 %v19215_v18  ;;  %4754 = vmatmul.mubr.bf16.vlgmr.msra.gmra.mxu1 %v19216_v12  ;;  %v14176_v39 = vadd.f32 %v1864_v24, %v1351_v28  ;;  %v1353_v53 = vpop.f32.mrf.mxu0  ;;  %v3437_v18 = vor.u32 %v3436_v22, %v3433_v45  ;;  %v3450_v12 = vshll.u32 %v14145_v11, 16  ;;  %v11697_v32 = vld [vmem:[%s19029_s4 + $0x760] ss:$8 sps:$4 sm:$0xff]   ;;  %v11673_v22 = vld [vmem:[%s19029_s4 + $0x650] ss:$8 sps:$4 sm:$0xff]  }
 0x150   : > { %5380 = vmatpush1.bf16.msra.mxu0 %v11667_v23  ;;  %4057 = vmatprep.mubr.bf16.mxu0 %v10643_v15  ;;  %v1866_v62 = vpop.f32.mrf.mxu1  ;;  %v19218_v23 = vcombine.high %v13946_v3, %v13950_v55  ;;  %v11675_v15 = vld [vmem:[%s19029_s4 + $0x654] ss:$8 sps:$4 sm:$0xff]   ;;  %v4327_v37 = vrot.slane %v4325_v33, 4  ;;  %v3488_v11 = vshll.u32 %v13591_v0, 16 }
 0x151   : > { %19217 = vst [vmem:[#allocation22_spill] sm:$0xff] %v14176_v39  ;;  %5381 = vmatprep.subr.bf16.mxu0 %v11672_v17  ;;  %v14200_v38 = vadd.f32 %v1866_v62, %v1353_v53  ;;  %6342 = vmatpush1.bf16.msra.mxu1 %v11694_v54  ;;  %v1355_v24 = vpop.f32.mrf.mxu0  ;;  %v14212_v53 = vrot.slane %v3455_v9, 4  ;;  %v3460_v62 = vrot.slane %v3458_v34, 5  ;;  %v14214_v17 = vrot.slane %v3464_v8, 5  ;;  %v12077_v28 = vld [vmem:[%s13320_s26 + $0x78] sm:$0xff] }
 0x152   : > { %4763 = vmatprep.mubr.bf16.mxu1 %v19218_v23  ;;  %v3447_v23 = vor.u32 %v3446_v46, %v14151_v59  ;;  %v1868_v45 = vpop.f32.mrf.mxu1  ;;  %v3470_v46 = vrot.slane %v3468_v51, 4  ;;  %6343 = vmatprep.subr.bf16.mxu1 %v11699_v13  ;;  %v10709_v6 = vrot.slane %v12077_v28, 9  ;;  %v3438_v8 = vrot.slane %v3437_v18, 4 }
 0x153   : > { %19219 = vst [vmem:[#allocation23_spill] sm:$0xff] %v14200_v38  ;;  %v14216_v54 = vadd.f32 %v1868_v45, %v1355_v24  ;;  %v14224_v38 = vld [vmem:[%s13320_s26 + $0xa0] sm:$0x11]  ;;  %v1357_v9 = vpop.f32.mrf.mxu0  ;;  %v3452_v51 = vrot.slane %v3450_v12, 5  ;;  %v3479_v13 = vshrl.u32 %v13588_v16, 16 }
 0x154   : > { %5382 = vmatpush1.bf16.msra.mxu0 %v11670_v48  ;;  %v1870_v34 = vpop.f32.mrf.mxu1  ;;  %v3482_v48 = vshll.u32 %v13588_v16, 16  ;;  %v11705_v24 = vld [vmem:[%s19029_s4 + $0x754] ss:$8 sps:$4 sm:$0xff]   ;;  %v3448_v28 = vrot.slane %v3447_v23, 4  ;;  %v19222_v16 = vcombine.low %v13967_v57, %v13980_v2  ;;  %v19225_v2 = vcombine.high %v14026_v1, %v14030_v26 }
 0x155   : > { %19220 = vst [vmem:[#allocation24_spill] sm:$0xff] %v14216_v54  ;;  %5383 = vmatprep.subr.bf16.mxu0 %v11675_v15  ;;  %v14231_v45 = vadd.f32 %v1870_v34, %v1357_v9  ;;  %v3492_v54 = vshrl.u32 %v13591_v0, 16  ;;  %6344 = vmatpush1.bf16.msra.mxu1 %v11697_v32  ;;  %v11703_v15 = vld [vmem:[%s19029_s4 + $0x750] ss:$8 sps:$4 sm:$0xff]   ;;  %v1361_v18 = vpop.f32.mrf.mxu0  ;;  %v19223_v9 = vcombine.low %v13946_v3, %v13950_v55  ;;  %v3474_v34 = vshll.u32 %v14224_v38, 16 }
 0x156   : > { %v1874_v12 = vpop.f32.mrf.mxu1  ;;  %v3461_v0 = vor.u32 %v3460_v62, %v14212_v53  ;;  %v3471_v32 = vor.u32 %v3470_v46, %v14214_v17  ;;  %v19226_v3 = vcombine.high %v14051_v49, %v14055_v5  ;;  %v14262_v55 = vsel %vm13126_vm5, %v10709_v6, %v4325_v33  ;;  %v14269_v53 = vld [vmem:[%s13320_s26 + $0x98] sm:$0xff]  ;;  %6345 = vmatprep.subr.bf16.mxu1 %v11705_v24 }
 0x157   : > { %19221 = vst [vmem:[#allocation25_spill] sm:$0xff] %v14231_v45  ;;  %4058 = vmatmul.mubr.bf16.gmra.mxu0 %v19222_v16  ;;  %4764 = vmatmul.mubr.bf16.gmra.mxu1 %v19223_v9  ;;  %v11708_v45 = vld [vmem:[%s19029_s4 + $0x744] ss:$8 sps:$4 sm:$0xff]   ;;  %v14252_v39 = vadd.f32 %v1874_v12, %v1361_v18  ;;  %v14266_v57 = vsel %vm13126_vm5, %v4327_v37, %v4328_v50  ;;  %v4332_v62 = vrot.slane %v14269_v53, 5  ;;  %v1363_v46 = vpop.f32.mrf.mxu0  ;;  %v11676_v12 = vld [vmem:[%s19029_s4 + $0x640] ss:$8 sps:$4 sm:$0xff]  }
 0x158   : > { %4067 = vmatprep.mubr.bf16.mxu0 %v19225_v2  ;;  %4773 = vmatprep.mubr.bf16.mxu1 %v19226_v3  ;;  %v1876_v18 = vpop.f32.mrf.mxu1  ;;  %v14280_v6 = vsel %vm12506_vm2, %v3438_v8, %v14151_v59  ;;  %v3481_v50 = vrot.slane %v3479_v13, 4  ;;  %v3484_v37 = vrot.slane %v3482_v48, 5  ;;  %v14289_v9 = vsel %vm12506_vm2, %v3448_v28, %v3452_v51  ;;  %v11706_v8 = vld [vmem:[%s19029_s4 + $0x740] ss:$8 sps:$4 sm:$0xff]   ;;  %v11679_v48 = vld [vmem:[%s19029_s4 + $0x630] ss:$8 sps:$4 sm:$0xff]  }
 0x159   : > { %19224 = vst [vmem:[#allocation26_spill] sm:$0xff] %v14252_v39  ;;  %5384 = vmatpush1.bf16.msra.mxu0 %v11673_v22  ;;  %v14282_v33 = vadd.f32 %v1876_v18, %v1363_v46  ;;  %v11681_v22 = vld [vmem:[%s19029_s4 + $0x634] ss:$8 sps:$4 sm:$0xff]   ;;  %v14291_v2 = vrot.slane %v3488_v11, 5  ;;  %v14293_v59 = vrot.slane %v3492_v54, 4  ;;  %6346 = vmatpush1.bf16.msra.mxu1 %v11703_v15  ;;  %v1365_v13 = vpop.f32.mrf.mxu0  ;;  %v3462_v24 = vrot.slane %v3461_v0, 4 }
 0x15a   : > { %5385 = vmatprep.subr.bf16.mxu0 %v11678_v21  ;;  %v1878_v21 = vpop.f32.mrf.mxu1  ;;  %v3472_v3 = vrot.slane %v3471_v32, 4  ;;  %v3476_v53 = vrot.slane %v3474_v34, 5  ;;  %v14301_v46 = vld [vmem:[%s13320_s26 + $0xb8] sm:$0x11]  ;;  %6347 = vmatprep.subr.bf16.mxu1 %v11708_v45  ;;  %v12079_v54 = vld [vmem:[%s13320_s26 + $0x90] sm:$0xff]  ;;  %v4334_v11 = vrot.slane %v4332_v62, 4  ;;  %v3485_v32 = vor.u32 %v3484_v37, %v3481_v50 }
 0x15b   : > { %19227 = vst [vmem:[#allocation27_spill] sm:$0xff] %v14282_v33  ;;  %v14303_v51 = vadd.f32 %v1878_v21, %v1365_v13  ;;  %v10710_v28 = vrot.slane %v12079_v54, 9  ;;  %v4335_v15 = vrot.slane %v14224_v38, 5  ;;  %v1367_v18 = vpop.f32.mrf.mxu0  ;;  %v3503_v45 = vshrl.u32 %v13625_v58, 16  ;;  %v11714_v13 = vld [vmem:[%s19029_s4 + $0x734] ss:$8 sps:$4 sm:$0xff]  }
 0x15c   : > { %v1880_v16 = vpop.f32.mrf.mxu1  ;;  %v3506_v34 = vshll.u32 %v13625_v58, 16  ;;  %v11684_v21 = vld [vmem:[%s19029_s4 + $0x624] ss:$8 sps:$4 sm:$0xff]   ;;  %v3495_v50 = vor.u32 %v14293_v59, %v14291_v2  ;;  %v3498_v58 = vshll.u32 %v14301_v46, 16  ;;  %v11712_v37 = vld [vmem:[%s19029_s4 + $0x730] ss:$8 sps:$4 sm:$0xff]   ;;  %v14345_v0 = vsel %vm12506_vm2, %v3472_v3, %v3476_v53 }
 0x15d   : > { %19228 = vst [vmem:[#allocation28_spill] sm:$0xff] %v14303_v51  ;;  %5386 = vmatpush1.bf16.msra.mxu0 %v11676_v12  ;;  %v14317_v38 = vadd.f32 %v1880_v16, %v1367_v18  ;;  %6348 = vmatpush1.bf16.msra.mxu1 %v11706_v8  ;;  %v1371_v16 = vpop.f32.mrf.mxu0  ;;  %v19231_v18 = vcombine.low %v14051_v49, %v14055_v5  ;;  %v14348_v12 = vld [vmem:[%s13320_s26 + $0xc8] sm:$0xff]  ;;  %v14375_v59 = vrot.slane %v3503_v45, 4  ;;  %v14404_v23 = vld [vmem:[%s13320_s26 + $0xd8] sm:$0xff] }
 0x15e   : > { %5387 = vmatprep.subr.bf16.mxu0 %v11681_v22  ;;  %v1884_v54 = vpop.f32.mrf.mxu1  ;;  %v19230_v22 = vcombine.low %v14026_v1, %v14030_v26  ;;  %v14341_v8 = vsel %vm12506_vm2, %v3462_v24, %v14214_v17  ;;  %v3512_v1 = vshll.u32 %v14348_v12, 16  ;;  %v11717_v49 = vld [vmem:[%s19029_s4 + $0x724] ss:$8 sps:$4 sm:$0xff]   ;;  %v19233_v5 = vcombine.high %v14080_v19, %v14093_v31  ;;  %6349 = vmatprep.subr.bf16.mxu1 %v11714_v13  ;;  %v11715_v45 = vld [vmem:[%s19029_s4 + $0x720] ss:$8 sps:$4 sm:$0xff]  }
 0x15f   : > { %19229 = vst [vmem:[#allocation29_spill] sm:$0xff] %v14317_v38  ;;  %4774 = vmatmul.mubr.bf16.gmra.mxu1 %v19231_v18  ;;  %v14354_v26 = vadd.f32 %v1884_v54, %v1371_v16  ;;  %v19234_v17 = vcombine.high %v14116_v27, %v14127_v40  ;;  %v14364_v24 = vsel %vm13126_vm5, %v10710_v28, %v4332_v62  ;;  %v3516_v53 = vshrl.u32 %v14348_v12, 16  ;;  %v1373_v16 = vpop.f32.mrf.mxu0 }
 0x160   : > { %4068 = vmatmul.mubr.bf16.gmra.mxu0 %v19230_v22  ;;  %v14368_v3 = vsel %vm13126_vm5, %v4334_v11, %v4335_v15  ;;  %v1886_v54 = vpop.f32.mrf.mxu1  ;;  %v11682_v22 = vld [vmem:[%s19029_s4 + $0x620] ss:$8 sps:$4 sm:$0xff]   ;;  %v3486_v18 = vrot.slane %v3485_v32, 4  ;;  %v14377_v62 = vrot.slane %v3506_v34, 5  ;;  %v11687_v11 = vld [vmem:[%s19029_s4 + $0x614] ss:$8 sps:$4 sm:$0xff]  }
 0x161   : > { %19232 = vst [vmem:[#allocation30_spill] sm:$0xff] %v14354_v26  ;;  %4077 = vmatprep.mubr.bf16.mxu0 %v19233_v5  ;;  %4783 = vmatprep.mubr.bf16.mxu1 %v19234_v17  ;;  %v12081_v5 = vld [vmem:[%s13320_s26 + $0xb0] sm:$0xff]  ;;  %v14379_v28 = vadd.f32 %v1886_v54, %v1373_v16  ;;  %v3496_v15 = vrot.slane %v3495_v50, 4  ;;  %v3500_v32 = vrot.slane %v3498_v58, 5  ;;  %v1375_v34 = vpop.f32.mrf.mxu0  ;;  %v12082_v54 = vld [vmem:[%s13320_s26 + $0xa8] sm:$0xff]  ;;  %v4346_v38 = vrot.slane %v14348_v12, 5 }
 0x162   : > { %5388 = vmatpush1.bf16.msra.mxu0 %v11679_v48  ;;  %v4339_v17 = vrot.slane %v12081_v5, 5  ;;  %6350 = vmatpush1.bf16.msra.mxu1 %v11712_v37  ;;  %v1888_v13 = vpop.f32.mrf.mxu1  ;;  %v10711_v5 = vrot.slane %v12082_v54, 9  ;;  %v14394_v48 = vrot.slane %v3512_v1, 5  ;;  %v14399_v58 = vld [vmem:[%s13320_s26 + $0xd0] sm:$0x11]  ;;  %v14401_v37 = vrot.slane %v3516_v53, 4 }
 0x163   : > { %19235 = vst [vmem:[#allocation31_spill] sm:$0xff] %v14379_v28  ;;  %5389 = vmatprep.subr.bf16.mxu0 %v11684_v21  ;;  %6351 = vmatprep.subr.bf16.mxu1 %v11717_v49  ;;  %v14396_v50 = vadd.f32 %v1888_v13, %v1375_v34  ;;  %v3527_v28 = vshrl.u32 %v14404_v23, 16  ;;  %v3530_v21 = vshll.u32 %v14404_v23, 16  ;;  %v1377_v26 = vpop.f32.mrf.mxu0  ;;  %v11685_v1 = vld [vmem:[%s19029_s4 + $0x610] ss:$8 sps:$4 sm:$0xff]   ;;  %v14414_v49 = vsel %vm12506_vm2, %v3486_v18, %v14291_v2  ;;  %v14432_v18 = vld [vmem:[%s13320_s26 + $0xe0] sm:$0xff] }
 0x164   : > { %v1890_v16 = vpop.f32.mrf.mxu1  ;;  %v4341_v53 = vrot.slane %v4339_v17, 4  ;;  %v4342_v34 = vrot.slane %v14301_v46, 5  ;;  %v3509_v13 = vor.u32 %v14377_v62, %v14375_v59  ;;  %v11723_v54 = vld [vmem:[%s19029_s4 + $0x714] ss:$8 sps:$4 sm:$0xff]   ;;  %v11690_v2 = vld [vmem:[%s19029_s4 + $0x604] ss:$8 sps:$4 sm:$0xff]  }
 0x165   : > { %19236 = vst [vmem:[#allocation32_spill] sm:$0xff] %v14396_v50  ;;  %v14426_v50 = vsel %vm12506_vm2, %v3496_v15, %v3500_v32  ;;  %v3536_v46 = vshll.u32 %v14432_v18, 16  ;;  %v3540_v59 = vshrl.u32 %v14432_v18, 16  ;;  %v1381_v62 = vpop.f32.mrf.mxu0  ;;  %v19238_v15 = vcombine.low %v14080_v19, %v14093_v31  ;;  %v11726_v19 = vld [vmem:[%s19029_s4 + $0x704] ss:$8 sps:$4 sm:$0xff]  }
 0x166   : > { %5390 = vmatpush1.bf16.msra.mxu0 %v11682_v22  ;;  %v14422_v22 = vadd.f32 %v1890_v16, %v1377_v26  ;;  %6352 = vmatpush1.bf16.msra.mxu1 %v11715_v45  ;;  %v11721_v26 = vld [vmem:[%s19029_s4 + $0x710] ss:$8 sps:$4 sm:$0xff]   ;;  %v19239_v32 = vcombine.low %v14116_v27, %v14127_v40  ;;  %v14449_v45 = vsel %vm13126_vm5, %v10711_v5, %v4339_v17  ;;  %v14466_v5 = vrot.slane %v3527_v28, 4 }
 0x167   : > { %5391 = vmatprep.subr.bf16.mxu0 %v11687_v11  ;;  %v1894_v11 = vpop.f32.mrf.mxu1  ;;  %v19241_v40 = vcombine.high %v14131_v14, %v14165_v36  ;;  %v19242_v27 = vcombine.high %v14138_v44, %v14142_v25  ;;  %v3519_v17 = vor.u32 %v14401_v37, %v14394_v48  ;;  %v14468_v12 = vrot.slane %v3530_v21, 5  ;;  %v12085_v37 = vld [vmem:[%s13320_s26 + $0xc0] sm:$0xff]  ;;  %6353 = vmatprep.subr.bf16.mxu1 %v11723_v54 }
 0x168   : > { %19237 = vst [vmem:[#allocation33_spill] sm:$0xff] %v14422_v22  ;;  %4078 = vmatmul.mubr.bf16.gmra.mxu0 %v19238_v15  ;;  %4784 = vmatmul.mubr.bf16.gmra.mxu1 %v19239_v32  ;;  %v3522_v22 = vshll.u32 %v14399_v58, 16  ;;  %v14456_v31 = vadd.f32 %v1894_v11, %v1381_v62  ;;  %v1383_v15 = vpop.f32.mrf.mxu0  ;;  %v10712_v28 = vrot.slane %v12085_v37, 9  ;;  %v11693_v62 = vld [vmem:[%s19029_s4 + $0x6f4] ss:$8 sps:$4 sm:$0xff]   ;;  %v14487_v11 = vrot.slane %v3536_v46, 5 }
 0x169   : > { %4087 = vmatprep.mubr.bf16.mxu0 %v19241_v40  ;;  %4793 = vmatprep.mubr.bf16.mxu1 %v19242_v27  ;;  %v1896_v32 = vpop.f32.mrf.mxu1  ;;  %v11688_v40 = vld [vmem:[%s19029_s4 + $0x600] ss:$8 sps:$4 sm:$0xff]   ;;  %v3510_v27 = vrot.slane %v3509_v13, 4  ;;  %v3542_v16 = vrot.slane %v3540_v59, 4  ;;  %v4353_v63 = vrot.slane %v14432_v18, 5 }
 0x16a   : > { %19240 = vst [vmem:[#allocation34_spill] sm:$0xff] %v14456_v31  ;;  %5392 = vmatpush1.bf16.msra.mxu0 %v11685_v1  ;;  %v14478_v21 = vadd.f32 %v1896_v32, %v1383_v15  ;;  %v14482_v1 = vsel %vm13126_vm5, %v4341_v53, %v4342_v34  ;;  %6354 = vmatpush1.bf16.msra.mxu1 %v11721_v26  ;;  %v11724_v13 = vld [vmem:[%s19029_s4 + $0x700] ss:$8 sps:$4 sm:$0xff]   ;;  %v1385_v54 = vpop.f32.mrf.mxu0  ;;  %v4348_v32 = vrot.slane %v4346_v38, 4  ;;  %v14497_v34 = vld [vmem:[%s13320_s26 + $0xf0] sm:$0xff]  ;;  %v3520_v26 = vrot.slane %v3519_v17, 4 }
 0x16b   : > { %5393 = vmatprep.subr.bf16.mxu0 %v11690_v2  ;;  %v1898_v15 = vpop.f32.mrf.mxu1  ;;  %v4349_v2 = vrot.slane %v14399_v58, 5  ;;  %v14494_v53 = vld [vmem:[%s13320_s26 + $0xe8] sm:$0x11]  ;;  %v3551_v37 = vshrl.u32 %v14497_v34, 16  ;;  %v3554_v46 = vshll.u32 %v14497_v34, 16  ;;  %6355 = vmatprep.subr.bf16.mxu1 %v11726_v19  ;;  %v3533_v58 = vor.u32 %v14468_v12, %v14466_v5  ;;  %v14512_v19 = vld [vmem:[%s13320_s26 + $0xf8] sm:$0xff] }
 0x16c   : > { %19243 = vst [vmem:[#allocation35_spill] sm:$0xff] %v14478_v21  ;;  %v14501_v59 = vadd.f32 %v1898_v15, %v1385_v54  ;;  %v3524_v21 = vrot.slane %v3522_v22, 5  ;;  %v11691_v31 = vld [vmem:[%s19029_s4 + $0x6f0] ss:$8 sps:$4 sm:$0xff]   ;;  %v1387_v51 = vpop.f32.mrf.mxu0  ;;  %v3560_v17 = vshll.u32 %v14512_v19, 16  ;;  %v3564_v22 = vshrl.u32 %v14512_v19, 16 }
 0x16d   : > { %v1900_v33 = vpop.f32.mrf.mxu1  ;;  %v11732_v54 = vld [vmem:[%s19029_s4 + $0x7f4] ss:$8 sps:$4 sm:$0xff]   ;;  %v14524_v5 = vsel %vm12506_vm2, %v3510_v27, %v14394_v48  ;;  %v3543_v18 = vor.u32 %v3542_v16, %v14487_v11  ;;  %v3546_v12 = vshll.u32 %v14494_v53, 16  ;;  %v19246_v48 = vcombine.low %v14131_v14, %v14165_v36 }
 0x16e   : > { %19244 = vst [vmem:[#allocation36_spill] sm:$0xff] %v14501_v59  ;;  %5394 = vmatpush1.bf16.msra.mxu0 %v11688_v40  ;;  %v14519_v15 = vadd.f32 %v1900_v33, %v1387_v51  ;;  %v11702_v40 = vld [vmem:[%s19029_s4 + $0x6e4] ss:$8 sps:$4 sm:$0xff]   ;;  %6356 = vmatpush1.bf16.msra.mxu1 %v11724_v13  ;;  %v11730_v33 = vld [vmem:[%s19029_s4 + $0x7f0] ss:$8 sps:$4 sm:$0xff]   ;;  %v1391_v51 = vpop.f32.mrf.mxu0  ;;  %v19247_v16 = vcombine.low %v14138_v44, %v14142_v25  ;;  %v3553_v13 = vrot.slane %v3551_v37, 4 }
 0x16f   : > { %5395 = vmatprep.subr.bf16.mxu0 %v11693_v62  ;;  %v1904_v39 = vpop.f32.mrf.mxu1  ;;  %v14542_v62 = vsel %vm13126_vm5, %v10712_v28, %v4346_v38  ;;  %v14546_v27 = vsel %vm13126_vm5, %v4348_v32, %v4349_v2  ;;  %v11735_v59 = vld [vmem:[%s19029_s4 + $0x7e4] ss:$8 sps:$4 sm:$0xff]   ;;  %v19249_v44 = vcombine.high %v14280_v6, %v14289_v9  ;;  %v19250_v25 = vcombine.high %v14262_v55, %v14266_v57  ;;  %v11700_v37 = vld [vmem:[%s19029_s4 + $0x6e0] ss:$8 sps:$4 sm:$0xff]  }
 0x170   : > { %19245 = vst [vmem:[#allocation37_spill] sm:$0xff] %v14519_v15  ;;  %4088 = vmatmul.mubr.bf16.gmra.mxu0 %v19246_v48  ;;  %4794 = vmatmul.mubr.bf16.gmra.mxu1 %v19247_v16  ;;  %v3556_v15 = vrot.slane %v3554_v46, 5  ;;  %v14551_v14 = vadd.f32 %v1904_v39, %v1391_v51  ;;  %v14561_v36 = vsel %vm12506_vm2, %v3520_v26, %v3524_v21  ;;  %v3534_v38 = vrot.slane %v3533_v58, 4  ;;  %v14565_v32 = vld [vmem:[%s13320_s26 + $0x100] sm:$0x11]  ;;  %v1393_v2 = vpop.f32.mrf.mxu0 }
 0x171   : > { %4097 = vmatprep.mubr.bf16.mxu0 %v19249_v44  ;;  %4803 = vmatprep.mubr.bf16.mxu1 %v19250_v25  ;;  %v10713_v28 = vrot.slane %v14404_v23, 9  ;;  %v1906_v39 = vpop.f32.mrf.mxu1  ;;  %v4355_v46 = vrot.slane %v4353_v63, 4  ;;  %v4356_v51 = vrot.slane %v14494_v53, 5  ;;  %v14571_v48 = vrot.slane %v3560_v17, 5  ;;  %v11733_v53 = vld [vmem:[%s19029_s4 + $0x7e0] ss:$8 sps:$4 sm:$0xff]  }
 0x172   : > { %19248 = vst [vmem:[#allocation38_spill] sm:$0xff] %v14551_v14  ;;  %5396 = vmatpush2.bf16.msra.mxu0 %v11691_v31  ;;  %v3566_v21 = vrot.slane %v3564_v22, 4  ;;  %6357 = vmatprep.subr.bf16.mxu1 %v11732_v54  ;;  %v14573_v26 = vadd.f32 %v1906_v39, %v1393_v2  ;;  %v3544_v58 = vrot.slane %v3543_v18, 4  ;;  %v3548_v16 = vrot.slane %v3546_v12, 5  ;;  %v11711_v31 = vld [vmem:[%s19029_s4 + $0x6d4] ss:$8 sps:$4 sm:$0xff]   ;;  %v1395_v17 = vpop.f32.mrf.mxu0 }
 0x173   : > { %5397 = vmatprep.subr.bf16.mxu0 %v11702_v40  ;;  %6358 = vmatpush2.bf16.msra.mxu1 %v11730_v33  ;;  %v1908_v22 = vpop.f32.mrf.mxu1  ;;  %v3557_v54 = vor.u32 %v3556_v15, %v3553_v13  ;;  %v3570_v44 = vshll.u32 %v14565_v32, 16  ;;  %v14585_v25 = vld [vmem:[%s13320_s26 + $0x108] sm:$0xff]  ;;  %v4360_v15 = vrot.slane %v14512_v19, 5  ;;  %v14599_v23 = vsel %vm12506_vm2, %v3534_v38, %v14487_v11  ;;  %v11709_v19 = vld [vmem:[%s19029_s4 + $0x6d0] ss:$8 sps:$4 sm:$0xff]  }
 0x174   : > { %19251 = vst [vmem:[#allocation39_spill] sm:$0xff] %v14573_v26  ;;  %v3575_v18 = vshrl.u32 %v14585_v25, 16  ;;  %v3578_v12 = vshll.u32 %v14585_v25, 16  ;;  %6359 = vmatprep.subr.bf16.mxu1 %v11735_v59  ;;  %v14589_v40 = vadd.f32 %v1908_v22, %v1395_v17  ;;  %v1397_v13 = vpop.f32.mrf.mxu0  ;;  %v14603_v59 = vsel %vm13126_vm5, %v10713_v28, %v4353_v63  ;;  %v11741_v11 = vld [vmem:[%s19029_s4 + $0x7d4] ss:$8 sps:$4 sm:$0xff]  }
 0x175   : > { %v1910_v39 = vpop.f32.mrf.mxu1  ;;  %v14607_v17 = vsel %vm13126_vm5, %v4355_v46, %v4356_v51  ;;  %v3567_v22 = vor.u32 %v3566_v21, %v14571_v48  ;;  %v14620_v63 = vsel %vm12506_vm2, %v3544_v58, %v3548_v16  ;;  %v14623_v28 = vld [vmem:[%s13320_s26 + $0x110] sm:$0xff]  ;;  %v11720_v51 = vld [vmem:[%s19029_s4 + $0x6c4] ss:$8 sps:$4 sm:$0xff]   ;;  %v19254_v58 = vcombine.low %v14280_v6, %v14289_v9 }
 0x176   : > { %19252 = vst [vmem:[#allocation40_spill] sm:$0xff] %v14589_v40  ;;  %5398 = vmatpush2.bf16.msra.mxu0 %v11700_v37  ;;  %v14616_v38 = vadd.f32 %v1910_v39, %v1397_v13  ;;  %v3584_v37 = vshll.u32 %v14623_v28, 16  ;;  %v3588_v46 = vshrl.u32 %v14623_v28, 16  ;;  %v11739_v21 = vld [vmem:[%s19029_s4 + $0x7d0] ss:$8 sps:$4 sm:$0xff]   ;;  %v1401_v13 = vpop.f32.mrf.mxu0  ;;  %v19255_v16 = vcombine.low %v14262_v55, %v14266_v57 }
 0x177   : > { %5399 = vmatprep.subr.bf16.mxu0 %v11711_v31  ;;  %6360 = vmatpush2.bf16.msra.mxu1 %v11733_v53  ;;  %v1914_v39 = vpop.f32.mrf.mxu1  ;;  %v3558_v31 = vrot.slane %v3557_v54, 4  ;;  %v3572_v33 = vrot.slane %v3570_v44, 5  ;;  %v3577_v2 = vrot.slane %v3575_v18, 4  ;;  %v11744_v53 = vld [vmem:[%s19029_s4 + $0x7c4] ss:$8 sps:$4 sm:$0xff]   ;;  %v19257_v26 = vcombine.high %v14341_v8, %v14345_v0 }
 0x178   : > { %19253 = vst [vmem:[#allocation41_spill] sm:$0xff] %v14616_v38  ;;  %4098 = vmatmul.mubr.bf16.gmra.mxu0 %v19254_v58  ;;  %4804 = vmatmul.mubr.bf16.gmra.mxu1 %v19255_v16  ;;  %v3580_v38 = vrot.slane %v3578_v12, 5  ;;  %v14642_v40 = vadd.f32 %v1914_v39, %v1401_v13  ;;  %v19258_v6 = vcombine.high %v14364_v24, %v14368_v3  ;;  %v10714_v55 = vrot.slane %v14497_v34, 9  ;;  %v1403_v54 = vpop.f32.mrf.mxu0  ;;  %v11718_v39 = vld [vmem:[%s19029_s4 + $0x6c0] ss:$8 sps:$4 sm:$0xff]  }
 0x179   : > { %4107 = vmatprep.mubr.bf16.mxu0 %v19257_v26  ;;  %v4362_v57 = vrot.slane %v4360_v15, 4  ;;  %v4363_v9 = vrot.slane %v14565_v32, 5  ;;  %v1916_v44 = vpop.f32.mrf.mxu1  ;;  %v3568_v13 = vrot.slane %v3567_v22, 4  ;;  %v14657_v26 = vld [vmem:[%s13320_s26 + $0x118] sm:$0x11]  ;;  %v4367_v34 = vrot.slane %v14623_v28, 5  ;;  %6361 = vmatprep.subr.bf16.mxu1 %v11741_v11 }
 0x17a   : > { %19256 = vst [vmem:[#allocation42_spill] sm:$0xff] %v14642_v40  ;;  %4813 = vmatprep.mubr.bf16.mxu1 %v19258_v6  ;;  %5400 = vmatpush2.bf16.msra.mxu0 %v11709_v19  ;;  %v14663_v32 = vadd.f32 %v1916_v44, %v1403_v54  ;;  %v14667_v16 = vrot.slane %v3584_v37, 5  ;;  %v3590_v6 = vrot.slane %v3588_v46, 4  ;;  %v11729_v22 = vld [vmem:[%s19029_s4 + $0x6b4] ss:$8 sps:$4 sm:$0xff]   ;;  %v1405_v28 = vpop.f32.mrf.mxu0  ;;  %v14682_v46 = vsel %vm12506_vm2, %v3558_v31, %v14571_v48 }
 0x17b   : > { %5401 = vmatprep.subr.bf16.mxu0 %v11720_v51  ;;  %6362 = vmatpush2.bf16.msra.mxu1 %v11739_v21  ;;  %v11742_v19 = vld [vmem:[%s19029_s4 + $0x7c0] ss:$8 sps:$4 sm:$0xff]   ;;  %v1918_v11 = vpop.f32.mrf.mxu1  ;;  %v3581_v51 = vor.u32 %v3580_v38, %v3577_v2  ;;  %v14688_v44 = vsel %vm13126_vm5, %v10714_v55, %v4360_v15  ;;  %v3594_v58 = vshll.u32 %v14657_v26, 16  ;;  %v10715_v54 = vrot.slane %v14585_v25, 9  ;;  %v11727_v25 = vld [vmem:[%s19029_s4 + $0x6b0] ss:$8 sps:$4 sm:$0xff]  }
 0x17c   : > { %19259 = vst [vmem:[#allocation43_spill] sm:$0xff] %v14663_v32  ;;  %6363 = vmatprep.subr.bf16.mxu1 %v11744_v53  ;;  %v14684_v21 = vadd.f32 %v1918_v11, %v1405_v28  ;;  %v1407_v12 = vpop.f32.mrf.mxu0  ;;  %v14694_v37 = vsel %vm12506_vm2, %v3568_v13, %v3572_v33  ;;  %v14698_v48 = vsel %vm13126_vm5, %v4362_v57, %v4363_v9  ;;  %v4369_v2 = vrot.slane %v4367_v34, 4  ;;  %v14701_v38 = vld [vmem:[%s13320_s26 + $0x120] sm:$0xff]  ;;  %v11750_v33 = vld [vmem:[%s19029_s4 + $0x7b4] ss:$8 sps:$4 sm:$0xff]  }
 0x17d   : > { %v1920_v18 = vpop.f32.mrf.mxu1  ;;  %v3599_v15 = vshrl.u32 %v14701_v38, 16  ;;  %v3591_v53 = vor.u32 %v3590_v6, %v14667_v16  ;;  %v4370_v55 = vrot.slane %v14657_v26, 5  ;;  %v3602_v57 = vshll.u32 %v14701_v38, 16  ;;  %v11738_v9 = vld [vmem:[%s19029_s4 + $0x6a4] ss:$8 sps:$4 sm:$0xff]  }
 0x17e   : > { %19260 = vst [vmem:[#allocation44_spill] sm:$0xff] %v14684_v21  ;;  %5402 = vmatpush2.bf16.msra.mxu0 %v11718_v39  ;;  %v14710_v31 = vadd.f32 %v1920_v18, %v1407_v12  ;;  %v11748_v13 = vld [vmem:[%s19029_s4 + $0x7b0] ss:$8 sps:$4 sm:$0xff]   ;;  %v1411_v39 = vpop.f32.mrf.mxu0  ;;  %v19262_v18 = vcombine.low %v14341_v8, %v14345_v0  ;;  %v19263_v12 = vcombine.low %v14364_v24, %v14368_v3  ;;  %v3582_v6 = vrot.slane %v3581_v51, 4  ;;  %v11756_v40 = vld [vmem:[%s19029_s4 + $0x684] ss:$8 sps:$4 sm:$0xff]  }
 0x17f   : > { %5403 = vmatprep.subr.bf16.mxu0 %v11729_v22  ;;  %6364 = vmatpush2.bf16.msra.mxu1 %v11742_v19  ;;  %v1924_v28 = vpop.f32.mrf.mxu1  ;;  %v14730_v22 = vld [vmem:[%s13320_s26 + $0x128] sm:$0xff]  ;;  %v19265_v8 = vcombine.high %v14414_v49, %v14426_v50  ;;  %v19266_v24 = vcombine.high %v14449_v45, %v14482_v1  ;;  %v14753_v26 = vsel %vm13126_vm5, %v10715_v54, %v4367_v34  ;;  %v3592_v51 = vrot.slane %v3591_v53, 4  ;;  %v11747_v34 = vld [vmem:[%s19029_s4 + $0x694] ss:$8 sps:$4 sm:$0xff]  }
 0x180   : > { %19261 = vst [vmem:[#allocation45_spill] sm:$0xff] %v14710_v31  ;;  %4108 = vmatmul.mubr.bf16.gmra.mxu0 %v19262_v18  ;;  %4814 = vmatmul.mubr.bf16.gmra.mxu1 %v19263_v12  ;;  %v3608_v19 = vshll.u32 %v14730_v22, 16  ;;  %v3612_v11 = vshrl.u32 %v14730_v22, 16  ;;  %v11753_v31 = vld [vmem:[%s19029_s4 + $0x7a4] ss:$8 sps:$4 sm:$0xff]   ;;  %v14737_v0 = vadd.f32 %v1924_v28, %v1411_v39  ;;  %v1413_v18 = vpop.f32.mrf.mxu0  ;;  %v3596_v28 = vrot.slane %v3594_v58, 5 }
 0x181   : > { %4117 = vmatprep.mubr.bf16.mxu0 %v19265_v8  ;;  %4823 = vmatprep.mubr.bf16.mxu1 %v19266_v24  ;;  %v1926_v12 = vpop.f32.mrf.mxu1  ;;  %v14755_v8 = vrot.slane %v3599_v15, 4  ;;  %v11736_v24 = vld [vmem:[%s19029_s4 + $0x6a0] ss:$8 sps:$4 sm:$0xff]   ;;  %v14764_v39 = vsel %vm13126_vm5, %v4369_v2, %v4370_v55  ;;  %v14766_v58 = vrot.slane %v3602_v57, 5  ;;  %v14782_v53 = vld [vmem:[%s13320_s26 + $0x130] sm:$0x11] }
 0x182   : > { %19264 = vst [vmem:[#allocation46_spill] sm:$0xff] %v14737_v0  ;;  %5404 = vmatpush2.bf16.msra.mxu0 %v11727_v25  ;;  %6365 = vmatprep.subr.bf16.mxu1 %v11750_v33  ;;  %v14760_v3 = vadd.f32 %v1926_v12, %v1413_v18  ;;  %v11751_v54 = vld [vmem:[%s19029_s4 + $0x7a0] ss:$8 sps:$4 sm:$0xff]   ;;  %v1415_v15 = vpop.f32.mrf.mxu0  ;;  %v14779_v33 = vsel %vm12506_vm2, %v3582_v6, %v14667_v16  ;;  %v14784_v55 = vrot.slane %v3608_v19, 5  ;;  %v14786_v57 = vrot.slane %v3612_v11, 4  ;;  %v14792_v18 = vld [vmem:[%s13320_s26 + $0x138] sm:$0xff] }
 0x183   : > { %5405 = vmatprep.subr.bf16.mxu0 %v11738_v9  ;;  %6366 = vmatpush2.bf16.msra.mxu1 %v11748_v13  ;;  %v1928_v25 = vpop.f32.mrf.mxu1  ;;  %v3623_v12 = vshrl.u32 %v14792_v18, 16  ;;  %v3626_v2 = vshll.u32 %v14792_v18, 16  ;;  %v14799_v0 = vld [vmem:[%s13320_s26 + $0x140] sm:$0xff]  ;;  %v14818_v21 = vsel %vm12506_vm2, %v3592_v51, %v3596_v28  ;;  %v3618_v32 = vshll.u32 %v14782_v53, 16 }
 0x184   : > { %19267 = vst [vmem:[#allocation47_spill] sm:$0xff] %v14760_v3  ;;  %6367 = vmatprep.subr.bf16.mxu1 %v11753_v31  ;;  %v14788_v9 = vadd.f32 %v1928_v25, %v1415_v15  ;;  %v7837_v3 = vpop.permute.xlu0 %7836  ;;  %v1417_v16 = vpop.f32.mrf.mxu0  ;;  %v3632_v31 = vshll.u32 %v14799_v0, 16  ;;  %v3636_v11 = vshrl.u32 %v14799_v0, 16  ;;  %v11745_v15 = vld [vmem:[%s19029_s4 + $0x690] ss:$8 sps:$4 sm:$0xff]   ;;  %v12094_v13 = vld [vmem:[%s19028_s3] sm:$0xff]  ;;  %v19271_v51 = vcombine.low %v14414_v49, %v14426_v50 }
 0x185   : > { %v1930_v6 = vpop.f32.mrf.mxu1  ;;  %v11759_v25 = vld [vmem:[%s19029_s4 + $0x794] ss:$8 sps:$4 sm:$0xff]   ;;  %v14812_v19 = vsub.f32 %v12094_v13, %v7837_v3  ;;  %v11757_v3 = vld [vmem:[%s19029_s4 + $0x790] ss:$8 sps:$4 sm:$0xff]   ;;  %v7841_v13 = vpop.permute.xlu1 %7840  ;;  %v19272_v28 = vcombine.low %v14449_v45, %v14482_v1  ;;  %v19274_v49 = vcombine.high %v14524_v5, %v14561_v36  ;;  %v19275_v45 = vcombine.high %v14542_v62, %v14546_v27 }
 0x186   : > { %19268 = vst [vmem:[#allocation48_spill] sm:$0xff] %v14788_v9  ;;  %5406 = vmatpush2.bf16.msra.mxu0 %v11736_v24  ;;  %v14814_v9 = vadd.f32 %v1930_v6, %v1417_v16  ;;  %v3605_v24 = vor.u32 %v14766_v58, %v14755_v8  ;;  %v1421_v16 = vpop.f32.mrf.mxu0  ;;  %v3615_v8 = vor.u32 %v14786_v57, %v14784_v55  ;;  %v10716_v58 = vrot.slane %v14701_v38, 9 }
 0x187   : > { %19269 = vst [vmem:[#allocation49_spill] sm:$0xff] %v14812_v19  ;;  %5407 = vmatprep.subr.bf16.mxu0 %v11747_v34  ;;  %6368 = vmatpush2.bf16.msra.mxu1 %v11751_v54  ;;  %v1934_v6 = vpop.f32.mrf.mxu1  ;;  %v4377_v34 = vrot.slane %v14782_v53, 5  ;;  %v11762_v54 = vld [vmem:[%s19029_s4 + $0x784] ss:$8 sps:$4 sm:$0xff]   ;;  %v19276_v1 = vrot.slane %v14730_v22, 5  ;;  %v14853_v53 = vrot.slane %v3623_v12, 4 }
 0x188   : > { %19270 = vst [vmem:[#allocation50_spill] sm:$0xff] %v14814_v9  ;;  %4118 = vmatmul.mubr.bf16.gmra.mxu0 %v19271_v51  ;;  %4824 = vmatmul.mubr.bf16.gmra.mxu1 %v19272_v28  ;;  %v7964_v9 = vmul.f32 0.5, %v14812_v19  ;;  %v14843_v50 = vadd.f32 %v1934_v6, %v1421_v16  ;;  %v14855_v57 = vrot.slane %v3626_v2, 5  ;;  %v7839_v51 = vpop.permute.xlu0 %7838  ;;  %v1423_v28 = vpop.f32.mrf.mxu0  ;;  %v14858_v16 = vld [vmem:[%s13320_s26 + $0x148] sm:$0x11]  ;;  %v14860_v6 = vrot.slane %v3632_v31, 5 }
 0x189   : > { %4127 = vmatprep.mubr.bf16.mxu0 %v19274_v49  ;;  %4833 = vmatprep.mubr.bf16.mxu1 %v19275_v45  ;;  %v4376_v38 = vrot.slane %v19276_v1, 4  ;;  %v1936_v14 = vpop.f32.mrf.mxu1  ;;  %v11754_v49 = vld [vmem:[%s19029_s4 + $0x680] ss:$8 sps:$4 sm:$0xff]   ;;  %v12095_v2 = vld [vmem:[%s19028_s3 + $0x10] sm:$0xff]  ;;  %v3606_v1 = vrot.slane %v3605_v24, 4 }
 0x18a   : > { %19273 = vst [vmem:[#allocation51_spill] sm:$0xff] %v14843_v50  ;;  %v14862_v50 = vrot.slane %v3636_v11, 4  ;;  %5408 = vmatpush2.bf16.msra.mxu0 %v11745_v15  ;;  %6369 = vmatprep.subr.bf16.mxu1 %v11759_v25  ;;  %v14870_v12 = vsub.f32 %v12095_v2, %v7841_v13  ;;  %v12096_v45 = vld [vmem:[%s19028_s3 + $0x8] sm:$0xff]  ;;  %v14877_v11 = vadd.f32 %v1936_v14, %v1423_v28  ;;  %v1425_v2 = vpop.f32.mrf.mxu0  ;;  %v3616_v28 = vrot.slane %v3615_v8, 4  ;;  %v7843_v8 = vpop.permute.xlu1 %7842 }
 0x18b   : > { %v14875_v31 = vsub.f32 %v12096_v45, %v7839_v51  ;;  %5409 = vmatprep.subr.bf16.mxu0 %v11756_v40  ;;  %6370 = vmatpush2.bf16.msra.mxu1 %v11757_v3  ;;  %v11760_v13 = vld [vmem:[%s19029_s4 + $0x780] ss:$8 sps:$4 sm:$0xff]   ;;  %v11767_v51 = vld [vmem:[%s19029_s4 + $0x874] ss:$8 sps:$4 sm:$0xff]   ;;  %v1938_v14 = vpop.f32.mrf.mxu1  ;;  %v3620_v45 = vrot.slane %v3618_v32, 5  ;;  %v19278_v15 = vrot.slane %v14730_v22, 5  ;;  %v14901_v3 = vsel %vm13126_vm5, %v4376_v38, %v4377_v34 }
 0x18c   : > { %19277 = vst [vmem:[#allocation52_spill] sm:$0xff] %v14877_v11  ;;  %6371 = vmatprep.subr.bf16.mxu1 %v11762_v54  ;;  %8028 = vrot.lane.b32.xlu0 %v7964_v9, %s12236_s16  ;;  %v14897_v24 = vadd.f32 %v1938_v14, %v1425_v2  ;;  %v3629_v32 = vor.u32 %v14855_v57, %v14853_v53  ;;  %v3642_v22 = vshll.u32 %v14858_v16, 16  ;;  %v12097_v2 = vld [vmem:[%s19028_s3 + $0x18] sm:$0xff]  ;;  %v12098_v34 = vld [vmem:[%s19028_s3 + $0x20] sm:$0xff]  ;;  %v7966_v53 = vmul.f32 0.5, %v14870_v12 }
 0x18d   : > { %v14893_v25 = vsel %vm13126_vm5, %v10716_v58, %v19278_v15  ;;  %v7965_v40 = vmul.f32 0.5, %v14875_v31  ;;  %v7845_v58 = vpop.permute.xlu0 %7844  ;;  %v1427_v15 = vpop.f32.mrf.mxu0  ;;  %v3639_v9 = vor.u32 %v14862_v50, %v14860_v6  ;;  %v14911_v14 = vsub.f32 %v12097_v2, %v7843_v8 }
 0x18e   : > { %19279 = vst [vmem:[#allocation53_spill] sm:$0xff] %v14897_v24  ;;  %v1940_v54 = vpop.f32.mrf.mxu1  ;;  %5410 = vmatpush2.bf16.msra.mxu0 %v11754_v49  ;;  %v14916_v38 = vsub.f32 %v12098_v34, %v7845_v58  ;;  %v14927_v49 = vsel %vm12506_vm2, %v3606_v1, %v14784_v55  ;;  %v19283_v58 = vcombine.low %v14524_v5, %v14561_v36  ;;  %v4381_v1 = vrot.slane %v14799_v0, 5 }
 0x18f   : > { %19280 = vst [vmem:[#allocation54_spill] sm:$0xff] %v14911_v14  ;;  %8030 = vrot.lane.b32.xlu1 %v7965_v40, %s12236_s16  ;;  %v14920_v57 = vadd.f32 %v1940_v54, %v1427_v15  ;;  %6372 = vmatpush2.bf16.msra.mxu1 %v11760_v13  ;;  %v2429_v8 = vpop.f32.mrf.mxu0  ;;  %v19284_v40 = vcombine.low %v14542_v62, %v14546_v27  ;;  %v7967_v13 = vmul.f32 0.5, %v14911_v14  ;;  %v3630_v36 = vrot.slane %v3629_v32, 4 }
 0x190   : > { %19281 = vst [vmem:[#allocation55_spill] sm:$0xff] %v14916_v38  ;;  %7047 = vmatprep.subr.bf16.mxu0 %v11767_v51  ;;  %4128 = vmatmul.mubr.bf16.gmra.mxu0 %v19283_v58  ;;  %v3087_v2 = vpop.f32.mrf.mxu1  ;;  %v14937_v15 = vsel %vm12506_vm2, %v3616_v28, %v3620_v45  ;;  %v2588_v51 = vadd.f32 %v2429_v8, %v13682_v29  ;;  %v3644_v28 = vrot.slane %v3642_v22, 5  ;;  %v7847_v45 = vpop.permute.xlu1 %7846  ;;  %v3640_v58 = vrot.slane %v3639_v9, 4  ;;  %v12099_v29 = vld [vmem:[%s19028_s3 + $0x28] sm:$0xff] }
 0x191   : > { %19282 = vst [vmem:[#allocation56_spill] sm:$0xff] %v14920_v57  ;;  %4834 = vmatmul.mubr.bf16.gmra.mxu1 %v19284_v40  ;;  %v19285_v5 = vcombine.high %v14599_v23, %v14620_v63  ;;  %v19286_v62 = vcombine.high %v14603_v59, %v14607_v17  ;;  %v7849_v54 = vpop.permute.xlu0 %7848  ;;  %v2431_v0 = vpop.f32.mrf.mxu0  ;;  %8032 = vrot.lane.b32.xlu0 %v7966_v53, %s12236_s16  ;;  %v12100_v40 = vld [vmem:[%s19028_s3 + $0x30] sm:$0xff]  ;;  %v7968_v22 = vmul.f32 0.5, %v14916_v38  ;;  %v4383_v55 = vrot.slane %v4381_v1, 4 }
 0x192   : > { %v3089_v34 = vpop.f32.mrf.mxu1  ;;  %v14956_v8 = vsub.f32 %v12099_v29, %v7847_v45  ;;  %v14961_v32 = vsub.f32 %v12100_v40, %v7849_v54  ;;  %v2589_v9 = vadd.f32 %v2431_v0, %v13690_v7  ;;  %v4384_v27 = vrot.slane %v14858_v16, 5  ;;  %v14973_v54 = vld [vmem:[%s13320_s26 + $0x150] sm:$0xff] }
 0x193   : > { %4137 = vmatprep.mubr.bf16.mxu0 %v19285_v5  ;;  %4843 = vmatprep.mubr.bf16.mxu1 %v19286_v62  ;;  %v14966_v5 = vadd.f32 %v3087_v2, %v2588_v51  ;;  %v10717_v62 = vrot.slane %v14792_v18, 9  ;;  %v2433_v45 = vpop.f32.mrf.mxu0  ;;  %v14983_v51 = vsel %vm12506_vm2, %v3630_v36, %v14860_v6  ;;  %v3650_v18 = vshll.u32 %v14973_v54, 16  ;;  %v12103_v6 = vld [vmem:[%s19028_s3 + $0x40] sm:$0xff] }
 0x194   : > { %19287 = vst [vmem:[#allocation57_spill] sm:$0xff] %v14956_v8  ;;  %19288 = vst [vmem:[#allocation58_spill] sm:$0xff] %v14961_v32  ;;  %8034 = vrot.lane.b32.xlu1 %v7967_v13, %s12236_s16  ;;  %v3091_v29 = vpop.f32.mrf.mxu1  ;;  %v3647_v13 = vshrl.u32 %v14973_v54, 16  ;;  %v7969_v40 = vmul.f32 0.5, %v14956_v8  ;;  %v2590_v7 = vadd.f32 %v2433_v45, %v13699_v41  ;;  %v14978_v2 = vadd.f32 %v3089_v34, %v2589_v9  ;;  %v7851_v0 = vpop.permute.xlu1 %7850  ;;  %v12102_v41 = vld [vmem:[%s19028_s3 + $0x38] sm:$0xff] }
 0x195   : > { %19289 = vst [vmem:[#allocation59_spill] sm:$0xff] %v14966_v5  ;;  %v7853_v16 = vpop.permute.xlu0 %7852  ;;  %v2435_v53 = vpop.f32.mrf.mxu0  ;;  %v14988_v5 = vsel %vm12506_vm2, %v3640_v58, %v3644_v28  ;;  %8036 = vrot.lane.b32.xlu0 %v7968_v22, %s12236_s16  ;;  %v14994_v34 = vsub.f32 %v12102_v41, %v7851_v0  ;;  %v7970_v9 = vmul.f32 0.5, %v14961_v32  ;;  %v15007_v22 = vld [vmem:[%s13320_s26 + $0x158] sm:$0xff] }
 0x196   : > { %19290 = vst [vmem:[#allocation60_spill] sm:$0xff] %v14978_v2  ;;  %v3093_v50 = vpop.f32.mrf.mxu1  ;;  %v14999_v36 = vsub.f32 %v12103_v6, %v7853_v16  ;;  %v2591_v28 = vadd.f32 %v2435_v53, %v13702_v20  ;;  %v15004_v58 = vadd.f32 %v3091_v29, %v2590_v7  ;;  %v3656_v45 = vshll.u32 %v15007_v22, 16 }
 0x197   : > { %19291 = vst [vmem:[#allocation61_spill] sm:$0xff] %v14994_v34  ;;  %v3660_v0 = vshrl.u32 %v15007_v22, 16  ;;  %v2439_v41 = vpop.f32.mrf.mxu0  ;;  %v19294_v2 = vcombine.low %v14599_v23, %v14620_v63  ;;  %v15021_v53 = vsel %vm13126_vm5, %v10717_v62, %v4381_v1  ;;  %v15023_v29 = vrot.slane %v3647_v13, 4 }
 0x198   : > { %19292 = vst [vmem:[#allocation62_spill] sm:$0xff] %v14999_v36  ;;  %8038 = vrot.lane.b32.xlu1 %v7969_v40, %s12236_s16  ;;  %19293 = vst [vmem:[#allocation63_spill] sm:$0xff] %v15004_v58  ;;  %v3097_v16 = vpop.f32.mrf.mxu1  ;;  %v19295_v40 = vcombine.low %v14603_v59, %v14607_v17  ;;  %v7971_v7 = vmul.f32 0.5, %v14994_v34  ;;  %v2592_v6 = vadd.f32 %v2439_v41, %v13713_v56  ;;  %v3652_v1 = vrot.slane %v3650_v18, 5  ;;  %v7855_v62 = vpop.permute.xlu1 %7854 }
 0x199   : > { %4138 = vmatmul.mubr.bf16.gmra.mxu0 %v19294_v2  ;;  %v15027_v23 = vadd.f32 %v3093_v50, %v2591_v28  ;;  %v19297_v63 = vcombine.high %v14682_v46, %v14694_v37  ;;  %v19298_v59 = vcombine.high %v14688_v44, %v14698_v48  ;;  %v15037_v17 = vsel %vm13126_vm5, %v4383_v55, %v4384_v27  ;;  %v7857_v13 = vpop.permute.xlu0 %7856  ;;  %v2441_v2 = vpop.f32.mrf.mxu0  ;;  %v12105_v50 = vld [vmem:[%s19028_s3 + $0x48] sm:$0xff]  ;;  %v12106_v55 = vld [vmem:[%s19028_s3 + $0x50] sm:$0xff] }
 0x19a   : > { %4844 = vmatmul.mubr.bf16.gmra.mxu1 %v19295_v40  ;;  %v3099_v40 = vpop.f32.mrf.mxu1  ;;  %8040 = vrot.lane.b32.xlu0 %v7970_v9, %s12236_s16  ;;  %v15045_v28 = vsub.f32 %v12105_v50, %v7855_v62  ;;  %v15050_v27 = vsub.f32 %v12106_v55, %v7857_v13  ;;  %v7972_v18 = vmul.f32 0.5, %v14999_v36  ;;  %v2593_v41 = vadd.f32 %v2441_v2, %v13722_v43  ;;  %v2696_v55 = vld [vmem:[%s13320_s26 + $0x160] sm:$0x11] }
 0x19b   : > { %19296 = vst [vmem:[#allocation64_spill] sm:$0xff] %v15027_v23  ;;  %4147 = vmatprep.mubr.bf16.mxu0 %v19297_v63  ;;  %4853 = vmatprep.mubr.bf16.mxu1 %v19298_v59  ;;  %v15055_v9 = vadd.f32 %v3097_v16, %v2592_v6  ;;  %v15057_v63 = vrot.slane %v3656_v45, 5  ;;  %v3662_v59 = vrot.slane %v3660_v0, 4  ;;  %v2443_v62 = vpop.f32.mrf.mxu0  ;;  %v19302_v23 = vld [vmem:[#allocation3_spill] sm:$0xff]  ;;  %v3653_v45 = vor.u32 %v3652_v1, %v15023_v29  ;;  %v12109_v29 = vld [vmem:[%s19028_s3 + $0x60] sm:$0xff] }
 0x19c   : > { %19299 = vst [vmem:[#allocation65_spill] sm:$0xff] %v15045_v28  ;;  %19300 = vst [vmem:[#allocation66_spill] sm:$0xff] %v15050_v27  ;;  %8042 = vrot.lane.b32.xlu1 %v7971_v7, %s12236_s16  ;;  %v3101_v50 = vpop.f32.mrf.mxu1  ;;  %v4388_v7 = vrot.slane %v15007_v22, 5  ;;  %v7973_v20 = vmul.f32 0.5, %v15045_v28  ;;  %v2594_v43 = vadd.f32 %v2443_v62, %v19302_v23  ;;  %v15067_v16 = vadd.f32 %v3099_v40, %v2593_v41  ;;  %v15071_v0 = vld [vmem:[%s13320_s26 + $0x168] sm:$0xff]  ;;  %v7859_v2 = vpop.permute.xlu1 %7858  ;;  %v12108_v22 = vld [vmem:[%s19028_s3 + $0x58] sm:$0xff] }
 0x19d   : > { %19301 = vst [vmem:[#allocation67_spill] sm:$0xff] %v15055_v9  ;;  %v3671_v6 = vshrl.u32 %v15071_v0, 16  ;;  %v7861_v56 = vpop.permute.xlu0 %7860  ;;  %v2445_v9 = vpop.f32.mrf.mxu0  ;;  %v3674_v13 = vshll.u32 %v15071_v0, 16  ;;  %v15079_v23 = vsub.f32 %v12108_v22, %v7859_v2  ;;  %v7974_v40 = vmul.f32 0.5, %v15050_v27  ;;  %v19306_v41 = vld [vmem:[#allocation4_spill] sm:$0xff] }
 0x19e   : > { %19303 = vst [vmem:[#allocation3_spill] sm:$0xff] %v15067_v16  ;;  %v3103_v58 = vpop.f32.mrf.mxu1  ;;  %8044 = vrot.lane.b32.xlu0 %v7972_v18, %s12236_s16  ;;  %v15084_v1 = vsub.f32 %v12109_v29, %v7861_v56  ;;  %v2595_v62 = vadd.f32 %v2445_v9, %v19306_v41  ;;  %v15089_v16 = vadd.f32 %v3101_v50, %v2594_v43  ;;  %v3666_v57 = vshll.u32 %v2696_v55, 16  ;;  %v19310_v50 = vld [vmem:[#allocation5_spill] sm:$0xff] }
 0x19f   : > { %19304 = vst [vmem:[#allocation68_spill] sm:$0xff] %v15079_v23  ;;  %v3663_v18 = vor.u32 %v3662_v59, %v15057_v63  ;;  %v2449_v24 = vpop.f32.mrf.mxu0  ;;  %v19308_v2 = vcombine.low %v14682_v46, %v14694_v37  ;;  %v19309_v56 = vcombine.low %v14688_v44, %v14698_v48  ;;  %v4390_v29 = vrot.slane %v4388_v7, 4 }
 0x1a0   : > { %19305 = vst [vmem:[#allocation69_spill] sm:$0xff] %v15084_v1  ;;  %8046 = vrot.lane.b32.xlu1 %v7973_v20, %s12236_s16  ;;  %19307 = vst [vmem:[#allocation4_spill] sm:$0xff] %v15089_v16  ;;  %v3107_v22 = vpop.f32.mrf.mxu1  ;;  %v10718_v20 = vrot.slane %v14973_v54, 9  ;;  %v4391_v11 = vrot.slane %v2696_v55, 5  ;;  %v7975_v9 = vmul.f32 0.5, %v15079_v23  ;;  %v2596_v43 = vadd.f32 %v2449_v24, %v19310_v50  ;;  %v7863_v48 = vpop.permute.xlu1 %7862  ;;  %v12110_v24 = vld [vmem:[%s19028_s3 + $0x68] sm:$0xff] }
 0x1a1   : > { %4148 = vmatmul.mubr.bf16.gmra.mxu0 %v19308_v2  ;;  %v15101_v59 = vadd.f32 %v3103_v58, %v2595_v62  ;;  %v19312_v41 = vcombine.high %v14779_v33, %v14818_v21  ;;  %v19313_v37 = vcombine.high %v14753_v26, %v14764_v39  ;;  %v3654_v46 = vrot.slane %v3653_v45, 4  ;;  %v7865_v54 = vpop.permute.xlu0 %7864  ;;  %v2451_v55 = vpop.f32.mrf.mxu0  ;;  %v12111_v45 = vld [vmem:[%s19028_s3 + $0x70] sm:$0xff]  ;;  %v19316_v62 = vld [vmem:[#allocation6_spill] sm:$0xff] }
 0x1a2   : > { %4854 = vmatmul.mubr.bf16.gmra.mxu1 %v19309_v56  ;;  %v15109_v44 = vrot.slane %v3671_v6, 4  ;;  %v3109_v2 = vpop.f32.mrf.mxu1  ;;  %v15111_v56 = vrot.slane %v3674_v13, 5  ;;  %8048 = vrot.lane.b32.xlu0 %v7974_v40, %s12236_s16  ;;  %v15117_v58 = vsub.f32 %v12110_v24, %v7863_v48  ;;  %v15122_v6 = vsub.f32 %v12111_v45, %v7865_v54  ;;  %v15149_v45 = vld [vmem:[%s13320_s26 + $0x178] sm:$0x11] }
 0x1a3   : > { %19311 = vst [vmem:[#allocation5_spill] sm:$0xff] %v15101_v59  ;;  %4157 = vmatprep.mubr.bf16.mxu0 %v19312_v41  ;;  %4863 = vmatprep.mubr.bf16.mxu1 %v19313_v37  ;;  %v7976_v13 = vmul.f32 0.5, %v15084_v1  ;;  %v2597_v40 = vadd.f32 %v2451_v55, %v19316_v62  ;;  %v15127_v50 = vadd.f32 %v3107_v22, %v2596_v43  ;;  %v3664_v41 = vrot.slane %v3663_v18, 4  ;;  %v2453_v48 = vpop.f32.mrf.mxu0  ;;  %v19318_v22 = vld [vmem:[#allocation7_spill] sm:$0xff]  ;;  %v15152_v62 = vld [vmem:[%s13320_s26 + $0x170] sm:$0xff]  ;;  %s12238_s26 = smov 3  }
 0x1a4   : > { %19314 = vst [vmem:[#allocation70_spill] sm:$0xff] %v15117_v58  ;;  %19315 = vst [vmem:[#allocation71_spill] sm:$0xff] %v15122_v6  ;;  %8050 = vrot.lane.b32.xlu1 %v7975_v9, %s12236_s16  ;;  %v3668_v37 = vrot.slane %v3666_v57, 5  ;;  %v3111_v24 = vpop.f32.mrf.mxu1  ;;  %v15133_v54 = vsel %vm13126_vm5, %v10718_v20, %v4388_v7  ;;  %v15137_v9 = vsel %vm13126_vm5, %v4390_v29, %v4391_v11  ;;  %v7977_v55 = vmul.f32 0.5, %v15117_v58  ;;  %v7867_v20 = vpop.permute.xlu1 %7866 }
 0x1a5   : > { %19317 = vst [vmem:[#allocation6_spill] sm:$0xff] %v15127_v50  ;;  %v2598_v43 = vadd.f32 %v2453_v48, %v19318_v22  ;;  %v15141_v18 = vadd.f32 %v3109_v2, %v2597_v40  ;;  %v15146_v57 = vsel %vm12506_vm2, %v3654_v46, %v15057_v63  ;;  %v3680_v7 = vshll.u32 %v15152_v62, 16  ;;  %v7869_v11 = vpop.permute.xlu0 %7868  ;;  %v2455_v29 = vpop.f32.mrf.mxu0  ;;  %v12113_v63 = vld [vmem:[%s19028_s3 + $0x78] sm:$0xff]  ;;  %v12114_v2 = vld [vmem:[%s19028_s3 + $0x80] sm:$0xff] }
 0x1a6   : > { %v3113_v59 = vpop.f32.mrf.mxu1  ;;  %v3677_v48 = vor.u32 %v15111_v56, %v15109_v44  ;;  %8052 = vrot.lane.b32.xlu0 %v7976_v13, %s12236_s16  ;;  %v15167_v46 = vsub.f32 %v12113_v63, %v7867_v20  ;;  %v15172_v40 = vsub.f32 %v12114_v2, %v7869_v11  ;;  %v7978_v44 = vmul.f32 0.5, %v15122_v6  ;;  %v19322_v56 = vld [vmem:[#allocation8_spill] sm:$0xff] }
 0x1a7   : > { %19319 = vst [vmem:[#allocation7_spill] sm:$0xff] %v15141_v18  ;;  %v2599_v22 = vadd.f32 %v2455_v29, %v19322_v56  ;;  %v15177_v18 = vadd.f32 %v3111_v24, %v2598_v43  ;;  %v15181_v13 = vsel %vm12506_vm2, %v3664_v41, %v3668_v37  ;;  %v3684_v20 = vshrl.u32 %v15152_v62, 16  ;;  %v2459_v63 = vpop.f32.mrf.mxu0  ;;  %v19326_v29 = vld [vmem:[#allocation9_spill] sm:$0xff] }
 0x1a8   : > { %19320 = vst [vmem:[#allocation72_spill] sm:$0xff] %v15167_v46  ;;  %19321 = vst [vmem:[#allocation73_spill] sm:$0xff] %v15172_v40  ;;  %8054 = vrot.lane.b32.xlu1 %v7977_v55, %s12236_s16  ;;  %v19324_v11 = vcombine.low %v14779_v33, %v14818_v21  ;;  %v3117_v2 = vpop.f32.mrf.mxu1  ;;  %v19325_v55 = vcombine.low %v14753_v26, %v14764_v39  ;;  %v3690_v37 = vshll.u32 %v15149_v45, 16  ;;  %v7979_v43 = vmul.f32 0.5, %v15167_v46  ;;  %v7871_v24 = vpop.permute.xlu1 %7870 }
 0x1a9   : > { %19323 = vst [vmem:[#allocation8_spill] sm:$0xff] %v15177_v18  ;;  %v2600_v56 = vadd.f32 %v2459_v63, %v19326_v29  ;;  %v15197_v21 = vadd.f32 %v3113_v59, %v2599_v22  ;;  %v19328_v33 = vcombine.high %v14927_v49, %v14937_v15  ;;  %v19329_v26 = vcombine.high %v14893_v25, %v14901_v3  ;;  %v7873_v41 = vpop.permute.xlu0 %7872  ;;  %v2461_v18 = vpop.f32.mrf.mxu0  ;;  %v15214_v22 = vld [vmem:[%s15161_s13 + $0x8] sm:$0xff] }
 0x1aa   : > { %4158 = vmatmul.mubr.bf16.gmra.mxu0 %v19324_v11  ;;  %4864 = vmatmul.mubr.bf16.gmra.mxu1 %v19325_v55  ;;  %v15205_v39 = vrot.slane %v3680_v7, 5  ;;  %v15209_v55 = vld [vmem:[%s15161_s13] sm:$0xff]  ;;  %v3119_v63 = vpop.f32.mrf.mxu1  ;;  %v12115_v7 = vld [vmem:[%s19028_s3 + $0x88] sm:$0xff]  ;;  %v7980_v59 = vmul.f32 0.5, %v15172_v40  ;;  %v3686_v16 = vrot.slane %v3684_v20, 4  ;;  %v19340_v40 = vrot.slane %v15152_v62, 5 }
 0x1ab   : > { %19327 = vst [vmem:[#allocation9_spill] sm:$0xff] %v15197_v21  ;;  %4167 = vmatprep.mubr.bf16.mxu0 %v19328_v33  ;;  %4873 = vmatprep.mubr.bf16.mxu1 %v19329_v26  ;;  %v15220_v29 = vsub.f32 %v12115_v7, %v7871_v24  ;;  %v12116_v33 = vld [vmem:[%s19028_s3 + $0x90] sm:$0xff]  ;;  %v19332_v11 = vld [vmem:[#allocation10_spill] sm:$0xff]  ;;  %v15230_v50 = vadd.f32 %v3117_v2, %v2600_v56  ;;  %v2463_v46 = vpop.f32.mrf.mxu0  ;;  %v15232_v24 = vrot.slane %v3690_v37, 5  ;;  %v5637_v7 = vshrl.u32 %v15209_v55, 16 }
 0x1ac   : > { %8056 = vrot.lane.b32.xlu0 %v7978_v44, %s12236_s16  ;;  %v15225_v26 = vsub.f32 %v12116_v33, %v7873_v41  ;;  %8058 = vrot.lane.b32.xlu1 %v7979_v43, %s12236_s16  ;;  %v2601_v21 = vadd.f32 %v2461_v18, %v19332_v11  ;;  %v3678_v44 = vrot.slane %v3677_v48, 4  ;;  %v3121_v6 = vpop.f32.mrf.mxu1  ;;  %v5640_v58 = vshll.u32 %v15209_v55, 16  ;;  %v19334_v33 = vld [vmem:[#allocation11_spill] sm:$0xff]  ;;  %v7875_v48 = vpop.permute.xlu1 %7874 }
 0x1ad   : > { %19330 = vst [vmem:[#allocation74_spill] sm:$0xff] %v15220_v29  ;;  %19333 = vst [vmem:[#allocation10_spill] sm:$0xff] %v15230_v50  ;;  %v7981_v41 = vmul.f32 0.5, %v15220_v29  ;;  %v2602_v43 = vadd.f32 %v2463_v46, %v19334_v33  ;;  %v5646_v18 = vshll.u32 %v15214_v22, 16  ;;  %v5650_v2 = vshrl.u32 %v15214_v22, 16  ;;  %v7877_v20 = vpop.permute.xlu0 %7876  ;;  %v2465_v56 = vpop.f32.mrf.mxu0  ;;  %v12117_v50 = vld [vmem:[%s19028_s3 + $0x98] sm:$0xff] }
 0x1ae   : > { %19331 = vst [vmem:[#allocation75_spill] sm:$0xff] %v15225_v26  ;;  %v15238_v1 = vadd.f32 %v3119_v63, %v2601_v21  ;;  %v3123_v11 = vpop.f32.mrf.mxu1  ;;  %v10719_v37 = vrot.slane %v15071_v0, 9  ;;  %v15247_v46 = vsub.f32 %v12117_v50, %v7875_v48  ;;  %v12118_v21 = vld [vmem:[%s19028_s3 + $0xa0] sm:$0xff]  ;;  %v7982_v33 = vmul.f32 0.5, %v15225_v26  ;;  %v19338_v0 = vld [vmem:[#allocation12_spill] sm:$0xff] }
 0x1af   : > { %v15252_v63 = vsub.f32 %v12118_v21, %v7877_v20  ;;  %v3687_v29 = vor.u32 %v3686_v16, %v15205_v39  ;;  %v4397_v50 = vrot.slane %v19340_v40, 4  ;;  %v2469_v48 = vpop.f32.mrf.mxu0  ;;  %v19341_v23 = vcombine.low %v14927_v49, %v14937_v15 }
 0x1b0   : > { %19335 = vst [vmem:[#allocation11_spill] sm:$0xff] %v15238_v1  ;;  %8060 = vrot.lane.b32.xlu0 %v7980_v59, %s12236_s16  ;;  %19336 = vst [vmem:[#allocation76_spill] sm:$0xff] %v15247_v46  ;;  %8062 = vrot.lane.b32.xlu1 %v7981_v41, %s12236_s16  ;;  %v2603_v1 = vadd.f32 %v2465_v56, %v19338_v0  ;;  %v15257_v59 = vadd.f32 %v3121_v6, %v2602_v43  ;;  %v3127_v20 = vpop.f32.mrf.mxu1  ;;  %v4398_v21 = vrot.slane %v15149_v45, 5  ;;  %v4980_v6 = vld [vmem:[%s15161_s13 + $0x10] sm:$0x11]  ;;  %v19343_v0 = vld [vmem:[#allocation13_spill] sm:$0xff] }
 0x1b1   : > { %19337 = vst [vmem:[#allocation77_spill] sm:$0xff] %v15252_v63  ;;  %v19342_v41 = vcombine.low %v14893_v25, %v14901_v3  ;;  %v5639_v43 = vrot.slane %v5637_v7, 4  ;;  %v5642_v56 = vrot.slane %v5640_v58, 5  ;;  %v7983_v16 = vmul.f32 0.5, %v15247_v46  ;;  %v7881_v45 = vpop.permute.xlu0 %7880  ;;  %v2471_v58 = vpop.f32.mrf.mxu0 }
 0x1b2   : > { %19339 = vst [vmem:[#allocation12_spill] sm:$0xff] %v15257_v59  ;;  %4168 = vmatmul.mubr.bf16.gmra.mxu0 %v19341_v23  ;;  %v2604_v40 = vadd.f32 %v2469_v48, %v19343_v0  ;;  %v15272_v59 = vadd.f32 %v3123_v11, %v2603_v1  ;;  %v19345_v49 = vcombine.high %v14983_v51, %v14988_v5  ;;  %v15280_v3 = vrot.slane %v5646_v18, 5  ;;  %v7879_v23 = vpop.permute.xlu1 %7878  ;;  %v3129_v7 = vpop.f32.mrf.mxu1  ;;  %v15288_v11 = vld [vmem:[%s15161_s13 + $0x18] sm:$0xff]  ;;  %v12119_v48 = vld [vmem:[%s19028_s3 + $0xa8] sm:$0xff] }
 0x1b3   : > { %4874 = vmatmul.mubr.bf16.gmra.mxu1 %v19342_v41  ;;  %v19346_v25 = vcombine.high %v15021_v53, %v15037_v17  ;;  %v5652_v15 = vrot.slane %v5650_v2, 4  ;;  %v15285_v1 = vsel %vm12506_vm2, %v3678_v44, %v15205_v39  ;;  %v15294_v18 = vsub.f32 %v12119_v48, %v7879_v23  ;;  %v12120_v2 = vld [vmem:[%s19028_s3 + $0xb0] sm:$0xff]  ;;  %v19349_v44 = vld [vmem:[#allocation14_spill] sm:$0xff] }
 0x1b4   : > { %19344 = vst [vmem:[#allocation13_spill] sm:$0xff] %v15272_v59  ;;  %4177 = vmatprep.mubr.bf16.mxu0 %v19345_v49  ;;  %8064 = vrot.lane.b32.xlu0 %v7982_v33, %s12236_s16  ;;  %v15299_v41 = vsub.f32 %v12120_v2, %v7881_v45  ;;  %v7984_v39 = vmul.f32 0.5, %v15252_v63  ;;  %v2605_v0 = vadd.f32 %v2471_v58, %v19349_v44  ;;  %v3688_v33 = vrot.slane %v3687_v29, 4  ;;  %v2473_v59 = vpop.f32.mrf.mxu0  ;;  %v3131_v23 = vpop.f32.mrf.mxu1 }
 0x1b5   : > { %4883 = vmatprep.mubr.bf16.mxu1 %v19346_v25  ;;  %19347 = vst [vmem:[#allocation78_spill] sm:$0xff] %v15294_v18  ;;  %v15303_v49 = vadd.f32 %v3127_v20, %v2604_v40  ;;  %v5656_v25 = vshll.u32 %v4980_v6, 16  ;;  %8066 = vrot.lane.b32.xlu1 %v7983_v16, %s12236_s16  ;;  %v19351_v48 = vrot.slane %v15152_v62, 5  ;;  %v15314_v45 = vsel %vm13126_vm5, %v4397_v50, %v4398_v21  ;;  %v15322_v40 = vld [vmem:[%s15161_s13 + $0x20] sm:$0xff] }
 0x1b6   : > { %19348 = vst [vmem:[#allocation79_spill] sm:$0xff] %v15299_v41  ;;  %v5643_v2 = vor.u32 %v5642_v56, %v5639_v43  ;;  %v7985_v20 = vmul.f32 0.5, %v15294_v18  ;;  %v2606_v29 = vadd.f32 %v2473_v59, %v13899_v4  ;;  %v15318_v6 = vadd.f32 %v3129_v7, %v2605_v0  ;;  %v7883_v58 = vpop.permute.xlu1 %7882  ;;  %v2475_v44 = vpop.f32.mrf.mxu0  ;;  %v12121_v4 = vld [vmem:[%s19028_s3 + $0xb8] sm:$0xff]  ;;  %v12122_v21 = vld [vmem:[%s19028_s3 + $0xc0] sm:$0xff] }
 0x1b7   : > { %19350 = vst [vmem:[#allocation14_spill] sm:$0xff] %v15303_v49  ;;  %v15310_v46 = vsel %vm13126_vm5, %v10719_v37, %v19351_v48  ;;  %v5653_v16 = vor.u32 %v5652_v15, %v15280_v3  ;;  %v5661_v62 = vshrl.u32 %v15288_v11, 16  ;;  %v7885_v37 = vpop.permute.xlu0 %7884  ;;  %v3133_v48 = vpop.f32.mrf.mxu1  ;;  %v5664_v50 = vshll.u32 %v15288_v11, 16 }
 0x1b8   : > { %19352 = vst [vmem:[#allocation80_spill] sm:$0xff] %v15318_v6  ;;  %8068 = vrot.lane.b32.xlu0 %v7984_v39, %s12236_s16  ;;  %v15330_v59 = vsub.f32 %v12121_v4, %v7883_v58  ;;  %v15335_v43 = vsub.f32 %v12122_v21, %v7885_v37  ;;  %v7986_v56 = vmul.f32 0.5, %v15299_v41  ;;  %v2607_v15 = vadd.f32 %v2475_v44, %v13909_v42  ;;  %v2479_v58 = vpop.f32.mrf.mxu0 }
 0x1b9   : > { %v15339_v7 = vadd.f32 %v3131_v23, %v2606_v29  ;;  %v15344_v39 = vsel %vm12506_vm2, %v3688_v33, %v15232_v24  ;;  %v5658_v0 = vrot.slane %v5656_v25, 5  ;;  %8070 = vrot.lane.b32.xlu1 %v7985_v20, %s12236_s16  ;;  %v19356_v4 = vcombine.low %v14983_v51, %v14988_v5  ;;  %v3137_v37 = vpop.f32.mrf.mxu1  ;;  %v19358_v33 = vld [vmem:[#allocation15_spill] sm:$0xff] }
 0x1ba   : > { %19353 = vst [vmem:[#allocation81_spill] sm:$0xff] %v15330_v59  ;;  %19354 = vst [vmem:[#allocation82_spill] sm:$0xff] %v15335_v43  ;;  %v19357_v21 = vcombine.low %v15021_v53, %v15037_v17  ;;  %v5644_v42 = vrot.slane %v5643_v2, 4  ;;  %v5670_v23 = vshll.u32 %v15322_v40, 16  ;;  %v5674_v29 = vshrl.u32 %v15322_v40, 16  ;;  %v7887_v2 = vpop.permute.xlu1 %7886 }
 0x1bb   : > { %19355 = vst [vmem:[#allocation83_spill] sm:$0xff] %v15339_v7  ;;  %4178 = vmatmul.mubr.bf16.gmra.mxu0 %v19356_v4  ;;  %v7987_v24 = vmul.f32 0.5, %v15330_v59  ;;  %v2608_v25 = vadd.f32 %v2479_v58, %v19358_v33  ;;  %v15357_v20 = vadd.f32 %v3133_v48, %v2607_v15  ;;  %v19360_v5 = vcombine.high %v15146_v57, %v15181_v13  ;;  %v7889_v44 = vpop.permute.xlu0 %7888  ;;  %v2481_v4 = vpop.f32.mrf.mxu0  ;;  %v12123_v48 = vld [vmem:[%s19028_s3 + $0xc8] sm:$0xff]  ;;  %v19364_v33 = vld [vmem:[#allocation16_spill] sm:$0xff] }
 0x1bc   : > { %4884 = vmatmul.mubr.bf16.gmra.mxu1 %v19357_v21  ;;  %v19361_v51 = vcombine.high %v15133_v54, %v15137_v9  ;;  %v5654_v53 = vrot.slane %v5653_v16, 4  ;;  %v15365_v17 = vrot.slane %v5661_v62, 4  ;;  %v3139_v21 = vpop.f32.mrf.mxu1  ;;  %v15367_v60 = vrot.slane %v5664_v50, 5  ;;  %8072 = vrot.lane.b32.xlu0 %v7986_v56, %s12236_s16  ;;  %v12124_v16 = vld [vmem:[%s19028_s3 + $0xd0] sm:$0xff] }
 0x1bd   : > { %19359 = vst [vmem:[#allocation15_spill] sm:$0xff] %v15357_v20  ;;  %4187 = vmatprep.mubr.bf16.mxu0 %v19360_v5  ;;  %v15373_v15 = vsub.f32 %v12123_v48, %v7887_v2  ;;  %v15378_v62 = vsub.f32 %v12124_v16, %v7889_v44  ;;  %v7988_v58 = vmul.f32 0.5, %v15335_v43  ;;  %v2609_v50 = vadd.f32 %v2481_v4, %v19364_v33  ;;  %v4983_v2 = vld [vmem:[%s15161_s13 + $0x28] sm:$0x11]  ;;  %v2483_v48 = vpop.f32.mrf.mxu0  ;;  %v19366_v16 = vld [vmem:[#allocation17_spill] sm:$0xff]  ;;  %v15405_v33 = vld [vmem:[%s15161_s13 + $0x30] sm:$0xff] }
 0x1be   : > { %4893 = vmatprep.mubr.bf16.mxu1 %v19361_v51  ;;  %v15382_v5 = vadd.f32 %v3137_v37, %v2608_v25  ;;  %v10668_v56 = vcombine.low %v15146_v57, %v15181_v13  ;;  %8074 = vrot.lane.b32.xlu1 %v7987_v24, %s12236_s16  ;;  %v3141_v20 = vpop.f32.mrf.mxu1  ;;  %v10671_v44 = vcombine.high %v15285_v1, %v15344_v39  ;;  %v15394_v37 = vrot.slane %v5670_v23, 5  ;;  %v7891_v51 = vpop.permute.xlu1 %7890 }
 0x1bf   : > { %19362 = vst [vmem:[#allocation84_spill] sm:$0xff] %v15373_v15  ;;  %19363 = vst [vmem:[#allocation85_spill] sm:$0xff] %v15378_v62  ;;  %v10783_v4 = vcombine.high %v15310_v46, %v15314_v45  ;;  %v5676_v25 = vrot.slane %v5674_v29, 4  ;;  %v2610_v57 = vadd.f32 %v2483_v48, %v19366_v16  ;;  %v15397_v13 = vadd.f32 %v3139_v21, %v2609_v50  ;;  %v2485_v6 = vpop.f32.mrf.mxu0  ;;  %v15415_v50 = vld [vmem:[%s15161_s13 + $0x38] sm:$0xff] }
 0x1c0   : > { %19365 = vst [vmem:[#allocation16_spill] sm:$0xff] %v15382_v5  ;;  %v15402_v24 = vsel %vm12506_vm2, %v5644_v42, %v15280_v3  ;;  %v7893_v5 = vpop.permute.xlu0 %7892  ;;  %v7989_v7 = vmul.f32 0.5, %v15373_v15  ;;  %v3143_v49 = vpop.f32.mrf.mxu1  ;;  %v15410_v23 = vsel %vm12506_vm2, %v5654_v53, %v5658_v0  ;;  %v5667_v29 = vor.u32 %v15367_v60, %v15365_v17  ;;  %8076 = vrot.lane.b32.xlu0 %v7988_v58, %s12236_s16  ;;  %v19368_v42 = vld [vmem:[#allocation18_spill] sm:$0xff] }
 0x1c1   : > { %19367 = vst [vmem:[#allocation17_spill] sm:$0xff] %v15397_v13  ;;  %v5680_v21 = vshll.u32 %v4983_v2, 16  ;;  %v7990_v3 = vmul.f32 0.5, %v15378_v62  ;;  %v2611_v48 = vadd.f32 %v2485_v6, %v19368_v42  ;;  %v15420_v16 = vadd.f32 %v3141_v20, %v2610_v57  ;;  %v12125_v13 = vld [vmem:[%s19028_s3 + $0xd8] sm:$0xff]  ;;  %v12126_v60 = vld [vmem:[%s19028_s3 + $0xe0] sm:$0xff]  ;;  %v2489_v17 = vpop.f32.mrf.mxu0 }
 0x1c2   : > { %v15425_v0 = vsub.f32 %v12125_v13, %v7891_v51  ;;  %v15430_v53 = vsub.f32 %v12126_v60, %v7893_v5  ;;  %8078 = vrot.lane.b32.xlu1 %v7989_v7, %s12236_s16  ;;  %v3147_v58 = vpop.f32.mrf.mxu1  ;;  %v19372_v6 = vcombine.low %v15133_v54, %v15137_v9  ;;  %v10670_v20 = vcombine.low %v15285_v1, %v15344_v39  ;;  %v19373_v5 = vld [vmem:[#allocation19_spill] sm:$0xff]  ;;  %v7895_v54 = vpop.permute.xlu1 %7894 }
 0x1c3   : > { %19369 = vst [vmem:[#allocation18_spill] sm:$0xff] %v15420_v16  ;;  %4188 = vmatmul.mubr.bf16.gmra.mxu0 %v10668_v56  ;;  %v5677_v51 = vor.u32 %v5676_v25, %v15394_v37  ;;  %v5685_v2 = vshrl.u32 %v15405_v33, 16  ;;  %v5688_v57 = vshll.u32 %v15405_v33, 16  ;;  %v2612_v13 = vadd.f32 %v2489_v17, %v19373_v5  ;;  %v2491_v39 = vpop.f32.mrf.mxu0  ;;  %v15460_v16 = vld [vmem:[%s15161_s13 + $0x50] sm:$0xff] }
 0x1c4   : > { %19370 = vst [vmem:[#allocation86_spill] sm:$0xff] %v15425_v0  ;;  %19371 = vst [vmem:[#allocation87_spill] sm:$0xff] %v15430_v53  ;;  %4894 = vmatmul.mubr.bf16.gmra.mxu1 %v19372_v6  ;;  %v15442_v42 = vadd.f32 %v3143_v49, %v2611_v48  ;;  %4197 = vmatprep.mubr.bf16.mxu0 %v10671_v44  ;;  %v5694_v7 = vshll.u32 %v15415_v50, 16  ;;  %v7897_v9 = vpop.permute.xlu0 %7896  ;;  %v7991_v1 = vmul.f32 0.5, %v15425_v0  ;;  %v3149_v56 = vpop.f32.mrf.mxu1  ;;  %v5698_v49 = vshrl.u32 %v15415_v50, 16 }
 0x1c5   : > { %4903 = vmatprep.mubr.bf16.mxu1 %v10783_v4  ;;  %v10849_v25 = vcombine.high %v15209_v55, %v15214_v22  ;;  %v10945_v60 = vcombine.high %v15402_v24, %v15410_v23  ;;  %8080 = vrot.lane.b32.xlu0 %v7990_v3, %s12236_s16  ;;  %v7992_v44 = vmul.f32 0.5, %v15430_v53  ;;  %v19375_v4 = vld [vmem:[#allocation20_spill] sm:$0xff]  ;;  %v15454_v17 = vadd.f32 %v3147_v58, %v2612_v13  ;;  %v2493_v0 = vpop.f32.mrf.mxu0  ;;  %v12127_v3 = vld [vmem:[%s19028_s3 + $0xe8] sm:$0xff]  ;;  %v4986_v53 = vld [vmem:[%s15161_s13 + $0x40] sm:$0x11] }
 0x1c6   : > { %19374 = vst [vmem:[#allocation19_spill] sm:$0xff] %v15442_v42  ;;  %v2613_v48 = vadd.f32 %v2491_v39, %v19375_v4  ;;  %v5668_v6 = vrot.slane %v5667_v29, 4  ;;  %v5682_v5 = vrot.slane %v5680_v21, 5  ;;  %v15457_v42 = vld [vmem:[%s15161_s13 + $0x48] sm:$0xff]  ;;  %8082 = vrot.lane.b32.xlu1 %v7991_v1, %s12236_s16  ;;  %v3151_v62 = vpop.f32.mrf.mxu1  ;;  %v5678_v15 = vrot.slane %v5677_v51, 4  ;;  %v12128_v29 = vld [vmem:[%s19028_s3 + $0xf0] sm:$0xff] }
 0x1c7   : > { %19376 = vst [vmem:[#allocation20_spill] sm:$0xff] %v15454_v17  ;;  %v15463_v43 = vrot.slane %v5685_v2, 4  ;;  %v15468_v58 = vsub.f32 %v12127_v3, %v7895_v54  ;;  %v15473_v21 = vsub.f32 %v12128_v29, %v7897_v9  ;;  %v2614_v13 = vadd.f32 %v2493_v0, %v14044_v35  ;;  %v7899_v2 = vpop.permute.xlu1 %7898  ;;  %v2495_v4 = vpop.f32.mrf.mxu0 }
 0x1c8   : > { %v15476_v1 = vadd.f32 %v3149_v56, %v2613_v48  ;;  %v5690_v39 = vrot.slane %v5688_v57, 5  ;;  %v15478_v51 = vrot.slane %v5694_v7, 5  ;;  %v3153_v17 = vpop.f32.mrf.mxu1  ;;  %v5700_v59 = vrot.slane %v5698_v49, 4  ;;  %v12129_v7 = vld [vmem:[%s19028_s3 + $0xf8] sm:$0xff] }
 0x1c9   : > { %19377 = vst [vmem:[#allocation88_spill] sm:$0xff] %v15468_v58  ;;  %v5709_v54 = vshrl.u32 %v15457_v42, 16  ;;  %v5712_v3 = vshll.u32 %v15457_v42, 16  ;;  %v5718_v41 = vshll.u32 %v15460_v16, 16  ;;  %8084 = vrot.lane.b32.xlu0 %v7992_v44, %s12236_s16  ;;  %v2615_v35 = vadd.f32 %v2495_v4, %v14060_v52  ;;  %v2499_v56 = vpop.f32.mrf.mxu0 }
 0x1ca   : > { %v15486_v0 = vadd.f32 %v3151_v62, %v2614_v13  ;;  %v5722_v57 = vshrl.u32 %v15460_v16, 16  ;;  %v15492_v9 = vsub.f32 %v12129_v7, %v7899_v2  ;;  %v3157_v49 = vpop.f32.mrf.mxu1  ;;  %v19379_v48 = vcombine.low %v15310_v46, %v15314_v45  ;;  %v15537_v7 = vld [vmem:[%s15161_s13 + $0x60] sm:$0xff] }
 0x1cb   : > { %4198 = vmatmul.mubr.bf16.gmra.mxu0 %v10670_v20  ;;  %v15500_v52 = vsel %vm12506_vm2, %v5668_v6, %v15394_v37  ;;  %v15504_v62 = vsel %vm12506_vm2, %v5678_v15, %v5682_v5  ;;  %v7993_v44 = vmul.f32 0.5, %v15468_v58  ;;  %v7994_v29 = vmul.f32 0.5, %v15473_v21  ;;  %v2501_v37 = vpop.f32.mrf.mxu0 }
 0x1cc   : > { %19378 = vst [vmem:[#allocation89_spill] sm:$0xff] %v15492_v9  ;;  %4904 = vmatmul.mubr.bf16.gmra.mxu1 %v19379_v48  ;;  %v2616_v20 = vadd.f32 %v2499_v56, %v14083_v47  ;;  %v15509_v13 = vadd.f32 %v3153_v17, %v2615_v35  ;;  %5411 = vmatprep.mubr.bf16.mxu0 %v10849_v25  ;;  %v5704_v45 = vshll.u32 %v4986_v53, 16  ;;  %v3159_v6 = vpop.f32.mrf.mxu1  ;;  %v5711_v15 = vrot.slane %v5709_v54, 4 }
 0x1cd   : > { %6373 = vmatprep.mubr.bf16.mxu1 %v10945_v60  ;;  %v5691_v46 = vor.u32 %v5690_v39, %v15463_v43  ;;  %v5701_v2 = vor.u32 %v5700_v59, %v15478_v51  ;;  %v5714_v5 = vrot.slane %v5712_v3, 5  ;;  %8086 = vrot.lane.b32.xlu1 %v7993_v44, %s12236_s16  ;;  %v7995_v47 = vmul.f32 0.5, %v15492_v9  ;;  %v4989_v43 = vld [vmem:[%s15161_s13 + $0x58] sm:$0x11]  ;;  %v2503_v39 = vpop.f32.mrf.mxu0 }
 0x1ce   : > { %8088 = vrot.lane.b32.xlu0 %v7994_v29, %s12236_s16  ;;  %v2617_v25 = vadd.f32 %v2501_v37, %v14100_v61  ;;  %v15517_v60 = vadd.f32 %v3157_v49, %v2616_v20  ;;  %v15520_v53 = vrot.slane %v5718_v41, 5  ;;  %v5724_v17 = vrot.slane %v5722_v57, 4  ;;  %v3161_v59 = vpop.f32.mrf.mxu1  ;;  %v11765_v61 = vld [vmem:[%s19029_s4 + $0x870] ss:$8 sps:$4 sm:$0xff]  }
 0x1cf   : > { %v10848_v4 = vcombine.low %v15209_v55, %v15214_v22  ;;  %v10944_v54 = vcombine.low %v15402_v24, %v15410_v23  ;;  %v2618_v3 = vadd.f32 %v2503_v39, %v14118_v30  ;;  %v10851_v41 = vcombine.high %v15288_v11, %v15322_v40  ;;  %v15540_v55 = vld [vmem:[%s15161_s13 + $0x68] sm:$0xff]  ;;  %v2505_v22 = vpop.f32.mrf.mxu0  ;;  %v19380_v44 = vld [vmem:[#allocation21_spill] sm:$0xff] }
 0x1d0   : > { %v15527_v35 = vadd.f32 %v3159_v6, %v2617_v25  ;;  %v10947_v57 = vcombine.high %v15500_v52, %v15504_v62  ;;  %v3163_v24 = vpop.f32.mrf.mxu1  ;;  %v11772_v30 = vld [vmem:[%s19029_s4 + $0x864] ss:$8 sps:$4 sm:$0xff]   ;;  %v5692_v23 = vrot.slane %v5691_v46, 4  ;;  %v5702_v56 = vrot.slane %v5701_v2, 4 }
 0x1d1   : > { %v5706_v49 = vrot.slane %v5704_v45, 5  ;;  %v5728_v48 = vshll.u32 %v4989_v43, 16  ;;  %8090 = vrot.lane.b32.xlu1 %v7995_v47, %s12236_s16  ;;  %v2619_v29 = vadd.f32 %v2505_v22, %v19380_v44  ;;  %v15549_v20 = vadd.f32 %v3161_v59, %v2618_v3  ;;  %v2509_v25 = vpop.f32.mrf.mxu0  ;;  %v19381_v43 = vld [vmem:[#allocation22_spill] sm:$0xff] }
 0x1d2   : > { %8220 = vrot.lane.b32.xlu0 %v14812_v19, %s12237_s22  ;;  %v5715_v37 = vor.u32 %v5714_v5, %v5711_v15  ;;  %v5725_v6 = vor.u32 %v5724_v17, %v15520_v53  ;;  %v3167_v39 = vpop.f32.mrf.mxu1  ;;  %v5733_v46 = vshrl.u32 %v15537_v7, 16  ;;  %v5736_v45 = vshll.u32 %v15537_v7, 16  ;;  %v11770_v5 = vld [vmem:[%s19029_s4 + $0x860] ss:$8 sps:$4 sm:$0xff]  }
 0x1d3   : > { %5412 = vmatmul.mubr.bf16.vlgmr.msra.gmra.mxu0 %v10848_v4  ;;  %v5742_v2 = vshll.u32 %v15540_v55, 16  ;;  %v5746_v47 = vshrl.u32 %v15540_v55, 16  ;;  %v2620_v19 = vadd.f32 %v2509_v25, %v19381_v43  ;;  %v15557_v22 = vadd.f32 %v3163_v24, %v2619_v29  ;;  %v2511_v17 = vpop.f32.mrf.mxu0 }
 0x1d4   : > { %6374 = vmatmul.mubr.bf16.vlgmr.msra.gmra.mxu1 %v10944_v54  ;;  %7048 = vmatpush1.bf16.msra.mxu0 %v11765_v61  ;;  %v10850_v15 = vcombine.low %v15288_v11, %v15322_v40  ;;  %v3169_v59 = vpop.f32.mrf.mxu1  ;;  %v10946_v4 = vcombine.low %v15500_v52, %v15504_v62  ;;  %v11777_v54 = vld [vmem:[%s19029_s4 + $0x854] ss:$8 sps:$4 sm:$0xff]   ;;  %v15572_v3 = vsel %vm12506_vm2, %v5692_v23, %v15478_v51  ;;  %v5730_v40 = vrot.slane %v5728_v48, 5  ;;  %v19382_v61 = vld [vmem:[#allocation23_spill] sm:$0xff] }
 0x1d5   : > { %5421 = vmatprep.mubr.bf16.mxu0 %v10851_v41  ;;  %7049 = vmatprep.subr.bf16.mxu0 %v11772_v30  ;;  %v15576_v11 = vsel %vm12506_vm2, %v5702_v56, %v5706_v49  ;;  %v2621_v41 = vadd.f32 %v2511_v17, %v19382_v61  ;;  %v15579_v24 = vadd.f32 %v3167_v39, %v2620_v19  ;;  %v5716_v52 = vrot.slane %v5715_v37, 4  ;;  %v2513_v51 = vpop.f32.mrf.mxu0  ;;  %v19383_v48 = vld [vmem:[#allocation24_spill] sm:$0xff] }
 0x1d6   : > { %6383 = vmatprep.mubr.bf16.mxu1 %v10947_v57  ;;  %v5726_v62 = vrot.slane %v5725_v6, 4  ;;  %8222 = vrot.lane.b32.xlu1 %v14875_v31, %s12237_s22  ;;  %v3171_v57 = vpop.f32.mrf.mxu1  ;;  %v5735_v30 = vrot.slane %v5733_v46, 4  ;;  %v5738_v23 = vrot.slane %v5736_v45, 5  ;;  %v15585_v56 = vrot.slane %v5742_v2, 5  ;;  %v4992_v6 = vld [vmem:[%s15161_s13 + $0x70] sm:$0x11] }
 0x1d7   : > { %8224 = vrot.lane.b32.xlu0 %v14870_v12, %s12237_s22  ;;  %v5748_v49 = vrot.slane %v5746_v47, 4  ;;  %v2622_v19 = vadd.f32 %v2513_v51, %v19383_v48  ;;  %v15588_v44 = vadd.f32 %v3169_v59, %v2621_v41  ;;  %v10853_v29 = vcombine.high %v15405_v33, %v15415_v50  ;;  %v2515_v25 = vpop.f32.mrf.mxu0  ;;  %v11775_v46 = vld [vmem:[%s19029_s4 + $0x850] ss:$8 sps:$4 sm:$0xff]   ;;  %v15613_v59 = vld [vmem:[%s15161_s13 + $0x80] sm:$0xff] }
 0x1d8   : > { %7050 = vmatpush1.bf16.msra.mxu0 %v11770_v5  ;;  %v10949_v37 = vcombine.high %v15572_v3, %v15576_v11  ;;  %v3173_v39 = vpop.f32.mrf.mxu1  ;;  %v15599_v45 = vld [vmem:[%s15161_s13 + $0x78] sm:$0xff]  ;;  %v11782_v5 = vld [vmem:[%s19029_s4 + $0x844] ss:$8 sps:$4 sm:$0xff]   ;;  %v15610_v17 = vsel %vm12506_vm2, %v5716_v52, %v15520_v53  ;;  %v15621_v41 = vsel %vm12506_vm2, %v5726_v62, %v5730_v40  ;;  %v5739_v51 = vor.u32 %v5738_v23, %v5735_v30  ;;  %v11780_v30 = vld [vmem:[%s19029_s4 + $0x840] ss:$8 sps:$4 sm:$0xff]  }
 0x1d9   : > { %7051 = vmatprep.subr.bf16.mxu0 %v11777_v54  ;;  %v19384_v2 = vld [vmem:[#allocation25_spill] sm:$0xff]  ;;  %v15602_v43 = vadd.f32 %v3171_v57, %v2622_v19  ;;  %v2519_v54 = vpop.f32.mrf.mxu0  ;;  %v5749_v53 = vor.u32 %v5748_v49, %v15585_v56  ;;  %v5752_v52 = vshll.u32 %v4992_v6, 16  ;;  %v19385_v57 = vld [vmem:[#allocation26_spill] sm:$0xff]  ;;  %v10852_v40 = vcombine.low %v15405_v33, %v15415_v50 }
 0x1da   : > { %v2623_v47 = vadd.f32 %v2515_v25, %v19384_v2  ;;  %8226 = vrot.lane.b32.xlu1 %v14911_v14, %s12237_s22  ;;  %v3177_v61 = vpop.f32.mrf.mxu1  ;;  %v2624_v48 = vadd.f32 %v2519_v54, %v19385_v57  ;;  %v5757_v25 = vshrl.u32 %v15599_v45, 16  ;;  %v10948_v62 = vcombine.low %v15572_v3, %v15576_v11  ;;  %v11787_v50 = vld [vmem:[%s19029_s4 + $0x834] ss:$8 sps:$4 sm:$0xff]  }
 0x1db   : > { %8228 = vrot.lane.b32.xlu0 %v14916_v38, %s12237_s22  ;;  %5422 = vmatmul.mubr.bf16.gmra.mxu0 %v10850_v15  ;;  %v5760_v15 = vshll.u32 %v15599_v45, 16  ;;  %v5766_v23 = vshll.u32 %v15613_v59, 16  ;;  %v5770_v49 = vshrl.u32 %v15613_v59, 16  ;;  %v10855_v33 = vcombine.high %v15457_v42, %v15460_v16  ;;  %v15647_v3 = vld [vmem:[%s15161_s13 + $0x90] sm:$0xff]  ;;  %v15654_v57 = vld [vmem:[%s15161_s13 + $0x98] sm:$0xff] }
 0x1dc   : > { %6384 = vmatmul.mubr.bf16.gmra.mxu1 %v10946_v4  ;;  %v15625_v19 = vadd.f32 %v3173_v39, %v2623_v47  ;;  %5431 = vmatprep.mubr.bf16.mxu0 %v10853_v29  ;;  %v2521_v4 = vpop.f32.mrf.mxu0  ;;  %v3179_v2 = vpop.f32.mrf.mxu1  ;;  %v19387_v29 = vld [vmem:[#allocation27_spill] sm:$0xff]  ;;  %v15639_v6 = vadd.f32 %v3177_v61, %v2624_v48  ;;  %v5740_v47 = vrot.slane %v5739_v51, 4  ;;  %v5750_v54 = vrot.slane %v5749_v53, 4 }
 0x1dd   : > { %6393 = vmatprep.mubr.bf16.mxu1 %v10949_v37  ;;  %7052 = vmatpush1.bf16.msra.mxu0 %v11775_v46  ;;  %v2625_v37 = vadd.f32 %v2521_v4, %v19387_v29  ;;  %v10951_v46 = vcombine.high %v15610_v17, %v15621_v41  ;;  %v5754_v61 = vrot.slane %v5752_v52, 5  ;;  %v11785_v29 = vld [vmem:[%s19029_s4 + $0x830] ss:$8 sps:$4 sm:$0xff]   ;;  %v5762_v38 = vrot.slane %v5760_v15, 5  ;;  %v4995_v51 = vld [vmem:[%s15161_s13 + $0x88] sm:$0x11] }
 0x1de   : > { %19386 = vst [vmem:[#allocation21_spill] sm:$0xff] %v15625_v19  ;;  %19388 = vst [vmem:[#allocation22_spill] sm:$0xff] %v15639_v6  ;;  %7053 = vmatprep.subr.bf16.mxu0 %v11782_v5  ;;  %8230 = vrot.lane.b32.xlu1 %v14956_v8, %s12237_s22  ;;  %v2523_v11 = vpop.f32.mrf.mxu0  ;;  %v3181_v39 = vpop.f32.mrf.mxu1  ;;  %v19389_v5 = vld [vmem:[#allocation28_spill] sm:$0xff]  ;;  %v5759_v8 = vrot.slane %v5757_v25, 4  ;;  %v15665_v53 = vrot.slane %v5766_v23, 5  ;;  %v5772_v52 = vrot.slane %v5770_v49, 4 }
 0x1df   : > { %8232 = vrot.lane.b32.xlu0 %v14961_v32, %s12237_s22  ;;  %v2626_v48 = vadd.f32 %v2523_v11, %v19389_v5  ;;  %v15659_v4 = vadd.f32 %v3179_v2, %v2625_v37  ;;  %v5781_v19 = vshrl.u32 %v15647_v3, 16  ;;  %v5784_v32 = vshll.u32 %v15647_v3, 16  ;;  %v19390_v11 = vld [vmem:[#allocation29_spill] sm:$0xff]  ;;  %v11792_v25 = vld [vmem:[%s19029_s4 + $0x824] ss:$8 sps:$4 sm:$0xff]  }
 0x1e0   : > { %v2525_v6 = vpop.f32.mrf.mxu0  ;;  %v3183_v14 = vpop.f32.mrf.mxu1  ;;  %v5790_v15 = vshll.u32 %v15654_v57, 16 }
 0x1e1   : > { %7054 = vmatpush1.bf16.msra.mxu0 %v11780_v30  ;;  %v2627_v2 = vadd.f32 %v2525_v6, %v19390_v11  ;;  %v15670_v37 = vadd.f32 %v3181_v39, %v2626_v48  ;;  %v5794_v30 = vshrl.u32 %v15654_v57, 16  ;;  %v15682_v6 = vsel %vm12506_vm2, %v5740_v47, %v15585_v56 }
 0x1e2   : > { %7055 = vmatprep.subr.bf16.mxu0 %v11787_v50  ;;  %8234 = vrot.lane.b32.xlu1 %v14994_v34, %s12237_s22  ;;  %v2529_v23 = vpop.f32.mrf.mxu0  ;;  %v3187_v49 = vpop.f32.mrf.mxu1  ;;  %v19392_v50 = vld [vmem:[#allocation30_spill] sm:$0xff]  ;;  %v15689_v48 = vsel %vm12506_vm2, %v5750_v54, %v5754_v61  ;;  %v5776_v11 = vshll.u32 %v4995_v51, 16  ;;  %v5763_v56 = vor.u32 %v5762_v38, %v5759_v8  ;;  %v5773_v47 = vor.u32 %v5772_v52, %v15665_v53  ;;  %v11797_v61 = vld [vmem:[%s19029_s4 + $0x814] ss:$8 sps:$4 sm:$0xff]  }
 0x1e3   : > { %19391 = vst [vmem:[#allocation23_spill] sm:$0xff] %v15670_v37  ;;  %5432 = vmatmul.mubr.bf16.gmra.mxu0 %v10852_v40  ;;  %v2628_v39 = vadd.f32 %v2529_v23, %v19392_v50  ;;  %v15685_v5 = vadd.f32 %v3183_v14, %v2627_v2  ;;  %v5783_v14 = vrot.slane %v5781_v19, 4  ;;  %v5786_v2 = vrot.slane %v5784_v32, 5  ;;  %8236 = vrot.lane.b32.xlu0 %v14999_v36, %s12237_s22  ;;  %v4998_v51 = vld [vmem:[%s15161_s13 + $0xa0] sm:$0x11]  ;;  %v19396_v52 = vld [vmem:[#allocation32_spill] sm:$0xff] }
 0x1e4   : > { %6394 = vmatmul.mubr.bf16.gmra.mxu1 %v10948_v62  ;;  %5441 = vmatprep.mubr.bf16.mxu0 %v10855_v33  ;;  %v2531_v34 = vpop.f32.mrf.mxu0  ;;  %v3189_v40 = vpop.f32.mrf.mxu1  ;;  %v11790_v62 = vld [vmem:[%s19029_s4 + $0x820] ss:$8 sps:$4 sm:$0xff]   ;;  %v15703_v38 = vrot.slane %v5790_v15, 5  ;;  %v5796_v8 = vrot.slane %v5794_v30, 4  ;;  %v10857_v15 = vcombine.high %v15537_v7, %v15540_v55  ;;  %v10953_v30 = vcombine.high %v15682_v6, %v15689_v48  ;;  %v15723_v50 = vld [vmem:[%s15161_s13 + $0xb0] sm:$0xff] }
 0x1e5   : > { %19393 = vst [vmem:[#allocation24_spill] sm:$0xff] %v15685_v5  ;;  %6403 = vmatprep.mubr.bf16.mxu1 %v10951_v46  ;;  %7056 = vmatpush1.bf16.msra.mxu0 %v11785_v29  ;;  %v19394_v33 = vld [vmem:[#allocation31_spill] sm:$0xff]  ;;  %v15698_v54 = vadd.f32 %v3187_v49, %v2628_v39  ;;  %v10950_v29 = vcombine.low %v15610_v17, %v15621_v41  ;;  %v5778_v17 = vrot.slane %v5776_v11, 5  ;;  %v11795_v41 = vld [vmem:[%s19029_s4 + $0x810] ss:$8 sps:$4 sm:$0xff]  }
 0x1e6   : > { %v2629_v46 = vadd.f32 %v2531_v34, %v19394_v33  ;;  %7057 = vmatprep.subr.bf16.mxu0 %v11792_v25  ;;  %8238 = vrot.lane.b32.xlu1 %v15045_v28, %s12237_s22  ;;  %v2533_v32 = vpop.f32.mrf.mxu0  ;;  %v3191_v19 = vpop.f32.mrf.mxu1  ;;  %v10854_v34 = vcombine.low %v15457_v42, %v15460_v16  ;;  %v15720_v49 = vld [vmem:[%s15161_s13 + $0xa8] sm:$0xff]  ;;  %v5764_v42 = vrot.slane %v5763_v56, 4  ;;  %v5774_v33 = vrot.slane %v5773_v47, 4 }
 0x1e7   : > { %19395 = vst [vmem:[#allocation25_spill] sm:$0xff] %v15698_v54  ;;  %v2630_v25 = vadd.f32 %v2533_v32, %v19396_v52  ;;  %8240 = vrot.lane.b32.xlu0 %v15050_v27, %s12237_s22  ;;  %v5797_v28 = vor.u32 %v5796_v8, %v15703_v38  ;;  %v11802_v11 = vld [vmem:[%s19029_s4 + $0x804] ss:$8 sps:$4 sm:$0xff]   ;;  %v5818_v8 = vshrl.u32 %v15723_v50, 16 }
 0x1e8   : > { %v15713_v23 = vadd.f32 %v3189_v40, %v2629_v46  ;;  %v2535_v39 = vpop.f32.mrf.mxu0  ;;  %v3193_v16 = vpop.f32.mrf.mxu1  ;;  %v5787_v40 = vor.u32 %v5786_v2, %v5783_v14  ;;  %v19398_v46 = vld [vmem:[#allocation33_spill] sm:$0xff]  ;;  %v5805_v14 = vshrl.u32 %v15720_v49, 16  ;;  %v5808_v2 = vshll.u32 %v15720_v49, 16 }
 0x1e9   : > { %7058 = vmatpush1.bf16.msra.mxu0 %v11790_v62  ;;  %v2631_v32 = vadd.f32 %v2535_v39, %v19398_v46  ;;  %v15731_v52 = vadd.f32 %v3191_v19, %v2630_v25  ;;  %v19400_v62 = vld [vmem:[#allocation68_spill] sm:$0xff]  ;;  %v19401_v19 = vld [vmem:[#allocation34_spill] sm:$0xff]  ;;  %v10856_v39 = vcombine.low %v15537_v7, %v15540_v55  ;;  %v19403_v55 = vld [vmem:[#allocation69_spill] sm:$0xff] }
 0x1ea   : > { %19397 = vst [vmem:[#allocation26_spill] sm:$0xff] %v15713_v23  ;;  %7059 = vmatprep.subr.bf16.mxu0 %v11797_v61  ;;  %v5800_v23 = vshll.u32 %v4998_v51, 16  ;;  %8242 = vrot.lane.b32.xlu1 %v19400_v62, %s12237_s22  ;;  %v2539_v56 = vpop.f32.mrf.mxu0  ;;  %v3197_v47 = vpop.f32.mrf.mxu1  ;;  %v5814_v61 = vshll.u32 %v15723_v50, 16  ;;  %v15753_v62 = vsel %vm12506_vm2, %v5764_v42, %v15665_v53  ;;  %v11800_v7 = vld [vmem:[%s19029_s4 + $0x800] ss:$8 sps:$4 sm:$0xff]  }
 0x1eb   : > { %19399 = vst [vmem:[#allocation27_spill] sm:$0xff] %v15731_v52  ;;  %5442 = vmatmul.mubr.bf16.gmra.mxu0 %v10854_v34  ;;  %v2632_v51 = vadd.f32 %v2539_v56, %v19401_v19  ;;  %v15744_v25 = vadd.f32 %v3193_v16, %v2631_v32  ;;  %v15757_v16 = vsel %vm12506_vm2, %v5774_v33, %v5778_v17  ;;  %v5798_v32 = vrot.slane %v5797_v28, 4  ;;  %v11807_v42 = vld [vmem:[%s19029_s4 + $0x8f4] ss:$8 sps:$4 sm:$0xff]   ;;  %v19406_v33 = vld [vmem:[#allocation70_spill] sm:$0xff] }
 0x1ec   : > { %6404 = vmatmul.mubr.bf16.gmra.mxu1 %v10950_v29  ;;  %5451 = vmatprep.mubr.bf16.mxu0 %v10857_v15  ;;  %v2541_v34 = vpop.f32.mrf.mxu0  ;;  %v3199_v46 = vpop.f32.mrf.mxu1  ;;  %v10952_v29 = vcombine.low %v15682_v6, %v15689_v48  ;;  %v5788_v15 = vrot.slane %v5787_v40, 4  ;;  %v19404_v6 = vld [vmem:[#allocation35_spill] sm:$0xff]  ;;  %v5802_v53 = vrot.slane %v5800_v23, 5  ;;  %v5001_v40 = vld [vmem:[%s15161_s13 + $0xb8] sm:$0x11]  ;;  %v5807_v56 = vrot.slane %v5805_v14, 4 }
 0x1ed   : > { %19402 = vst [vmem:[#allocation28_spill] sm:$0xff] %v15744_v25  ;;  %6413 = vmatprep.mubr.bf16.mxu1 %v10953_v30  ;;  %7060 = vmatpush1.bf16.msra.mxu0 %v11795_v41  ;;  %v2633_v48 = vadd.f32 %v2541_v34, %v19404_v6  ;;  %v15765_v30 = vadd.f32 %v3197_v47, %v2632_v51  ;;  %v5810_v19 = vrot.slane %v5808_v2, 5  ;;  %v15773_v34 = vrot.slane %v5814_v61, 5  ;;  %v19407_v28 = vld [vmem:[#allocation36_spill] sm:$0xff]  ;;  %v15791_v2 = vld [vmem:[%s15161_s13 + $0xc8] sm:$0xff] }
 0x1ee   : > { %8244 = vrot.lane.b32.xlu0 %v19403_v55, %s12237_s22  ;;  %7061 = vmatprep.subr.bf16.mxu0 %v11802_v11  ;;  %v2543_v17 = vpop.f32.mrf.mxu0  ;;  %v3201_v41 = vpop.f32.mrf.mxu1  ;;  %v5820_v47 = vrot.slane %v5818_v8, 4  ;;  %v10859_v11 = vcombine.high %v15599_v45, %v15613_v59  ;;  %v10955_v6 = vcombine.high %v15753_v62, %v15757_v16  ;;  %v15788_v14 = vsel %vm12506_vm2, %v5788_v15, %v15703_v38  ;;  %v11805_v61 = vld [vmem:[%s19029_s4 + $0x8f0] ss:$8 sps:$4 sm:$0xff]   ;;  %v19409_v8 = vld [vmem:[#allocation71_spill] sm:$0xff] }
 0x1ef   : > { %19405 = vst [vmem:[#allocation29_spill] sm:$0xff] %v15765_v30  ;;  %8246 = vrot.lane.b32.xlu1 %v19406_v33, %s12237_s22  ;;  %v2634_v51 = vadd.f32 %v2543_v17, %v19407_v28  ;;  %v15776_v23 = vadd.f32 %v3199_v46, %v2633_v48  ;;  %v15783_v33 = vld [vmem:[%s15161_s13 + $0xc0] sm:$0xff]  ;;  %v19410_v46 = vld [vmem:[#allocation37_spill] sm:$0xff]  ;;  %v15803_v28 = vsel %vm12506_vm2, %v5798_v32, %v5802_v53  ;;  %v5824_v38 = vshll.u32 %v5001_v40, 16  ;;  %v5004_v25 = vld [vmem:[%s15161_s13 + $0xd0] sm:$0x11] }
 0x1f0   : > { %v2545_v55 = vpop.f32.mrf.mxu0  ;;  %v3203_v30 = vpop.f32.mrf.mxu1  ;;  %v11812_v15 = vld [vmem:[%s19029_s4 + $0x8e4] ss:$8 sps:$4 sm:$0xff]   ;;  %v5832_v32 = vshll.u32 %v15783_v33, 16 }
 0x1f1   : > { %19408 = vst [vmem:[#allocation30_spill] sm:$0xff] %v15776_v23  ;;  %7062 = vmatpush1.bf16.msra.mxu0 %v11800_v7  ;;  %v2635_v48 = vadd.f32 %v2545_v55, %v19410_v46  ;;  %v15799_v17 = vadd.f32 %v3201_v41, %v2634_v51  ;;  %v19412_v7 = vld [vmem:[#allocation72_spill] sm:$0xff]  ;;  %v5811_v55 = vor.u32 %v5810_v19, %v5807_v56  ;;  %v5829_v51 = vshrl.u32 %v15783_v33, 16  ;;  %v19413_v53 = vld [vmem:[#allocation38_spill] sm:$0xff] }
 0x1f2   : > { %8248 = vrot.lane.b32.xlu0 %v19409_v8, %s12237_s22  ;;  %7063 = vmatprep.subr.bf16.mxu0 %v11807_v42  ;;  %v2549_v23 = vpop.f32.mrf.mxu0  ;;  %v3207_v8 = vpop.f32.mrf.mxu1  ;;  %v5821_v41 = vor.u32 %v5820_v47, %v15773_v34  ;;  %v5838_v46 = vshll.u32 %v15791_v2, 16  ;;  %v10858_v19 = vcombine.low %v15599_v45, %v15613_v59  ;;  %v10954_v47 = vcombine.low %v15753_v62, %v15757_v16  ;;  %v15835_v62 = vld [vmem:[%s15161_s13 + $0xd8] sm:$0xff]  ;;  %v15838_v16 = vld [vmem:[%s15161_s13 + $0xe0] sm:$0xff] }
 0x1f3   : > { %19411 = vst [vmem:[#allocation31_spill] sm:$0xff] %v15799_v17  ;;  %8250 = vrot.lane.b32.xlu1 %v19412_v7, %s12237_s22  ;;  %5452 = vmatmul.mubr.bf16.gmra.mxu0 %v10856_v39  ;;  %v2636_v42 = vadd.f32 %v2549_v23, %v19413_v53  ;;  %v15814_v40 = vadd.f32 %v3203_v30, %v2635_v48  ;;  %v5842_v39 = vshrl.u32 %v15791_v2, 16  ;;  %v11810_v23 = vld [vmem:[%s19029_s4 + $0x8e0] ss:$8 sps:$4 sm:$0xff]   ;;  %v5826_v59 = vrot.slane %v5824_v38, 5 }
 0x1f4   : > { %6414 = vmatmul.mubr.bf16.gmra.mxu1 %v10952_v29  ;;  %5461 = vmatprep.mubr.bf16.mxu0 %v10859_v11  ;;  %v2551_v29 = vpop.f32.mrf.mxu0  ;;  %v3209_v56 = vpop.f32.mrf.mxu1  ;;  %v10861_v30 = vcombine.high %v15647_v3, %v15654_v57  ;;  %v19415_v11 = vld [vmem:[#allocation73_spill] sm:$0xff]  ;;  %v10957_v45 = vcombine.high %v15788_v14, %v15803_v28  ;;  %v5834_v7 = vrot.slane %v5832_v32, 5  ;;  %v15849_v27 = vrot.slane %v5838_v46, 5  ;;  %v11822_v46 = vld [vmem:[%s19029_s4 + $0x8c4] ss:$8 sps:$4 sm:$0xff]  }
 0x1f5   : > { %19414 = vst [vmem:[#allocation32_spill] sm:$0xff] %v15814_v40  ;;  %6423 = vmatprep.mubr.bf16.mxu1 %v10955_v6  ;;  %7064 = vmatpush2.bf16.msra.mxu0 %v11805_v61  ;;  %v19416_v6 = vld [vmem:[#allocation39_spill] sm:$0xff]  ;;  %v15830_v53 = vadd.f32 %v3207_v8, %v2636_v42  ;;  %v11817_v61 = vld [vmem:[%s19029_s4 + $0x8d4] ss:$8 sps:$4 sm:$0xff]   ;;  %v5812_v42 = vrot.slane %v5811_v55, 4  ;;  %v5853_v54 = vshrl.u32 %v15835_v62, 16 }
 0x1f6   : > { %8252 = vrot.lane.b32.xlu0 %v19415_v11, %s12237_s22  ;;  %v2637_v48 = vadd.f32 %v2551_v29, %v19416_v6  ;;  %7065 = vmatprep.subr.bf16.mxu0 %v11812_v15  ;;  %v19418_v11 = vld [vmem:[#allocation74_spill] sm:$0xff]  ;;  %v2553_v29 = vpop.f32.mrf.mxu0  ;;  %v3211_v8 = vpop.f32.mrf.mxu1  ;;  %v5822_v6 = vrot.slane %v5821_v41, 4  ;;  %v19419_v40 = vld [vmem:[#allocation40_spill] sm:$0xff]  ;;  %v5844_v15 = vrot.slane %v5842_v39, 4  ;;  %v5862_v5 = vshll.u32 %v15838_v16, 16 }
 0x1f7   : > { %19417 = vst [vmem:[#allocation33_spill] sm:$0xff] %v15830_v53  ;;  %8254 = vrot.lane.b32.xlu1 %v19418_v11, %s12237_s22  ;;  %v5831_v53 = vrot.slane %v5829_v51, 4  ;;  %v2638_v38 = vadd.f32 %v2553_v29, %v19419_v40  ;;  %v5856_v11 = vshll.u32 %v15835_v62, 16  ;;  %v5866_v55 = vshrl.u32 %v15838_v16, 16  ;;  %v11815_v41 = vld [vmem:[%s19029_s4 + $0x8d0] ss:$8 sps:$4 sm:$0xff]  }
 0x1f8   : > { %v15846_v17 = vadd.f32 %v3209_v56, %v2637_v48  ;;  %v2555_v52 = vpop.f32.mrf.mxu0  ;;  %v3213_v36 = vpop.f32.mrf.mxu1  ;;  %v19421_v51 = vld [vmem:[#allocation41_spill] sm:$0xff]  ;;  %v19423_v39 = vld [vmem:[#allocation76_spill] sm:$0xff]  ;;  %v15871_v48 = vsel %vm12506_vm2, %v5812_v42, %v15773_v34  ;;  %v19424_v29 = vld [vmem:[#allocation42_spill] sm:$0xff]  ;;  %v15881_v42 = vrot.slane %v5862_v5, 5 }
 0x1f9   : > { %7066 = vmatpush2.bf16.msra.mxu0 %v11810_v23  ;;  %v2639_v32 = vadd.f32 %v2555_v52, %v19421_v51  ;;  %v15861_v40 = vadd.f32 %v3211_v8, %v2638_v38  ;;  %v15875_v52 = vsel %vm12506_vm2, %v5822_v6, %v5826_v59  ;;  %v5858_v34 = vrot.slane %v5856_v11, 5  ;;  %v11827_v5 = vld [vmem:[%s19029_s4 + $0x8b4] ss:$8 sps:$4 sm:$0xff]  }
 0x1fa   : > { %19420 = vst [vmem:[#allocation34_spill] sm:$0xff] %v15846_v17  ;;  %8256 = vrot.lane.b32.xlu0 %v15225_v26, %s12237_s22  ;;  %7067 = vmatprep.subr.bf16.mxu0 %v11817_v61  ;;  %v2559_v56 = vpop.f32.mrf.mxu0  ;;  %v3217_v23 = vpop.f32.mrf.mxu1  ;;  %v5835_v61 = vor.u32 %v5834_v7, %v5831_v53  ;;  %v5855_v26 = vrot.slane %v5853_v54, 4  ;;  %v11820_v7 = vld [vmem:[%s19029_s4 + $0x8c0] ss:$8 sps:$4 sm:$0xff]   ;;  %v10956_v59 = vcombine.low %v15788_v14, %v15803_v28 }
 0x1fb   : > { %19422 = vst [vmem:[#allocation35_spill] sm:$0xff] %v15861_v40  ;;  %8258 = vrot.lane.b32.xlu1 %v19423_v39, %s12237_s22  ;;  %5462 = vmatmul.mubr.bf16.gmra.mxu0 %v10858_v19  ;;  %v2640_v8 = vadd.f32 %v2559_v56, %v19424_v29  ;;  %v15878_v38 = vadd.f32 %v3213_v36, %v2639_v32  ;;  %v5868_v40 = vrot.slane %v5866_v55, 4  ;;  %v19426_v36 = vld [vmem:[#allocation43_spill] sm:$0xff]  ;;  %v19428_v55 = vld [vmem:[#allocation44_spill] sm:$0xff]  ;;  %v15912_v29 = vld [vmem:[%s15161_s13 + $0xf8] sm:$0xff] }
 0x1fc   : > { %6424 = vmatmul.mubr.bf16.gmra.mxu1 %v10954_v47  ;;  %5471 = vmatprep.mubr.bf16.mxu0 %v10861_v30  ;;  %v5845_v19 = vor.u32 %v5844_v15, %v15849_v27  ;;  %v5848_v47 = vshll.u32 %v5004_v25, 16  ;;  %v2561_v51 = vpop.f32.mrf.mxu0  ;;  %v3219_v39 = vpop.f32.mrf.mxu1  ;;  %v5007_v25 = vld [vmem:[%s15161_s13 + $0xe8] sm:$0x11]  ;;  %v10863_v6 = vcombine.high %v15720_v49, %v15723_v50  ;;  %v10959_v15 = vcombine.high %v15871_v48, %v15875_v52 }
 0x1fd   : > { %19425 = vst [vmem:[#allocation36_spill] sm:$0xff] %v15878_v38  ;;  %6433 = vmatprep.mubr.bf16.mxu1 %v10957_v45  ;;  %7068 = vmatpush2.bf16.msra.mxu0 %v11815_v41  ;;  %v2641_v30 = vadd.f32 %v2561_v51, %v19426_v36  ;;  %v15889_v53 = vadd.f32 %v3217_v23, %v2640_v8  ;;  %v15909_v23 = vld [vmem:[%s15161_s13 + $0xf0] sm:$0xff]  ;;  %v5872_v51 = vshll.u32 %v5007_v25, 16 }
 0x1fe   : > { %8260 = vrot.lane.b32.xlu0 %v15252_v63, %s12237_s22  ;;  %7069 = vmatprep.subr.bf16.mxu0 %v11822_v46  ;;  %v2563_v54 = vpop.f32.mrf.mxu0  ;;  %v3221_v11 = vpop.f32.mrf.mxu1  ;;  %v10860_v45 = vcombine.low %v15647_v3, %v15654_v57  ;;  %v5836_v46 = vrot.slane %v5835_v61, 4  ;;  %v5850_v56 = vrot.slane %v5848_v47, 5  ;;  %v5846_v8 = vrot.slane %v5845_v19, 4  ;;  %v11825_v36 = vld [vmem:[%s19029_s4 + $0x8b0] ss:$8 sps:$4 sm:$0xff]  }
 0x1ff   : > { %19427 = vst [vmem:[#allocation37_spill] sm:$0xff] %v15889_v53  ;;  %8262 = vrot.lane.b32.xlu1 %v15294_v18, %s12237_s22  ;;  %v2642_v41 = vadd.f32 %v2563_v54, %v19428_v55  ;;  %v15906_v32 = vadd.f32 %v3219_v39, %v2641_v30  ;;  %v5859_v14 = vor.u32 %v5858_v34, %v5855_v26  ;;  %v19430_v39 = vld [vmem:[#allocation79_spill] sm:$0xff]  ;;  %v19431_v61 = vld [vmem:[#allocation45_spill] sm:$0xff]  ;;  %v15930_v19 = vpop.permute.xlu0 %8028  ;;  %v5877_v25 = vshrl.u32 %v15909_v23, 16 }
 0x200   : > { %v2565_v3 = vpop.f32.mrf.mxu0  ;;  %v3223_v57 = vpop.f32.mrf.mxu1  ;;  %v5869_v28 = vor.u32 %v5868_v40, %v15881_v42  ;;  %v11832_v26 = vld [vmem:[%s19029_s4 + $0x8a4] ss:$8 sps:$4 sm:$0xff]   ;;  %v19433_v40 = vld [vmem:[#allocation81_spill] sm:$0xff]  ;;  %v5886_v55 = vshll.u32 %v15912_v29, 16 }
 0x201   : > { %19429 = vst [vmem:[#allocation38_spill] sm:$0xff] %v15906_v32  ;;  %7070 = vmatpush2.bf16.msra.mxu0 %v11820_v7  ;;  %v2643_v47 = vadd.f32 %v2565_v3, %v19431_v61  ;;  %v15921_v30 = vadd.f32 %v3221_v11, %v2642_v41  ;;  %v5880_v11 = vshll.u32 %v15909_v23, 16  ;;  %v19434_v41 = vld [vmem:[#allocation46_spill] sm:$0xff] }
 0x202   : > { %8264 = vrot.lane.b32.xlu0 %v19430_v39, %s12237_s22  ;;  %7071 = vmatprep.subr.bf16.mxu0 %v11827_v5  ;;  %v2569_v34 = vpop.f32.mrf.mxu0  ;;  %v3227_v7 = vpop.f32.mrf.mxu1  ;;  %v5890_v5 = vshrl.u32 %v15912_v29, 16  ;;  %v15948_v39 = vsel %vm12506_vm2, %v5846_v8, %v5850_v56  ;;  %v5870_v18 = vrot.slane %v5869_v28, 4  ;;  %v10958_v56 = vcombine.low %v15871_v48, %v15875_v52  ;;  %v11837_v8 = vld [vmem:[%s19029_s4 + $0x894] ss:$8 sps:$4 sm:$0xff]  }
 0x203   : > { %19432 = vst [vmem:[#allocation39_spill] sm:$0xff] %v15921_v30  ;;  %8266 = vrot.lane.b32.xlu1 %v19433_v40, %s12237_s22  ;;  %5472 = vmatmul.mubr.bf16.gmra.mxu0 %v10860_v45  ;;  %v2644_v3 = vadd.f32 %v2569_v34, %v19434_v41  ;;  %v15937_v61 = vadd.f32 %v3223_v57, %v2643_v47  ;;  %v5860_v30 = vrot.slane %v5859_v14, 4  ;;  %v5874_v34 = vrot.slane %v5872_v51, 5  ;;  %v19439_v14 = vld [vmem:[#allocation84_spill] sm:$0xff]  ;;  %v15968_v41 = vld [vmem:[%s15161_s13 + $0x108] sm:$0xff] }
 0x204   : > { %6434 = vmatmul.mubr.bf16.gmra.mxu1 %v10956_v59  ;;  %5481 = vmatprep.mubr.bf16.mxu0 %v10863_v6  ;;  %v15942_v45 = vsel %vm12506_vm2, %v5836_v46, %v15849_v27  ;;  %v15944_v59 = vpop.permute.xlu1 %8030  ;;  %v2571_v54 = vpop.f32.mrf.mxu0  ;;  %v11830_v6 = vld [vmem:[%s19029_s4 + $0x8a0] ss:$8 sps:$4 sm:$0xff]   ;;  %v5882_v47 = vrot.slane %v5880_v11, 5  ;;  %v5901_v32 = vshrl.u32 %v15968_v41, 16 }
 0x205   : > { %19435 = vst [vmem:[#allocation40_spill] sm:$0xff] %v15937_v61  ;;  %6443 = vmatprep.mubr.bf16.mxu1 %v10959_v15  ;;  %v3229_v40 = vpop.f32.mrf.mxu1  ;;  %7072 = vmatpush2.bf16.msra.mxu0 %v11825_v36  ;;  %v19436_v27 = vld [vmem:[#allocation82_spill] sm:$0xff]  ;;  %v19437_v15 = vld [vmem:[#allocation47_spill] sm:$0xff]  ;;  %v15956_v57 = vadd.f32 %v3227_v7, %v2644_v3  ;;  %v5879_v36 = vrot.slane %v5877_v25, 4  ;;  %v5892_v7 = vrot.slane %v5890_v5, 4  ;;  %v19440_v3 = vld [vmem:[#allocation48_spill] sm:$0xff]  ;;  %v15981_v25 = vpop.permute.xlu0 %8032 }
 0x206   : > { %8268 = vrot.lane.b32.xlu0 %v19436_v27, %s12237_s22  ;;  %v2645_v46 = vadd.f32 %v2571_v54, %v19437_v15  ;;  %7073 = vmatprep.subr.bf16.mxu0 %v11832_v26  ;;  %v2573_v28 = vpop.f32.mrf.mxu0  ;;  %v15965_v54 = vrot.slane %v5886_v55, 5  ;;  %v10865_v26 = vcombine.high %v15783_v33, %v15791_v2  ;;  %v10961_v15 = vcombine.high %v15942_v45, %v15948_v39  ;;  %v15979_v27 = vld [vmem:[%s15161_s13 + $0x110] sm:$0xff] }
 0x207   : > { %19438 = vst [vmem:[#allocation41_spill] sm:$0xff] %v15956_v57  ;;  %8270 = vrot.lane.b32.xlu1 %v19439_v14, %s12237_s22  ;;  %v3231_v51 = vpop.f32.mrf.mxu1  ;;  %v2646_v48 = vadd.f32 %v2573_v28, %v19440_v3  ;;  %v5010_v14 = vld [vmem:[%s15161_s13 + $0x100] sm:$0x11]  ;;  %v11835_v28 = vld [vmem:[%s19029_s4 + $0x890] ss:$8 sps:$4 sm:$0xff]  }
 0x208   : > { %v15971_v52 = vadd.f32 %v3229_v40, %v2645_v46  ;;  %v15983_v11 = vpop.permute.xlu1 %8034  ;;  %v2575_v55 = vpop.f32.mrf.mxu0  ;;  %v15988_v40 = vsel %vm12506_vm2, %v5860_v30, %v15881_v42  ;;  %v15992_v46 = vsel %vm12506_vm2, %v5870_v18, %v5874_v34  ;;  %v19442_v3 = vld [vmem:[#allocation85_spill] sm:$0xff]  ;;  %v5904_v42 = vshll.u32 %v15968_v41, 16  ;;  %v11842_v18 = vld [vmem:[%s19029_s4 + $0x884] ss:$8 sps:$4 sm:$0xff]  }
 0x209   : > { %v3233_v5 = vpop.f32.mrf.mxu1  ;;  %7074 = vmatpush2.bf16.msra.mxu0 %v11830_v6  ;;  %v16000_v61 = vadd.f32 %v3231_v51, %v2646_v48  ;;  %v19445_v30 = vld [vmem:[#allocation86_spill] sm:$0xff]  ;;  %v19446_v6 = vcombine.low %v15720_v49, %v15723_v50  ;;  %v5883_v51 = vor.u32 %v5882_v47, %v5879_v36  ;;  %v5893_v48 = vor.u32 %v5892_v7, %v15965_v54  ;;  %v16020_v50 = vpop.permute.xlu0 %8036 }
 0x20a   : > { %19441 = vst [vmem:[#allocation42_spill] sm:$0xff] %v15971_v52  ;;  %8272 = vrot.lane.b32.xlu0 %v19442_v3, %s12237_s22  ;;  %v19443_v52 = vld [vmem:[#allocation50_spill] sm:$0xff]  ;;  %7075 = vmatprep.subr.bf16.mxu0 %v11837_v8  ;;  %v2579_v34 = vpop.f32.mrf.mxu0  ;;  %v5910_v8 = vshll.u32 %v15979_v27, 16  ;;  %v19447_v3 = vld [vmem:[#allocation51_spill] sm:$0xff]  ;;  %v5914_v49 = vshrl.u32 %v15979_v27, 16  ;;  %v10960_v47 = vcombine.low %v15942_v45, %v15948_v39  ;;  %v10963_v7 = vcombine.high %v15988_v40, %v15992_v46 }
 0x20b   : > { %v2647_v57 = vadd.f32 %v2575_v55, %v19443_v52  ;;  %19444 = vst [vmem:[#allocation43_spill] sm:$0xff] %v16000_v61  ;;  %8274 = vrot.lane.b32.xlu1 %v19445_v30, %s12237_s22  ;;  %5482 = vmatmul.mubr.bf16.gmra.mxu0 %v19446_v6  ;;  %v3237_v52 = vpop.f32.mrf.mxu1  ;;  %v5896_v55 = vshll.u32 %v5010_v14, 16  ;;  %v2648_v61 = vadd.f32 %v2579_v34, %v19447_v3  ;;  %v5903_v45 = vrot.slane %v5901_v32, 4  ;;  %v16042_v34 = vld [vmem:[%s15161_s13 + $0x128] sm:$0xff] }
 0x20c   : > { %6444 = vmatmul.mubr.bf16.gmra.mxu1 %v10958_v56  ;;  %5491 = vmatprep.mubr.bf16.mxu0 %v10865_v26  ;;  %v10864_v30 = vcombine.low %v15783_v33, %v15791_v2  ;;  %v16022_v56 = vpop.permute.xlu1 %8038  ;;  %v2581_v36 = vpop.f32.mrf.mxu0  ;;  %v16031_v33 = vld [vmem:[%s15161_s13 + $0x120] sm:$0xff]  ;;  %v19449_v26 = vld [vmem:[#allocation87_spill] sm:$0xff]  ;;  %v5906_v3 = vrot.slane %v5904_v42, 5  ;;  %v5894_v53 = vrot.slane %v5893_v48, 4  ;;  %v16046_v17 = vrot.slane %v5910_v8, 5 }
 0x20d   : > { %v16015_v63 = vadd.f32 %v3233_v5, %v2647_v57  ;;  %6453 = vmatprep.mubr.bf16.mxu1 %v10961_v15  ;;  %v3239_v14 = vpop.f32.mrf.mxu1  ;;  %v10867_v57 = vcombine.high %v15835_v62, %v15838_v16  ;;  %7076 = vmatpush2.bf16.msra.mxu0 %v11835_v28  ;;  %v11840_v2 = vld [vmem:[%s19029_s4 + $0x880] ss:$8 sps:$4 sm:$0xff]   ;;  %v19450_v15 = vld [vmem:[#allocation52_spill] sm:$0xff]  ;;  %v16039_v39 = vadd.f32 %v3237_v52, %v2648_v61  ;;  %v5898_v38 = vrot.slane %v5896_v55, 5  ;;  %v5013_v61 = vld [vmem:[%s15161_s13 + $0x118] sm:$0x11]  ;;  %v16053_v52 = vpop.permute.xlu0 %8040 }
 0x20e   : > { %8276 = vrot.lane.b32.xlu0 %v19449_v26, %s12237_s22  ;;  %v2649_v5 = vadd.f32 %v2581_v36, %v19450_v15  ;;  %7077 = vmatprep.subr.bf16.mxu0 %v11842_v18  ;;  %v2583_v28 = vpop.f32.mrf.mxu0  ;;  %v19452_v26 = vld [vmem:[#allocation53_spill] sm:$0xff]  ;;  %v5916_v32 = vrot.slane %v5914_v49, 4  ;;  %v5925_v42 = vshrl.u32 %v16031_v33, 16  ;;  %v5934_v48 = vshll.u32 %v16042_v34, 16  ;;  %v12130_v8 = vld [vmem:[%s19028_s3] sm:$0xff] }
 0x20f   : > { %19448 = vst [vmem:[#allocation44_spill] sm:$0xff] %v16015_v63  ;;  %19451 = vst [vmem:[#allocation45_spill] sm:$0xff] %v16039_v39  ;;  %8278 = vrot.lane.b32.xlu1 %v15468_v58, %s12237_s22  ;;  %v3241_v6 = vpop.f32.mrf.mxu1  ;;  %v5884_v63 = vrot.slane %v5883_v51, 4  ;;  %v2650_v37 = vadd.f32 %v2583_v28, %v19452_v26  ;;  %v5928_v51 = vshll.u32 %v16031_v33, 16  ;;  %v5938_v55 = vshrl.u32 %v16042_v34, 16 }
 0x210   : > { %v16049_v36 = vadd.f32 %v3239_v14, %v2649_v5  ;;  %v16055_v18 = vpop.permute.xlu1 %8042  ;;  %v2585_v15 = vpop.f32.mrf.mxu0  ;;  %v8124_v49 = vadd.f32 %v12130_v8, %v15930_v19  ;;  %v19454_v14 = vld [vmem:[#allocation56_spill] sm:$0xff]  ;;  %v5907_v28 = vor.u32 %v5906_v3, %v5903_v45  ;;  %v10866_v8 = vcombine.low %v15835_v62, %v15838_v16 }
 0x211   : > { %v3243_v58 = vpop.f32.mrf.mxu1  ;;  %7078 = vmatpush2.bf16.msra.mxu0 %v11840_v2  ;;  %v2651_v26 = vadd.f32 %v2585_v15, %v19454_v14  ;;  %v16067_v5 = vadd.f32 %v3241_v6, %v2650_v37  ;;  %v16080_v37 = vsel %vm12506_vm2, %v5884_v63, %v15965_v54  ;;  %v16084_v45 = vsel %vm12506_vm2, %v5894_v53, %v5898_v38  ;;  %v19456_v6 = vld [vmem:[#allocation59_spill] sm:$0xff]  ;;  %v16092_v16 = vpop.permute.xlu0 %8044  ;;  %v5016_v15 = vld [vmem:[%s15161_s13 + $0x130] sm:$0x11] }
 0x212   : > { %19453 = vst [vmem:[#allocation46_spill] sm:$0xff] %v16049_v36  ;;  %8280 = vrot.lane.b32.xlu0 %v15473_v21, %s12237_s22  ;;  %v12131_v36 = vld [vmem:[%s19028_s3 + $0x8] sm:$0xff]  ;;  %v4049_v39 = vpop.f32.mrf.mxu0  ;;  %v16090_v62 = vrot.slane %v5925_v42, 4  ;;  %v5930_v38 = vrot.slane %v5928_v51, 5  ;;  %v16096_v53 = vrot.slane %v5934_v48, 5  ;;  %v5908_v42 = vrot.slane %v5907_v28, 4 }
 0x213   : > { %v8125_v2 = vadd.f32 %v12131_v36, %v15944_v59  ;;  %8282 = vrot.lane.b32.xlu1 %v15492_v9, %s12237_s22  ;;  %5492 = vmatmul.mubr.bf16.gmra.mxu0 %v10864_v30  ;;  %v4755_v19 = vpop.f32.mrf.mxu1  ;;  %v5920_v59 = vshll.u32 %v5013_v61, 16  ;;  %v16086_v3 = vadd.f32 %v3243_v58, %v2651_v26  ;;  %v4208_v36 = vadd.f32 %v4049_v39, %v19456_v6  ;;  %v19457_v39 = vld [vmem:[#allocation60_spill] sm:$0xff]  ;;  %v12133_v51 = vld [vmem:[%s19028_s3 + $0x18] sm:$0xff] }
 0x214   : > { %6454 = vmatmul.mubr.bf16.gmra.mxu1 %v10960_v47  ;;  %5501 = vmatprep.mubr.bf16.mxu0 %v10867_v57  ;;  %v5917_v30 = vor.u32 %v5916_v32, %v16046_v17  ;;  %v16094_v63 = vpop.permute.xlu1 %8046  ;;  %v4051_v54 = vpop.f32.mrf.mxu0  ;;  %v5940_v58 = vrot.slane %v5938_v55, 4  ;;  %v12132_v57 = vld [vmem:[%s19028_s3 + $0x10] sm:$0xff]  ;;  %v8127_v48 = vadd.f32 %v12133_v51, %v15983_v11  ;;  %v10869_v14 = vcombine.high %v15909_v23, %v15912_v29 }
 0x215   : > { %19455 = vst [vmem:[#allocation47_spill] sm:$0xff] %v16086_v3  ;;  %6463 = vmatprep.mubr.bf16.mxu1 %v10963_v7  ;;  %v4757_v47 = vpop.f32.mrf.mxu1  ;;  %v8126_v7 = vadd.f32 %v12132_v57, %v15981_v25  ;;  %v4209_v61 = vadd.f32 %v4051_v54, %v19457_v39  ;;  %v16104_v32 = vadd.f32 %v4755_v19, %v4208_v36  ;;  %v19459_v19 = vld [vmem:[#allocation63_spill] sm:$0xff]  ;;  %v16124_v54 = vld [vmem:[%s15161_s13 + $0x138] sm:$0xff]  ;;  %v16127_v57 = vld [vmem:[%s15161_s13 + $0x140] sm:$0xff]  ;;  %v5944_v9 = vshll.u32 %v5016_v15, 16 }
 0x216   : > { %8380 = vrot.lane.b32.xlu0 %v8124_v49, %s12238_s26  ;;  %v4053_v25 = vpop.f32.mrf.mxu0  ;;  %v10962_v49 = vcombine.low %v15988_v40, %v15992_v46  ;;  %v10965_v28 = vcombine.high %v16080_v37, %v16084_v45  ;;  %v5918_v11 = vrot.slane %v5917_v30, 4  ;;  %v16129_v40 = vpop.permute.xlu0 %8048  ;;  %v5931_v26 = vor.u32 %v5930_v38, %v16090_v62  ;;  %v12134_v30 = vld [vmem:[%s19028_s3 + $0x20] sm:$0xff]  ;;  %v12135_v62 = vld [vmem:[%s19028_s3 + $0x28] sm:$0xff] }
 0x217   : > { %19458 = vst [vmem:[#allocation48_spill] sm:$0xff] %v16104_v32  ;;  %8382 = vrot.lane.b32.xlu1 %v8125_v2, %s12238_s26  ;;  %v4759_v55 = vpop.f32.mrf.mxu1  ;;  %v4210_v6 = vadd.f32 %v4053_v25, %v19459_v19  ;;  %v16121_v36 = vadd.f32 %v4757_v47, %v4209_v61  ;;  %v5922_v2 = vrot.slane %v5920_v59, 5  ;;  %v5941_v32 = vor.u32 %v5940_v58, %v16096_v53  ;;  %v19461_v47 = vld [vmem:[#allocation64_spill] sm:$0xff] }
 0x218   : > { %v16131_v46 = vpop.permute.xlu1 %8050  ;;  %v4055_v39 = vpop.f32.mrf.mxu0  ;;  %v8128_v59 = vadd.f32 %v12134_v30, %v16020_v50  ;;  %v16146_v19 = vsel %vm12506_vm2, %v5908_v42, %v16046_v17  ;;  %v8129_v38 = vadd.f32 %v12135_v62, %v16022_v56  ;;  %v5952_v15 = vshll.u32 %v16124_v54, 16  ;;  %v19463_v42 = vld [vmem:[#allocation67_spill] sm:$0xff] }
 0x219   : > { %19460 = vst [vmem:[#allocation50_spill] sm:$0xff] %v16121_v36  ;;  %v4761_v51 = vpop.f32.mrf.mxu1  ;;  %v4211_v61 = vadd.f32 %v4055_v39, %v19461_v47  ;;  %v16141_v25 = vadd.f32 %v4759_v55, %v4210_v6  ;;  %v5958_v55 = vshll.u32 %v16127_v57, 16  ;;  %v5962_v17 = vshrl.u32 %v16127_v57, 16 }
 0x21a   : > { %8384 = vrot.lane.b32.xlu0 %v8126_v7, %s12238_s26  ;;  %v4059_v50 = vpop.f32.mrf.mxu0  ;;  %v5949_v7 = vshrl.u32 %v16124_v54, 16  ;;  %v16162_v56 = vsel %vm12506_vm2, %v5918_v11, %v5922_v2  ;;  %v5932_v47 = vrot.slane %v5931_v26, 4  ;;  %v5942_v62 = vrot.slane %v5941_v32, 4 }
 0x21b   : > { %19462 = vst [vmem:[#allocation51_spill] sm:$0xff] %v16141_v25  ;;  %8386 = vrot.lane.b32.xlu1 %v8127_v48, %s12238_s26  ;;  %5502 = vmatmul.mubr.bf16.gmra.mxu0 %v10866_v8  ;;  %v4765_v58 = vpop.f32.mrf.mxu1  ;;  %v4212_v6 = vadd.f32 %v4059_v50, %v19463_v42  ;;  %v16158_v39 = vadd.f32 %v4761_v51, %v4211_v61  ;;  %v16164_v8 = vpop.permute.xlu0 %8052  ;;  %v5946_v25 = vrot.slane %v5944_v9, 5  ;;  %v12136_v51 = vld [vmem:[%s19028_s3 + $0x30] sm:$0xff]  ;;  %v12137_v9 = vld [vmem:[%s19028_s3 + $0x38] sm:$0xff]  ;;  %v5019_v50 = vld [vmem:[%s15161_s13 + $0x148] sm:$0x11] }
 0x21c   : > { %6464 = vmatmul.mubr.bf16.gmra.mxu1 %v10962_v49  ;;  %5511 = vmatprep.mubr.bf16.mxu0 %v10869_v14  ;;  %v16166_v48 = vpop.permute.xlu1 %8054  ;;  %v4061_v49 = vpop.f32.mrf.mxu0  ;;  %v8130_v14 = vadd.f32 %v12136_v51, %v16053_v52  ;;  %v10964_v61 = vcombine.low %v16080_v37, %v16084_v45  ;;  %v8131_v32 = vadd.f32 %v12137_v9, %v16055_v18  ;;  %v5954_v42 = vrot.slane %v5952_v15, 5  ;;  %v16212_v9 = vld [vmem:[%s15161_s13 + $0x158] sm:$0xff] }
 0x21d   : > { %19464 = vst [vmem:[#allocation52_spill] sm:$0xff] %v16158_v39  ;;  %6473 = vmatprep.mubr.bf16.mxu1 %v10965_v28  ;;  %v4767_v30 = vpop.f32.mrf.mxu1  ;;  %v19465_v28 = vld [vmem:[#allocation3_spill] sm:$0xff]  ;;  %v16174_v2 = vadd.f32 %v4765_v58, %v4212_v6  ;;  %v16184_v58 = vrot.slane %v5958_v55, 5  ;;  %v5964_v6 = vrot.slane %v5962_v17, 4  ;;  %v10871_v45 = vcombine.high %v15968_v41, %v15979_v27  ;;  %v19469_v17 = vld [vmem:[#allocation5_spill] sm:$0xff] }
 0x21e   : > { %8388 = vrot.lane.b32.xlu0 %v8128_v59, %s12238_s26  ;;  %v4213_v11 = vadd.f32 %v4061_v49, %v19465_v28  ;;  %v4063_v26 = vpop.f32.mrf.mxu0  ;;  %v5951_v59 = vrot.slane %v5949_v7, 4  ;;  %v19467_v49 = vld [vmem:[#allocation4_spill] sm:$0xff]  ;;  %v10967_v18 = vcombine.high %v16146_v19, %v16162_v56  ;;  %v19471_v39 = vcombine.low %v15909_v23, %v15912_v29 }
 0x21f   : > { %19466 = vst [vmem:[#allocation53_spill] sm:$0xff] %v16174_v2  ;;  %8390 = vrot.lane.b32.xlu1 %v8129_v38, %s12238_s26  ;;  %v4769_v52 = vpop.f32.mrf.mxu1  ;;  %v4214_v51 = vadd.f32 %v4063_v26, %v19467_v49  ;;  %v16194_v38 = vld [vmem:[%s15161_s13 + $0x150] sm:$0xff]  ;;  %v16196_v28 = vpop.permute.xlu0 %8056  ;;  %v12138_v26 = vld [vmem:[%s19028_s3 + $0x40] sm:$0xff]  ;;  %v5986_v23 = vshrl.u32 %v16212_v9, 16 }
 0x220   : > { %v16187_v37 = vadd.f32 %v4767_v30, %v4213_v11  ;;  %v16198_v7 = vpop.permute.xlu1 %8058  ;;  %v4065_v15 = vpop.f32.mrf.mxu0  ;;  %v16205_v30 = vsel %vm12506_vm2, %v5932_v47, %v16096_v53  ;;  %v16209_v11 = vsel %vm12506_vm2, %v5942_v62, %v5946_v25  ;;  %v8132_v49 = vadd.f32 %v12138_v26, %v16092_v16  ;;  %v12139_v25 = vld [vmem:[%s19028_s3 + $0x48] sm:$0xff] }
 0x221   : > { %v4771_v55 = vpop.f32.mrf.mxu1  ;;  %v16220_v2 = vadd.f32 %v4769_v52, %v4214_v51  ;;  %v5968_v53 = vshll.u32 %v5019_v50, 16  ;;  %v8133_v47 = vadd.f32 %v12139_v25, %v16094_v63  ;;  %v5965_v52 = vor.u32 %v5964_v6, %v16184_v58  ;;  %v19474_v25 = vld [vmem:[#allocation7_spill] sm:$0xff] }
 0x222   : > { %19468 = vst [vmem:[#allocation56_spill] sm:$0xff] %v16187_v37  ;;  %8392 = vrot.lane.b32.xlu0 %v8130_v14, %s12238_s26  ;;  %v4215_v37 = vadd.f32 %v4065_v15, %v19469_v17  ;;  %v4069_v62 = vpop.f32.mrf.mxu0  ;;  %v5955_v14 = vor.u32 %v5954_v42, %v5951_v59  ;;  %v5973_v50 = vshrl.u32 %v16194_v38, 16  ;;  %v5976_v51 = vshll.u32 %v16194_v38, 16  ;;  %v19472_v15 = vld [vmem:[#allocation6_spill] sm:$0xff] }
 0x223   : > { %19470 = vst [vmem:[#allocation59_spill] sm:$0xff] %v16220_v2  ;;  %8394 = vrot.lane.b32.xlu1 %v8131_v32, %s12238_s26  ;;  %5512 = vmatmul.mubr.bf16.gmra.mxu0 %v19471_v39  ;;  %v4775_v16 = vpop.f32.mrf.mxu1  ;;  %v4216_v17 = vadd.f32 %v4069_v62, %v19472_v15  ;;  %v5982_v63 = vshll.u32 %v16212_v9, 16  ;;  %v16238_v29 = vpop.permute.xlu0 %8060  ;;  %v11844_v32 = vld [vmem:[%s19031_s6 + $0x38] sm:$0xff]   ;;  %v10966_v6 = vcombine.low %v16146_v19, %v16162_v56  ;;  %v5970_v19 = vrot.slane %v5968_v53, 5 }
 0x224   : > { %6474 = vmatmul.mubr.bf16.gmra.mxu1 %v10964_v61  ;;  %v16234_v26 = vadd.f32 %v4771_v55, %v4215_v37  ;;  %5521 = vmatprep.mubr.bf16.mxu0 %v10871_v45  ;;  %v16240_v39 = vpop.permute.xlu1 %8062  ;;  %v11843_v61 = vld [vmem:[%s19031_s6 + $0x78] sm:$0xff]   ;;  %v4071_v59 = vpop.f32.mrf.mxu0  ;;  %v10873_v37 = vcombine.high %v16031_v33, %v16042_v34  ;;  %v10969_v45 = vcombine.high %v16205_v30, %v16209_v11  ;;  %v5975_v36 = vrot.slane %v5973_v50, 4 }
 0x225   : > { %6483 = vmatprep.mubr.bf16.mxu1 %v10967_v18  ;;  %v4777_v42 = vpop.f32.mrf.mxu1  ;;  %v12140_v18 = vld [vmem:[%s19028_s3 + $0x50] sm:$0xff]  ;;  %v4217_v62 = vadd.f32 %v4071_v59, %v19474_v25  ;;  %v16260_v15 = vadd.f32 %v4775_v16, %v4216_v17  ;;  %v12141_v56 = vld [vmem:[%s19028_s3 + $0x58] sm:$0xff]  ;;  %11172 = vmatprep.subr.bf16.mxu1 %v11843_v61  ;;  %v5978_v59 = vrot.slane %v5976_v51, 5  ;;  %v5022_v25 = vld [vmem:[%s15161_s13 + $0x160] sm:$0x11] }
 0x226   : > { %19473 = vst [vmem:[#allocation60_spill] sm:$0xff] %v16234_v26  ;;  %v8134_v55 = vadd.f32 %v12140_v18, %v16129_v40  ;;  %8396 = vrot.lane.b32.xlu0 %v8132_v49, %s12238_s26  ;;  %v8135_v26 = vadd.f32 %v12141_v56, %v16131_v46  ;;  %v4073_v2 = vpop.f32.mrf.mxu0  ;;  %v5956_v18 = vrot.slane %v5955_v14, 4  ;;  %v5966_v49 = vrot.slane %v5965_v52, 4  ;;  %11173 = vmatpush3.bf16.msra.mxu1 %v11844_v32  ;;  %v19476_v16 = vld [vmem:[#allocation8_spill] sm:$0xff]  ;;  %v16278_v14 = vld [vmem:[%s15161_s13 + $0x168] sm:$0xff]  ;;  %v12142_v52 = vld [vmem:[%s19028_s3 + $0x60] sm:$0xff] }
 0x227   : > { %19475 = vst [vmem:[#allocation63_spill] sm:$0xff] %v16260_v15  ;;  %8398 = vrot.lane.b32.xlu1 %v8133_v47, %s12238_s26  ;;  %v4779_v40 = vpop.f32.mrf.mxu1  ;;  %v4218_v17 = vadd.f32 %v4073_v2, %v19476_v16  ;;  %v16268_v53 = vadd.f32 %v4777_v42, %v4217_v62  ;;  %v16271_v15 = vrot.slane %v5982_v63, 5  ;;  %v5988_v46 = vrot.slane %v5986_v23, 4  ;;  %v16273_v56 = vpop.permute.xlu0 %8064  ;;  %v19477_v50 = vld [vmem:[#allocation9_spill] sm:$0xff]  ;;  %v16291_v32 = vld [vmem:[%s15161_s13 + $0x170] sm:$0xff]  ;;  %v12143_v42 = vld [vmem:[%s19028_s3 + $0x68] sm:$0xff] }
 0x228   : > { %v16275_v47 = vpop.permute.xlu1 %8066  ;;  %v4075_v61 = vpop.f32.mrf.mxu0  ;;  %v8136_v2 = vadd.f32 %v12142_v52, %v16164_v8  ;;  %v10872_v23 = vcombine.low %v16031_v33, %v16042_v34  ;;  %v8137_v62 = vadd.f32 %v12143_v42, %v16166_v48  ;;  %v16304_v33 = vsel %vm12506_vm2, %v5956_v18, %v16184_v58 }
 0x229   : > { %v4781_v3 = vpop.f32.mrf.mxu1  ;;  %v4219_v51 = vadd.f32 %v4075_v61, %v19477_v50  ;;  %v16286_v63 = vadd.f32 %v4779_v40, %v4218_v17  ;;  %v16308_v34 = vsel %vm12506_vm2, %v5966_v49, %v5970_v19  ;;  %v5979_v16 = vor.u32 %v5978_v59, %v5975_v36  ;;  %v19479_v17 = vld [vmem:[#allocation10_spill] sm:$0xff]  ;;  %v12144_v36 = vld [vmem:[%s19028_s3 + $0x70] sm:$0xff] }
 0x22a   : > { %8400 = vrot.lane.b32.xlu0 %v8134_v55, %s12238_s26  ;;  %v4079_v8 = vpop.f32.mrf.mxu0  ;;  %v19478_v55 = vcombine.low %v15968_v41, %v15979_v27  ;;  %v5992_v48 = vshll.u32 %v5022_v25, 16  ;;  %v5989_v27 = vor.u32 %v5988_v46, %v16271_v15  ;;  %v5997_v41 = vshrl.u32 %v16278_v14, 16  ;;  %v12145_v25 = vld [vmem:[%s19028_s3 + $0x78] sm:$0xff] }
 0x22b   : > { %8402 = vrot.lane.b32.xlu1 %v8135_v26, %s12238_s26  ;;  %v4785_v40 = vpop.f32.mrf.mxu1  ;;  %v4220_v26 = vadd.f32 %v4079_v8, %v19479_v17  ;;  %v16311_v61 = vadd.f32 %v4781_v3, %v4219_v51  ;;  %v6000_v58 = vshll.u32 %v16278_v14, 16  ;;  %v6006_v18 = vshll.u32 %v16291_v32, 16  ;;  %v16332_v50 = vpop.permute.xlu0 %8068  ;;  %v19483_v17 = vld [vmem:[#allocation12_spill] sm:$0xff] }
 0x22c   : > { %5522 = vmatmul.mubr.bf16.gmra.mxu0 %v19478_v55  ;;  %6484 = vmatmul.mubr.bf16.gmra.mxu1 %v10966_v6  ;;  %v4081_v6 = vpop.f32.mrf.mxu0  ;;  %v6010_v19 = vshrl.u32 %v16291_v32, 16  ;;  %v8138_v3 = vadd.f32 %v12144_v36, %v16196_v28  ;;  %v10875_v59 = vcombine.high %v16124_v54, %v16127_v57  ;;  %v8139_v46 = vadd.f32 %v12145_v25, %v16198_v7  ;;  %v16335_v28 = vpop.permute.xlu1 %8070 }
 0x22d   : > { %19480 = vst [vmem:[#allocation64_spill] sm:$0xff] %v16311_v61  ;;  %5531 = vmatprep.mubr.bf16.mxu0 %v10873_v37  ;;  %6493 = vmatprep.mubr.bf16.mxu1 %v10969_v45  ;;  %v4787_v52 = vpop.f32.mrf.mxu1  ;;  %v19481_v37 = vld [vmem:[#allocation11_spill] sm:$0xff]  ;;  %v16324_v49 = vadd.f32 %v4785_v40, %v4220_v26  ;;  %v10968_v42 = vcombine.low %v16205_v30, %v16209_v11  ;;  %v5980_v55 = vrot.slane %v5979_v16, 4  ;;  %v5994_v40 = vrot.slane %v5992_v48, 5  ;;  %v12146_v30 = vld [vmem:[%s19028_s3 + $0x80] sm:$0xff]  ;;  %v19484_v16 = vld [vmem:[#allocation13_spill] sm:$0xff] }
 0x22e   : > { %8404 = vrot.lane.b32.xlu0 %v8136_v2, %s12238_s26  ;;  %v4221_v45 = vadd.f32 %v4081_v6, %v19481_v37  ;;  %v4083_v2 = vpop.f32.mrf.mxu0  ;;  %v10971_v8 = vcombine.high %v16304_v33, %v16308_v34  ;;  %v5990_v6 = vrot.slane %v5989_v27, 4  ;;  %v5999_v36 = vrot.slane %v5997_v41, 4  ;;  %v5025_v27 = vld [vmem:[%s15161_s13 + $0x178] sm:$0x11]  ;;  %v12147_v41 = vld [vmem:[%s19028_s3 + $0x88] sm:$0xff] }
 0x22f   : > { %19482 = vst [vmem:[#allocation67_spill] sm:$0xff] %v16324_v49  ;;  %8406 = vrot.lane.b32.xlu1 %v8137_v62, %s12238_s26  ;;  %v4789_v51 = vpop.f32.mrf.mxu1  ;;  %v4222_v26 = vadd.f32 %v4083_v2, %v19483_v17  ;;  %v6002_v25 = vrot.slane %v6000_v58, 5  ;;  %v16344_v49 = vrot.slane %v6006_v18, 5  ;;  %v6012_v61 = vrot.slane %v6010_v19, 4 }
 0x230   : > { %v16342_v7 = vadd.f32 %v4787_v52, %v4221_v45  ;;  %v4085_v62 = vpop.f32.mrf.mxu0  ;;  %v8140_v11 = vadd.f32 %v12146_v30, %v16238_v29  ;;  %v8141_v58 = vadd.f32 %v12147_v41, %v16240_v39  ;;  %v16363_v29 = vsel %vm12506_vm2, %v5980_v55, %v16271_v15  ;;  %v11846_v15 = vld [vmem:[%s19031_s6 + $0x30] sm:$0xff]   ;;  %v12149_v30 = vld [vmem:[%s19028_s3 + $0x98] sm:$0xff] }
 0x231   : > { %v4791_v37 = vpop.f32.mrf.mxu1  ;;  %v4223_v48 = vadd.f32 %v4085_v62, %v19484_v16  ;;  %v16352_v52 = vadd.f32 %v4789_v51, %v4222_v26  ;;  %v16370_v39 = vsel %vm12506_vm2, %v5990_v6, %v5994_v40  ;;  %v8075_v51 = vpop.permute.xlu1 %8074  ;;  %v6003_v17 = vor.u32 %v6002_v25, %v5999_v36  ;;  %v12148_v40 = vld [vmem:[%s19028_s3 + $0x90] sm:$0xff]  ;;  %v19487_v16 = vld [vmem:[#allocation83_spill] sm:$0xff] }
 0x232   : > { %8408 = vrot.lane.b32.xlu0 %v8138_v3, %s12238_s26  ;;  %v4089_v18 = vpop.f32.mrf.mxu0  ;;  %v19485_v3 = vld [vmem:[#allocation14_spill] sm:$0xff]  ;;  %v8142_v26 = vadd.f32 %v12148_v40, %v16273_v56  ;;  %v19486_v6 = vld [vmem:[#allocation80_spill] sm:$0xff]  ;;  %v8143_v36 = vadd.f32 %v12149_v30, %v16275_v47  ;;  %v10874_v56 = vcombine.low %v16124_v54, %v16127_v57  ;;  %v10877_v41 = vcombine.high %v16194_v38, %v16212_v9  ;;  %v12152_v30 = vld [vmem:[%s15161_s13 + $0x8] sm:$0xff] }
 0x233   : > { %8410 = vrot.lane.b32.xlu1 %v8139_v46, %s12238_s26  ;;  %v4795_v19 = vpop.f32.mrf.mxu1  ;;  %v4224_v45 = vadd.f32 %v4089_v18, %v19485_v3  ;;  %v16366_v2 = vadd.f32 %v4791_v37, %v4223_v48  ;;  %v8073_v46 = vpop.permute.xlu0 %8072  ;;  %v10973_v47 = vcombine.high %v16363_v29, %v16370_v39  ;;  %v12150_v57 = vld [vmem:[%s19028_s3 + $0xa0] sm:$0xff] }
 0x234   : > { %5532 = vmatmul.mubr.bf16.gmra.mxu0 %v10872_v23  ;;  %6494 = vmatmul.mubr.bf16.gmra.mxu1 %v10968_v42  ;;  %v11845_v23 = vld [vmem:[%s19031_s6 + $0x70] sm:$0xff]   ;;  %v4091_v42 = vpop.f32.mrf.mxu0 }
 0x235   : > { %5541 = vmatprep.mubr.bf16.mxu0 %v10875_v59  ;;  %6503 = vmatprep.mubr.bf16.mxu1 %v10971_v8  ;;  %v4797_v55 = vpop.f32.mrf.mxu1  ;;  %v6013_v59 = vor.u32 %v6012_v61, %v16344_v49  ;;  %v6016_v8 = vshll.u32 %v5025_v27, 16  ;;  %v4225_v62 = vadd.f32 %v4091_v42, %v19486_v6  ;;  %v16385_v37 = vadd.f32 %v4795_v19, %v4224_v45 }
 0x236   : > { %8412 = vrot.lane.b32.xlu0 %v8140_v11, %s12238_s26  ;;  %11174 = vmatprep.subr.bf16.mxu1 %v11845_v23  ;;  %v4093_v61 = vpop.f32.mrf.mxu0  ;;  %v10970_v11 = vcombine.low %v16304_v33, %v16308_v34  ;;  %v6004_v19 = vrot.slane %v6003_v17, 4  ;;  %v8144_v33 = vadd.f32 %v12150_v57, %v16332_v50  ;;  %v19488_v34 = vld [vmem:[#allocation15_spill] sm:$0xff]  ;;  %v8079_v17 = vpop.permute.xlu1 %8078 }
 0x237   : > { %8414 = vrot.lane.b32.xlu1 %v8141_v58, %s12238_s26  ;;  %v4799_v25 = vpop.f32.mrf.mxu1  ;;  %11175 = vmatpush3.bf16.msra.mxu1 %v11846_v15  ;;  %v4226_v48 = vadd.f32 %v4093_v61, %v19487_v16  ;;  %v16397_v27 = vadd.f32 %v4797_v55, %v4225_v62  ;;  %v6014_v3 = vrot.slane %v6013_v59, 4  ;;  %v6018_v54 = vrot.slane %v6016_v8, 5  ;;  %v12151_v15 = vld [vmem:[%s19028_s3 + $0xa8] sm:$0xff]  ;;  %v8077_v55 = vpop.permute.xlu0 %8076  ;;  %v19489_v8 = vld [vmem:[#allocation16_spill] sm:$0xff] }
 0x238   : > { %v4095_v58 = vpop.f32.mrf.mxu0  ;;  %v8145_v42 = vadd.f32 %v12151_v15, %v16335_v28  ;;  %v16424_v62 = vsel %vm12506_vm2, %v6004_v19, %v16344_v49  ;;  %v12153_v61 = vld [vmem:[%s19028_s3 + $0xb0] sm:$0xff]  ;;  %v8147_v49 = vadd.f32 %v12154_v10, %v8075_v51  ;;  %v11848_v10 = vld [vmem:[%s19031_s6 + $0x28] sm:$0xff]  }
 0x239   : > { %v16403_v18 = vpop.f32.mrf.mxu1  ;;  %v16411_v45 = vadd.f32 %v4095_v58, %v19488_v34  ;;  %v16413_v23 = vadd.f32 %v4799_v25, %v4226_v48  ;;  %v16428_v28 = vsel %vm12506_vm2, %v6014_v3, %v6018_v54  ;;  %v8146_v25 = vadd.f32 %v12153_v61, %v8073_v46  ;;  %v19491_v58 = vld [vmem:[#allocation18_spill] sm:$0xff] }
 0x23a   : > { %8416 = vrot.lane.b32.xlu0 %v8142_v26, %s12238_s26  ;;  %v4099_v59 = vpop.f32.mrf.mxu0  ;;  %v10876_v46 = vcombine.low %v16194_v38, %v16212_v9  ;;  %v10879_v54 = vcombine.high %v16278_v14, %v16291_v32  ;;  %v10975_v51 = vcombine.high %v16424_v62, %v16428_v28 }
 0x23b   : > { %8418 = vrot.lane.b32.xlu1 %v8143_v36, %s12238_s26  ;;  %v4805_v50 = vpop.f32.mrf.mxu1  ;;  %v4228_v40 = vadd.f32 %v4099_v59, %v19489_v8  ;;  %v6616_v36 = vrot.slane %v12152_v30, 5  ;;  %v8081_v57 = vpop.permute.xlu0 %8080  ;;  %v12156_v59 = vld [vmem:[%s15161_s13 + $0x10] sm:$0x11]  ;;  %v19492_v8 = vld [vmem:[#allocation19_spill] sm:$0xff] }
 0x23c   : > { %5542 = vmatmul.mubr.bf16.gmra.mxu0 %v10874_v56  ;;  %6504 = vmatmul.mubr.bf16.gmra.mxu1 %v10970_v11  ;;  %v4101_v26 = vpop.f32.mrf.mxu0  ;;  %v19490_v56 = vld [vmem:[#allocation17_spill] sm:$0xff] }
 0x23d   : > { %5551 = vmatprep.mubr.bf16.mxu0 %v10877_v41  ;;  %6513 = vmatprep.mubr.bf16.mxu1 %v10973_v47  ;;  %v4807_v6 = vpop.f32.mrf.mxu1  ;;  %v4229_v11 = vadd.f32 %v4101_v26, %v19490_v56  ;;  %v16436_v16 = vadd.f32 %v4805_v50, %v4228_v40  ;;  %v10972_v47 = vcombine.low %v16363_v29, %v16370_v39  ;;  %v6618_v9 = vrot.slane %v6616_v36, 4  ;;  %v12157_v39 = vld [vmem:[%s19028_s3 + $0xc0] sm:$0xff] }
 0x23e   : > { %8420 = vrot.lane.b32.xlu0 %v8144_v33, %s12238_s26  ;;  %v4103_v48 = vpop.f32.mrf.mxu0  ;;  %v8083_v33 = vpop.permute.xlu1 %8082  ;;  %v6619_v29 = vrot.slane %v12156_v59, 5  ;;  %v8148_v50 = vadd.f32 %v12157_v39, %v8077_v55  ;;  %v19493_v55 = vld [vmem:[#allocation20_spill] sm:$0xff] }
 0x23f   : > { %8422 = vrot.lane.b32.xlu1 %v8145_v42, %s12238_s26  ;;  %v4809_v41 = vpop.f32.mrf.mxu1  ;;  %v4230_v19 = vadd.f32 %v4103_v48, %v19491_v58  ;;  %v16447_v3 = vadd.f32 %v4807_v6, %v4229_v11  ;;  %v12155_v42 = vld [vmem:[%s15161_s13] sm:$0xff]  ;;  %v12158_v6 = vld [vmem:[%s19028_s3 + $0xc8] sm:$0xff] }
 0x240   : > { %v4105_v34 = vpop.f32.mrf.mxu0  ;;  %v11008_v38 = vrot.slane %v12155_v42, 9  ;;  %v8149_v30 = vadd.f32 %v12158_v6, %v8079_v17 }
 0x241   : > { %v16453_v15 = vpop.f32.mrf.mxu1  ;;  %v16462_v40 = vadd.f32 %v4105_v34, %v19492_v8  ;;  %v16464_v26 = vadd.f32 %v4809_v41, %v4230_v19  ;;  %v12160_v19 = vld [vmem:[%s19028_s3 + $0xd0] sm:$0xff] }
 0x242   : > { %8424 = vrot.lane.b32.xlu0 %v8146_v25, %s12238_s26  ;;  %v4109_v61 = vpop.f32.mrf.mxu0  ;;  %v11847_v25 = vld [vmem:[%s19031_s6 + $0x68] sm:$0xff]  }
 0x243   : > { %8426 = vrot.lane.b32.xlu1 %v8147_v49, %s12238_s26  ;;  %v4815_v56 = vpop.f32.mrf.mxu1  ;;  %v4232_v11 = vadd.f32 %v4109_v61, %v19493_v55  ;;  %v16479_v49 = vsel %vm13126_vm5, %v11008_v38, %v6616_v36  ;;  %v12161_v36 = vld [vmem:[%s19028_s3 + $0xd8] sm:$0xff]  ;;  %v8085_v38 = vpop.permute.xlu0 %8084  ;;  %11176 = vmatprep.subr.bf16.mxu1 %v11847_v25  ;;  %v12163_v55 = vld [vmem:[%s15161_s13 + $0x28] sm:$0x11] }
 0x244   : > { %5552 = vmatmul.mubr.bf16.gmra.mxu0 %v10876_v46  ;;  %6514 = vmatmul.mubr.bf16.gmra.mxu1 %v10972_v47  ;;  %v4111_v48 = vpop.f32.mrf.mxu0  ;;  %v16483_v46 = vsel %vm13126_vm5, %v6618_v9, %v6619_v29  ;;  %v12159_v47 = vld [vmem:[%s15161_s13 + $0x20] sm:$0xff]  ;;  %v8151_v42 = vadd.f32 %v12161_v36, %v8083_v33  ;;  %v8087_v9 = vpop.permute.xlu1 %8086  ;;  %v10878_v29 = vcombine.low %v16278_v14, %v16291_v32 }
 0x245   : > { %5561 = vmatprep.mubr.bf16.mxu0 %v10879_v54  ;;  %6523 = vmatprep.mubr.bf16.mxu1 %v10975_v51  ;;  %v4817_v17 = vpop.f32.mrf.mxu1  ;;  %v6623_v58 = vrot.slane %v12159_v47, 5  ;;  %v8150_v54 = vadd.f32 %v12160_v19, %v8081_v57  ;;  %v4233_v51 = vadd.f32 %v4111_v48, %v15476_v1  ;;  %v16491_v34 = vadd.f32 %v4815_v56, %v4232_v11  ;;  %v12164_v14 = vld [vmem:[%s19028_s3 + $0xe0] sm:$0xff] }
 0x246   : > { %8428 = vrot.lane.b32.xlu0 %v8148_v50, %s12238_s26  ;;  %v4113_v59 = vpop.f32.mrf.mxu0  ;;  %v10974_v1 = vcombine.low %v16424_v62, %v16428_v28  ;;  %11177 = vmatpush3.bf16.msra.mxu1 %v11848_v10  ;;  %v11057_v33 = vcombine.high %v16479_v49, %v16483_v46  ;;  %v6626_v11 = vrot.slane %v12163_v55, 5  ;;  %v8152_v32 = vadd.f32 %v12164_v14, %v8085_v38  ;;  %v12165_v28 = vld [vmem:[%s19028_s3 + $0xe8] sm:$0xff]  ;;  %v12169_v55 = vld [vmem:[%s15161_s13 + $0x30] sm:$0xff] }
 0x247   : > { %8430 = vrot.lane.b32.xlu1 %v8149_v30, %s12238_s26  ;;  %v4819_v57 = vpop.f32.mrf.mxu1  ;;  %v4234_v39 = vadd.f32 %v4113_v59, %v15486_v0  ;;  %v16502_v50 = vadd.f32 %v4817_v17, %v4233_v51  ;;  %v12162_v30 = vld [vmem:[%s15161_s13 + $0x18] sm:$0xff]  ;;  %v6625_v56 = vrot.slane %v6623_v58, 4  ;;  %v8153_v25 = vadd.f32 %v12165_v28, %v8087_v9  ;;  %v8089_v47 = vpop.permute.xlu0 %8088  ;;  %v12167_v9 = vld [vmem:[%s19028_s3 + $0xf0] sm:$0xff] }
 0x248   : > { %v4115_v8 = vpop.f32.mrf.mxu0  ;;  %v11009_v61 = vrot.slane %v12162_v30, 9 }
 0x249   : > { %v16506_v6 = vpop.f32.mrf.mxu1  ;;  %v16515_v0 = vadd.f32 %v4115_v8, %v15509_v13  ;;  %v16517_v62 = vadd.f32 %v4819_v57, %v4234_v39  ;;  %v8091_v13 = vpop.permute.xlu1 %8090  ;;  %v16530_v36 = vsel %vm13126_vm5, %v6625_v56, %v6626_v11  ;;  %v11010_v11 = vrot.slane %v12169_v55, 9 }
 0x24a   : > { %8432 = vrot.lane.b32.xlu0 %v8150_v54, %s12238_s26  ;;  %v4119_v10 = vpop.f32.mrf.mxu0  ;;  %v16526_v51 = vsel %vm13126_vm5, %v11009_v61, %v6623_v58  ;;  %v12168_v58 = vld [vmem:[%s19028_s3 + $0xf8] sm:$0xff] }
 0x24b   : > { %8434 = vrot.lane.b32.xlu1 %v8151_v42, %s12238_s26  ;;  %v4825_v48 = vpop.f32.mrf.mxu1  ;;  %v4236_v17 = vadd.f32 %v4119_v10, %v15517_v60  ;;  %v12166_v42 = vld [vmem:[%s15161_s13 + $0x38] sm:$0xff]  ;;  %v8154_v60 = vadd.f32 %v12167_v9, %v8089_v47 }
 0x24c   : > { %5562 = vmatmul.mubr.bf16.gmra.mxu0 %v10878_v29  ;;  %6524 = vmatmul.mubr.bf16.gmra.mxu1 %v10974_v1  ;;  %v4121_v19 = vpop.f32.mrf.mxu0  ;;  %v6630_v38 = vrot.slane %v12166_v42, 5  ;;  %v8155_v29 = vadd.f32 %v12168_v58, %v8091_v13  ;;  %v19495_v42 = vld [vmem:[#allocation49_spill] sm:$0xff]  ;;  %v11058_v58 = vcombine.low %v16526_v51, %v16530_v36 }
 0x24d   : > { %7079 = vmatprep.mubr.bf16.mxu0 %v11057_v33  ;;  %v4827_v54 = vpop.f32.mrf.mxu1  ;;  %v4237_v59 = vadd.f32 %v4121_v19, %v15527_v35  ;;  %v16538_v57 = vadd.f32 %v4825_v48, %v4236_v17  ;;  %v11056_v33 = vcombine.low %v16479_v49, %v16483_v46  ;;  %v11059_v35 = vcombine.high %v16526_v51, %v16530_v36  ;;  %v11849_v48 = vld [vmem:[%s19031_s6 + $0x60] sm:$0xff]  }
 0x24e   : > { %8436 = vrot.lane.b32.xlu0 %v8152_v32, %s12238_s26  ;;  %v4123_v1 = vpop.f32.mrf.mxu0  ;;  %v6632_v14 = vrot.slane %v6630_v38, 4  ;;  %v12170_v32 = vld [vmem:[%s15161_s13 + $0x40] sm:$0x11]  ;;  %v6631_v13 = vsel %vm13126_vm5, %v11010_v11, %v6630_v38  ;;  %11178 = vmatprep.subr.bf16.mxu1 %v11849_v48  ;;  %v19496_v11 = vld [vmem:[#allocation21_spill] sm:$0xff] }
 0x24f   : > { %8438 = vrot.lane.b32.xlu1 %v8153_v25, %s12238_s26  ;;  %v4829_v39 = vpop.f32.mrf.mxu1  ;;  %v4238_v8 = vadd.f32 %v4123_v1, %v15549_v20  ;;  %v16547_v30 = vadd.f32 %v4827_v54, %v4237_v59  ;;  %v6633_v28 = vrot.slane %v12170_v32, 5  ;;  %v11850_v17 = vld [vmem:[%s19031_s6 + $0x20] sm:$0xff]   ;;  %v12171_v54 = vld [vmem:[%s15161_s13 + $0x50] sm:$0xff] }
 0x250   : > { %v4125_v61 = vpop.f32.mrf.mxu0  ;;  %11179 = vmatpush3.bf16.msra.mxu1 %v11850_v17  ;;  %v12174_v17 = vld [vmem:[%s15161_s13 + $0x68] sm:$0xff] }
 0x251   : > { %v16551_v56 = vpop.f32.mrf.mxu1  ;;  %v16557_v49 = vadd.f32 %v4125_v61, %v15557_v22  ;;  %v16559_v20 = vadd.f32 %v4829_v39, %v4238_v8  ;;  %v6634_v19 = vsel %vm13126_vm5, %v6632_v14, %v6633_v28  ;;  %v12172_v8 = vld [vmem:[%s15161_s13 + $0x48] sm:$0xff]  ;;  %v19498_v28 = vld [vmem:[#allocation22_spill] sm:$0xff] }
 0x252   : > { %8440 = vrot.lane.b32.xlu0 %v8154_v60, %s12238_s26  ;;  %v4129_v46 = vpop.f32.mrf.mxu0  ;;  %v11061_v39 = vcombine.high %v6631_v13, %v6634_v19 }
 0x253   : > { %8442 = vrot.lane.b32.xlu1 %v8155_v29, %s12238_s26  ;;  %v4835_v25 = vpop.f32.mrf.mxu1  ;;  %v4240_v10 = vadd.f32 %v4129_v46, %v15579_v24  ;;  %v6637_v24 = vrot.slane %v12171_v54, 5 }
 0x254   : > { %7080 = vmatmul.mubr.bf16.vlgmr.msra.gmra.mxu0 %v11056_v33  ;;  %v4131_v22 = vpop.f32.mrf.mxu0 }
 0x255   : > { %7089 = vmatprep.mubr.bf16.mxu0 %v11059_v35  ;;  %v4837_v47 = vpop.f32.mrf.mxu1  ;;  %v4241_v9 = vadd.f32 %v4131_v22, %v15588_v44  ;;  %v16577_v60 = vadd.f32 %v4835_v25, %v4240_v10  ;;  %v11011_v35 = vrot.slane %v12172_v8, 9  ;;  %v6639_v61 = vrot.slane %v6637_v24, 4 }
 0x256   : > { %8572 = vrot.lane.b32.xlu0 %v19495_v42, %s12238_s26  ;;  %v4133_v59 = vpop.f32.mrf.mxu0  ;;  %v6644_v22 = vrot.slane %v12174_v17, 5  ;;  %v11851_v17 = vld [vmem:[%s19031_s6 + $0x58] sm:$0xff]  }
 0x257   : > { %8574 = vrot.lane.b32.xlu1 %v14875_v31, %s12238_s26  ;;  %v4839_v38 = vpop.f32.mrf.mxu1  ;;  %v4242_v29 = vadd.f32 %v4133_v59, %v15602_v43  ;;  %v16584_v1 = vadd.f32 %v4837_v47, %v4241_v9  ;;  %v12173_v31 = vld [vmem:[%s15161_s13 + $0x58] sm:$0x11]  ;;  %v19497_v43 = vld [vmem:[#allocation54_spill] sm:$0xff]  ;;  %v6638_v48 = vsel %vm13126_vm5, %v11011_v35, %v6637_v24  ;;  %v19499_v47 = vld [vmem:[#allocation55_spill] sm:$0xff]  ;;  %v11060_v24 = vcombine.low %v6631_v13, %v6634_v19 }
 0x258   : > { %v4135_v33 = vpop.f32.mrf.mxu0  ;;  %v6640_v55 = vrot.slane %v12173_v31, 5  ;;  %v19500_v9 = vld [vmem:[#allocation57_spill] sm:$0xff]  ;;  %11180 = vmatprep.subr.bf16.mxu1 %v11851_v17  ;;  %v19512_v17 = vld [vmem:[#allocation66_spill] sm:$0xff] }
 0x259   : > { %v16586_v44 = vpop.f32.mrf.mxu1  ;;  %v16593_v51 = vadd.f32 %v4135_v33, %v19496_v11  ;;  %v16595_v36 = vadd.f32 %v4839_v38, %v4242_v29  ;;  %v19504_v19 = vld [vmem:[#allocation61_spill] sm:$0xff] }
 0x25a   : > { %8576 = vrot.lane.b32.xlu0 %v14870_v12, %s12238_s26  ;;  %v4139_v14 = vpop.f32.mrf.mxu0  ;;  %v6641_v12 = vsel %vm13126_vm5, %v6639_v61, %v6640_v55  ;;  %v12175_v61 = vld [vmem:[%s15161_s13 + $0x60] sm:$0xff]  ;;  %v6646_v55 = vrot.slane %v6644_v22, 4 }
 0x25b   : > { %8578 = vrot.lane.b32.xlu1 %v19497_v43, %s12238_s26  ;;  %v4845_v32 = vpop.f32.mrf.mxu1  ;;  %v4244_v46 = vadd.f32 %v4139_v14, %v19498_v28  ;;  %v11063_v33 = vcombine.high %v6638_v48, %v6641_v12  ;;  %v11012_v31 = vrot.slane %v12175_v61, 9  ;;  %v19502_v43 = vld [vmem:[#allocation58_spill] sm:$0xff]  ;;  %v19503_v14 = vld [vmem:[#allocation24_spill] sm:$0xff] }
 0x25c   : > { %7090 = vmatmul.mubr.bf16.gmra.mxu0 %v11058_v58  ;;  %v4141_v25 = vpop.f32.mrf.mxu0  ;;  %v19501_v58 = vld [vmem:[#allocation23_spill] sm:$0xff] }
 0x25d   : > { %7099 = vmatprep.mubr.bf16.mxu0 %v11061_v39  ;;  %v4847_v10 = vpop.f32.mrf.mxu1  ;;  %v4245_v54 = vadd.f32 %v4141_v25, %v15659_v4  ;;  %v16608_v42 = vadd.f32 %v4845_v32, %v4244_v46  ;;  %v12176_v4 = vld [vmem:[%s15161_s13 + $0x70] sm:$0x11]  ;;  %v19505_v25 = vld [vmem:[#allocation25_spill] sm:$0xff] }
 0x25e   : > { %8580 = vrot.lane.b32.xlu0 %v19499_v47, %s12238_s26  ;;  %v4143_v59 = vpop.f32.mrf.mxu0  ;;  %v6647_v11 = vrot.slane %v12176_v4, 5  ;;  %v11852_v47 = vld [vmem:[%s19031_s6 + $0x18] sm:$0xff]  }
 0x25f   : > { %8582 = vrot.lane.b32.xlu1 %v19500_v9, %s12238_s26  ;;  %v4849_v38 = vpop.f32.mrf.mxu1  ;;  %v4246_v29 = vadd.f32 %v4143_v59, %v19501_v58  ;;  %v16613_v39 = vadd.f32 %v4847_v10, %v4245_v54  ;;  %v6645_v59 = vsel %vm13126_vm5, %v11012_v31, %v6644_v22  ;;  %v19508_v4 = vld [vmem:[#allocation65_spill] sm:$0xff]  ;;  %v11062_v31 = vcombine.low %v6638_v48, %v6641_v12 }
 0x260   : > { %v4145_v8 = vpop.f32.mrf.mxu0  ;;  %11181 = vmatpush3.bf16.msra.mxu1 %v11852_v47  ;;  %v19516_v47 = vld [vmem:[#allocation68_spill] sm:$0xff] }
 0x261   : > { %v16615_v35 = vpop.f32.mrf.mxu1  ;;  %v16622_v32 = vadd.f32 %v4145_v8, %v19503_v14  ;;  %v16624_v13 = vadd.f32 %v4849_v38, %v4246_v29  ;;  %v6648_v38 = vsel %vm13126_vm5, %v6646_v55, %v6647_v11  ;;  %v19506_v29 = vld [vmem:[#allocation62_spill] sm:$0xff]  ;;  %v19509_v55 = vld [vmem:[#allocation27_spill] sm:$0xff] }
 0x262   : > { %8584 = vrot.lane.b32.xlu0 %v19502_v43, %s12238_s26  ;;  %v4149_v28 = vpop.f32.mrf.mxu0 }
 0x263   : > { %8586 = vrot.lane.b32.xlu1 %v19504_v19, %s12238_s26  ;;  %v4855_v46 = vpop.f32.mrf.mxu1  ;;  %v4248_v10 = vadd.f32 %v4149_v28, %v19505_v25  ;;  %v11065_v19 = vcombine.high %v6645_v59, %v6648_v38 }
 0x264   : > { %7100 = vmatmul.mubr.bf16.gmra.mxu0 %v11060_v24  ;;  %v4151_v54 = vpop.f32.mrf.mxu0  ;;  %v12177_v24 = vld [vmem:[%s15161_s13 + $0x80] sm:$0xff] }
 0x265   : > { %7109 = vmatprep.mubr.bf16.mxu0 %v11063_v33  ;;  %v4857_v9 = vpop.f32.mrf.mxu1  ;;  %v6651_v58 = vrot.slane %v12177_v24, 5  ;;  %v19507_v33 = vld [vmem:[#allocation26_spill] sm:$0xff]  ;;  %v16643_v61 = vadd.f32 %v4855_v46, %v4248_v10  ;;  %v12179_v10 = vld [vmem:[%s15161_s13 + $0x88] sm:$0x11] }
 0x266   : > { %8588 = vrot.lane.b32.xlu0 %v19506_v29, %s12238_s26  ;;  %v4249_v8 = vadd.f32 %v4151_v54, %v19507_v33  ;;  %v4153_v43 = vpop.f32.mrf.mxu0  ;;  %v12178_v54 = vld [vmem:[%s15161_s13 + $0x78] sm:$0xff]  ;;  %v6654_v29 = vrot.slane %v12179_v10, 5  ;;  %v19513_v33 = vld [vmem:[#allocation28_spill] sm:$0xff] }
 0x267   : > { %8590 = vrot.lane.b32.xlu1 %v19508_v4, %s12238_s26  ;;  %v4859_v22 = vpop.f32.mrf.mxu1  ;;  %v4250_v11 = vadd.f32 %v4153_v43, %v19509_v55  ;;  %v11013_v24 = vrot.slane %v12178_v54, 9  ;;  %v6653_v46 = vrot.slane %v6651_v58, 4  ;;  %v19517_v4 = vld [vmem:[#allocation29_spill] sm:$0xff] }
 0x268   : > { %v16648_v14 = vadd.f32 %v4857_v9, %v4249_v8  ;;  %v4155_v28 = vpop.f32.mrf.mxu0 }
 0x269   : > { %v16650_v25 = vpop.f32.mrf.mxu1  ;;  %v16657_v48 = vadd.f32 %v4155_v28, %v19513_v33  ;;  %v16659_v12 = vadd.f32 %v4859_v22, %v4250_v11  ;;  %v6652_v10 = vsel %vm13126_vm5, %v11013_v24, %v6651_v58  ;;  %v6655_v28 = vsel %vm13126_vm5, %v6653_v46, %v6654_v29  ;;  %v12180_v22 = vld [vmem:[%s15161_s13 + $0x98] sm:$0xff]  ;;  %v19522_v24 = vld [vmem:[#allocation31_spill] sm:$0xff] }
 0x26a   : > { %19510 = vst [vmem:[#allocation3_spill] sm:$0xff] %v16648_v14  ;;  %19511 = vst [vmem:[#allocation4_spill] sm:$0xff] %v16650_v25  ;;  %8592 = vrot.lane.b32.xlu0 %v19512_v17, %s12238_s26  ;;  %v4159_v9 = vpop.f32.mrf.mxu0  ;;  %v6658_v11 = vrot.slane %v12180_v22, 5  ;;  %v19518_v17 = vld [vmem:[#allocation69_spill] sm:$0xff]  ;;  %v11064_v58 = vcombine.low %v6645_v59, %v6648_v38  ;;  %v11067_v46 = vcombine.high %v6652_v10, %v6655_v28  ;;  %v19529_v38 = vld [vmem:[#allocation72_spill] sm:$0xff] }
 0x26b   : > { %19514 = vst [vmem:[#allocation5_spill] sm:$0xff] %v16657_v48  ;;  %19515 = vst [vmem:[#allocation6_spill] sm:$0xff] %v16659_v12  ;;  %8594 = vrot.lane.b32.xlu1 %v19516_v47, %s12238_s26  ;;  %v4865_v8 = vpop.f32.mrf.mxu1  ;;  %v4252_v43 = vadd.f32 %v4159_v9, %v19517_v4  ;;  %v12181_v48 = vld [vmem:[%s15161_s13 + $0x90] sm:$0xff] }
 0x26c   : > { %7110 = vmatmul.mubr.bf16.gmra.mxu0 %v11062_v31  ;;  %v4161_v55 = vpop.f32.mrf.mxu0  ;;  %v19519_v31 = vld [vmem:[#allocation30_spill] sm:$0xff]  ;;  %v6660_v14 = vrot.slane %v6658_v11, 4 }
 0x26d   : > { %7119 = vmatprep.mubr.bf16.mxu0 %v11065_v19  ;;  %v4867_v54 = vpop.f32.mrf.mxu1  ;;  %v4253_v33 = vadd.f32 %v4161_v55, %v19519_v31  ;;  %v16672_v47 = vadd.f32 %v4865_v8, %v4252_v43  ;;  %v19521_v19 = vld [vmem:[#allocation70_spill] sm:$0xff]  ;;  %v19525_v43 = vld [vmem:[#allocation71_spill] sm:$0xff]  ;;  %v19526_v31 = vld [vmem:[#allocation32_spill] sm:$0xff] }
 0x26e   : > { %8596 = vrot.lane.b32.xlu0 %v19518_v17, %s12238_s26  ;;  %v4163_v9 = vpop.f32.mrf.mxu0  ;;  %v11014_v17 = vrot.slane %v12181_v48, 9  ;;  %v12182_v55 = vld [vmem:[%s15161_s13 + $0xa0] sm:$0x11] }
 0x26f   : > { %19520 = vst [vmem:[#allocation7_spill] sm:$0xff] %v16672_v47  ;;  %8598 = vrot.lane.b32.xlu1 %v19521_v19, %s12238_s26  ;;  %v4869_v4 = vpop.f32.mrf.mxu1  ;;  %v4254_v12 = vadd.f32 %v4163_v9, %v19522_v24  ;;  %v16677_v25 = vadd.f32 %v4867_v54, %v4253_v33  ;;  %v6661_v8 = vrot.slane %v12182_v55, 5  ;;  %v19530_v9 = vld [vmem:[#allocation33_spill] sm:$0xff]  ;;  %v11853_v24 = vld [vmem:[%s19031_s6 + $0x50] sm:$0xff]  }
 0x270   : > { %v4165_v29 = vpop.f32.mrf.mxu0  ;;  %11182 = vmatprep.subr.bf16.mxu1 %v11853_v24  ;;  %v19539_v24 = vld [vmem:[#allocation36_spill] sm:$0xff] }
 0x271   : > { %19523 = vst [vmem:[#allocation8_spill] sm:$0xff] %v16677_v25  ;;  %v16679_v22 = vpop.f32.mrf.mxu1  ;;  %v16686_v19 = vadd.f32 %v4165_v29, %v19526_v31  ;;  %v16688_v59 = vadd.f32 %v4869_v4, %v4254_v12  ;;  %v11854_v29 = vld [vmem:[%s19031_s6 + $0x10] sm:$0xff]   ;;  %v6659_v4 = vsel %vm13126_vm5, %v11014_v17, %v6658_v11  ;;  %v11066_v17 = vcombine.low %v6652_v10, %v6655_v28 }
 0x272   : > { %19524 = vst [vmem:[#allocation9_spill] sm:$0xff] %v16679_v22  ;;  %8600 = vrot.lane.b32.xlu0 %v19525_v43, %s12238_s26  ;;  %v4169_v54 = vpop.f32.mrf.mxu0  ;;  %v12183_v43 = vld [vmem:[%s15161_s13 + $0xb0] sm:$0xff]  ;;  %11183 = vmatpush3.bf16.msra.mxu1 %v11854_v29 }
 0x273   : > { %19527 = vst [vmem:[#allocation10_spill] sm:$0xff] %v16686_v19  ;;  %19528 = vst [vmem:[#allocation11_spill] sm:$0xff] %v16688_v59  ;;  %8602 = vrot.lane.b32.xlu1 %v19529_v38, %s12238_s26  ;;  %v4875_v33 = vpop.f32.mrf.mxu1  ;;  %v4256_v48 = vadd.f32 %v4169_v54, %v19530_v9  ;;  %v6665_v31 = vrot.slane %v12183_v43, 5  ;;  %v19532_v38 = vld [vmem:[#allocation34_spill] sm:$0xff] }
 0x274   : > { %7120 = vmatmul.mubr.bf16.gmra.mxu0 %v11064_v58  ;;  %v4171_v55 = vpop.f32.mrf.mxu0  ;;  %v6662_v58 = vsel %vm13126_vm5, %v6660_v14, %v6661_v8  ;;  %v19534_v59 = vld [vmem:[#allocation74_spill] sm:$0xff]  ;;  %v19535_v14 = vld [vmem:[#allocation35_spill] sm:$0xff] }
 0x275   : > { %7129 = vmatprep.mubr.bf16.mxu0 %v11067_v46  ;;  %v4877_v12 = vpop.f32.mrf.mxu1  ;;  %v19531_v46 = vld [vmem:[#allocation73_spill] sm:$0xff]  ;;  %v4257_v54 = vadd.f32 %v4171_v55, %v19532_v38  ;;  %v16707_v9 = vadd.f32 %v4875_v33, %v4256_v48  ;;  %v11069_v43 = vcombine.high %v6659_v4, %v6662_v58  ;;  %v12184_v55 = vld [vmem:[%s15161_s13 + $0xa8] sm:$0xff]  ;;  %v6667_v33 = vrot.slane %v6665_v31, 4 }
 0x276   : > { %8604 = vrot.lane.b32.xlu0 %v19531_v46, %s12238_s26  ;;  %v4173_v22 = vpop.f32.mrf.mxu0  ;;  %v11015_v38 = vrot.slane %v12184_v55, 9  ;;  %v12185_v48 = vld [vmem:[%s15161_s13 + $0xb8] sm:$0x11] }
 0x277   : > { %19533 = vst [vmem:[#allocation12_spill] sm:$0xff] %v16707_v9  ;;  %8606 = vrot.lane.b32.xlu1 %v19534_v59, %s12238_s26  ;;  %v4879_v11 = vpop.f32.mrf.mxu1  ;;  %v4258_v8 = vadd.f32 %v4173_v22, %v19535_v14  ;;  %v16712_v19 = vadd.f32 %v4877_v12, %v4257_v54  ;;  %v6668_v9 = vrot.slane %v12185_v48, 5  ;;  %v19538_v59 = vld [vmem:[#allocation75_spill] sm:$0xff]  ;;  %v19542_v22 = vld [vmem:[#allocation76_spill] sm:$0xff]  ;;  %v19543_v54 = vld [vmem:[#allocation37_spill] sm:$0xff] }
 0x278   : > { %v4175_v25 = vpop.f32.mrf.mxu0  ;;  %v6666_v48 = vsel %vm13126_vm5, %v11015_v38, %v6665_v31  ;;  %v11068_v31 = vcombine.low %v6659_v4, %v6662_v58  ;;  %v19547_v38 = vld [vmem:[#allocation39_spill] sm:$0xff]  ;;  %v19554_v58 = vld [vmem:[#allocation81_spill] sm:$0xff] }
 0x279   : > { %19536 = vst [vmem:[#allocation13_spill] sm:$0xff] %v16712_v19  ;;  %v16714_v46 = vpop.f32.mrf.mxu1  ;;  %v16721_v10 = vadd.f32 %v4175_v25, %v19539_v24  ;;  %v16723_v28 = vadd.f32 %v4879_v11, %v4258_v8  ;;  %v6669_v25 = vsel %vm13126_vm5, %v6667_v33, %v6668_v9  ;;  %v12186_v11 = vld [vmem:[%s15161_s13 + $0xc8] sm:$0xff]  ;;  %v12187_v19 = vld [vmem:[%s15161_s13 + $0xc0] sm:$0xff] }
 0x27a   : > { %19537 = vst [vmem:[#allocation14_spill] sm:$0xff] %v16714_v46  ;;  %8608 = vrot.lane.b32.xlu0 %v19538_v59, %s12238_s26  ;;  %v6672_v8 = vrot.slane %v12186_v11, 5  ;;  %v19544_v59 = vld [vmem:[#allocation77_spill] sm:$0xff]  ;;  %v11071_v9 = vcombine.high %v6666_v48, %v6669_v25 }
 0x27b   : > { %19540 = vst [vmem:[#allocation80_spill] sm:$0xff] %v16721_v10  ;;  %19541 = vst [vmem:[#allocation83_spill] sm:$0xff] %v16723_v28  ;;  %8610 = vrot.lane.b32.xlu1 %v19542_v22, %s12238_s26  ;;  %v4179_v29 = vpop.f32.mrf.mxu0 }
 0x27c   : > { %7130 = vmatmul.mubr.bf16.gmra.mxu0 %v11066_v17  ;;  %v4885_v12 = vpop.f32.mrf.mxu1  ;;  %v4260_v14 = vadd.f32 %v4179_v29, %v19543_v54  ;;  %v19545_v17 = vld [vmem:[#allocation38_spill] sm:$0xff]  ;;  %v6674_v47 = vrot.slane %v6672_v8, 4 }
 0x27d   : > { %7139 = vmatprep.mubr.bf16.mxu0 %v11069_v43  ;;  %v4181_v55 = vpop.f32.mrf.mxu0  ;;  %v19546_v43 = vld [vmem:[#allocation78_spill] sm:$0xff] }
 0x27e   : > { %v4887_v46 = vpop.f32.mrf.mxu1  ;;  %8612 = vrot.lane.b32.xlu0 %v19544_v59, %s12238_s26  ;;  %v4261_v24 = vadd.f32 %v4181_v55, %v19545_v17  ;;  %v16736_v22 = vadd.f32 %v4885_v12, %v4260_v14  ;;  %v11016_v59 = vrot.slane %v12187_v19, 9  ;;  %v12188_v55 = vld [vmem:[%s15161_s13 + $0xd0] sm:$0x11]  ;;  %v19550_v14 = vld [vmem:[#allocation79_spill] sm:$0xff] }
 0x27f   : > { %8614 = vrot.lane.b32.xlu1 %v19546_v43, %s12238_s26  ;;  %v4183_v29 = vpop.f32.mrf.mxu0  ;;  %v6675_v12 = vrot.slane %v12188_v55, 5  ;;  %v19551_v17 = vld [vmem:[#allocation40_spill] sm:$0xff] }
 0x280   : > { %v4889_v54 = vpop.f32.mrf.mxu1  ;;  %v4262_v28 = vadd.f32 %v4183_v29, %v19547_v38  ;;  %v16741_v10 = vadd.f32 %v4887_v46, %v4261_v24  ;;  %v19555_v29 = vld [vmem:[#allocation41_spill] sm:$0xff]  ;;  %v11855_v38 = vld [vmem:[%s19031_s6 + $0x48] sm:$0xff]  }
 0x281   : > { %v4185_v33 = vpop.f32.mrf.mxu0  ;;  %11184 = vmatprep.subr.bf16.mxu1 %v11855_v38  ;;  %v19564_v38 = vld [vmem:[#allocation44_spill] sm:$0xff] }
 0x282   : > { %19548 = vst [vmem:[#allocation15_spill] sm:$0xff] %v16741_v10  ;;  %v16743_v11 = vpop.f32.mrf.mxu1  ;;  %8616 = vrot.lane.b32.xlu0 %v19550_v14, %s12238_s26  ;;  %v16750_v43 = vadd.f32 %v4185_v33, %v19551_v17  ;;  %v16752_v4 = vadd.f32 %v4889_v54, %v4262_v28  ;;  %v11856_v33 = vld [vmem:[%s19031_s6 + $0x8] sm:$0xff]   ;;  %v6673_v54 = vsel %vm13126_vm5, %v11016_v59, %v6672_v8  ;;  %v12189_v14 = vld [vmem:[%s15161_s13 + $0xe0] sm:$0xff] }
 0x283   : > { %19549 = vst [vmem:[#allocation16_spill] sm:$0xff] %v16743_v11  ;;  %8618 = vrot.lane.b32.xlu1 %v19554_v58, %s12238_s26  ;;  %v4189_v46 = vpop.f32.mrf.mxu0  ;;  %v6679_v17 = vrot.slane %v12189_v14, 5  ;;  %v19557_v58 = vld [vmem:[#allocation42_spill] sm:$0xff]  ;;  %v11070_v59 = vcombine.low %v6666_v48, %v6669_v25  ;;  %11185 = vmatpush3.bf16.msra.mxu1 %v11856_v33 }
 0x284   : > { %19552 = vst [vmem:[#allocation17_spill] sm:$0xff] %v16750_v43  ;;  %19553 = vst [vmem:[#allocation18_spill] sm:$0xff] %v16752_v4  ;;  %7140 = vmatmul.mubr.bf16.gmra.mxu0 %v11068_v31  ;;  %v4895_v24 = vpop.f32.mrf.mxu1  ;;  %v4264_v19 = vadd.f32 %v4189_v46, %v19555_v29  ;;  %v6676_v31 = vsel %vm13126_vm5, %v6674_v47, %v6675_v12  ;;  %v19559_v4 = vld [vmem:[#allocation84_spill] sm:$0xff]  ;;  %v19560_v47 = vld [vmem:[#allocation43_spill] sm:$0xff] }
 0x285   : > { %7149 = vmatprep.mubr.bf16.mxu0 %v11071_v9  ;;  %v4191_v55 = vpop.f32.mrf.mxu0  ;;  %v19556_v9 = vld [vmem:[#allocation82_spill] sm:$0xff]  ;;  %v11073_v14 = vcombine.high %v6673_v54, %v6676_v31 }
 0x286   : > { %v4897_v28 = vpop.f32.mrf.mxu1  ;;  %8620 = vrot.lane.b32.xlu0 %v19556_v9, %s12238_s26  ;;  %v4265_v46 = vadd.f32 %v4191_v55, %v19557_v58  ;;  %v16771_v29 = vadd.f32 %v4895_v24, %v4264_v19  ;;  %v12190_v55 = vld [vmem:[%s15161_s13 + $0xd8] sm:$0xff]  ;;  %v6681_v24 = vrot.slane %v6679_v17, 4  ;;  %v12191_v19 = vld [vmem:[%s15161_s13 + $0xe8] sm:$0x11] }
 0x287   : > { %8622 = vrot.lane.b32.xlu1 %v19559_v4, %s12238_s26  ;;  %v4193_v11 = vpop.f32.mrf.mxu0  ;;  %v11017_v58 = vrot.slane %v12190_v55, 9  ;;  %v19563_v4 = vld [vmem:[#allocation85_spill] sm:$0xff] }
 0x288   : > { %19558 = vst [vmem:[#allocation19_spill] sm:$0xff] %v16771_v29  ;;  %v4899_v8 = vpop.f32.mrf.mxu1  ;;  %v4266_v12 = vadd.f32 %v4193_v11, %v19560_v47  ;;  %v16776_v43 = vadd.f32 %v4897_v28, %v4265_v46  ;;  %v6682_v29 = vrot.slane %v12191_v19, 5  ;;  %v19567_v11 = vld [vmem:[#allocation86_spill] sm:$0xff]  ;;  %v19568_v46 = vld [vmem:[#allocation45_spill] sm:$0xff] }
 0x289   : > { %v4195_v10 = vpop.f32.mrf.mxu0  ;;  %v6680_v19 = vsel %vm13126_vm5, %v11017_v58, %v6679_v17  ;;  %v11072_v17 = vcombine.low %v6673_v54, %v6676_v31 }
 0x28a   : > { %19561 = vst [vmem:[#allocation20_spill] sm:$0xff] %v16776_v43  ;;  %v16778_v9 = vpop.f32.mrf.mxu1  ;;  %8624 = vrot.lane.b32.xlu0 %v19563_v4, %s12238_s26  ;;  %v16785_v48 = vadd.f32 %v4195_v10, %v19564_v38  ;;  %v16787_v25 = vadd.f32 %v4899_v8, %v4266_v12  ;;  %v6683_v10 = vsel %vm13126_vm5, %v6681_v24, %v6682_v29  ;;  %v12192_v8 = vld [vmem:[%s15161_s13 + $0xf8] sm:$0xff]  ;;  %v19569_v4 = vld [vmem:[#allocation87_spill] sm:$0xff] }
 0x28b   : > { %19562 = vst [vmem:[#allocation2_spill] sm:$0xff] %v16778_v9  ;;  %8626 = vrot.lane.b32.xlu1 %v19567_v11, %s12238_s26  ;;  %v4199_v33 = vpop.f32.mrf.mxu0  ;;  %v6686_v12 = vrot.slane %v12192_v8, 5  ;;  %v11075_v29 = vcombine.high %v6680_v19, %v6683_v10 }
 0x28c   : > { %19565 = vst [vmem:[#allocation49_spill] sm:$0xff] %v16785_v48  ;;  %19566 = vst [vmem:[#allocation21_spill] sm:$0xff] %v16787_v25  ;;  %7150 = vmatmul.mubr.bf16.gmra.mxu0 %v11070_v59  ;;  %v4905_v28 = vpop.f32.mrf.mxu1  ;;  %v4268_v47 = vadd.f32 %v4199_v33, %v19568_v46  ;;  %v19570_v59 = vld [vmem:[#allocation46_spill] sm:$0xff]  ;;  %v12193_v48 = vld [vmem:[%s15161_s13 + $0xf0] sm:$0xff] }
 0x28d   : > { %7159 = vmatprep.mubr.bf16.mxu0 %v11073_v14  ;;  %v4201_v55 = vpop.f32.mrf.mxu0  ;;  %v19571_v14 = vld [vmem:[#allocation88_spill] sm:$0xff]  ;;  %v6688_v43 = vrot.slane %v6686_v12, 4 }
 0x28e   : > { %v4907_v9 = vpop.f32.mrf.mxu1  ;;  %8628 = vrot.lane.b32.xlu0 %v19569_v4, %s12238_s26  ;;  %v4269_v38 = vadd.f32 %v4201_v55, %v19570_v59  ;;  %v16800_v11 = vadd.f32 %v4905_v28, %v4268_v47  ;;  %v11018_v4 = vrot.slane %v12193_v48, 9  ;;  %v12194_v28 = vld [vmem:[%s15161_s13 + $0x100] sm:$0x11]  ;;  %v19572_v55 = vld [vmem:[#allocation47_spill] sm:$0xff]  ;;  %v19576_v48 = vld [vmem:[#allocation48_spill] sm:$0xff] }
 0x28f   : > { %8630 = vrot.lane.b32.xlu1 %v19571_v14, %s12238_s26  ;;  %v4203_v33 = vpop.f32.mrf.mxu0  ;;  %v6689_v47 = vrot.slane %v12194_v28, 5 }
 0x290   : > { %v4909_v46 = vpop.f32.mrf.mxu1  ;;  %v4270_v58 = vadd.f32 %v4203_v33, %v16067_v5  ;;  %v16805_v25 = vadd.f32 %v4907_v9, %v4269_v38  ;;  %v19574_v5 = vld [vmem:[#allocation89_spill] sm:$0xff] }
 0x291   : > { %v4205_v24 = vpop.f32.mrf.mxu0 }
 0x292   : > { %v16807_v8 = vpop.f32.mrf.mxu1  ;;  %8632 = vrot.lane.b32.xlu0 %v15473_v21, %s12238_s26  ;;  %v16814_v59 = vadd.f32 %v4205_v24, %v19572_v55  ;;  %v16816_v54 = vadd.f32 %v4909_v46, %v4270_v58  ;;  %v6687_v21 = vsel %vm13126_vm5, %v11018_v4, %v6686_v12  ;;  %v6690_v46 = vsel %vm13126_vm5, %v6688_v43, %v6689_v47  ;;  %v12195_v58 = vld [vmem:[%s15161_s13 + $0x110] sm:$0xff]  ;;  %v11858_v12 = vld [vmem:[%s19031_s6] sm:$0xff]   ;;  %v12196_v47 = vld [vmem:[%s15161_s13 + $0x108] sm:$0xff] }
 0x293   : > { %8634 = vrot.lane.b32.xlu1 %v19574_v5, %s12238_s26  ;;  %v5413_v31 = vpop.f32.mrf.mxu0  ;;  %v6693_v24 = vrot.slane %v12195_v58, 5  ;;  %v11074_v5 = vcombine.low %v6680_v19, %v6683_v10  ;;  %v12197_v19 = vld [vmem:[%s15161_s13 + $0x118] sm:$0x11] }
 0x294   : > { %19573 = vst [vmem:[#allocation54_spill] sm:$0xff] %v16816_v54  ;;  %7160 = vmatmul.mubr.bf16.gmra.mxu0 %v11072_v17  ;;  %v16820_v9 = vpop.f32.mrf.mxu1  ;;  %v16823_v38 = vadd.f32 %v5413_v31, %v19576_v48  ;;  %v19579_v17 = vld [vmem:[#allocation50_spill] sm:$0xff]  ;;  %v19581_v31 = vld [vmem:[#allocation51_spill] sm:$0xff]  ;;  %v11077_v48 = vcombine.high %v6687_v21, %v6690_v46  ;;  %v6696_v10 = vrot.slane %v12197_v19, 5  ;;  %v12200_v54 = vld [vmem:[%s15161_s13 + $0x130] sm:$0x11] }
 0x295   : > { %19575 = vst [vmem:[#allocation22_spill] sm:$0xff] %v16820_v9  ;;  %7169 = vmatprep.mubr.bf16.mxu0 %v11075_v29  ;;  %v5415_v14 = vpop.f32.mrf.mxu0  ;;  %v6695_v58 = vrot.slane %v6693_v24, 4  ;;  %v12198_v19 = vld [vmem:[%s15161_s13 + $0x128] sm:$0xff] }
 0x296   : > { %19577 = vst [vmem:[#allocation55_spill] sm:$0xff] %v16823_v38  ;;  %v16825_v33 = vpop.f32.mrf.mxu1  ;;  %v16833_v28 = vadd.f32 %v5415_v14, %v19579_v17  ;;  %v11019_v14 = vrot.slane %v12196_v47, 9  ;;  %v19584_v17 = vld [vmem:[#allocation52_spill] sm:$0xff]  ;;  %v12199_v38 = vld [vmem:[%s15161_s13 + $0x120] sm:$0xff] }
 0x297   : > { %19578 = vst [vmem:[#allocation57_spill] sm:$0xff] %v16825_v33  ;;  %v5417_v55 = vpop.f32.mrf.mxu0  ;;  %v11857_v33 = vld [vmem:[%s19031_s6 + $0x40] sm:$0xff]  }
 0x298   : > { %19580 = vst [vmem:[#allocation23_spill] sm:$0xff] %v16833_v28  ;;  %v16836_v29 = vadd.f32 %v5417_v55, %v19581_v31  ;;  %v16844_v4 = vpop.f32.mrf.mxu1  ;;  %11186 = vmatprep.subr.bf16.mxu1 %v11857_v33  ;;  %v6694_v47 = vsel %vm13126_vm5, %v11019_v14, %v6693_v24  ;;  %v6700_v33 = vrot.slane %v12198_v19, 5  ;;  %v11020_v24 = vrot.slane %v12199_v38, 9 }
 0x299   : > { %v5419_v43 = vpop.f32.mrf.mxu0  ;;  %19583 = vst [vmem:[#allocation24_spill] sm:$0xff] %v16844_v4  ;;  %11187 = vmatpush3.bf16.msra.mxu1 %v11858_v12 }
 0x29a   : > { %19582 = vst [vmem:[#allocation58_spill] sm:$0xff] %v16836_v29  ;;  %v16849_v55 = vadd.f32 %v5419_v43, %v19584_v17  ;;  %v19586_v29 = vld [vmem:[#allocation53_spill] sm:$0xff]  ;;  %v16854_v9 = vpop.f32.mrf.mxu1  ;;  %v6697_v43 = vsel %vm13126_vm5, %v6695_v58, %v6696_v10  ;;  %v19589_v17 = vld [vmem:[#allocation56_spill] sm:$0xff]  ;;  %v6702_v14 = vrot.slane %v6700_v33, 4  ;;  %v6703_v58 = vrot.slane %v12200_v54, 5 }
 0x29b   : > { %v5423_v31 = vpop.f32.mrf.mxu0  ;;  %19588 = vst [vmem:[#allocation62_spill] sm:$0xff] %v16854_v9  ;;  %v19592_v10 = vld [vmem:[#allocation60_spill] sm:$0xff]  ;;  %v6701_v38 = vsel %vm13126_vm5, %v11020_v24, %v6700_v33 }
 0x29c   : > { %19585 = vst [vmem:[#allocation61_spill] sm:$0xff] %v16849_v55  ;;  %7170 = vmatmul.mubr.bf16.gmra.mxu0 %v11074_v5  ;;  %v16852_v28 = vadd.f32 %v5423_v31, %v19586_v29  ;;  %v11076_v55 = vcombine.low %v6687_v21, %v6690_v46  ;;  %v19590_v29 = vld [vmem:[#allocation59_spill] sm:$0xff]  ;;  %v6704_v54 = vsel %vm13126_vm5, %v6702_v14, %v6703_v58  ;;  %v19599_v58 = vld [vmem:[#allocation64_spill] sm:$0xff] }
 0x29d   : > { %7179 = vmatprep.mubr.bf16.mxu0 %v11077_v48  ;;  %v5425_v4 = vpop.f32.mrf.mxu0  ;;  %v11079_v48 = vcombine.high %v6694_v47, %v6697_v43 }
 0x29e   : > { %19587 = vst [vmem:[#allocation25_spill] sm:$0xff] %v16852_v28  ;;  %v16862_v5 = vadd.f32 %v5425_v4, %v19589_v17  ;;  %v16867_v28 = vpop.f32.mrf.mxu1  ;;  %v19594_v17 = vld [vmem:[#allocation63_spill] sm:$0xff] }
 0x29f   : > { %v5427_v12 = vpop.f32.mrf.mxu0 }
 0x2a0   : > { %v16865_v31 = vadd.f32 %v5427_v12, %v19590_v29  ;;  %v16877_v46 = vpop.f32.mrf.mxu1  ;;  %v12201_v29 = vld [vmem:[%s15161_s13 + $0x140] sm:$0xff] }
 0x2a1   : > { %v5429_v9 = vpop.f32.mrf.mxu0  ;;  %19596 = vst [vmem:[#allocation66_spill] sm:$0xff] %v16877_v46  ;;  %v12203_v46 = vld [vmem:[%s15161_s13 + $0x148] sm:$0x11] }
 0x2a2   : > { %19591 = vst [vmem:[#allocation26_spill] sm:$0xff] %v16865_v31  ;;  %v16872_v19 = vadd.f32 %v5429_v9, %v19592_v10  ;;  %v6707_v9 = vrot.slane %v12201_v29, 5  ;;  %v12202_v31 = vld [vmem:[%s15161_s13 + $0x138] sm:$0xff]  ;;  %v6710_v14 = vrot.slane %v12203_v46, 5 }
 0x2a3   : > { %v5433_v4 = vpop.f32.mrf.mxu0  ;;  %v11021_v33 = vrot.slane %v12202_v31, 9 }
 0x2a4   : > { %19593 = vst [vmem:[#allocation65_spill] sm:$0xff] %v16872_v19  ;;  %7180 = vmatmul.mubr.bf16.gmra.mxu0 %v11076_v55  ;;  %v16875_v21 = vadd.f32 %v5433_v4, %v19594_v17  ;;  %v11078_v19 = vcombine.low %v6694_v47, %v6697_v43  ;;  %v16890_v17 = vpop.f32.mrf.mxu1  ;;  %v6709_v24 = vrot.slane %v6707_v9, 4 }
 0x2a5   : > { %7189 = vmatprep.mubr.bf16.mxu0 %v11079_v48  ;;  %v5435_v12 = vpop.f32.mrf.mxu0  ;;  %v11081_v48 = vcombine.high %v6701_v38, %v6704_v54  ;;  %v6708_v31 = vsel %vm13126_vm5, %v11021_v33, %v6707_v9 }
 0x2a6   : > { %19595 = vst [vmem:[#allocation27_spill] sm:$0xff] %v16875_v21  ;;  %v16885_v10 = vadd.f32 %v5435_v12, %v16268_v53  ;;  %v19601_v12 = vld [vmem:[#allocation67_spill] sm:$0xff]  ;;  %v6711_v46 = vsel %vm13126_vm5, %v6709_v24, %v6710_v14 }
 0x2a7   : > { %v5437_v55 = vpop.f32.mrf.mxu0 }
 0x2a8   : > { %19597 = vst [vmem:[#allocation28_spill] sm:$0xff] %v16885_v10  ;;  %v16888_v4 = vadd.f32 %v5437_v55, %v16286_v63  ;;  %v16900_v63 = vpop.f32.mrf.mxu1  ;;  %v12204_v55 = vld [vmem:[%s15161_s13 + $0x158] sm:$0xff]  ;;  %v12206_v10 = vld [vmem:[%s15161_s13 + $0x160] sm:$0x11] }
 0x2a9   : > { %v5439_v21 = vpop.f32.mrf.mxu0  ;;  %v6717_v24 = vrot.slane %v12206_v10, 5 }
 0x2aa   : > { %19598 = vst [vmem:[#allocation68_spill] sm:$0xff] %v16888_v4  ;;  %v16895_v29 = vadd.f32 %v5439_v21, %v19599_v58  ;;  %v6714_v21 = vrot.slane %v12204_v55, 5  ;;  %v12205_v4 = vld [vmem:[%s15161_s13 + $0x150] sm:$0xff]  ;;  %v4933_v55 = vadd.f32 %v16403_v18, %v16411_v45 }
 0x2ab   : > { %v5443_v53 = vpop.f32.mrf.mxu0  ;;  %v11022_v9 = vrot.slane %v12205_v4, 9 }
 0x2ac   : > { %19600 = vst [vmem:[#allocation29_spill] sm:$0xff] %v16895_v29  ;;  %7190 = vmatmul.mubr.bf16.gmra.mxu0 %v11078_v19  ;;  %v16898_v47 = vadd.f32 %v5443_v53, %v19601_v12  ;;  %v11080_v29 = vcombine.low %v6701_v38, %v6704_v54  ;;  %v16913_v12 = vpop.f32.mrf.mxu1  ;;  %v6716_v33 = vrot.slane %v6714_v21, 4 }
 0x2ad   : > { %7199 = vmatprep.mubr.bf16.mxu0 %v11081_v48  ;;  %v5445_v43 = vpop.f32.mrf.mxu0  ;;  %v11083_v48 = vcombine.high %v6708_v31, %v6711_v46  ;;  %v6715_v4 = vsel %vm13126_vm5, %v11022_v9, %v6714_v21  ;;  %v12208_v9 = vld [vmem:[%s15161_s13 + $0x168] sm:$0xff] }
 0x2ae   : > { %19602 = vst [vmem:[#allocation69_spill] sm:$0xff] %v16898_v47  ;;  %v16908_v58 = vadd.f32 %v5445_v43, %v16342_v7  ;;  %v6718_v10 = vsel %vm13126_vm5, %v6716_v33, %v6717_v24  ;;  %v12207_v43 = vld [vmem:[%s15161_s13 + $0x170] sm:$0xff]  ;;  %v12209_v24 = vld [vmem:[%s15161_s13 + $0x178] sm:$0x11] }
 0x2af   : > { %v5447_v19 = vpop.f32.mrf.mxu0 }
 0x2b0   : > { %v16911_v53 = vadd.f32 %v5447_v19, %v16352_v52  ;;  %v16923_v52 = vpop.f32.mrf.mxu1 }
 0x2b1   : > { %v5449_v47 = vpop.f32.mrf.mxu0 }
 0x2b2   : > { %v16918_v14 = vadd.f32 %v5449_v47, %v16366_v2  ;;  %v6721_v2 = vrot.slane %v12207_v43, 5  ;;  %v6724_v43 = vrot.slane %v12209_v24, 5 }
 0x2b3   : > { %v5453_v7 = vpop.f32.mrf.mxu0 }
 0x2b4   : > { %19603 = vst [vmem:[#allocation30_spill] sm:$0xff] %v16918_v14  ;;  %7200 = vmatmul.mubr.bf16.gmra.mxu0 %v11080_v29  ;;  %v16921_v38 = vadd.f32 %v5453_v7, %v16385_v37  ;;  %v11082_v37 = vcombine.low %v6708_v31, %v6711_v46  ;;  %v16938_v7 = vpop.f32.mrf.mxu1  ;;  %v6723_v33 = vrot.slane %v6721_v2, 4 }
 0x2b5   : > { %7209 = vmatprep.mubr.bf16.mxu0 %v11083_v48  ;;  %v5455_v54 = vpop.f32.mrf.mxu0  ;;  %v11085_v48 = vcombine.high %v6715_v4, %v6718_v10 }
 0x2b6   : > { %19604 = vst [vmem:[#allocation70_spill] sm:$0xff] %v16921_v38  ;;  %v16931_v47 = vadd.f32 %v5455_v54, %v16397_v27  ;;  %v11023_v38 = vrot.slane %v12208_v9, 9  ;;  %v16947_v18 = vpop.f32.mrf.mxu1  ;;  %v6725_v46 = vsel %vm13126_vm5, %v6723_v33, %v6724_v43 }
 0x2b7   : > { %v5457_v29 = vpop.f32.mrf.mxu0 }
 0x2b8   : > { %v16936_v19 = vadd.f32 %v5457_v29, %v16413_v23  ;;  %v6722_v23 = vsel %vm13126_vm5, %v11023_v38, %v6721_v2 }
 0x2b9   : > { %v5459_v21 = vpop.f32.mrf.mxu0 }
 0x2ba   : > { %v16942_v14 = vadd.f32 %v5459_v21, %v4933_v55  ;;  %v11084_v55 = vcombine.low %v6715_v4, %v6718_v10  ;;  %v16961_v21 = vpop.f32.mrf.mxu1  ;;  %v4941_v10 = vadd.f32 %v16506_v6, %v16515_v0  ;;  %v4945_v0 = vadd.f32 %v16551_v56, %v16557_v49 }
 0x2bb   : > { %v5463_v27 = vpop.f32.mrf.mxu0  ;;  %v4949_v56 = vadd.f32 %v16586_v44, %v16593_v51  ;;  %v4953_v44 = vadd.f32 %v16615_v35, %v16622_v32  ;;  %v19618_v35 = vld [vmem:[#allocation5_spill] sm:$0xff]  ;;  %v19619_v32 = vld [vmem:[#allocation4_spill] sm:$0xff] }
 0x2bc   : > { %7210 = vmatmul.mubr.bf16.gmra.mxu0 %v11082_v37  ;;  %v16945_v31 = vadd.f32 %v5463_v27, %v16436_v16  ;;  %v4937_v37 = vadd.f32 %v16453_v15, %v16462_v40 }
 0x2bd   : > { %7219 = vmatprep.mubr.bf16.mxu0 %v11085_v48  ;;  %v5465_v45 = vpop.f32.mrf.mxu0  ;;  %v11087_v48 = vcombine.high %v6722_v23, %v6725_v46 }
 0x2be   : > { %v16954_v54 = vadd.f32 %v5465_v45, %v16447_v3  ;;  %v16968_v3 = vpop.f32.mrf.mxu1 }
 0x2bf   : > { %v5467_v29 = vpop.f32.mrf.mxu0 }
 0x2c0   : > { %v16959_v16 = vadd.f32 %v5467_v29, %v16464_v26  ;;  %v11086_v26 = vcombine.low %v6722_v23, %v6725_v46  ;;  %v16978_v33 = vpop.f32.mrf.mxu1 }
 0x2c1   : > { %v5469_v9 = vpop.f32.mrf.mxu0 }
 0x2c2   : > { %v16963_v24 = vadd.f32 %v5469_v9, %v4937_v37 }
 0x2c3   : > { %v5473_v38 = vpop.f32.mrf.mxu0 }
 0x2c4   : > { %7220 = vmatmul.mubr.bf16.gmra.mxu0 %v11084_v55  ;;  %v16966_v41 = vadd.f32 %v5473_v38, %v16491_v34 }
 0x2c5   : > { %7229 = vmatprep.mubr.bf16.mxu0 %v11087_v48  ;;  %v5475_v4 = vpop.f32.mrf.mxu0 }
 0x2c6   : > { %v16971_v15 = vadd.f32 %v5475_v4, %v16502_v50  ;;  %v16985_v50 = vpop.f32.mrf.mxu1 }
 0x2c7   : > { %v5477_v40 = vpop.f32.mrf.mxu0 }
 0x2c8   : > { %v16976_v2 = vadd.f32 %v5477_v40, %v16517_v62  ;;  %v16995_v46 = vpop.f32.mrf.mxu1 }
 0x2c9   : > { %v5479_v43 = vpop.f32.mrf.mxu0 }
 0x2ca   : > { %v16980_v34 = vadd.f32 %v5479_v43, %v4941_v10  ;;  %v17002_v9 = vpop.f32.mrf.mxu1 }
 0x2cb   : > { %v5483_v27 = vpop.f32.mrf.mxu0 }
 0x2cc   : > { %7230 = vmatmul.mubr.bf16.gmra.mxu0 %v11086_v26  ;;  %v16983_v45 = vadd.f32 %v5483_v27, %v16538_v57 }
 0x2cd   : > { %v5485_v29 = vpop.f32.mrf.mxu0 }
 0x2ce   : > { %v16988_v23 = vadd.f32 %v5485_v29, %v16547_v30 }
 0x2cf   : > { %v5487_v6 = vpop.f32.mrf.mxu0 }
 0x2d0   : > { %v16993_v62 = vadd.f32 %v5487_v6, %v16559_v20  ;;  %v17012_v20 = vpop.f32.mrf.mxu1 }
 0x2d1   : > { %v5489_v55 = vpop.f32.mrf.mxu0 }
 0x2d2   : > { %19605 = vst [vmem:[#allocation31_spill] sm:$0xff] %v16993_v62  ;;  %v16997_v37 = vadd.f32 %v5489_v55, %v4945_v0  ;;  %v17019_v43 = vpop.f32.mrf.mxu1 }
 0x2d3   : > { %v5493_v57 = vpop.f32.mrf.mxu0 }
 0x2d4   : > { %19606 = vst [vmem:[#allocation71_spill] sm:$0xff] %v16997_v37  ;;  %v17000_v48 = vadd.f32 %v5493_v57, %v16577_v60 }
 0x2d5   : > { %v5495_v30 = vpop.f32.mrf.mxu0 }
 0x2d6   : > { %19607 = vst [vmem:[#allocation32_spill] sm:$0xff] %v17000_v48  ;;  %v17005_v38 = vadd.f32 %v5495_v30, %v16584_v1  ;;  %v19616_v30 = vld [vmem:[#allocation3_spill] sm:$0xff]  ;;  %v19671_v48 = vld [vmem:[#allocation58_spill] sm:$0xff] }
 0x2d7   : > { %v5497_v4 = vpop.f32.mrf.mxu0 }
 0x2d8   : > { %19608 = vst [vmem:[#allocation72_spill] sm:$0xff] %v17005_v38  ;;  %v17010_v49 = vadd.f32 %v5497_v4, %v16595_v36  ;;  %v17029_v36 = vpop.f32.mrf.mxu1  ;;  %v7306_v38 = vlaneseq }
 0x2d9   : > { %v5499_v40 = vpop.f32.mrf.mxu0 }
 0x2da   : > { %19609 = vst [vmem:[#allocation33_spill] sm:$0xff] %v17010_v49  ;;  %v17014_v26 = vadd.f32 %v5499_v40, %v4949_v56  ;;  %v17036_v57 = vpop.f32.mrf.mxu1  ;;  %v19620_v40 = vld [vmem:[#allocation6_spill] sm:$0xff] }
 0x2db   : > { %v5503_v60 = vpop.f32.mrf.mxu0 }
 0x2dc   : > { %19610 = vst [vmem:[#allocation73_spill] sm:$0xff] %v17014_v26  ;;  %v17017_v10 = vadd.f32 %v5503_v60, %v16608_v42 }
 0x2dd   : > { %v5505_v1 = vpop.f32.mrf.mxu0 }
 0x2de   : > { %19611 = vst [vmem:[#allocation34_spill] sm:$0xff] %v17017_v10  ;;  %v17022_v27 = vadd.f32 %v5505_v1, %v16613_v39  ;;  %v17046_v1 = vpop.f32.mrf.mxu1 }
 0x2df   : > { %v5507_v29 = vpop.f32.mrf.mxu0 }
 0x2e0   : > { %19612 = vst [vmem:[#allocation74_spill] sm:$0xff] %v17022_v27  ;;  %v17027_v51 = vadd.f32 %v5507_v29, %v16624_v13  ;;  %v4957_v13 = vadd.f32 %v19619_v32, %v19618_v35  ;;  %v19627_v35 = vld [vmem:[#allocation10_spill] sm:$0xff]  ;;  %v19628_v32 = vld [vmem:[#allocation9_spill] sm:$0xff] }
 0x2e1   : > { %v5509_v6 = vpop.f32.mrf.mxu0 }
 0x2e2   : > { %19613 = vst [vmem:[#allocation35_spill] sm:$0xff] %v17027_v51  ;;  %v17031_v0 = vadd.f32 %v5509_v6, %v4953_v44  ;;  %v19623_v6 = vld [vmem:[#allocation7_spill] sm:$0xff] }
 0x2e3   : > { %v5513_v42 = vpop.f32.mrf.mxu0 }
 0x2e4   : > { %19614 = vst [vmem:[#allocation75_spill] sm:$0xff] %v17031_v0  ;;  %v17034_v55 = vadd.f32 %v5513_v42, %v16643_v61 }
 0x2e5   : > { %v5515_v39 = vpop.f32.mrf.mxu0 }
 0x2e6   : > { %19615 = vst [vmem:[#allocation36_spill] sm:$0xff] %v17034_v55  ;;  %v17039_v4 = vadd.f32 %v5515_v39, %v19616_v30  ;;  %v17053_v55 = vpop.f32.mrf.mxu1  ;;  %v19625_v30 = vld [vmem:[#allocation8_spill] sm:$0xff] }
 0x2e7   : > { %v5517_v56 = vpop.f32.mrf.mxu0 }
 0x2e8   : > { %19617 = vst [vmem:[#allocation76_spill] sm:$0xff] %v17039_v4  ;;  %v17044_v60 = vadd.f32 %v5517_v56, %v19620_v40  ;;  %v4961_v56 = vadd.f32 %v19628_v32, %v19627_v35  ;;  %v19629_v40 = vld [vmem:[#allocation11_spill] sm:$0xff]  ;;  %v17063_v51 = vpop.f32.mrf.mxu1  ;;  %v19636_v35 = vld [vmem:[#allocation80_spill] sm:$0xff]  ;;  %v19637_v32 = vld [vmem:[#allocation14_spill] sm:$0xff] }
 0x2e9   : > { %v5519_v29 = vpop.f32.mrf.mxu0 }
 0x2ea   : > { %19621 = vst [vmem:[#allocation37_spill] sm:$0xff] %v17044_v60  ;;  %v17048_v44 = vadd.f32 %v5519_v29, %v4957_v13 }
 0x2ec   : > { %19622 = vst [vmem:[#allocation77_spill] sm:$0xff] %v17048_v44  ;;  %v5523_v61 = vpop.f32.mrf.mxu0  ;;  %v17070_v44 = vpop.f32.mrf.mxu1 }
 0x2ed   : > { %v17051_v42 = vadd.f32 %v5523_v61, %v19623_v6  ;;  %v19632_v6 = vld [vmem:[#allocation12_spill] sm:$0xff] }
 0x2ee   : > { %v5525_v39 = vpop.f32.mrf.mxu0  ;;  %v17080_v10 = vpop.f32.mrf.mxu1 }
 0x2ef   : > { %19624 = vst [vmem:[#allocation38_spill] sm:$0xff] %v17051_v42  ;;  %v17056_v4 = vadd.f32 %v5525_v39, %v19625_v30  ;;  %v19634_v30 = vld [vmem:[#allocation13_spill] sm:$0xff] }
 0x2f0   : > { %v5527_v0 = vpop.f32.mrf.mxu0 }
 0x2f1   : > { %19626 = vst [vmem:[#allocation78_spill] sm:$0xff] %v17056_v4  ;;  %v17061_v60 = vadd.f32 %v5527_v0, %v19629_v40  ;;  %v4965_v0 = vadd.f32 %v19637_v32, %v19636_v35  ;;  %v19638_v40 = vld [vmem:[#allocation83_spill] sm:$0xff]  ;;  %v19644_v35 = vld [vmem:[#allocation17_spill] sm:$0xff]  ;;  %v19645_v32 = vld [vmem:[#allocation16_spill] sm:$0xff] }
 0x2f2   : > { %v5529_v13 = vpop.f32.mrf.mxu0 }
 0x2f3   : > { %19630 = vst [vmem:[#allocation39_spill] sm:$0xff] %v17061_v60  ;;  %v17065_v29 = vadd.f32 %v5529_v13, %v4961_v56 }
 0x2f4   : > { %v5533_v61 = vpop.f32.mrf.mxu0 }
 0x2f5   : > { %19631 = vst [vmem:[#allocation79_spill] sm:$0xff] %v17065_v29  ;;  %v17068_v42 = vadd.f32 %v5533_v61, %v19632_v6 }
 0x2f6   : > { %v5535_v39 = vpop.f32.mrf.mxu0 }
 0x2f7   : > { %19633 = vst [vmem:[#allocation40_spill] sm:$0xff] %v17068_v42  ;;  %v17073_v4 = vadd.f32 %v5535_v39, %v19634_v30  ;;  %v17087_v42 = vpop.f32.mrf.mxu1  ;;  %v19642_v30 = vld [vmem:[#allocation15_spill] sm:$0xff] }
 0x2f8   : > { %v5537_v27 = vpop.f32.mrf.mxu0 }
 0x2f9   : > { %19635 = vst [vmem:[#allocation81_spill] sm:$0xff] %v17073_v4  ;;  %v17078_v60 = vadd.f32 %v5537_v27, %v19638_v40  ;;  %v4969_v27 = vadd.f32 %v19645_v32, %v19644_v35  ;;  %v19646_v40 = vld [vmem:[#allocation18_spill] sm:$0xff]  ;;  %v17097_v26 = vpop.f32.mrf.mxu1  ;;  %v19653_v35 = vld [vmem:[#allocation49_spill] sm:$0xff] }
 0x2fa   : > { %v5539_v56 = vpop.f32.mrf.mxu0  ;;  %v19654_v32 = vld [vmem:[#allocation2_spill] sm:$0xff] }
 0x2fb   : > { %19639 = vst [vmem:[#allocation41_spill] sm:$0xff] %v17078_v60  ;;  %v17082_v13 = vadd.f32 %v5539_v56, %v4965_v0 }
 0x2fc   : > { %v5543_v61 = vpop.f32.mrf.mxu0 }
 0x2fd   : > { %19640 = vst [vmem:[#allocation82_spill] sm:$0xff] %v17082_v13  ;;  %v17085_v6 = vadd.f32 %v5543_v61, %v16736_v22  ;;  %v19649_v61 = vld [vmem:[#allocation19_spill] sm:$0xff]  ;;  %v17104_v13 = vpop.f32.mrf.mxu1 }
 0x2fe   : > { %v5545_v39 = vpop.f32.mrf.mxu0 }
 0x2ff   : > { %19641 = vst [vmem:[#allocation42_spill] sm:$0xff] %v17085_v6  ;;  %v17090_v4 = vadd.f32 %v5545_v39, %v19642_v30  ;;  %v19651_v30 = vld [vmem:[#allocation20_spill] sm:$0xff] }
 0x300   : > { %v5547_v29 = vpop.f32.mrf.mxu0 }
 0x301   : > { %19643 = vst [vmem:[#allocation84_spill] sm:$0xff] %v17090_v4  ;;  %v17095_v60 = vadd.f32 %v5547_v29, %v19646_v40  ;;  %v4973_v29 = vadd.f32 %v19654_v32, %v19653_v35  ;;  %v19655_v40 = vld [vmem:[#allocation21_spill] sm:$0xff]  ;;  %v19662_v32 = vld [vmem:[#allocation54_spill] sm:$0xff] }
 0x302   : > { %v5549_v0 = vpop.f32.mrf.mxu0 }
 0x303   : > { %19647 = vst [vmem:[#allocation43_spill] sm:$0xff] %v17095_v60  ;;  %v17099_v56 = vadd.f32 %v5549_v0, %v4969_v27  ;;  %v17114_v27 = vpop.f32.mrf.mxu1 }
 0x304   : > { %v5553_v22 = vpop.f32.mrf.mxu0  ;;  %19657 = vst [vmem:[#allocation87_spill] sm:$0xff] %v17114_v27 }
 0x305   : > { %19648 = vst [vmem:[#allocation85_spill] sm:$0xff] %v17099_v56  ;;  %v17102_v6 = vadd.f32 %v5553_v22, %v19649_v61 }
 0x306   : > { %v5555_v39 = vpop.f32.mrf.mxu0 }
 0x307   : > { %19650 = vst [vmem:[#allocation44_spill] sm:$0xff] %v17102_v6  ;;  %v17107_v4 = vadd.f32 %v5555_v39, %v19651_v30  ;;  %v7307_v6 = vshrl.u32 %v7306_v38, 7  ;;  %v17121_v39 = vpop.f32.mrf.mxu1  ;;  %v19665_v38 = vld [vmem:[#allocation55_spill] sm:$0xff] }
 0x308   : > { %v5557_v49 = vpop.f32.mrf.mxu0  ;;  %19660 = vst [vmem:[#allocation47_spill] sm:$0xff] %v17121_v39  ;;  %v19672_v39 = vld [vmem:[#allocation24_spill] sm:$0xff] }
 0x309   : > { %19652 = vst [vmem:[#allocation86_spill] sm:$0xff] %v17107_v4  ;;  %v17112_v60 = vadd.f32 %v5557_v49, %v19655_v40  ;;  %v4977_v49 = vadd.f32 %v16807_v8, %v16814_v59  ;;  %v19669_v8 = vld [vmem:[#allocation57_spill] sm:$0xff]  ;;  %v6536_v37 = vadd.f32 %v19672_v39, %v19671_v48 }
 0x30a   : > { %v5559_v0 = vpop.f32.mrf.mxu0 }
 0x30b   : > { %19656 = vst [vmem:[#allocation45_spill] sm:$0xff] %v17112_v60  ;;  %v17116_v56 = vadd.f32 %v5559_v0, %v4973_v29  ;;  %v7308_v29 = vsub.s32 0, %v7307_v6  ;;  %v17131_v0 = vpop.f32.mrf.mxu1  ;;  %v19668_v60 = vld [vmem:[#allocation23_spill] sm:$0xff] }
 0x30c   : > { %v5563_v22 = vpop.f32.mrf.mxu0  ;;  %19664 = vst [vmem:[#allocation50_spill] sm:$0xff] %v17131_v0  ;;  %v6535_v59 = vadd.f32 %v19669_v8, %v19668_v60 }
 0x30d   : > { %19658 = vst [vmem:[#allocation46_spill] sm:$0xff] %v17116_v56  ;;  %v17119_v61 = vadd.f32 %v5563_v22, %v16800_v11  ;;  %v7304_v11 = vld [vmem:[%s19030_s5] sm:$0x3] }
 0x30e   : > { %v5565_v30 = vpop.f32.mrf.mxu0  ;;  %v19666_v22 = vld [vmem:[#allocation22_spill] sm:$0xff] }
 0x30f   : > { %19659 = vst [vmem:[#allocation88_spill] sm:$0xff] %v17119_v61  ;;  %v17124_v4 = vadd.f32 %v5565_v30, %v16805_v25  ;;  %v6534_v61 = vadd.f32 %v19666_v22, %v19665_v38  ;;  %v7312_v30 = vsub.s32 1, %v7307_v6 }
 0x310   : > { %v5567_v35 = vpop.f32.mrf.mxu0 }
 0x311   : > { %19661 = vst [vmem:[#allocation89_spill] sm:$0xff] %v17124_v4  ;;  %v17129_v40 = vadd.f32 %v5567_v35, %v19662_v32  ;;  %v17142_v32 = vrot.slane %v7304_v11, %v7308_v29  ;;  %v17148_v62 = vrot.slane %v7304_v11, %v7312_v30 }
 0x312   : > { %v5569_v56 = vpop.f32.mrf.mxu0 }
 0x313   : > { %19663 = vst [vmem:[#allocation48_spill] sm:$0xff] %v17129_v40  ;;  %v17138_v25 = vadd.f32 %v5569_v56, %v4977_v49  ;;  %v17144_v40 = vpop.f32.mrf.mxu1  ;;  %v19673_v56 = vld [vmem:[#allocation61_spill] sm:$0xff]  ;;  %v19674_v49 = vld [vmem:[#allocation62_spill] sm:$0xff] }
 0x314   : > { %v7081_v4 = vpop.f32.mrf.mxu0  ;;  %19670 = vst [vmem:[#allocation52_spill] sm:$0xff] %v17144_v40  ;;  %v6537_v6 = vadd.f32 %v19674_v49, %v19673_v56 }
 0x315   : > { %19667 = vst [vmem:[#allocation51_spill] sm:$0xff] %v17138_v25  ;;  %v7240_v35 = vadd.f32 %v7081_v4, %v6534_v61  ;;  %v17153_v60 = vpop.f32.mrf.mxu1  ;;  %v19676_v61 = vld [vmem:[#allocation25_spill] sm:$0xff] }
 0x316   : > { %v7083_v0 = vpop.f32.mrf.mxu0  ;;  %19675 = vst [vmem:[#allocation53_spill] sm:$0xff] %v17153_v60  ;;  %v6538_v29 = vadd.f32 %v16867_v28, %v19676_v61 }
 0x317   : > { %v7241_v27 = vadd.f32 %v7083_v0, %v6535_v59  ;;  %v7316_v22 = vadd.f32 %v17142_v32, %v7240_v35  ;;  %v19677_v0 = vld [vmem:[#allocation66_spill] sm:$0xff]  ;;  %v17164_v60 = vpop.f32.mrf.mxu1 }
 0x318   : > { %v7085_v38 = vpop.f32.mrf.mxu0  ;;  %v6539_v11 = vadd.f32 %v19677_v0, %v16862_v5 }
 0x319   : > { %v7242_v25 = vadd.f32 %v7085_v38, %v6536_v37  ;;  %v7317_v8 = vadd.f32 %v17148_v62, %v7241_v27  ;;  %v7380_v59 = vmax.f32 %v7316_v22, 0.0  ;;  %v19678_v38 = vld [vmem:[#allocation26_spill] sm:$0xff] }
 0x31a   : > { %v7087_v4 = vpop.f32.mrf.mxu0  ;;  %v6540_v49 = vadd.f32 %v16890_v17, %v19678_v38 }
 0x31b   : > { %v7318_v48 = vadd.f32 %v17142_v32, %v7242_v25  ;;  %v7243_v39 = vadd.f32 %v7087_v4, %v6537_v6  ;;  %v7381_v61 = vmax.f32 %v7317_v8, 0.0  ;;  %v19679_v4 = vld [vmem:[#allocation65_spill] sm:$0xff] }
 0x31c   : > { %v7091_v30 = vpop.f32.mrf.mxu0  ;;  %v6541_v5 = vadd.f32 %v16900_v63, %v19679_v4 }
 0x31d   : > { %v7382_v56 = vmax.f32 %v7318_v48, 0.0  ;;  %v7319_v35 = vadd.f32 %v17148_v62, %v7243_v39  ;;  %v7244_v37 = vadd.f32 %v7091_v30, %v6538_v29  ;;  %v17169_v39 = vpop.f32.mrf.mxu1  ;;  %v19680_v30 = vld [vmem:[#allocation27_spill] sm:$0xff] }
 0x31e   : > { %v7093_v28 = vpop.f32.mrf.mxu0  ;;  %v6542_v17 = vadd.f32 %v16913_v12, %v19680_v30 }
 0x31f   : > { %v7444_v27 = vpack.c.bf16 %v7382_v56, %v7380_v59  ;;  %v7383_v40 = vmax.f32 %v7319_v35, 0.0  ;;  %v7245_v25 = vadd.f32 %v7093_v28, %v6539_v11  ;;  %v7320_v22 = vadd.f32 %v17142_v32, %v7244_v37  ;;  %v19681_v11 = vld [vmem:[#allocation28_spill] sm:$0xff]  ;;  %v17180_v12 = vpop.f32.mrf.mxu1 }
 0x320   : > { %v7095_v6 = vpop.f32.mrf.mxu0  ;;  %v6543_v56 = vadd.f32 %v16923_v52, %v19681_v11  ;;  %v19682_v28 = vld [vmem:[#allocation68_spill] sm:$0xff] }
 0x321   : > { %v7246_v48 = vadd.f32 %v7095_v6, %v6540_v49  ;;  %v7445_v0 = vpack.c.bf16 %v7383_v40, %v7381_v61  ;;  %v7321_v38 = vadd.f32 %v17148_v62, %v7245_v25  ;;  %v7384_v35 = vmax.f32 %v7320_v22, 0.0 }
 0x322   : > { %v7097_v29 = vpop.f32.mrf.mxu0  ;;  %v6544_v61 = vadd.f32 %v16938_v7, %v19682_v28  ;;  %v6548_v28 = vadd.f32 %v16978_v33, %v16911_v53 }
 0x323   : > { %v7322_v8 = vadd.f32 %v17142_v32, %v7246_v48  ;;  %v7247_v59 = vadd.f32 %v7097_v29, %v6541_v5  ;;  %7643 = vmatprep.mubr.bf16.mxu1 %v7445_v0  ;;  %v7385_v6 = vmax.f32 %v7321_v38, 0.0  ;;  %v19683_v29 = vld [vmem:[#allocation29_spill] sm:$0xff] }
 0x324   : > { %v7101_v63 = vpop.f32.mrf.mxu0  ;;  %7644 = vmatmul.mubr.bf16.vlgmr.msra.gmra.mxu1 %v7444_v27  ;;  %v6545_v52 = vadd.f32 %v16947_v18, %v19683_v29  ;;  %v19685_v29 = vld [vmem:[#allocation30_spill] sm:$0xff] }
 0x325   : > { %v7386_v37 = vmax.f32 %v7322_v8, 0.0  ;;  %v7323_v40 = vadd.f32 %v17148_v62, %v7247_v59  ;;  %v7248_v49 = vadd.f32 %v7101_v63, %v6542_v17  ;;  %v17185_v8 = vpop.f32.mrf.mxu1  ;;  %v19684_v59 = vld [vmem:[#allocation69_spill] sm:$0xff] }
 0x326   : > { %v7103_v25 = vpop.f32.mrf.mxu0  ;;  %v6546_v7 = vadd.f32 %v16961_v21, %v19684_v59 }
 0x327   : > { %v7446_v4 = vpack.c.bf16 %v7386_v37, %v7384_v35  ;;  %v7387_v5 = vmax.f32 %v7323_v40, 0.0  ;;  %v7249_v48 = vadd.f32 %v7103_v25, %v6543_v56  ;;  %v7324_v27 = vadd.f32 %v17142_v32, %v7248_v49  ;;  %v17196_v21 = vpop.f32.mrf.mxu1 }
 0x328   : > { %v7105_v0 = vpop.f32.mrf.mxu0  ;;  %v6547_v56 = vadd.f32 %v16968_v3, %v16908_v58  ;;  %v6549_v58 = vadd.f32 %v16985_v50, %v19685_v29 }
 0x329   : > { %v7250_v22 = vadd.f32 %v7105_v0, %v6544_v61  ;;  %v7447_v30 = vpack.c.bf16 %v7387_v5, %v7385_v6  ;;  %v7325_v11 = vadd.f32 %v17148_v62, %v7249_v48  ;;  %v7388_v35 = vmax.f32 %v7324_v27, 0.0  ;;  %v17201_v27 = vpop.f32.mrf.mxu1 }
 0x32a   : > { %v7107_v17 = vpop.f32.mrf.mxu0 }
 0x32b   : > { %v7326_v38 = vadd.f32 %v17142_v32, %v7250_v22  ;;  %v7251_v63 = vadd.f32 %v7107_v17, %v6545_v52  ;;  %7651 = vmatprep.mubr.bf16.mxu1 %v7447_v30  ;;  %v7389_v25 = vmax.f32 %v7325_v11, 0.0  ;;  %v19686_v30 = vld [vmem:[#allocation70_spill] sm:$0xff] }
 0x32c   : > { %v7111_v18 = vpop.f32.mrf.mxu0  ;;  %7652 = vmatmul.mubr.bf16.gmra.mxu1 %v7446_v4  ;;  %v6550_v53 = vadd.f32 %v16995_v46, %v19686_v30  ;;  %v17212_v46 = vpop.f32.mrf.mxu1  ;;  %v6556_v30 = vadd.f32 %v17046_v1, %v16959_v16 }
 0x32d   : > { %v7390_v37 = vmax.f32 %v7326_v38, 0.0  ;;  %v7327_v40 = vadd.f32 %v17148_v62, %v7251_v63  ;;  %v7252_v49 = vadd.f32 %v7111_v18, %v6546_v7  ;;  %v6551_v7 = vadd.f32 %v17002_v9, %v16931_v47 }
 0x32e   : > { %v7113_v61 = vpop.f32.mrf.mxu0  ;;  %v6552_v18 = vadd.f32 %v17012_v20, %v16936_v19  ;;  %v6553_v47 = vadd.f32 %v17019_v43, %v16942_v14  ;;  %v6554_v19 = vadd.f32 %v17029_v36, %v16945_v31  ;;  %v6555_v14 = vadd.f32 %v17036_v57, %v16954_v54 }
 0x32f   : > { %v7448_v6 = vpack.c.bf16 %v7390_v37, %v7388_v35  ;;  %v7391_v5 = vmax.f32 %v7327_v40, 0.0  ;;  %v7253_v48 = vadd.f32 %v7113_v61, %v6547_v56  ;;  %v7328_v3 = vadd.f32 %v17142_v32, %v7252_v49 }
 0x330   : > { %v7115_v0 = vpop.f32.mrf.mxu0 }
 0x331   : > { %v7254_v4 = vadd.f32 %v7115_v0, %v6548_v28  ;;  %v7449_v52 = vpack.c.bf16 %v7391_v5, %v7389_v25  ;;  %v7329_v33 = vadd.f32 %v17148_v62, %v7253_v48  ;;  %v7392_v11 = vmax.f32 %v7328_v3, 0.0  ;;  %v17217_v5 = vpop.f32.mrf.mxu1  ;;  %v17219_v0 = vpop.permute.xlu0 %8220 }
 0x332   : > { %v7117_v22 = vpop.f32.mrf.mxu0 }
 0x333   : > { %v7330_v17 = vadd.f32 %v17142_v32, %v7254_v4  ;;  %v7255_v59 = vadd.f32 %v7117_v22, %v6549_v58  ;;  %7659 = vmatprep.mubr.bf16.mxu1 %v7449_v52  ;;  %v7393_v37 = vmax.f32 %v7329_v33, 0.0  ;;  %v17230_v31 = vpop.f32.mrf.mxu1 }
 0x334   : > { %v7121_v50 = vpop.f32.mrf.mxu0  ;;  %7660 = vmatmul.mubr.bf16.gmra.mxu1 %v7448_v6 }
 0x335   : > { %v7394_v38 = vmax.f32 %v7330_v17, 0.0  ;;  %v7331_v63 = vadd.f32 %v17148_v62, %v7255_v59  ;;  %v7256_v56 = vadd.f32 %v7121_v50, %v6550_v53  ;;  %v17232_v53 = vpop.permute.xlu1 %8222  ;;  %v17234_v57 = vpop.permute.xlu0 %8224  ;;  %v6557_v50 = vadd.f32 %v17053_v55, %v16963_v24 }
 0x336   : > { %v7123_v35 = vpop.f32.mrf.mxu0  ;;  %v17239_v16 = vpop.f32.mrf.mxu1 }
 0x337   : > { %v7450_v40 = vpack.c.bf16 %v7394_v38, %v7392_v11  ;;  %v7395_v49 = vmax.f32 %v7331_v63, 0.0  ;;  %v7257_v28 = vadd.f32 %v7123_v35, %v6551_v7  ;;  %v7332_v9 = vadd.f32 %v17142_v32, %v7256_v56 }
 0x338   : > { %v7125_v61 = vpop.f32.mrf.mxu0  ;;  %v6558_v56 = vadd.f32 %v17063_v51, %v16966_v41  ;;  %v6560_v41 = vadd.f32 %v17080_v10, %v16976_v2  ;;  %v17252_v51 = vpop.f32.mrf.mxu1 }
 0x339   : > { %v7258_v25 = vadd.f32 %v7125_v61, %v6552_v18  ;;  %v7451_v6 = vpack.c.bf16 %v7395_v49, %v7393_v37  ;;  %v7333_v20 = vadd.f32 %v17148_v62, %v7257_v28  ;;  %v7396_v3 = vmax.f32 %v7332_v9, 0.0  ;;  %v17247_v55 = vpop.permute.xlu1 %8226 }
 0x33a   : > { %v7127_v48 = vpop.f32.mrf.mxu0 }
 0x33b   : > { %v7334_v29 = vadd.f32 %v17142_v32, %v7258_v25  ;;  %v7259_v58 = vadd.f32 %v7127_v48, %v6553_v47  ;;  %7667 = vmatprep.mubr.bf16.mxu1 %v7451_v6  ;;  %v7397_v33 = vmax.f32 %v7333_v20, 0.0  ;;  %v17254_v25 = vpop.permute.xlu0 %8228  ;;  %v6561_v20 = vadd.f32 %v17087_v42, %v16980_v34 }
 0x33c   : > { %v7131_v43 = vpop.f32.mrf.mxu0  ;;  %7668 = vmatmul.mubr.bf16.gmra.mxu1 %v7450_v40  ;;  %v6559_v40 = vadd.f32 %v17070_v44, %v16971_v15  ;;  %v6563_v34 = vadd.f32 %v17104_v13, %v16988_v23 }
 0x33d   : > { %v7398_v4 = vmax.f32 %v7334_v29, 0.0  ;;  %v7335_v52 = vadd.f32 %v17148_v62, %v7259_v58  ;;  %v7260_v22 = vadd.f32 %v7131_v43, %v6554_v19  ;;  %v17259_v43 = vpop.f32.mrf.mxu1  ;;  %v17261_v10 = vpop.permute.xlu1 %8230 }
 0x33e   : > { %v7133_v36 = vpop.f32.mrf.mxu0 }
 0x33f   : > { %v7452_v17 = vpack.c.bf16 %v7398_v4, %v7396_v3  ;;  %v7399_v59 = vmax.f32 %v7335_v52, 0.0  ;;  %v7261_v7 = vadd.f32 %v7133_v36, %v6555_v14  ;;  %v7336_v11 = vadd.f32 %v17142_v32, %v7260_v22 }
 0x340   : > { %v7135_v54 = vpop.f32.mrf.mxu0  ;;  %v6562_v3 = vadd.f32 %v17097_v26, %v16983_v45  ;;  %v19688_v45 = vld [vmem:[#allocation87_spill] sm:$0xff] }
 0x341   : > { %v7262_v38 = vadd.f32 %v7135_v54, %v6556_v30  ;;  %v7453_v63 = vpack.c.bf16 %v7399_v59, %v7397_v33  ;;  %v7337_v18 = vadd.f32 %v17148_v62, %v7261_v7  ;;  %v7400_v49 = vmax.f32 %v7336_v11, 0.0  ;;  %v17269_v30 = vpop.permute.xlu0 %8232  ;;  %v19687_v7 = vld [vmem:[#allocation31_spill] sm:$0xff]  ;;  %v17274_v54 = vpop.f32.mrf.mxu1 }
 0x342   : > { %v7137_v1 = vpop.f32.mrf.mxu0  ;;  %v6564_v26 = vadd.f32 %v19688_v45, %v19687_v7  ;;  %v17276_v13 = vpop.permute.xlu1 %8234 }
 0x343   : > { %v7338_v35 = vadd.f32 %v17142_v32, %v7262_v38  ;;  %v7263_v37 = vadd.f32 %v7137_v1, %v6557_v50  ;;  %7675 = vmatprep.mubr.bf16.mxu1 %v7453_v63  ;;  %v7401_v6 = vmax.f32 %v7337_v18, 0.0  ;;  %v19690_v18 = vld [vmem:[#allocation47_spill] sm:$0xff] }
 0x344   : > { %v7141_v24 = vpop.f32.mrf.mxu0  ;;  %7676 = vmatmul.mubr.bf16.gmra.mxu1 %v7452_v17 }
 0x345   : > { %v7402_v28 = vmax.f32 %v7338_v35, 0.0  ;;  %v7339_v61 = vadd.f32 %v17148_v62, %v7263_v37  ;;  %v7264_v47 = vadd.f32 %v7141_v24, %v6558_v56  ;;  %v19689_v56 = vld [vmem:[#allocation71_spill] sm:$0xff] }
 0x346   : > { %v7143_v9 = vpop.f32.mrf.mxu0  ;;  %v6565_v35 = vadd.f32 %v19690_v18, %v19689_v56  ;;  %v19698_v18 = vld [vmem:[#allocation34_spill] sm:$0xff] }
 0x347   : > { %v7454_v48 = vpack.c.bf16 %v7402_v28, %v7400_v49  ;;  %v7403_v15 = vmax.f32 %v7339_v61, 0.0  ;;  %v7265_v44 = vadd.f32 %v7143_v9, %v6559_v40  ;;  %v7340_v29 = vadd.f32 %v17142_v32, %v7264_v47  ;;  %v17281_v49 = vpop.f32.mrf.mxu1  ;;  %v17283_v61 = vpop.permute.xlu0 %8236  ;;  %v19691_v47 = vld [vmem:[#allocation32_spill] sm:$0xff] }
 0x348   : > { %v7145_v19 = vpop.f32.mrf.mxu0 }
 0x349   : > { %v7266_v58 = vadd.f32 %v7145_v19, %v6560_v41  ;;  %v7455_v14 = vpack.c.bf16 %v7403_v15, %v7401_v6  ;;  %v7341_v4 = vadd.f32 %v17148_v62, %v7265_v44  ;;  %v7404_v36 = vmax.f32 %v7340_v29, 0.0  ;;  %v19692_v41 = vld [vmem:[#allocation50_spill] sm:$0xff]  ;;  %v19693_v44 = vld [vmem:[#allocation72_spill] sm:$0xff] }
 0x34a   : > { %v7147_v2 = vpop.f32.mrf.mxu0  ;;  %v6566_v9 = vadd.f32 %v19692_v41, %v19691_v47  ;;  %v19694_v19 = vld [vmem:[#allocation52_spill] sm:$0xff] }
 0x34b   : > { %v7342_v52 = vadd.f32 %v17142_v32, %v7266_v58  ;;  %v7267_v22 = vadd.f32 %v7147_v2, %v6561_v20  ;;  %7683 = vmatprep.mubr.bf16.mxu1 %v7455_v14  ;;  %v7405_v11 = vmax.f32 %v7341_v4, 0.0  ;;  %v6567_v20 = vadd.f32 %v19694_v19, %v19693_v44  ;;  %v19695_v4 = vld [vmem:[#allocation33_spill] sm:$0xff]  ;;  %v19700_v44 = vld [vmem:[#allocation35_spill] sm:$0xff] }
 0x34c   : > { %v7151_v42 = vpop.f32.mrf.mxu0  ;;  %7684 = vmatmul.mubr.bf16.gmra.mxu1 %v7454_v48 }
 0x34d   : > { %v7406_v33 = vmax.f32 %v7342_v52, 0.0  ;;  %v7343_v17 = vadd.f32 %v17148_v62, %v7267_v22  ;;  %v7268_v59 = vadd.f32 %v7151_v42, %v6562_v3  ;;  %v19696_v52 = vld [vmem:[#allocation53_spill] sm:$0xff] }
 0x34e   : > { %v7153_v50 = vpop.f32.mrf.mxu0  ;;  %v6568_v22 = vadd.f32 %v19696_v52, %v19695_v4  ;;  %v19701_v4 = vld [vmem:[#allocation75_spill] sm:$0xff] }
 0x34f   : > { %v7456_v38 = vpack.c.bf16 %v7406_v33, %v7404_v36  ;;  %v7407_v63 = vmax.f32 %v7343_v17, 0.0  ;;  %v7269_v1 = vadd.f32 %v7153_v50, %v6563_v34  ;;  %v7344_v37 = vadd.f32 %v17142_v32, %v7268_v59  ;;  %v17294_v34 = vpop.f32.mrf.mxu1  ;;  %v17296_v36 = vpop.permute.xlu1 %8238  ;;  %v19697_v50 = vld [vmem:[#allocation73_spill] sm:$0xff] }
 0x350   : > { %v7155_v23 = vpop.f32.mrf.mxu0  ;;  %v6573_v52 = vadd.f32 %v17196_v21, %v19701_v4 }
 0x351   : > { %v7270_v40 = vadd.f32 %v7155_v23, %v6564_v26  ;;  %v7457_v24 = vpack.c.bf16 %v7407_v63, %v7405_v11  ;;  %v7345_v6 = vadd.f32 %v17148_v62, %v7269_v1  ;;  %v7408_v58 = vmax.f32 %v7344_v37, 0.0  ;;  %v17298_v26 = vpop.permute.xlu0 %8240  ;;  %v17303_v23 = vpop.f32.mrf.mxu1 }
 0x352   : > { %v7157_v28 = vpop.f32.mrf.mxu0  ;;  %v6569_v11 = vadd.f32 %v17164_v60, %v19697_v50 }
 0x353   : > { %v7346_v48 = vadd.f32 %v17142_v32, %v7270_v40  ;;  %v7271_v15 = vadd.f32 %v7157_v28, %v6565_v35  ;;  %7691 = vmatprep.mubr.bf16.mxu1 %v7457_v24  ;;  %v7409_v33 = vmax.f32 %v7345_v6, 0.0  ;;  %v6570_v35 = vadd.f32 %v17169_v39, %v19698_v18  ;;  %v19699_v28 = vld [vmem:[#allocation74_spill] sm:$0xff]  ;;  %v17311_v41 = vpop.permute.xlu1 %8242  ;;  %v17316_v19 = vpop.f32.mrf.mxu1 }
 0x354   : > { %v7161_v29 = vpop.f32.mrf.mxu0  ;;  %7692 = vmatmul.mubr.bf16.gmra.mxu1 %v7456_v38  ;;  %v6571_v47 = vadd.f32 %v17180_v12, %v19699_v28  ;;  %v6572_v39 = vadd.f32 %v17185_v8, %v19700_v44  ;;  %v19707_v44 = vld [vmem:[#allocation77_spill] sm:$0xff] }
 0x355   : > { %v7410_v14 = vmax.f32 %v7346_v48, 0.0  ;;  %v7347_v2 = vadd.f32 %v17148_v62, %v7271_v15  ;;  %v7272_v3 = vadd.f32 %v7161_v29, %v6566_v9  ;;  %v17318_v29 = vpop.permute.xlu0 %8244 }
 0x356   : > { %v7163_v42 = vpop.f32.mrf.mxu0 }
 0x357   : > { %v7458_v17 = vpack.c.bf16 %v7410_v14, %v7408_v58  ;;  %v7411_v59 = vmax.f32 %v7347_v2, 0.0  ;;  %v7273_v7 = vadd.f32 %v7163_v42, %v6567_v20  ;;  %v7348_v38 = vadd.f32 %v17142_v32, %v7272_v3 }
 0x358   : > { %v7165_v45 = vpop.f32.mrf.mxu0 }
 0x359   : > { %v7274_v63 = vadd.f32 %v7165_v45, %v6568_v22  ;;  %v7459_v1 = vpack.c.bf16 %v7411_v59, %v7409_v33  ;;  %v7349_v37 = vadd.f32 %v17148_v62, %v7273_v7  ;;  %v7412_v9 = vmax.f32 %v7348_v38, 0.0  ;;  %v17325_v59 = vpop.permute.xlu1 %8246  ;;  %v19702_v7 = vld [vmem:[#allocation36_spill] sm:$0xff] }
 0x35a   : > { %v7167_v56 = vpop.f32.mrf.mxu0  ;;  %v6574_v45 = vadd.f32 %v17201_v27, %v19702_v7 }
 0x35b   : > { %v7350_v40 = vadd.f32 %v17142_v32, %v7274_v63  ;;  %v7275_v24 = vadd.f32 %v7167_v56, %v6569_v11  ;;  %7699 = vmatprep.mubr.bf16.mxu1 %v7459_v1  ;;  %v7413_v58 = vmax.f32 %v7349_v37, 0.0  ;;  %v19703_v63 = vld [vmem:[#allocation76_spill] sm:$0xff]  ;;  %v17333_v56 = vpop.permute.xlu0 %8248 }
 0x35c   : > { %v7171_v60 = vpop.f32.mrf.mxu0  ;;  %7700 = vmatmul.mubr.bf16.gmra.mxu1 %v7458_v17  ;;  %v17323_v17 = vpop.f32.mrf.mxu1  ;;  %v6575_v21 = vadd.f32 %v17212_v46, %v19703_v63  ;;  %19704 = vst [vmem:[#allocation56_spill] sm:$0xff] %v17333_v56 }
 0x35d   : > { %v7414_v6 = vmax.f32 %v7350_v40, 0.0  ;;  %v7351_v48 = vadd.f32 %v17148_v62, %v7275_v24  ;;  %v7276_v15 = vadd.f32 %v7171_v60, %v6570_v35  ;;  %v19705_v24 = vld [vmem:[#allocation37_spill] sm:$0xff] }
 0x35e   : > { %v7173_v20 = vpop.f32.mrf.mxu0  ;;  %v6576_v27 = vadd.f32 %v17217_v5, %v19705_v24  ;;  %v17338_v28 = vpop.f32.mrf.mxu1 }
 0x35f   : > { %v7460_v14 = vpack.c.bf16 %v7414_v6, %v7412_v9  ;;  %v7415_v12 = vmax.f32 %v7351_v48, 0.0  ;;  %v7277_v2 = vadd.f32 %v7173_v20, %v6571_v47  ;;  %v7352_v22 = vadd.f32 %v17142_v32, %v7276_v15  ;;  %v17340_v15 = vpop.permute.xlu1 %8250 }
 0x360   : > { %v7175_v3 = vpop.f32.mrf.mxu0  ;;  %19706 = vst [vmem:[#allocation59_spill] sm:$0xff] %v17340_v15 }
 0x361   : > { %v7278_v42 = vadd.f32 %v7175_v3, %v6572_v39  ;;  %v7461_v33 = vpack.c.bf16 %v7415_v12, %v7413_v58  ;;  %v7353_v50 = vadd.f32 %v17148_v62, %v7277_v2  ;;  %v7416_v18 = vmax.f32 %v7352_v22, 0.0  ;;  %v17345_v12 = vpop.f32.mrf.mxu1  ;;  %v17347_v2 = vpop.permute.xlu0 %8252  ;;  %v19709_v3 = vld [vmem:[#allocation38_spill] sm:$0xff] }
 0x362   : > { %v7177_v8 = vpop.f32.mrf.mxu0  ;;  %v6577_v39 = vadd.f32 %v17230_v31, %v19707_v44  ;;  %19708 = vst [vmem:[#allocation60_spill] sm:$0xff] %v17347_v2  ;;  %v6578_v4 = vadd.f32 %v17239_v16, %v19709_v3 }
 0x363   : > { %v7354_v11 = vadd.f32 %v17142_v32, %v7278_v42  ;;  %v7279_v38 = vadd.f32 %v7177_v8, %v6573_v52  ;;  %7707 = vmatprep.mubr.bf16.mxu1 %v7461_v33  ;;  %v7417_v60 = vmax.f32 %v7353_v50, 0.0  ;;  %v19710_v33 = vld [vmem:[#allocation78_spill] sm:$0xff]  ;;  %v17358_v16 = vpop.f32.mrf.mxu1 }
 0x364   : > { %v7181_v1 = vpop.f32.mrf.mxu0  ;;  %7708 = vmatmul.mubr.bf16.gmra.mxu1 %v7460_v14  ;;  %v6579_v31 = vadd.f32 %v17252_v51, %v19710_v33  ;;  %v19718_v33 = vld [vmem:[#allocation41_spill] sm:$0xff] }
 0x365   : > { %v7418_v35 = vmax.f32 %v7354_v11, 0.0  ;;  %v7355_v37 = vadd.f32 %v17148_v62, %v7279_v38  ;;  %v7280_v40 = vadd.f32 %v7181_v1, %v6574_v45  ;;  %v19711_v38 = vld [vmem:[#allocation39_spill] sm:$0xff]  ;;  %v17360_v1 = vpop.permute.xlu1 %8254  ;;  %v17362_v24 = vpop.permute.xlu0 %8256 }
 0x366   : > { %v7183_v47 = vpop.f32.mrf.mxu0  ;;  %v6580_v63 = vadd.f32 %v17259_v43, %v19711_v38  ;;  %19712 = vst [vmem:[#allocation63_spill] sm:$0xff] %v17360_v1  ;;  %19713 = vst [vmem:[#allocation64_spill] sm:$0xff] %v17362_v24  ;;  %v6515_v43 = vpop.f32.mrf.mxu1 }
 0x367   : > { %v7462_v9 = vpack.c.bf16 %v7418_v35, %v7416_v18  ;;  %v7419_v6 = vmax.f32 %v7355_v37, 0.0  ;;  %v7281_v48 = vadd.f32 %v7183_v47, %v6575_v21  ;;  %v7356_v20 = vadd.f32 %v17142_v32, %v7280_v40 }
 0x368   : > { %v7185_v46 = vpop.f32.mrf.mxu0 }
 0x369   : > { %v7282_v58 = vadd.f32 %v7185_v46, %v6576_v27  ;;  %v7463_v14 = vpack.c.bf16 %v7419_v6, %v7417_v60  ;;  %v7357_v52 = vadd.f32 %v17148_v62, %v7281_v48  ;;  %v7420_v7 = vmax.f32 %v7356_v20, 0.0  ;;  %v19714_v27 = vld [vmem:[#allocation79_spill] sm:$0xff]  ;;  %v19715_v46 = vld [vmem:[#allocation40_spill] sm:$0xff] }
 0x36a   : > { %v7187_v5 = vpop.f32.mrf.mxu0  ;;  %v6581_v47 = vadd.f32 %v17274_v54, %v19714_v27  ;;  %v6582_v44 = vadd.f32 %v17281_v49, %v19715_v46  ;;  %v17373_v54 = vpop.permute.xlu1 %8258  ;;  %v6584_v49 = vadd.f32 %v17303_v23, %v19718_v33  ;;  %v19722_v23 = vld [vmem:[#allocation42_spill] sm:$0xff] }
 0x36b   : > { %v7358_v22 = vadd.f32 %v17142_v32, %v7282_v58  ;;  %v7283_v42 = vadd.f32 %v7187_v5, %v6577_v39  ;;  %7715 = vmatprep.mubr.bf16.mxu1 %v7463_v14  ;;  %v7421_v18 = vmax.f32 %v7357_v52, 0.0  ;;  %v19716_v14 = vld [vmem:[#allocation81_spill] sm:$0xff]  ;;  %19717 = vst [vmem:[#allocation67_spill] sm:$0xff] %v17373_v54 }
 0x36c   : > { %v7191_v8 = vpop.f32.mrf.mxu0  ;;  %7716 = vmatmul.mubr.bf16.gmra.mxu1 %v7462_v9  ;;  %v6583_v5 = vadd.f32 %v17294_v34, %v19716_v14 }
 0x36d   : > { %v7422_v45 = vmax.f32 %v7358_v22, 0.0  ;;  %v7359_v50 = vadd.f32 %v17148_v62, %v7283_v42  ;;  %v7284_v11 = vadd.f32 %v7191_v8, %v6578_v4 }
 0x36e   : > { %v7193_v21 = vpop.f32.mrf.mxu0  ;;  %v17383_v27 = vpop.permute.xlu1 %8262 }
 0x36f   : > { %v7464_v35 = vpack.c.bf16 %v7422_v45, %v7420_v7  ;;  %v7423_v37 = vmax.f32 %v7359_v50, 0.0  ;;  %v7285_v40 = vadd.f32 %v7193_v21, %v6579_v31  ;;  %v7360_v60 = vadd.f32 %v17142_v32, %v7284_v11  ;;  %v6517_v31 = vpop.f32.mrf.mxu1  ;;  %v17378_v7 = vpop.permute.xlu0 %8260  ;;  %19721 = vst [vmem:[#allocation5_spill] sm:$0xff] %v17383_v27 }
 0x370   : > { %v7195_v51 = vpop.f32.mrf.mxu0  ;;  %19719 = vst [vmem:[#allocation3_spill] sm:$0xff] %v17378_v7 }
 0x371   : > { %v7286_v9 = vadd.f32 %v7195_v51, %v6580_v63  ;;  %v7465_v6 = vpack.c.bf16 %v7423_v37, %v7421_v18  ;;  %v7361_v39 = vadd.f32 %v17148_v62, %v7285_v40  ;;  %v7424_v4 = vmax.f32 %v7360_v60, 0.0  ;;  %v19720_v63 = vld [vmem:[#allocation82_spill] sm:$0xff]  ;;  %v6519_v40 = vpop.f32.mrf.mxu1 }
 0x372   : > { %v7197_v48 = vpop.f32.mrf.mxu0  ;;  %v6585_v21 = vadd.f32 %v17316_v19, %v19720_v63 }
 0x373   : > { %v7362_v20 = vadd.f32 %v17142_v32, %v7286_v9  ;;  %v7287_v58 = vadd.f32 %v7197_v48, %v6581_v47  ;;  %7723 = vmatprep.mubr.bf16.mxu1 %v7465_v6  ;;  %v7425_v45 = vmax.f32 %v7361_v39, 0.0  ;;  %v6586_v47 = vadd.f32 %v17323_v17, %v19722_v23  ;;  %v19723_v48 = vld [vmem:[#allocation84_spill] sm:$0xff]  ;;  %v19730_v23 = vld [vmem:[#allocation86_spill] sm:$0xff] }
 0x374   : > { %v7201_v3 = vpop.f32.mrf.mxu0  ;;  %7724 = vmatmul.mubr.bf16.gmra.mxu1 %v7464_v35  ;;  %v6587_v19 = vadd.f32 %v17338_v28, %v19723_v48  ;;  %v17396_v28 = vpop.permute.xlu1 %8266 }
 0x375   : > { %v7426_v52 = vmax.f32 %v7362_v20, 0.0  ;;  %v7363_v22 = vadd.f32 %v17148_v62, %v7287_v58  ;;  %v7288_v42 = vadd.f32 %v7201_v3, %v6582_v44  ;;  %v17391_v44 = vpop.permute.xlu0 %8264  ;;  %v6521_v3 = vpop.f32.mrf.mxu1  ;;  %19726 = vst [vmem:[#allocation6_spill] sm:$0xff] %v17396_v28 }
 0x376   : > { %v7203_v8 = vpop.f32.mrf.mxu0  ;;  %19724 = vst [vmem:[#allocation4_spill] sm:$0xff] %v17391_v44 }
 0x377   : > { %v7466_v50 = vpack.c.bf16 %v7426_v52, %v7424_v4  ;;  %v7427_v11 = vmax.f32 %v7363_v22, 0.0  ;;  %v7289_v34 = vadd.f32 %v7203_v8, %v6583_v5  ;;  %v7364_v18 = vadd.f32 %v17142_v32, %v7288_v42  ;;  %v19725_v5 = vld [vmem:[#allocation43_spill] sm:$0xff]  ;;  %v19727_v8 = vld [vmem:[#allocation85_spill] sm:$0xff] }
 0x378   : > { %v7205_v38 = vpop.f32.mrf.mxu0  ;;  %v6588_v17 = vadd.f32 %v17345_v12, %v19725_v5  ;;  %v19729_v12 = vld [vmem:[#allocation44_spill] sm:$0xff] }
 0x379   : > { %v7290_v35 = vadd.f32 %v7205_v38, %v6584_v49  ;;  %v7467_v37 = vpack.c.bf16 %v7427_v11, %v7425_v45  ;;  %v7365_v60 = vadd.f32 %v17148_v62, %v7289_v34  ;;  %v7428_v39 = vmax.f32 %v7364_v18, 0.0  ;;  %v6525_v38 = vpop.f32.mrf.mxu1 }
 0x37a   : > { %v7207_v51 = vpop.f32.mrf.mxu0  ;;  %v6589_v45 = vadd.f32 %v17358_v16, %v19727_v8  ;;  %v6590_v18 = vadd.f32 %v6515_v43, %v19729_v12  ;;  %v17409_v43 = vpop.permute.xlu1 %8270  ;;  %v19736_v12 = vld [vmem:[#allocation89_spill] sm:$0xff] }
 0x37b   : > { %v7366_v9 = vadd.f32 %v17142_v32, %v7290_v35  ;;  %v7291_v6 = vadd.f32 %v7207_v51, %v6585_v21  ;;  %7731 = vmatprep.mubr.bf16.mxu1 %v7467_v37  ;;  %v7429_v52 = vmax.f32 %v7365_v60, 0.0  ;;  %v17401_v21 = vpop.permute.xlu0 %8268  ;;  %19732 = vst [vmem:[#allocation8_spill] sm:$0xff] %v17409_v43 }
 0x37c   : > { %v7211_v46 = vpop.f32.mrf.mxu0  ;;  %7732 = vmatmul.mubr.bf16.gmra.mxu1 %v7466_v50  ;;  %19728 = vst [vmem:[#allocation7_spill] sm:$0xff] %v17401_v21 }
 0x37d   : > { %v7430_v20 = vmax.f32 %v7366_v9, 0.0  ;;  %v7367_v58 = vadd.f32 %v17148_v62, %v7291_v6  ;;  %v7292_v14 = vadd.f32 %v7211_v46, %v6586_v47  ;;  %v6591_v47 = vadd.f32 %v6517_v31, %v19730_v23  ;;  %v19734_v31 = vld [vmem:[#allocation46_spill] sm:$0xff] }
 0x37e   : > { %v7213_v4 = vpop.f32.mrf.mxu0 }
 0x37f   : > { %v7468_v22 = vpack.c.bf16 %v7430_v20, %v7428_v39  ;;  %v7431_v42 = vmax.f32 %v7367_v58, 0.0  ;;  %v7293_v33 = vadd.f32 %v7213_v4, %v6587_v19  ;;  %v7368_v50 = vadd.f32 %v17142_v32, %v7292_v14  ;;  %v19731_v19 = vld [vmem:[#allocation45_spill] sm:$0xff]  ;;  %v6527_v39 = vpop.f32.mrf.mxu1 }
 0x380   : > { %v7215_v49 = vpop.f32.mrf.mxu0  ;;  %v6592_v46 = vadd.f32 %v6519_v40, %v19731_v19  ;;  %v19735_v40 = vld [vmem:[#allocation88_spill] sm:$0xff] }
 0x381   : > { %v7294_v11 = vadd.f32 %v7215_v49, %v6588_v17  ;;  %v7469_v34 = vpack.c.bf16 %v7431_v42, %v7429_v52  ;;  %v7369_v35 = vadd.f32 %v17148_v62, %v7293_v33  ;;  %v7432_v16 = vmax.f32 %v7368_v50, 0.0  ;;  %v17411_v52 = vpop.permute.xlu0 %8272  ;;  %v6529_v8 = vpop.f32.mrf.mxu1 }
 0x382   : > { %v7217_v63 = vpop.f32.mrf.mxu0  ;;  %19733 = vst [vmem:[#allocation10_spill] sm:$0xff] %v17411_v52  ;;  %v6594_v50 = vadd.f32 %v6525_v38, %v19735_v40 }
 0x383   : > { %v7370_v37 = vadd.f32 %v17142_v32, %v7294_v11  ;;  %v7295_v51 = vadd.f32 %v7217_v63, %v6589_v45  ;;  %7739 = vmatprep.mubr.bf16.mxu1 %v7469_v34  ;;  %v7433_v58 = vmax.f32 %v7369_v35, 0.0  ;;  %v6531_v38 = vpop.f32.mrf.mxu1 }
 0x384   : > { %v7221_v60 = vpop.f32.mrf.mxu0  ;;  %7740 = vmatmul.mubr.bf16.gmra.mxu1 %v7468_v22  ;;  %v6593_v22 = vadd.f32 %v6521_v3, %v19734_v31 }
 0x385   : > { %v7434_v9 = vmax.f32 %v7370_v37, 0.0  ;;  %v7371_v6 = vadd.f32 %v17148_v62, %v7295_v51  ;;  %v7296_v48 = vadd.f32 %v7221_v60, %v6590_v18  ;;  %v6595_v18 = vadd.f32 %v6527_v39, %v19736_v12  ;;  %v17419_v37 = vpop.permute.xlu1 %8274  ;;  %v19738_v60 = vld [vmem:[#allocation48_spill] sm:$0xff] }
 0x386   : > { %v7223_v20 = vpop.f32.mrf.mxu0  ;;  %19737 = vst [vmem:[#allocation9_spill] sm:$0xff] %v17419_v37 }
 0x387   : > { %v7470_v14 = vpack.c.bf16 %v7434_v9, %v7432_v16  ;;  %v7435_v5 = vmax.f32 %v7371_v6, 0.0  ;;  %v7297_v17 = vadd.f32 %v7223_v20, %v6591_v47  ;;  %v7372_v42 = vadd.f32 %v17142_v32, %v7296_v48  ;;  %v17423_v20 = vpop.permute.xlu0 %8276 }
 0x388   : > { %v7225_v4 = vpop.f32.mrf.mxu0  ;;  %v6596_v16 = vadd.f32 %v6529_v8, %v19738_v60  ;;  %19739 = vst [vmem:[#allocation11_spill] sm:$0xff] %v17423_v20 }
 0x389   : > { %v7298_v33 = vadd.f32 %v7225_v4, %v6592_v46  ;;  %v7471_v49 = vpack.c.bf16 %v7435_v5, %v7433_v58  ;;  %v7373_v11 = vadd.f32 %v17148_v62, %v7297_v17  ;;  %v7436_v3 = vmax.f32 %v7372_v42, 0.0  ;;  %v19740_v58 = vld [vmem:[#allocation51_spill] sm:$0xff] }
 0x38a   : > { %v7227_v45 = vpop.f32.mrf.mxu0 }
 0x38b   : > { %v7374_v34 = vadd.f32 %v17142_v32, %v7298_v33  ;;  %v7299_v63 = vadd.f32 %v7227_v45, %v6593_v22  ;;  %7747 = vmatprep.mubr.bf16.mxu1 %v7471_v49  ;;  %v7437_v6 = vmax.f32 %v7373_v11, 0.0  ;;  %v17429_v49 = vpop.permute.xlu1 %8278 }
 0x38c   : > { %v7231_v35 = vpop.f32.mrf.mxu0  ;;  %7748 = vmatmul.mubr.bf16.gmra.mxu1 %v7470_v14  ;;  %v6597_v14 = vadd.f32 %v6531_v38, %v19740_v58  ;;  %19741 = vst [vmem:[#allocation12_spill] sm:$0xff] %v17429_v49 }
 0x38d   : > { %v7438_v51 = vmax.f32 %v7374_v34, 0.0  ;;  %v7375_v23 = vadd.f32 %v17148_v62, %v7299_v63  ;;  %v7300_v47 = vadd.f32 %v7231_v35, %v6594_v50  ;;  %v17432_v50 = vpop.permute.xlu0 %8280 }
 0x38e   : > { %v7233_v9 = vpop.f32.mrf.mxu0  ;;  %19742 = vst [vmem:[#allocation13_spill] sm:$0xff] %v17432_v50 }
 0x38f   : > { %v7472_v48 = vpack.c.bf16 %v7438_v51, %v7436_v3  ;;  %v7439_v19 = vmax.f32 %v7375_v23, 0.0  ;;  %v7301_v46 = vadd.f32 %v7233_v9, %v6595_v18  ;;  %v7376_v5 = vadd.f32 %v17142_v32, %v7300_v47  ;;  %v17434_v18 = vpop.permute.xlu1 %8282 }
 0x390   : > { %v7235_v39 = vpop.f32.mrf.mxu0  ;;  %19743 = vst [vmem:[#allocation80_spill] sm:$0xff] %v17434_v18 }
 0x391   : > { %v7302_v17 = vadd.f32 %v7235_v39, %v6596_v16  ;;  %v7473_v4 = vpack.c.bf16 %v7439_v19, %v7437_v6  ;;  %v7377_v22 = vadd.f32 %v17148_v62, %v7301_v46  ;;  %v7440_v8 = vmax.f32 %v7376_v5, 0.0  ;;  %v17436_v35 = vpop.permute.xlu0 %8380 }
 0x392   : > { %v7237_v31 = vpop.f32.mrf.mxu0 }
 0x393   : > { %v7378_v42 = vadd.f32 %v17142_v32, %v7302_v17  ;;  %v7303_v33 = vadd.f32 %v7237_v31, %v6597_v14  ;;  %7755 = vmatprep.mubr.bf16.mxu1 %v7473_v4  ;;  %v7441_v11 = vmax.f32 %v7377_v22, 0.0  ;;  %v17438_v32 = vpop.permute.xlu1 %8382 }
 0x394   : > { %7756 = vmatmul.mubr.bf16.gmra.mxu1 %v7472_v48 }
 0x395   : > { %v7442_v45 = vmax.f32 %v7378_v42, 0.0  ;;  %v7379_v40 = vadd.f32 %v17148_v62, %v7303_v33  ;;  %v17440_v3 = vpop.permute.xlu0 %8384 }
 0x397   : > { %v7474_v34 = vpack.c.bf16 %v7442_v45, %v7440_v8  ;;  %v7443_v63 = vmax.f32 %v7379_v40, 0.0  ;;  %v17442_v51 = vpop.permute.xlu1 %8386  ;;  %v17489_v45 = vld [vmem:[%s19032_s7] ss:$0 sm:$0xff] }
 0x399   : > { %v7475_v12 = vpack.c.bf16 %v7443_v63, %v7441_v11  ;;  %v17444_v23 = vpop.permute.xlu0 %8388 }
 0x39b   : > { %7763 = vmatprep.mubr.bf16.mxu1 %v7475_v12  ;;  %v17446_v62 = vpop.permute.xlu1 %8390 }
 0x39c   : > { %7764 = vmatmul.mubr.bf16.gmra.mxu1 %v7474_v34 }
 0x39d   : > { %v17448_v47 = vpop.permute.xlu0 %8392 }
 0x39f   : > { %v17450_v60 = vpop.permute.xlu1 %8394 }
 0x3a1   : > { %v17452_v16 = vpop.permute.xlu0 %8396 }
 0x3a3   : > { %v17454_v38 = vpop.permute.xlu1 %8398 }
 0x3a5   : > { %v17456_v9 = vpop.permute.xlu0 %8400 }
 0x3a7   : > { %v17458_v6 = vpop.permute.xlu1 %8402 }
 0x3a9   : > { %v17460_v48 = vpop.permute.xlu0 %8404 }
 0x3ab   : > { %v17462_v19 = vpop.permute.xlu1 %8406 }
 0x3ac   : > { %19744 = vst [vmem:[#allocation14_spill] sm:$0xff] %v17462_v19 }
 0x3ad   : > { %v17464_v46 = vpop.permute.xlu0 %8408 }
 0x3ae   : > { %19745 = vst [vmem:[#allocation83_spill] sm:$0xff] %v17464_v46 }
 0x3af   : > { %v17466_v39 = vpop.permute.xlu1 %8410 }
 0x3b0   : > { %19746 = vst [vmem:[#allocation15_spill] sm:$0xff] %v17466_v39 }
 0x3b1   : > { %v17468_v58 = vpop.permute.xlu0 %8412 }
 0x3b2   : > { %19747 = vst [vmem:[#allocation17_spill] sm:$0xff] %v17468_v58 }
 0x3b3   : > { %v17470_v14 = vpop.permute.xlu1 %8414 }
 0x3b4   : > { %19748 = vst [vmem:[#allocation16_spill] sm:$0xff] %v17470_v14 }
 0x3b5   : > { %v17472_v5 = vpop.permute.xlu0 %8416 }
 0x3b6   : > { %19749 = vst [vmem:[#allocation18_spill] sm:$0xff] %v17472_v5 }
 0x3b7   : > { %v17474_v17 = vpop.permute.xlu1 %8418 }
 0x3b8   : > { %19750 = vst [vmem:[#allocation19_spill] sm:$0xff] %v17474_v17 }
 0x3b9   : > { %v17476_v4 = vpop.permute.xlu0 %8420 }
 0x3ba   : > { %19751 = vst [vmem:[#allocation20_spill] sm:$0xff] %v17476_v4 }
 0x3bb   : > { %v17478_v31 = vpop.permute.xlu1 %8422 }
 0x3bc   : > { %19752 = vst [vmem:[#allocation49_spill] sm:$0xff] %v17478_v31 }
 0x3bd   : > { %v17480_v22 = vpop.permute.xlu0 %8424 }
 0x3be   : > { %19753 = vst [vmem:[#allocation2_spill] sm:$0xff] %v17480_v22 }
 0x3bf   : > { %v17482_v42 = vpop.permute.xlu1 %8426 }
 0x3c0   : > { %19754 = vst [vmem:[#allocation21_spill] sm:$0xff] %v17482_v42 }
 0x3c1   : > { %v17484_v33 = vpop.permute.xlu0 %8428 }
 0x3c2   : > { %19755 = vst [vmem:[#allocation54_spill] sm:$0xff] %v17484_v33 }
 0x3c3   : > { %v17491_v34 = vpop.permute.xlu1 %8430 }
 0x3c4   : > { %19756 = vst [vmem:[#allocation55_spill] sm:$0xff] %v17491_v34 }
 0x3c5   : > { %v17496_v18 = vpop.permute.xlu0 %8432 }
 0x3c6   : > { %19757 = vst [vmem:[#allocation22_spill] sm:$0xff] %v17496_v18 }
 0x3c9   : > { %v17507_v34 = vpop.permute.xlu0 %8436 }
 0x3ca   : > { %19759 = vst [vmem:[#allocation57_spill] sm:$0xff] %v17507_v34 }
 0x3e4   : > { %v11188_v8 = vpop.f32.mrf.mxu1 }
 0x3e6   : > { %v11189_v40 = vpop.f32.mrf.mxu1 }
 0x3e7   : > { %v11190_v11 = vadd.f32 %v11189_v40, %v11188_v8  ;;  %v17503_v8 = vpop.permute.xlu1 %8434 }
 0x3e8   : > { %v11191_v63 = vpop.f32.mrf.mxu1  ;;  %19758 = vst [vmem:[#allocation23_spill] sm:$0xff] %v17503_v8 }
 0x3e9   : > { %v17494_v12 = vadd.f32 %v11190_v11, %v17489_v45 }
 0x3ea   : > { %v11192_v50 = vpop.f32.mrf.mxu1 }
 0x3eb   : > { %v8156_v49 = vmin.f32 %v17494_v12, 4.1351666  ;;  %v11137_v20 = vmul.f32 -1.442695, %v17494_v12  ;;  %v11193_v37 = vadd.f32 %v11192_v50, %v11191_v63  ;;  %v17512_v50 = vpop.permute.xlu1 %8438 }
 0x3ec   : > { %v11194_v52 = vpop.f32.mrf.mxu1  ;;  %19760 = vst [vmem:[#allocation58_spill] sm:$0xff] %v17512_v50 }
 0x3ed   : > { %v8508_v33 = vmul.f32 1.442695, %v8156_v49  ;;  %11859 = vpow2.f32 %v11137_v20  ;;  %v17501_v43 = vadd.f32 %v11193_v37, %v17489_v45 }
 0x3ee   : > { %v11195_v40 = vpop.f32.mrf.mxu1 }
 0x3ef   : > { %11861 = vpow2.f32 %v8508_v33  ;;  %v8157_v11 = vmin.f32 %v17501_v43, 4.1351666  ;;  %v11138_v18 = vmul.f32 -1.442695, %v17501_v43  ;;  %v11196_v42 = vadd.f32 %v11195_v40, %v11194_v52  ;;  %v17519_v52 = vpop.permute.xlu0 %8440 }
 0x3f0   : > { %v11197_v21 = vpop.f32.mrf.mxu1  ;;  %19761 = vst [vmem:[#allocation24_spill] sm:$0xff] %v17519_v52 }
 0x3f1   : > { %v8510_v28 = vmul.f32 1.442695, %v8157_v11  ;;  %11863 = vpow2.f32 %v11138_v18  ;;  %v17510_v49 = vadd.f32 %v11196_v42, %v17489_v45 }
 0x3f2   : > { %v11198_v20 = vpop.f32.mrf.mxu1 }
 0x3f3   : > { %11865 = vpow2.f32 %v8510_v28  ;;  %v11199_v37 = vadd.f32 %v11198_v20, %v11197_v21  ;;  %v8158_v33 = vmin.f32 %v17510_v49, 4.1351666  ;;  %v11139_v63 = vmul.f32 -1.442695, %v17510_v49  ;;  %v8573_v52 = vpop.permute.xlu0 %8572 }
 0x3f4   : > { %v11200_v8 = vpop.f32.mrf.mxu1 }
 0x3f5   : > { %v17517_v22 = vadd.f32 %v11199_v37, %v17489_v45  ;;  %v8512_v40 = vmul.f32 1.442695, %v8158_v33  ;;  %11867 = vpow2.f32 %v11139_v63  ;;  %v17526_v37 = vpop.permute.xlu1 %8442 }
 0x3f6   : > { %v11201_v18 = vpop.f32.mrf.mxu1  ;;  %19762 = vst [vmem:[#allocation61_spill] sm:$0xff] %v17526_v37 }
 0x3f7   : > { %v8159_v42 = vmin.f32 %v17517_v22, 4.1351666  ;;  %v11140_v28 = vmul.f32 -1.442695, %v17517_v22  ;;  %v11202_v21 = vadd.f32 %v11201_v18, %v11200_v8  ;;  %11869 = vpow2.f32 %v8512_v40 }
 0x3f8   : > { %v11203_v11 = vpop.f32.mrf.mxu1 }
 0x3f9   : > { %v8514_v20 = vmul.f32 1.442695, %v8159_v42  ;;  %11871 = vpow2.f32 %v11140_v28  ;;  %v17524_v50 = vadd.f32 %v11202_v21, %v17489_v45  ;;  %v8575_v5 = vpop.permute.xlu1 %8574 }
 0x3fa   : > { %v11860_v34 = vpop.eup %11859  ;;  %v11204_v31 = vpop.f32.mrf.mxu1 }
 0x3fb   : > { %11873 = vpow2.f32 %v8514_v20  ;;  %v8160_v33 = vmin.f32 %v17524_v50, 4.1351666  ;;  %v9372_v44 = vadd.f32 1.0, %v11860_v34  ;;  %v11141_v4 = vmul.f32 -1.442695, %v17524_v50 }
 0x3fc   : > { %v11862_v63 = vpop.eup %11861  ;;  %v11205_v8 = vadd.f32 %v11204_v31, %v11203_v11  ;;  %v11206_v40 = vpop.f32.mrf.mxu1 }
 0x3fd   : > { %v8516_v18 = vmul.f32 1.442695, %v8160_v33  ;;  %v8668_v42 = vmul.f32 %v11862_v63, %v8573_v52  ;;  %11875 = vpow2.f32 %v11141_v4 }
 0x3fe   : > { %v11864_v28 = vpop.eup %11863  ;;  %v17531_v21 = vadd.f32 %v11205_v8, %v17489_v45  ;;  %v11207_v27 = vpop.f32.mrf.mxu1 }
 0x3ff   : > { %v9373_v37 = vadd.f32 1.0, %v11864_v28  ;;  %11877 = vpow2.f32 %v8516_v18  ;;  %v11208_v20 = vadd.f32 %v11207_v27, %v11206_v40  ;;  %v8700_v7 = vmul.f32 0.5, %v8668_v42 }
 0x400   : > { %v11866_v17 = vpop.eup %11865  ;;  %11879 = vrcp.f32 %v9372_v44  ;;  %v8161_v34 = vmin.f32 %v17531_v21, 4.1351666  ;;  %v11142_v31 = vmul.f32 -1.442695, %v17531_v21  ;;  %v11209_v11 = vpop.f32.mrf.mxu1 }
 0x401   : > { %v17536_v52 = vadd.f32 %v11208_v20, %v17489_v45  ;;  %8764 = vrot.lane.b32.xlu0 %v8700_v7, %s12236_s16  ;;  %v8669_v4 = vmul.f32 %v11866_v17, %v8575_v5  ;;  %v8577_v20 = vpop.permute.xlu0 %8576 }
 0x402   : > { %v8518_v33 = vmul.f32 1.442695, %v8161_v34  ;;  %11881 = vpow2.f32 %v11142_v31  ;;  %v11210_v63 = vpop.f32.mrf.mxu1  ;;  %v11868_v8 = vpop.eup %11867 }
 0x403   : > { %11883 = vrcp.f32 %v9373_v37  ;;  %v8162_v27 = vmin.f32 %v17536_v52, 4.1351666  ;;  %v11143_v44 = vmul.f32 -1.442695, %v17536_v52  ;;  %v11211_v40 = vadd.f32 %v11210_v63, %v11209_v11  ;;  %v8579_v11 = vpop.permute.xlu1 %8578 }
 0x404   : > { %v9374_v18 = vadd.f32 1.0, %v11868_v8  ;;  %11885 = vpow2.f32 %v8518_v33  ;;  %v11212_v42 = vpop.f32.mrf.mxu1  ;;  %v8701_v28 = vmul.f32 0.5, %v8669_v4  ;;  %v11870_v54 = vpop.eup %11869 }
 0x405   : > { %v8520_v14 = vmul.f32 1.442695, %v8162_v27  ;;  %11887 = vpow2.f32 %v11143_v44  ;;  %v17542_v7 = vadd.f32 %v11211_v40, %v17489_v45  ;;  %v8670_v37 = vmul.f32 %v11870_v54, %v8577_v20 }
 0x406   : > { %v11872_v5 = vpop.eup %11871  ;;  %11889 = vrcp.f32 %v9374_v18  ;;  %8766 = vrot.lane.b32.xlu1 %v8701_v28, %s12236_s16  ;;  %v11213_v17 = vpop.f32.mrf.mxu1 }
 0x407   : > { %11891 = vpow2.f32 %v8520_v14  ;;  %v8163_v34 = vmin.f32 %v17542_v7, 4.1351666  ;;  %v9375_v33 = vadd.f32 1.0, %v11872_v5  ;;  %v11144_v4 = vmul.f32 -1.442695, %v17542_v7  ;;  %v8581_v5 = vpop.permute.xlu0 %8580 }
 0x408   : > { %v11874_v31 = vpop.eup %11873  ;;  %v11214_v63 = vadd.f32 %v11213_v17, %v11212_v42  ;;  %v11215_v8 = vpop.f32.mrf.mxu1  ;;  %v8702_v27 = vmul.f32 0.5, %v8670_v37 }
 0x409   : > { %v8522_v44 = vmul.f32 1.442695, %v8163_v34  ;;  %v8671_v40 = vmul.f32 %v11874_v31, %v8579_v11  ;;  %11893 = vpow2.f32 %v11144_v4 }
 0x40a   : > { %v17548_v18 = vadd.f32 %v11214_v63, %v17489_v45  ;;  %8768 = vrot.lane.b32.xlu0 %v8702_v27, %s12236_s16  ;;  %v11216_v54 = vpop.f32.mrf.mxu1  ;;  %v11876_v14 = vpop.eup %11875 }
 0x40b   : > { %11895 = vpow2.f32 %v8522_v44  ;;  %v11217_v28 = vadd.f32 %v11216_v54, %v11215_v8  ;;  %v8703_v20 = vmul.f32 0.5, %v8671_v40  ;;  %v9376_v58 = vadd.f32 1.0, %v11876_v14 }
 0x40c   : > { %v11878_v24 = vpop.eup %11877  ;;  %11897 = vrcp.f32 %v9375_v33  ;;  %v8164_v42 = vmin.f32 %v17548_v18, 4.1351666  ;;  %v11145_v17 = vmul.f32 -1.442695, %v17548_v18  ;;  %v11218_v37 = vpop.f32.mrf.mxu1 }
 0x40d   : > { %v11880_v34 = vpop.eup %11879  ;;  %v17554_v31 = vadd.f32 %v11217_v28, %v17489_v45  ;;  %8770 = vrot.lane.b32.xlu1 %v8703_v20, %s12236_s16  ;;  %v8672_v11 = vmul.f32 %v11878_v24, %v8581_v5  ;;  %11899 = vrcp.f32 %v9376_v58  ;;  %v8583_v20 = vpop.permute.xlu1 %8582 }
 0x40e   : > { %v8524_v4 = vmul.f32 1.442695, %v8164_v42  ;;  %9500 = vrot.lane.b32.xlu0 %v11880_v34, %s12238_s26  ;;  %v11219_v63 = vpop.f32.mrf.mxu1  ;;  %11901 = vpow2.f32 %v11145_v17 }
 0x40f   : > { %v11882_v8 = vpop.eup %11881  ;;  %v8165_v33 = vmin.f32 %v17554_v31, 4.1351666  ;;  %v11146_v27 = vmul.f32 -1.442695, %v17554_v31  ;;  %v11220_v54 = vadd.f32 %v11219_v63, %v11218_v37  ;;  %v8704_v28 = vmul.f32 0.5, %v8672_v11  ;;  %v8585_v11 = vpop.permute.xlu0 %8584 }
 0x410   : > { %v11884_v44 = vpop.eup %11883  ;;  %v9377_v40 = vadd.f32 1.0, %v11882_v8  ;;  %11903 = vpow2.f32 %v8524_v4  ;;  %v11221_v14 = vpop.f32.mrf.mxu1 }
 0x411   : > { %v11886_v39 = vpop.eup %11885  ;;  %v8526_v24 = vmul.f32 1.442695, %v8165_v33  ;;  %11905 = vpow2.f32 %v11146_v27  ;;  %9502 = vrot.lane.b32.xlu1 %v11884_v44, %s12238_s26  ;;  %v17562_v5 = vadd.f32 %v11220_v54, %v17489_v45 }
 0x412   : > { %v11888_v58 = vpop.eup %11887  ;;  %8772 = vrot.lane.b32.xlu0 %v8704_v28, %s12236_s16  ;;  %v11222_v42 = vpop.f32.mrf.mxu1  ;;  %v8673_v17 = vmul.f32 %v11886_v39, %v8583_v20 }
 0x413   : > { %v11890_v34 = vpop.eup %11889  ;;  %v9378_v8 = vadd.f32 1.0, %v11888_v58  ;;  %11907 = vpow2.f32 %v8526_v24  ;;  %v11223_v37 = vadd.f32 %v11222_v42, %v11221_v14  ;;  %v8166_v63 = vmin.f32 %v17562_v5, 4.1351666  ;;  %v8587_v42 = vpop.permute.xlu1 %8586 }
 0x414   : > { %v11892_v4 = vpop.eup %11891  ;;  %11909 = vrcp.f32 %v9377_v40  ;;  %v11147_v33 = vmul.f32 -1.442695, %v17562_v5  ;;  %v11224_v27 = vpop.f32.mrf.mxu1  ;;  %v8705_v44 = vmul.f32 0.5, %v8673_v17 }
 0x415   : > { %v17568_v54 = vadd.f32 %v11223_v37, %v17489_v45  ;;  %v8674_v1 = vmul.f32 %v11892_v4, %v8585_v11  ;;  %v8528_v28 = vmul.f32 1.442695, %v8166_v63 }
 0x416   : > { %11911 = vpow2.f32 %v11147_v33  ;;  %8774 = vrot.lane.b32.xlu1 %v8705_v44, %s12236_s16  ;;  %9504 = vrot.lane.b32.xlu0 %v11890_v34, %s12238_s26  ;;  %v11225_v39 = vpop.f32.mrf.mxu1  ;;  %v11894_v14 = vpop.eup %11893 }
 0x417   : > { %11913 = vrcp.f32 %v9378_v8  ;;  %v8167_v40 = vmin.f32 %v17568_v54, 4.1351666  ;;  %v11148_v20 = vmul.f32 -1.442695, %v17568_v54  ;;  %v11226_v24 = vadd.f32 %v11225_v39, %v11224_v27 }
 0x418   : > { %v11896_v58 = vpop.eup %11895  ;;  %v9379_v17 = vadd.f32 1.0, %v11894_v14  ;;  %11915 = vpow2.f32 %v8528_v28  ;;  %v11227_v37 = vpop.f32.mrf.mxu1  ;;  %v8706_v4 = vmul.f32 0.5, %v8674_v1 }
 0x419   : > { %v11898_v11 = vpop.eup %11897  ;;  %v8530_v63 = vmul.f32 1.442695, %v8167_v40  ;;  %11917 = vpow2.f32 %v11148_v20  ;;  %v17575_v33 = vadd.f32 %v11226_v24, %v17489_v45  ;;  %v8675_v34 = vmul.f32 %v11896_v58, %v8587_v42  ;;  %v8589_v24 = vpop.permute.xlu0 %8588 }
 0x41a   : > { %9506 = vrot.lane.b32.xlu1 %v11898_v11, %s12238_s26  ;;  %8776 = vrot.lane.b32.xlu0 %v8706_v4, %s12236_s16  ;;  %v11228_v8 = vpop.f32.mrf.mxu1  ;;  %v11900_v44 = vpop.eup %11899 }
 0x41b   : > { %11919 = vpow2.f32 %v8530_v63  ;;  %v8168_v27 = vmin.f32 %v17575_v33, 4.1351666  ;;  %v11149_v28 = vmul.f32 -1.442695, %v17575_v33  ;;  %v11902_v39 = vpop.eup %11901  ;;  %v11229_v1 = vadd.f32 %v11228_v8, %v11227_v37  ;;  %v8591_v8 = vpop.permute.xlu1 %8590 }
 0x41c   : > { %11921 = vrcp.f32 %v9379_v17  ;;  %v11230_v14 = vpop.f32.mrf.mxu1  ;;  %v8707_v40 = vmul.f32 0.5, %v8675_v34  ;;  %v9380_v2 = vadd.f32 1.0, %v11902_v39 }
 0x41d   : > { %v11904_v20 = vpop.eup %11903  ;;  %v8532_v58 = vmul.f32 1.442695, %v8168_v27  ;;  %11923 = vpow2.f32 %v11149_v28  ;;  %v17582_v4 = vadd.f32 %v11229_v1, %v17489_v45 }
 0x41e   : > { %v11906_v42 = vpop.eup %11905  ;;  %8778 = vrot.lane.b32.xlu1 %v8707_v40, %s12236_s16  ;;  %9508 = vrot.lane.b32.xlu0 %v11900_v44, %s12238_s26  ;;  %v11231_v11 = vpop.f32.mrf.mxu1  ;;  %v8676_v63 = vmul.f32 %v11904_v20, %v8589_v24 }
 0x41f   : > { %v9381_v15 = vadd.f32 1.0, %v11906_v42  ;;  %v11232_v17 = vadd.f32 %v11231_v11, %v11230_v14  ;;  %11925 = vpow2.f32 %v8532_v58  ;;  %v8169_v34 = vmin.f32 %v17582_v4, 4.1351666 }
 0x420   : > { %v11908_v37 = vpop.eup %11907  ;;  %v11150_v27 = vmul.f32 -1.442695, %v17582_v4  ;;  %v11233_v28 = vpop.f32.mrf.mxu1  ;;  %11927 = vrcp.f32 %v9380_v2  ;;  %v8708_v40 = vmul.f32 0.5, %v8676_v63 }
 0x421   : > { %v11910_v39 = vpop.eup %11909  ;;  %v17589_v1 = vadd.f32 %v11232_v17, %v17489_v45  ;;  %v8677_v46 = vmul.f32 %v11908_v37, %v8591_v8  ;;  %v8534_v44 = vmul.f32 1.442695, %v8169_v34  ;;  %v8593_v37 = vpop.permute.xlu0 %8592 }
 0x422   : > { %11929 = vpow2.f32 %v11150_v27  ;;  %9510 = vrot.lane.b32.xlu1 %v11910_v39, %s12238_s26  ;;  %v11234_v14 = vpop.f32.mrf.mxu1  ;;  %8780 = vrot.lane.b32.xlu0 %v8708_v40, %s12236_s16 }
 0x423   : > { %19763 = vst [vmem:[#allocation62_spill] sm:$0xff] %v17589_v1  ;;  %v11912_v20 = vpop.eup %11911  ;;  %11931 = vrcp.f32 %v9381_v15  ;;  %v8170_v24 = vmin.f32 %v17589_v1, 4.1351666  ;;  %v11151_v58 = vmul.f32 -1.442695, %v17589_v1  ;;  %v11235_v42 = vadd.f32 %v11234_v14, %v11233_v28 }
 0x424   : > { %v11914_v2 = vpop.eup %11913  ;;  %11933 = vpow2.f32 %v8534_v44  ;;  %v11236_v11 = vpop.f32.mrf.mxu1  ;;  %v8709_v17 = vmul.f32 0.5, %v8677_v46  ;;  %v9382_v8 = vadd.f32 1.0, %v11912_v20 }
 0x425   : > { %v11916_v63 = vpop.eup %11915  ;;  %v8536_v34 = vmul.f32 1.442695, %v8170_v24  ;;  %11935 = vpow2.f32 %v11151_v58  ;;  %v17596_v27 = vadd.f32 %v11235_v42, %v17489_v45  ;;  %v8595_v46 = vpop.permute.xlu1 %8594 }
 0x426   : > { %v11918_v15 = vpop.eup %11917  ;;  %8782 = vrot.lane.b32.xlu1 %v8709_v17, %s12236_s16  ;;  %v11237_v39 = vpop.f32.mrf.mxu1  ;;  %v8678_v19 = vmul.f32 %v11916_v63, %v8593_v37  ;;  %9512 = vrot.lane.b32.xlu0 %v11914_v2, %s12238_s26 }
 0x427   : > { %19764 = vst [vmem:[#allocation25_spill] sm:$0xff] %v17596_v27  ;;  %11937 = vpow2.f32 %v8536_v34  ;;  %v8171_v28 = vmin.f32 %v17596_v27, 4.1351666  ;;  %v9383_v44 = vadd.f32 1.0, %v11918_v15  ;;  %v11152_v14 = vmul.f32 -1.442695, %v17596_v27 }
 0x428   : > { %v11920_v40 = vpop.eup %11919  ;;  %v11238_v20 = vadd.f32 %v11237_v39, %v11236_v11  ;;  %v11239_v24 = vpop.f32.mrf.mxu1  ;;  %v8710_v58 = vmul.f32 0.5, %v8678_v19  ;;  %11939 = vrcp.f32 %v9382_v8 }
 0x429   : > { %v11922_v42 = vpop.eup %11921  ;;  %v8538_v56 = vmul.f32 1.442695, %v8171_v28  ;;  %v8679_v1 = vmul.f32 %v11920_v40, %v8595_v46  ;;  %11941 = vpow2.f32 %v11152_v14  ;;  %v8597_v28 = vpop.permute.xlu0 %8596 }
 0x42a   : > { %v11924_v17 = vpop.eup %11923  ;;  %v17603_v63 = vadd.f32 %v11238_v20, %v17489_v45  ;;  %9514 = vrot.lane.b32.xlu1 %v11922_v42, %s12238_s26  ;;  %v11240_v2 = vpop.f32.mrf.mxu1  ;;  %8784 = vrot.lane.b32.xlu0 %v8710_v58, %s12236_s16 }
 0x42b   : > { %v9384_v37 = vadd.f32 1.0, %v11924_v17  ;;  %11943 = vpow2.f32 %v8538_v56  ;;  %v11241_v34 = vadd.f32 %v11240_v2, %v11239_v24  ;;  %v8711_v11 = vmul.f32 0.5, %v8679_v1 }
 0x42c   : > { %19765 = vst [vmem:[#allocation66_spill] sm:$0xff] %v17603_v63  ;;  %11945 = vrcp.f32 %v9383_v44  ;;  %v8172_v19 = vmin.f32 %v17603_v63, 4.1351666  ;;  %v11153_v8 = vmul.f32 -1.442695, %v17603_v63  ;;  %v11242_v15 = vpop.f32.mrf.mxu1  ;;  %v11926_v39 = vpop.eup %11925 }
 0x42d   : > { %v17610_v40 = vadd.f32 %v11241_v34, %v17489_v45  ;;  %v11928_v46 = vpop.eup %11927  ;;  %v8680_v20 = vmul.f32 %v11926_v39, %v8597_v28 }
 0x42e   : > { %v8540_v14 = vmul.f32 1.442695, %v8172_v19  ;;  %11947 = vpow2.f32 %v11153_v8  ;;  %8786 = vrot.lane.b32.xlu1 %v8711_v11, %s12236_s16  ;;  %v11243_v56 = vpop.f32.mrf.mxu1  ;;  %9516 = vrot.lane.b32.xlu0 %v11928_v46, %s12238_s26  ;;  %v8599_v8 = vpop.permute.xlu1 %8598 }
 0x42f   : > { %19766 = vst [vmem:[#allocation26_spill] sm:$0xff] %v17610_v40  ;;  %v11930_v24 = vpop.eup %11929  ;;  %11949 = vrcp.f32 %v9384_v37  ;;  %v8173_v1 = vmin.f32 %v17610_v40, 4.1351666  ;;  %v11154_v44 = vmul.f32 -1.442695, %v17610_v40  ;;  %v11244_v58 = vadd.f32 %v11243_v56, %v11242_v15 }
 0x430   : > { %v11932_v42 = vpop.eup %11931  ;;  %v9385_v17 = vadd.f32 1.0, %v11930_v24  ;;  %11951 = vpow2.f32 %v8540_v14  ;;  %v11245_v2 = vpop.f32.mrf.mxu1  ;;  %v8712_v34 = vmul.f32 0.5, %v8680_v20 }
 0x431   : > { %v11934_v19 = vpop.eup %11933  ;;  %v8542_v63 = vmul.f32 1.442695, %v8173_v1  ;;  %11953 = vpow2.f32 %v11154_v44  ;;  %v17617_v11 = vadd.f32 %v11244_v58, %v17489_v45  ;;  %v8601_v14 = vpop.permute.xlu0 %8600 }
 0x432   : > { %v11936_v37 = vpop.eup %11935  ;;  %9518 = vrot.lane.b32.xlu1 %v11932_v42, %s12238_s26  ;;  %v11246_v39 = vpop.f32.mrf.mxu1  ;;  %v8681_v28 = vmul.f32 %v11934_v19, %v8599_v8  ;;  %8788 = vrot.lane.b32.xlu0 %v8712_v34, %s12236_s16 }
 0x433   : > { %19767 = vst [vmem:[#allocation65_spill] sm:$0xff] %v17617_v11  ;;  %11955 = vpow2.f32 %v8542_v63  ;;  %v8174_v15 = vmin.f32 %v17617_v11, 4.1351666  ;;  %v11155_v56 = vmul.f32 -1.442695, %v17617_v11  ;;  %v11247_v20 = vadd.f32 %v11246_v39, %v11245_v2  ;;  %v8603_v8 = vpop.permute.xlu1 %8602 }
 0x434   : > { %v11938_v46 = vpop.eup %11937  ;;  %11957 = vrcp.f32 %v9385_v17  ;;  %v11248_v24 = vpop.f32.mrf.mxu1  ;;  %v8713_v1 = vmul.f32 0.5, %v8681_v28  ;;  %v9386_v44 = vadd.f32 1.0, %v11936_v37 }
 0x435   : > { %v8544_v58 = vmul.f32 1.442695, %v8174_v15  ;;  %v8682_v40 = vmul.f32 %v11938_v46, %v8601_v14  ;;  %v11940_v27 = vpop.eup %11939  ;;  %11959 = vpow2.f32 %v11155_v56  ;;  %v17624_v42 = vadd.f32 %v11247_v20, %v17489_v45 }
 0x436   : > { %8790 = vrot.lane.b32.xlu1 %v8713_v1, %s12236_s16  ;;  %v11249_v63 = vpop.f32.mrf.mxu1  ;;  %v11942_v34 = vpop.eup %11941  ;;  %9520 = vrot.lane.b32.xlu0 %v11940_v27, %s12238_s26 }
 0x437   : > { %19768 = vst [vmem:[#allocation27_spill] sm:$0xff] %v17624_v42  ;;  %11961 = vpow2.f32 %v8544_v58  ;;  %v11250_v17 = vadd.f32 %v11249_v63, %v11248_v24  ;;  %v8714_v19 = vmul.f32 0.5, %v8682_v40  ;;  %v9387_v39 = vadd.f32 1.0, %v11942_v34 }
 0x438   : > { %v11944_v2 = vpop.eup %11943  ;;  %v8175_v37 = vmin.f32 %v17624_v42, 4.1351666  ;;  %v11156_v28 = vmul.f32 -1.442695, %v17624_v42  ;;  %v11251_v15 = vpop.f32.mrf.mxu1  ;;  %11963 = vrcp.f32 %v9386_v44 }
 0x439   : > { %v11946_v46 = vpop.eup %11945  ;;  %v17631_v14 = vadd.f32 %v11250_v17, %v17489_v45  ;;  %v8683_v56 = vmul.f32 %v11944_v2, %v8603_v8  ;;  %11965 = vrcp.f32 %v9387_v39  ;;  %v8605_v2 = vpop.permute.xlu0 %8604 }
 0x43a   : > { %v8546_v20 = vmul.f32 1.442695, %v8175_v37  ;;  %9522 = vrot.lane.b32.xlu1 %v11946_v46, %s12238_s26  ;;  %v11252_v27 = vpop.f32.mrf.mxu1  ;;  %11967 = vpow2.f32 %v11156_v28  ;;  %8792 = vrot.lane.b32.xlu0 %v8714_v19, %s12236_s16 }
 0x43b   : > { %19769 = vst [vmem:[#allocation28_spill] sm:$0xff] %v17631_v14  ;;  %v11948_v40 = vpop.eup %11947  ;;  %v8176_v24 = vmin.f32 %v17631_v14, 4.1351666  ;;  %v11157_v1 = vmul.f32 -1.442695, %v17631_v14  ;;  %v11253_v44 = vadd.f32 %v11252_v27, %v11251_v15  ;;  %v8715_v34 = vmul.f32 0.5, %v8683_v56  ;;  %v8607_v56 = vpop.permute.xlu1 %8606 }
 0x43c   : > { %v11950_v58 = vpop.eup %11949  ;;  %11969 = vpow2.f32 %v8546_v20  ;;  %v11254_v63 = vpop.f32.mrf.mxu1  ;;  %v9388_v8 = vadd.f32 1.0, %v11948_v40 }
 0x43d   : > { %v11952_v17 = vpop.eup %11951  ;;  %v8548_v39 = vmul.f32 1.442695, %v8176_v24  ;;  %11971 = vpow2.f32 %v11157_v1  ;;  %v17638_v46 = vadd.f32 %v11253_v44, %v17489_v45 }
 0x43e   : > { %v11954_v37 = vpop.eup %11953  ;;  %8794 = vrot.lane.b32.xlu1 %v8715_v34, %s12236_s16  ;;  %v11255_v28 = vpop.f32.mrf.mxu1  ;;  %v8684_v14 = vmul.f32 %v11952_v17, %v8605_v2  ;;  %9524 = vrot.lane.b32.xlu0 %v11950_v58, %s12238_s26 }
 0x43f   : > { %19770 = vst [vmem:[#allocation68_spill] sm:$0xff] %v17638_v46  ;;  %v9389_v42 = vadd.f32 1.0, %v11954_v37  ;;  %11973 = vpow2.f32 %v8548_v39  ;;  %v11256_v19 = vadd.f32 %v11255_v28, %v11254_v63  ;;  %v8177_v20 = vmin.f32 %v17638_v46, 4.1351666 }
 0x440   : > { %v11956_v15 = vpop.eup %11955  ;;  %v11158_v27 = vmul.f32 -1.442695, %v17638_v46  ;;  %v11257_v40 = vpop.f32.mrf.mxu1  ;;  %v8716_v24 = vmul.f32 0.5, %v8684_v14  ;;  %11975 = vrcp.f32 %v9388_v8 }
 0x441   : > { %v11958_v1 = vpop.eup %11957  ;;  %v17645_v44 = vadd.f32 %v11256_v19, %v17489_v45  ;;  %v8685_v34 = vmul.f32 %v11956_v15, %v8607_v56  ;;  %v8550_v17 = vmul.f32 1.442695, %v8177_v20  ;;  %v8609_v8 = vpop.permute.xlu0 %8608 }
 0x442   : > { %11977 = vpow2.f32 %v11158_v27  ;;  %9526 = vrot.lane.b32.xlu1 %v11958_v1, %s12238_s26  ;;  %v11258_v58 = vpop.f32.mrf.mxu1  ;;  %v11960_v63 = vpop.eup %11959  ;;  %8796 = vrot.lane.b32.xlu0 %v8716_v24, %s12236_s16 }
 0x443   : > { %19771 = vst [vmem:[#allocation29_spill] sm:$0xff] %v17645_v44  ;;  %11979 = vrcp.f32 %v9389_v42  ;;  %v8178_v2 = vmin.f32 %v17645_v44, 4.1351666  ;;  %v11159_v39 = vmul.f32 -1.442695, %v17645_v44  ;;  %v11259_v14 = vadd.f32 %v11258_v58, %v11257_v40 }
 0x444   : > { %v11962_v37 = vpop.eup %11961  ;;  %v9390_v28 = vadd.f32 1.0, %v11960_v63  ;;  %11981 = vpow2.f32 %v8550_v17  ;;  %v11260_v19 = vpop.f32.mrf.mxu1  ;;  %v8717_v15 = vmul.f32 0.5, %v8685_v34 }
 0x445   : > { %v8552_v56 = vmul.f32 1.442695, %v8178_v2  ;;  %11983 = vpow2.f32 %v11159_v39  ;;  %v17652_v20 = vadd.f32 %v11259_v14, %v17489_v45  ;;  %v8686_v27 = vmul.f32 %v11962_v37, %v8609_v8  ;;  %v11964_v42 = vpop.eup %11963  ;;  %v8611_v39 = vpop.permute.xlu1 %8610 }
 0x446   : > { %8798 = vrot.lane.b32.xlu1 %v8717_v15, %s12236_s16  ;;  %v11261_v1 = vpop.f32.mrf.mxu1  ;;  %v11966_v44 = vpop.eup %11965  ;;  %9528 = vrot.lane.b32.xlu0 %v11964_v42, %s12238_s26 }
 0x447   : > { %19772 = vst [vmem:[#allocation69_spill] sm:$0xff] %v17652_v20  ;;  %11985 = vpow2.f32 %v8552_v56  ;;  %v8179_v40 = vmin.f32 %v17652_v20, 4.1351666  ;;  %v11160_v24 = vmul.f32 -1.442695, %v17652_v20  ;;  %v11968_v17 = vpop.eup %11967  ;;  %v11262_v34 = vadd.f32 %v11261_v1, %v11260_v19  ;;  %v8613_v42 = vpop.permute.xlu0 %8612 }
 0x448   : > { %11987 = vrcp.f32 %v9390_v28  ;;  %v11263_v58 = vpop.f32.mrf.mxu1  ;;  %v8718_v63 = vmul.f32 0.5, %v8686_v27  ;;  %v9391_v14 = vadd.f32 1.0, %v11968_v17 }
 0x449   : > { %v11970_v2 = vpop.eup %11969  ;;  %v8554_v37 = vmul.f32 1.442695, %v8179_v40  ;;  %11989 = vpow2.f32 %v11160_v24  ;;  %v17659_v15 = vadd.f32 %v11262_v34, %v17489_v45 }
 0x44a   : > { %v11972_v8 = vpop.eup %11971  ;;  %9530 = vrot.lane.b32.xlu1 %v11966_v44, %s12238_s26  ;;  %v11264_v56 = vpop.f32.mrf.mxu1  ;;  %v8687_v20 = vmul.f32 %v11970_v2, %v8611_v39  ;;  %8800 = vrot.lane.b32.xlu0 %v8718_v63, %s12236_s16 }
 0x44b   : > { %19773 = vst [vmem:[#allocation30_spill] sm:$0xff] %v17659_v15  ;;  %v9392_v46 = vadd.f32 1.0, %v11972_v8  ;;  %v11265_v28 = vadd.f32 %v11264_v56, %v11263_v58  ;;  %11991 = vpow2.f32 %v8554_v37  ;;  %v8180_v27 = vmin.f32 %v17659_v15, 4.1351666 }
 0x44c   : > { %v11974_v19 = vpop.eup %11973  ;;  %v11161_v1 = vmul.f32 -1.442695, %v17659_v15  ;;  %v11266_v40 = vpop.f32.mrf.mxu1  ;;  %11993 = vrcp.f32 %v9391_v14  ;;  %v8719_v17 = vmul.f32 0.5, %v8687_v20 }
 0x44d   : > { %v17666_v24 = vadd.f32 %v11265_v28, %v17489_v45  ;;  %v8688_v44 = vmul.f32 %v11974_v19, %v8613_v42  ;;  %v11976_v34 = vpop.eup %11975  ;;  %v8556_v2 = vmul.f32 1.442695, %v8180_v27  ;;  %v8615_v19 = vpop.permute.xlu1 %8614 }
 0x44e   : > { %11995 = vpow2.f32 %v11161_v1  ;;  %v11267_v39 = vpop.f32.mrf.mxu1  ;;  %8802 = vrot.lane.b32.xlu1 %v8719_v17, %s12236_s16  ;;  %9532 = vrot.lane.b32.xlu0 %v11976_v34, %s12238_s26 }
 0x44f   : > { %19774 = vst [vmem:[#allocation70_spill] sm:$0xff] %v17666_v24  ;;  %v11978_v63 = vpop.eup %11977  ;;  %11997 = vrcp.f32 %v9392_v46  ;;  %v8181_v58 = vmin.f32 %v17666_v24, 4.1351666  ;;  %v11162_v37 = vmul.f32 -1.442695, %v17666_v24  ;;  %v11268_v14 = vadd.f32 %v11267_v39, %v11266_v40 }
 0x450   : > { %v11980_v8 = vpop.eup %11979  ;;  %11999 = vpow2.f32 %v8556_v2  ;;  %v11269_v56 = vpop.f32.mrf.mxu1  ;;  %v8720_v20 = vmul.f32 0.5, %v8688_v44  ;;  %v9393_v42 = vadd.f32 1.0, %v11978_v63 }
 0x451   : > { %v11982_v28 = vpop.eup %11981  ;;  %v8558_v27 = vmul.f32 1.442695, %v8181_v58  ;;  %12001 = vpow2.f32 %v11162_v37  ;;  %v17673_v46 = vadd.f32 %v11268_v14, %v17489_v45  ;;  %v8617_v44 = vpop.permute.xlu0 %8616 }
 0x452   : > { %v11984_v1 = vpop.eup %11983  ;;  %v11270_v15 = vpop.f32.mrf.mxu1  ;;  %v8689_v24 = vmul.f32 %v11982_v28, %v8615_v19  ;;  %9534 = vrot.lane.b32.xlu1 %v11980_v8, %s12238_s26  ;;  %8804 = vrot.lane.b32.xlu0 %v8720_v20, %s12236_s16 }
 0x453   : > { %19775 = vst [vmem:[#allocation31_spill] sm:$0xff] %v17673_v46  ;;  %12003 = vpow2.f32 %v8558_v27  ;;  %v8182_v17 = vmin.f32 %v17673_v46, 4.1351666  ;;  %v11163_v34 = vmul.f32 -1.442695, %v17673_v46  ;;  %v11271_v2 = vadd.f32 %v11270_v15, %v11269_v56 }
 0x454   : > { %v11986_v40 = vpop.eup %11985  ;;  %v11272_v39 = vpop.f32.mrf.mxu1  ;;  %v8721_v63 = vmul.f32 0.5, %v8689_v24  ;;  %12005 = vrcp.f32 %v9393_v42  ;;  %v9394_v37 = vadd.f32 1.0, %v11984_v1 }
 0x455   : > { %v11988_v58 = vpop.eup %11987  ;;  %v8560_v14 = vmul.f32 1.442695, %v8182_v17  ;;  %v8690_v11 = vmul.f32 %v11986_v40, %v8617_v44  ;;  %12007 = vpow2.f32 %v11163_v34  ;;  %v17680_v19 = vadd.f32 %v11271_v2, %v17489_v45  ;;  %v8619_v1 = vpop.permute.xlu1 %8618 }
 0x456   : > { %v11990_v28 = vpop.eup %11989  ;;  %v11273_v8 = vpop.f32.mrf.mxu1  ;;  %8806 = vrot.lane.b32.xlu1 %v8721_v63, %s12236_s16  ;;  %9536 = vrot.lane.b32.xlu0 %v11988_v58, %s12238_s26 }
 0x457   : > { %19776 = vst [vmem:[#allocation87_spill] sm:$0xff] %v17680_v19  ;;  %12009 = vpow2.f32 %v8560_v14  ;;  %v11274_v20 = vadd.f32 %v11273_v8, %v11272_v39  ;;  %v8722_v15 = vmul.f32 0.5, %v8690_v11  ;;  %v8183_v24 = vmin.f32 %v17680_v19, 4.1351666 }
 0x458   : > { %v11164_v56 = vmul.f32 -1.442695, %v17680_v19  ;;  %v11275_v42 = vpop.f32.mrf.mxu1  ;;  %v11992_v27 = vpop.eup %11991  ;;  %12011 = vrcp.f32 %v9394_v37  ;;  %v9395_v17 = vadd.f32 1.0, %v11990_v28 }
 0x459   : > { %v17687_v40 = vadd.f32 %v11274_v20, %v17489_v45  ;;  %v11994_v44 = vpop.eup %11993  ;;  %v8562_v34 = vmul.f32 1.442695, %v8183_v24  ;;  %v8691_v63 = vmul.f32 %v11992_v27, %v8619_v1  ;;  %v8621_v19 = vpop.permute.xlu0 %8620 }
 0x45a   : > { %12013 = vpow2.f32 %v11164_v56  ;;  %v11276_v2 = vpop.f32.mrf.mxu1  ;;  %9538 = vrot.lane.b32.xlu1 %v11994_v44, %s12238_s26  ;;  %8808 = vrot.lane.b32.xlu0 %v8722_v15, %s12236_s16 }
 0x45b   : > { %19777 = vst [vmem:[#allocation71_spill] sm:$0xff] %v17687_v40  ;;  %v11996_v58 = vpop.eup %11995  ;;  %v8184_v11 = vmin.f32 %v17687_v40, 4.1351666  ;;  %v11277_v39 = vadd.f32 %v11276_v2, %v11275_v42  ;;  %12015 = vpow2.f32 %v8562_v34  ;;  %v11165_v37 = vmul.f32 -1.442695, %v17687_v40  ;;  %v8623_v34 = vpop.permute.xlu1 %8622 }
 0x45c   : > { %v11998_v14 = vpop.eup %11997  ;;  %v11278_v28 = vpop.f32.mrf.mxu1  ;;  %v8723_v8 = vmul.f32 0.5, %v8691_v63  ;;  %12017 = vrcp.f32 %v9395_v17  ;;  %v9396_v24 = vadd.f32 1.0, %v11996_v58 }
 0x45d   : > { %v12000_v20 = vpop.eup %11999  ;;  %v8564_v56 = vmul.f32 1.442695, %v8184_v11  ;;  %v17694_v27 = vadd.f32 %v11277_v39, %v17489_v45  ;;  %v8625_v40 = vpop.permute.xlu0 %8624 }
 0x45e   : > { %v12002_v1 = vpop.eup %12001  ;;  %v11279_v46 = vpop.f32.mrf.mxu1  ;;  %v8692_v44 = vmul.f32 %v12000_v20, %v8621_v19  ;;  %8810 = vrot.lane.b32.xlu1 %v8723_v8, %s12236_s16  ;;  %9540 = vrot.lane.b32.xlu0 %v11998_v14, %s12238_s26  ;;  %v12210_v20 = vld [vmem:[%s19032_s7] ss:$0 sm:$0xff] }
 0x45f   : > { %12019 = vpow2.f32 %v8564_v56  ;;  %v8185_v15 = vmin.f32 %v17694_v27, 4.1351666  ;;  %v9397_v2 = vadd.f32 1.0, %v12002_v1  ;;  %v11280_v17 = vadd.f32 %v11279_v46, %v11278_v28 }
 0x460   : > { %v12004_v42 = vpop.eup %12003  ;;  %12021 = vpow2.f32 %v11165_v37  ;;  %v11281_v63 = vpop.f32.mrf.mxu1  ;;  %v8724_v58 = vmul.f32 0.5, %v8692_v44  ;;  %v11166_v11 = vmul.f32 -1.442695, %v17694_v27 }
 0x461   : > { %12023 = vrcp.f32 %v9396_v24  ;;  %v8566_v45 = vmul.f32 1.442695, %v8185_v15  ;;  %v8693_v39 = vmul.f32 %v12004_v42, %v8623_v34  ;;  %v12006_v19 = vpop.eup %12005  ;;  %v17703_v8 = vadd.f32 %v12210_v20, %v11280_v17 }
 0x462   : > { %v11282_v14 = vpop.f32.mrf.mxu1  ;;  %v12008_v56 = vpop.eup %12007  ;;  %9542 = vrot.lane.b32.xlu1 %v12006_v19, %s12238_s26  ;;  %8812 = vrot.lane.b32.xlu0 %v8724_v58, %s12236_s16 }
 0x463   : > { %12025 = vpow2.f32 %v8566_v45  ;;  %v11283_v46 = vadd.f32 %v11282_v14, %v11281_v63  ;;  %v8725_v37 = vmul.f32 0.5, %v8693_v39  ;;  %v8186_v24 = vmin.f32 %v17703_v8, 4.1351666  ;;  %v8627_v63 = vpop.permute.xlu1 %8626  ;;  %v8629_v19 = vpop.permute.xlu0 %8628 }
 0x464   : > { %v12010_v28 = vpop.eup %12009  ;;  %12027 = vrcp.f32 %v9397_v2  ;;  %v9398_v1 = vadd.f32 1.0, %v12008_v56  ;;  %v11167_v2 = vmul.f32 -1.442695, %v17703_v8 }
 0x465   : > { %12029 = vpow2.f32 %v11166_v11  ;;  %v17708_v44 = vadd.f32 %v12210_v20, %v11283_v46  ;;  %v8694_v15 = vmul.f32 %v12010_v28, %v8625_v40  ;;  %v12012_v42 = vpop.eup %12011  ;;  %v8568_v34 = vmul.f32 1.442695, %v8186_v24 }
 0x466   : > { %8814 = vrot.lane.b32.xlu1 %v8725_v37, %s12236_s16  ;;  %9544 = vrot.lane.b32.xlu0 %v12012_v42, %s12238_s26 }
 0x467   : > { %v12014_v17 = vpop.eup %12013  ;;  %v8187_v45 = vmin.f32 %v17708_v44, 4.1351666  ;;  %12031 = vpow2.f32 %v8568_v34  ;;  %v8726_v58 = vmul.f32 0.5, %v8694_v15  ;;  %v11168_v46 = vmul.f32 -1.442695, %v17708_v44  ;;  %v8631_v42 = vpop.permute.xlu1 %8630 }
 0x468   : > { %v12016_v39 = vpop.eup %12015  ;;  %12033 = vrcp.f32 %v9398_v1  ;;  %v9399_v11 = vadd.f32 1.0, %v12014_v17  ;;  %v8316_v1 = vmul.f32 %v17219_v0, %v17494_v12  ;;  %v8633_v34 = vpop.permute.xlu0 %8632 }
 0x469   : > { %v8570_v20 = vmul.f32 1.442695, %v8187_v45  ;;  %v12018_v40 = vpop.eup %12017  ;;  %v8695_v14 = vmul.f32 %v12016_v39, %v8627_v63 }
 0x46a   : > { %9546 = vrot.lane.b32.xlu1 %v12018_v40, %s12238_s26  ;;  %8816 = vrot.lane.b32.xlu0 %v8726_v58, %s12236_s16 }
 0x46b   : > { %12035 = vpow2.f32 %v8570_v20  ;;  %v8727_v37 = vmul.f32 0.5, %v8695_v14  ;;  %v8635_v20 = vpop.permute.xlu1 %8634 }
 0x46c   : > { %v12020_v56 = vpop.eup %12019  ;;  %12037 = vpow2.f32 %v11167_v2 }
 0x46d   : > { %v12022_v28 = vpop.eup %12021  ;;  %12039 = vrcp.f32 %v9399_v11  ;;  %v8696_v24 = vmul.f32 %v12020_v56, %v8629_v19  ;;  %v8476_v11 = vadd.f32 %v17436_v35, %v8316_v1  ;;  %v8317_v19 = vmul.f32 %v17232_v53, %v17501_v43 }
 0x46e   : > { %v12024_v15 = vpop.eup %12023  ;;  %8818 = vrot.lane.b32.xlu1 %v8727_v37, %s12236_s16  ;;  %12041 = vpow2.f32 %v11168_v46  ;;  %v9400_v2 = vadd.f32 1.0, %v12022_v28  ;;  %v8318_v28 = vmul.f32 %v17234_v57, %v17510_v49  ;;  %v8319_v57 = vmul.f32 %v17247_v55, %v17517_v22 }
 0x46f   : > { %9548 = vrot.lane.b32.xlu0 %v12024_v15, %s12238_s26  ;;  %v8728_v17 = vmul.f32 0.5, %v8696_v24  ;;  %v8477_v53 = vadd.f32 %v17438_v32, %v8317_v19 }
 0x470   : > { %v12026_v45 = vpop.eup %12025  ;;  %12043 = vrcp.f32 %v9400_v2 }
 0x471   : > { %v12028_v63 = vpop.eup %12027  ;;  %v8697_v58 = vmul.f32 %v12026_v45, %v8631_v42 }
 0x472   : > { %v12030_v39 = vpop.eup %12029  ;;  %9550 = vrot.lane.b32.xlu1 %v12028_v63, %s12238_s26 }
 0x473   : > { %8820 = vrot.lane.b32.xlu0 %v8728_v17, %s12236_s16  ;;  %v8765_v0 = vpop.permute.xlu0 %8764  ;;  %v8729_v12 = vmul.f32 0.5, %v8697_v58  ;;  %v9401_v46 = vadd.f32 1.0, %v12030_v39 }
 0x474   : > { %v8860_v40 = vsub.f32 %v8476_v11, %v8765_v0  ;;  %v8956_v14 = vadd.f32 %v8765_v0, %v8476_v11  ;;  %v12032_v56 = vpop.eup %12031 }
 0x475   : > { %v12034_v37 = vpop.eup %12033  ;;  %v8698_v24 = vmul.f32 %v12032_v56, %v8633_v34  ;;  %12045 = vrcp.f32 %v9401_v46  ;;  %v8478_v34 = vadd.f32 %v17440_v3, %v8318_v28  ;;  %v8479_v3 = vadd.f32 %v17442_v51, %v8319_v57 }
 0x476   : > { %v8892_v35 = vmax.f32 %v8860_v40, 0.0  ;;  %v8988_v15 = vmax.f32 %v8956_v14, 0.0  ;;  %8822 = vrot.lane.b32.xlu1 %v8729_v12, %s12236_s16 }
 0x477   : > { %9552 = vrot.lane.b32.xlu0 %v12034_v37, %s12238_s26  ;;  %v8730_v1 = vmul.f32 0.5, %v8698_v24  ;;  %v8320_v37 = vmul.f32 %v17254_v25, %v17524_v50  ;;  %v8321_v25 = vmul.f32 %v17261_v10, %v17531_v21  ;;  %v8322_v10 = vmul.f32 %v17269_v30, %v17536_v52 }
 0x478   : > { %v12036_v43 = vpop.eup %12035  ;;  %v8767_v42 = vpop.permute.xlu1 %8766  ;;  %v17733_v49 = vmin.f32 %v8892_v35, 64.0  ;;  %v9020_v39 = vmin.f32 %v8988_v15, 64.0 }
 0x479   : > { %v12038_v17 = vpop.eup %12037  ;;  %v8861_v45 = vsub.f32 %v8477_v53, %v8767_v42  ;;  %v8957_v63 = vadd.f32 %v8767_v42, %v8477_v53  ;;  %v8699_v2 = vmul.f32 %v12036_v43, %v8635_v20  ;;  %v8480_v50 = vadd.f32 %v17444_v23, %v8320_v37 }
 0x47a   : > { %v12040_v58 = vpop.eup %12039  ;;  %19778 = vst [vmem:[#allocation47_spill] sm:$0xff] %v17733_v49  ;;  %v9402_v19 = vadd.f32 1.0, %v12038_v17  ;;  %v9052_v46 = vsub.f32 %v9020_v39, %v17733_v49  ;;  %v8481_v23 = vadd.f32 %v17446_v62, %v8321_v25 }
 0x47b   : > { %v8893_v11 = vmax.f32 %v8861_v45, 0.0  ;;  %v8989_v0 = vmax.f32 %v8957_v63, 0.0  ;;  %9554 = vrot.lane.b32.xlu1 %v12040_v58, %s12238_s26  ;;  %8824 = vrot.lane.b32.xlu0 %v8730_v1, %s12236_s16  ;;  %v8731_v32 = vmul.f32 0.5, %v8699_v2  ;;  %v12042_v40 = vpop.eup %12041 }
 0x47c   : > { %v8769_v12 = vpop.permute.xlu0 %8768  ;;  %12047 = vrcp.f32 %v9402_v19  ;;  %v9403_v28 = vadd.f32 1.0, %v12042_v40  ;;  %vm17753_vm6 = vcmp.ge.f32.partialorder %v9052_v46, 0.001 }
 0x47d   : > { %v8862_v20 = vsub.f32 %v8478_v34, %v8769_v12  ;;  %v8958_v14 = vadd.f32 %v8769_v12, %v8478_v34  ;;  %v17738_v56 = vmin.f32 %v8893_v11, 64.0  ;;  %v9021_v55 = vmin.f32 %v8989_v0, 64.0  ;;  %v12044_v42 = vpop.eup %12043 }
 0x47e   : > { %12049 = vrcp.f32 %v9403_v28  ;;  %v19095_v0 = vmov 0   ;;  %v8323_v28 = vmul.f32 %v17276_v13, %v17542_v7  ;;  %v8324_v13 = vmul.f32 %v17283_v61, %v17548_v18 }
 0x47f   : > { %19779 = vst [vmem:[#allocation32_spill] sm:$0xff] %v17738_v56  ;;  %8826 = vrot.lane.b32.xlu1 %v8731_v32, %s12236_s16  ;;  %9887 = vrot.lane.b32.xlu0 %v9020_v39, %s12235_s17  ;;  %v8771_v22 = vpop.permute.xlu1 %8770  ;;  %v8894_v24 = vmax.f32 %v8862_v20, 0.0  ;;  %v8990_v15 = vmax.f32 %v8958_v14, 0.0  ;;  %v9053_v1 = vsub.f32 %v9021_v55, %v17738_v56  ;;  %v9116_v32 = vsel %vm17753_vm6, 1, %v19095_v0  ;;  %s11171_s16 = sshll.u32 %s20004_s27, 8 }
 0x480   : > { %v17746_v35 = vpop.permute.xlu0 %9500  ;;  %v8863_v53 = vsub.f32 %v8479_v3, %v8771_v22  ;;  %v8959_v43 = vadd.f32 %v8771_v22, %v8479_v3  ;;  %s18456_s23 = scalar_lea.vmem %s19033_s8, %s11171_s16 }
 0x481   : > { %v17760_v63 = vmin.f32 %v8894_v24, 64.0  ;;  %v9022_v2 = vmin.f32 %v8990_v15, 64.0  ;;  %vm17765_vm7 = vcmp.ge.f32.partialorder %v9053_v1, 0.001  ;;  %v8482_v24 = vadd.f32 %v17448_v47, %v8322_v10 }
 0x482   : > { %v8895_v58 = vmax.f32 %v8863_v53, 0.0  ;;  %v8991_v57 = vmax.f32 %v8959_v43, 0.0  ;;  %v12046_v34 = vpop.eup %12045  ;;  %v9117_v14 = vsel %vm17765_vm7, 1, %v19095_v0 }
 0x483   : > { %9889 = vrot.lane.b32.xlu1 %v9021_v55, %s12235_s17  ;;  %9556 = vrot.lane.b32.xlu0 %v12044_v42, %s12238_s26  ;;  %v17751_v51 = vpop.permute.xlu1 %9502  ;;  %19782 = vst [vmem:[#allocation50_spill] sm:$0xff] %v17760_v63  ;;  %v9054_v55 = vsub.f32 %v9022_v2, %v17760_v63  ;;  %v19869_v63 = vld [vmem:[#allocation6_spill] sm:$0xff] }
 0x484   : > { %v8773_v45 = vpop.permute.xlu0 %8772  ;;  %v17776_v40 = vmin.f32 %v8895_v58, 64.0  ;;  %v9023_v20 = vmin.f32 %v8991_v57, 64.0  ;;  %v8325_v58 = vmul.f32 %v17296_v36, %v17554_v31  ;;  %v8483_v57 = vadd.f32 %v17450_v60, %v8323_v28 }
 0x485   : > { %v8864_v39 = vsub.f32 %v8480_v50, %v8773_v45  ;;  %v8960_v11 = vadd.f32 %v8773_v45, %v8480_v50  ;;  %vm17789_vm8 = vcmp.ge.f32.partialorder %v9054_v55, 0.001  ;;  %v8484_v60 = vadd.f32 %v17452_v16, %v8324_v13 }
 0x486   : > { %19785 = vst [vmem:[#allocation72_spill] sm:$0xff] %v17776_v40  ;;  %v9055_v53 = vsub.f32 %v9023_v20, %v17776_v40  ;;  %v8326_v31 = vmul.f32 %v17298_v26, %v17562_v5  ;;  %v8485_v55 = vadd.f32 %v17454_v38, %v8325_v58 }
 0x487   : > { %9558 = vrot.lane.b32.xlu1 %v12046_v34, %s12238_s26  ;;  %9148 = vrot.lane.b32.xlu0 %v9116_v32, %s12237_s22  ;;  %v8896_v3 = vmax.f32 %v8864_v39, 0.0  ;;  %v8992_v22 = vmax.f32 %v8960_v11, 0.0  ;;  %v9118_v34 = vsel %vm17789_vm8, 1, %v19095_v0 }
 0x488   : > { %v8775_v21 = vpop.permute.xlu1 %8774  ;;  %v17774_v12 = vpop.permute.xlu0 %9504  ;;  %vm17810_vm9 = vcmp.ge.f32.partialorder %v9055_v53, 0.001 }
 0x489   : > { %v8865_v46 = vsub.f32 %v8481_v23, %v8775_v21  ;;  %v8961_v37 = vadd.f32 %v8775_v21, %v8481_v23  ;;  %v12048_v52 = vpop.eup %12047  ;;  %v17794_v43 = vmin.f32 %v8896_v3, 64.0  ;;  %v9024_v42 = vmin.f32 %v8992_v22, 64.0 }
 0x48b   : > { %9150 = vrot.lane.b32.xlu1 %v9117_v14, %s12237_s22  ;;  %9891 = vrot.lane.b32.xlu0 %v9022_v2, %s12235_s17  ;;  %19788 = vst [vmem:[#allocation52_spill] sm:$0xff] %v17794_v43  ;;  %v8897_v1 = vmax.f32 %v8865_v46, 0.0  ;;  %v8993_v25 = vmax.f32 %v8961_v37, 0.0  ;;  %v12050_v2 = vpop.eup %12049  ;;  %v9056_v61 = vsub.f32 %v9024_v42, %v17794_v43  ;;  %v9119_v14 = vsel %vm17810_vm9, 1, %v19095_v0 }
 0x48c   : > { %v17784_v30 = vpop.permute.xlu1 %9506  ;;  %v8777_v62 = vpop.permute.xlu0 %8776 }
 0x48d   : > { %v8866_v50 = vsub.f32 %v8482_v24, %v8777_v62  ;;  %v8962_v45 = vadd.f32 %v8777_v62, %v8482_v24  ;;  %v17808_v39 = vmin.f32 %v8897_v1, 64.0  ;;  %v9025_v11 = vmin.f32 %v8993_v25, 64.0 }
 0x48e   : > { %vm17826_vm10 = vcmp.ge.f32.partialorder %v9056_v61, 0.001  ;;  %v8327_v25 = vmul.f32 %v17311_v41, %v17568_v54 }
 0x48f   : > { %9893 = vrot.lane.b32.xlu1 %v9023_v20, %s12235_s17  ;;  %9560 = vrot.lane.b32.xlu0 %v12048_v52, %s12238_s26  ;;  %19789 = vst [vmem:[#allocation33_spill] sm:$0xff] %v17808_v39  ;;  %v8898_v18 = vmax.f32 %v8866_v50, 0.0  ;;  %v8994_v10 = vmax.f32 %v8962_v45, 0.0  ;;  %v9057_v37 = vsub.f32 %v9025_v11, %v17808_v39  ;;  %v9120_v50 = vsel %vm17826_vm10, 1, %v19095_v0 }
 0x490   : > { %v8779_v47 = vpop.permute.xlu1 %8778  ;;  %v17800_v7 = vpop.permute.xlu0 %9508  ;;  %v8486_v45 = vadd.f32 %v17456_v9, %v8326_v31 }
 0x491   : > { %v8867_v23 = vsub.f32 %v8483_v57, %v8779_v47  ;;  %v8963_v21 = vadd.f32 %v8779_v47, %v8483_v57  ;;  %v17831_v62 = vmin.f32 %v8898_v18, 64.0  ;;  %v9026_v16 = vmin.f32 %v8994_v10, 64.0 }
 0x492   : > { %vm17847_vm11 = vcmp.ge.f32.partialorder %v9057_v37, 0.001  ;;  %v8487_v10 = vadd.f32 %v17458_v6, %v8327_v25 }
 0x493   : > { %9562 = vrot.lane.b32.xlu1 %v12050_v2, %s12238_s26  ;;  %9152 = vrot.lane.b32.xlu0 %v9118_v34, %s12237_s22  ;;  %19794 = vst [vmem:[#allocation53_spill] sm:$0xff] %v17831_v62  ;;  %v8899_v52 = vmax.f32 %v8867_v23, 0.0  ;;  %v8995_v26 = vmax.f32 %v8963_v21, 0.0  ;;  %v9058_v2 = vsub.f32 %v9026_v16, %v17831_v62 }
 0x494   : > { %v17817_v36 = vpop.permute.xlu1 %9510  ;;  %v8781_v20 = vpop.permute.xlu0 %8780 }
 0x495   : > { %v8868_v3 = vsub.f32 %v8484_v60, %v8781_v20  ;;  %v8964_v22 = vadd.f32 %v8781_v20, %v8484_v60  ;;  %v17843_v13 = vmin.f32 %v8899_v52, 64.0  ;;  %v9027_v47 = vmin.f32 %v8995_v26, 64.0 }
 0x496   : > { %vm17862_vm12 = vcmp.ge.f32.partialorder %v9058_v2, 0.001  ;;  %v8328_v60 = vmul.f32 %v17318_v29, %v17575_v33  ;;  %v8329_v33 = vmul.f32 %v17325_v59, %v17582_v4  ;;  %v19808_v4 = vld [vmem:[#allocation56_spill] sm:$0xff] }
 0x497   : > { %9154 = vrot.lane.b32.xlu1 %v9119_v14, %s12237_s22  ;;  %9895 = vrot.lane.b32.xlu0 %v9024_v42, %s12235_s17  ;;  %v8900_v5 = vmax.f32 %v8868_v3, 0.0  ;;  %v8996_v28 = vmax.f32 %v8964_v22, 0.0  ;;  %19795 = vst [vmem:[#allocation73_spill] sm:$0xff] %v17843_v13  ;;  %v9059_v21 = vsub.f32 %v9027_v47, %v17843_v13  ;;  %v9122_v52 = vsel %vm17862_vm12, 1, %v19095_v0 }
 0x498   : > { %v8783_v38 = vpop.permute.xlu1 %8782  ;;  %v17835_v1 = vpop.permute.xlu0 %9512 }
 0x499   : > { %v8869_v24 = vsub.f32 %v8485_v55, %v8783_v38  ;;  %v8965_v53 = vadd.f32 %v8783_v38, %v8485_v55  ;;  %v17852_v41 = vmin.f32 %v8900_v5, 64.0  ;;  %v9028_v54 = vmin.f32 %v8996_v28, 64.0 }
 0x49a   : > { %vm17879_vm13 = vcmp.ge.f32.partialorder %v9059_v21, 0.001  ;;  %v8488_v5 = vadd.f32 %v17460_v48, %v8328_v60  ;;  %v19807_v48 = vld [vmem:[#allocation62_spill] sm:$0xff] }
 0x49b   : > { %9897 = vrot.lane.b32.xlu1 %v9025_v11, %s12235_s17  ;;  %9156 = vrot.lane.b32.xlu0 %v9120_v50, %s12237_s22  ;;  %19798 = vst [vmem:[#allocation34_spill] sm:$0xff] %v17852_v41  ;;  %v8901_v58 = vmax.f32 %v8869_v24, 0.0  ;;  %v8997_v57 = vmax.f32 %v8965_v53, 0.0  ;;  %v9121_v11 = vsel %vm17847_vm11, 1, %v19095_v0  ;;  %v9060_v55 = vsub.f32 %v9028_v54, %v17852_v41  ;;  %v19836_v41 = vld [vmem:[#allocation67_spill] sm:$0xff] }
 0x49c   : > { %v17854_v34 = vpop.permute.xlu1 %9514  ;;  %v8785_v9 = vpop.permute.xlu0 %8784  ;;  %v9123_v59 = vsel %vm17879_vm13, 1, %v19095_v0 }
 0x49d   : > { %v8870_v61 = vsub.f32 %v8486_v45, %v8785_v9  ;;  %v8966_v18 = vadd.f32 %v8785_v9, %v8486_v45  ;;  %v17869_v31 = vmin.f32 %v8901_v58, 64.0  ;;  %v9029_v20 = vmin.f32 %v8997_v57, 64.0  ;;  %v19809_v57 = vld [vmem:[#allocation14_spill] sm:$0xff] }
 0x49e   : > { %vm17888_vm14 = vcmp.ge.f32.partialorder %v9060_v55, 0.001  ;;  %v8330_v58 = vmul.f32 %v19808_v4, %v19807_v48  ;;  %v8489_v9 = vadd.f32 %v19809_v57, %v8329_v33  ;;  %v19814_v33 = vld [vmem:[#allocation25_spill] sm:$0xff]  ;;  %v19819_v57 = vld [vmem:[#allocation66_spill] sm:$0xff] }
 0x49f   : > { %9158 = vrot.lane.b32.xlu1 %v9121_v11, %s12237_s22  ;;  %9899 = vrot.lane.b32.xlu0 %v9026_v16, %s12235_s17  ;;  %19801 = vst [vmem:[#allocation74_spill] sm:$0xff] %v17869_v31  ;;  %v8902_v3 = vmax.f32 %v8870_v61, 0.0  ;;  %v8998_v22 = vmax.f32 %v8966_v18, 0.0  ;;  %v9061_v38 = vsub.f32 %v9029_v20, %v17869_v31  ;;  %v9124_v18 = vsel %vm17888_vm14, 1, %v19095_v0 }
 0x4a0   : > { %v8787_v14 = vpop.permute.xlu1 %8786  ;;  %v17872_v6 = vpop.permute.xlu0 %9516 }
 0x4a1   : > { %v8871_v37 = vsub.f32 %v8487_v10, %v8787_v14  ;;  %v8967_v16 = vadd.f32 %v8787_v14, %v8487_v10  ;;  %v17893_v24 = vmin.f32 %v8902_v3, 64.0  ;;  %v9030_v53 = vmin.f32 %v8998_v22, 64.0 }
 0x4a2   : > { %vm17910_vm15 = vcmp.ge.f32.partialorder %v9061_v38, 0.001 }
 0x4a3   : > { %9901 = vrot.lane.b32.xlu1 %v9027_v47, %s12235_s17  ;;  %9160 = vrot.lane.b32.xlu0 %v9122_v52, %s12237_s22  ;;  %19806 = vst [vmem:[#allocation35_spill] sm:$0xff] %v17893_v24  ;;  %v8903_v25 = vmax.f32 %v8871_v37, 0.0  ;;  %v8999_v50 = vmax.f32 %v8967_v16, 0.0  ;;  %v19813_v16 = vld [vmem:[#allocation83_spill] sm:$0xff] }
 0x4a4   : > { %v17885_v26 = vpop.permute.xlu1 %9518  ;;  %v8789_v45 = vpop.permute.xlu0 %8788  ;;  %v8490_v52 = vadd.f32 %v19813_v16, %v8330_v58  ;;  %v19822_v16 = vld [vmem:[#allocation63_spill] sm:$0xff] }
 0x4a5   : > { %v8872_v47 = vsub.f32 %v8488_v5, %v8789_v45  ;;  %v8968_v2 = vadd.f32 %v8789_v45, %v8488_v5  ;;  %v17906_v11 = vmin.f32 %v8903_v25, 64.0  ;;  %v9031_v10 = vmin.f32 %v8999_v50, 64.0  ;;  %v19815_v5 = vld [vmem:[#allocation59_spill] sm:$0xff] }
 0x4a6   : > { %v8331_v38 = vmul.f32 %v19815_v5, %v19814_v33  ;;  %v9125_v50 = vsel %vm17910_vm15, 1, %v19095_v0  ;;  %v19823_v5 = vld [vmem:[#allocation15_spill] sm:$0xff] }
 0x4a7   : > { %9162 = vrot.lane.b32.xlu1 %v9123_v59, %s12237_s22  ;;  %9903 = vrot.lane.b32.xlu0 %v9028_v54, %s12235_s17  ;;  %19810 = vst [vmem:[#allocation75_spill] sm:$0xff] %v17906_v11  ;;  %v9062_v54 = vsub.f32 %v9030_v53, %v17893_v24  ;;  %v8904_v14 = vmax.f32 %v8872_v47, 0.0  ;;  %v9000_v55 = vmax.f32 %v8968_v2, 0.0 }
 0x4a8   : > { %v8791_v61 = vpop.permute.xlu1 %8790  ;;  %v17908_v21 = vpop.permute.xlu0 %9520  ;;  %v8491_v0 = vadd.f32 %v19823_v5, %v8331_v38  ;;  %v19829_v5 = vld [vmem:[#allocation65_spill] sm:$0xff] }
 0x4a9   : > { %v8873_v3 = vsub.f32 %v8489_v9, %v8791_v61  ;;  %v8969_v22 = vadd.f32 %v8791_v61, %v8489_v9  ;;  %vm17925_vm0 = vcmp.ge.f32.partialorder %v9062_v54, 0.001  ;;  %v17930_v47 = vmin.f32 %v8904_v14, 64.0  ;;  %v19820_v9 = vld [vmem:[#allocation60_spill] sm:$0xff]  ;;  %v19821_v54 = vld [vmem:[#allocation26_spill] sm:$0xff] }
 0x4aa   : > { %v9032_v2 = vmin.f32 %v9000_v55, 64.0  ;;  %v8332_v61 = vmul.f32 %v19820_v9, %v19819_v57  ;;  %v8333_v33 = vmul.f32 %v19822_v16, %v19821_v54  ;;  %v19824_v55 = vmov 0   ;;  %v19828_v16 = vld [vmem:[#allocation17_spill] sm:$0xff] }
 0x4ab   : > { %9905 = vrot.lane.b32.xlu1 %v9029_v20, %s12235_s17  ;;  %9164 = vrot.lane.b32.xlu0 %v9124_v18, %s12237_s22  ;;  %v9063_v20 = vsub.f32 %v9031_v10, %v17906_v11  ;;  %19818 = vst [vmem:[#allocation36_spill] sm:$0xff] %v17930_v47  ;;  %v8905_v59 = vmax.f32 %v8873_v3, 0.0  ;;  %v9001_v48 = vmax.f32 %v8969_v22, 0.0  ;;  %v9126_v3 = vsel %vm17925_vm0, 1, %v19824_v55 }
 0x4ac   : > { %v17917_v37 = vpop.permute.xlu1 %9522  ;;  %v8793_v25 = vpop.permute.xlu0 %8792 }
 0x4ad   : > { %v8874_v4 = vsub.f32 %v8490_v52, %v8793_v25  ;;  %v8970_v58 = vadd.f32 %v8793_v25, %v8490_v52  ;;  %v17944_v22 = vmin.f32 %v8905_v59, 64.0  ;;  %v9033_v52 = vmin.f32 %v9001_v48, 64.0  ;;  %v19830_v48 = vld [vmem:[#allocation64_spill] sm:$0xff] }
 0x4ae   : > { %vm17946_vm1 = vcmp.ge.f32.partialorder %v9063_v20, 0.001  ;;  %v9064_v25 = vsub.f32 %v9032_v2, %v17930_v47  ;;  %v8492_v59 = vadd.f32 %v19828_v16, %v8332_v61  ;;  %v8334_v20 = vmul.f32 %v19830_v48, %v19829_v5 }
 0x4af   : > { %9166 = vrot.lane.b32.xlu1 %v9125_v50, %s12237_s22  ;;  %9907 = vrot.lane.b32.xlu0 %v9030_v53, %s12235_s17  ;;  %19825 = vst [vmem:[#allocation76_spill] sm:$0xff] %v17944_v22  ;;  %v8906_v50 = vmax.f32 %v8874_v4, 0.0  ;;  %v9002_v57 = vmax.f32 %v8970_v58, 0.0  ;;  %v9127_v47 = vsel %vm17946_vm1, 1, %v19824_v55  ;;  %v19831_v4 = vld [vmem:[#allocation16_spill] sm:$0xff] }
 0x4b0   : > { %v8795_v18 = vpop.permute.xlu1 %8794  ;;  %v17939_v14 = vpop.permute.xlu0 %9524  ;;  %v8493_v58 = vadd.f32 %v19831_v4, %v8333_v33  ;;  %vm17962_vm2 = vcmp.ge.f32.partialorder %v9064_v25, 0.001 }
 0x4b1   : > { %v8875_v9 = vsub.f32 %v8491_v0, %v8795_v18  ;;  %v8971_v54 = vadd.f32 %v8795_v18, %v8491_v0  ;;  %v9065_v18 = vsub.f32 %v9033_v52, %v17944_v22  ;;  %v9034_v61 = vmin.f32 %v9002_v57, 64.0  ;;  %v19837_v57 = vld [vmem:[#allocation18_spill] sm:$0xff] }
 0x4b3   : > { %9909 = vrot.lane.b32.xlu1 %v9031_v10, %s12235_s17  ;;  %9168 = vrot.lane.b32.xlu0 %v9126_v3, %s12237_s22  ;;  %v19832_v10 = vmov 0  ;;  %v17967_v3 = vmin.f32 %v8906_v50, 64.0  ;;  %v8907_v16 = vmax.f32 %v8875_v9, 0.0  ;;  %v9003_v5 = vmax.f32 %v8971_v54, 0.0 }
 0x4b4   : > { %v17953_v38 = vpop.permute.xlu1 %9526  ;;  %v8797_v11 = vpop.permute.xlu0 %8796  ;;  %v19833_v10 = vsel %vm17962_vm2, 4294967295, %v19832_v10  ;;  %v9128_v50 = vsel %vm17962_vm2, 1, %v19824_v55  ;;  %v8494_v9 = vadd.f32 %v19837_v57, %v8334_v20  ;;  %vm17983_vm3 = vcmp.ge.f32.partialorder %v9065_v18, 0.001  ;;  %v19842_v18 = vld [vmem:[#allocation19_spill] sm:$0xff] }
 0x4b5   : > { %v8876_v24 = vsub.f32 %v8492_v59, %v8797_v11  ;;  %v8972_v0 = vadd.f32 %v8797_v11, %v8492_v59  ;;  %19834 = vst [vmem:[#allocation37_spill] sm:$0xff] %v17967_v3  ;;  %v19835_v59 = vld [vmem:[#allocation27_spill] sm:$0xff]  ;;  %v17979_v54 = vmin.f32 %v8907_v16, 64.0 }
 0x4b6   : > { %v8335_v13 = vmul.f32 %v19836_v41, %v19835_v59 }
 0x4b7   : > { %9170 = vrot.lane.b32.xlu1 %v9127_v47, %s12237_s22  ;;  %9911 = vrot.lane.b32.xlu0 %v9032_v2, %s12235_s17  ;;  %v8908_v48 = vmax.f32 %v8876_v24, 0.0  ;;  %v9004_v31 = vmax.f32 %v8972_v0, 0.0  ;;  %19838 = vst [vmem:[#allocation77_spill] sm:$0xff] %v17979_v54  ;;  %v9035_v47 = vmin.f32 %v9003_v5, 64.0  ;;  %v19839_v24 = vmov 0 }
 0x4b8   : > { %v8799_v33 = vpop.permute.xlu1 %8798  ;;  %v17971_v25 = vpop.permute.xlu0 %9528  ;;  %v19840_v24 = vsel %vm17983_vm3, 4294967295, %v19839_v24  ;;  %v9066_v2 = vsub.f32 %v9034_v61, %v17967_v3 }
 0x4b9   : > { %v8877_v4 = vsub.f32 %v8493_v58, %v8799_v33  ;;  %v8973_v11 = vadd.f32 %v8799_v33, %v8493_v58  ;;  %v17988_v41 = vmin.f32 %v8908_v48, 64.0  ;;  %v9036_v58 = vmin.f32 %v9004_v31, 64.0 }
 0x4ba   : > { %vm17998_vm4 = vcmp.ge.f32.partialorder %v9066_v2, 0.001  ;;  %v19843_v48 = vmov 0  ;;  %v9067_v31 = vsub.f32 %v9035_v47, %v17979_v54 }
 0x4bb   : > { %9913 = vrot.lane.b32.xlu1 %v9033_v52, %s12235_s17  ;;  %9172 = vrot.lane.b32.xlu0 %v9128_v50, %s12237_s22  ;;  %19841 = vst [vmem:[#allocation38_spill] sm:$0xff] %v17988_v41  ;;  %v8909_v0 = vmax.f32 %v8877_v4, 0.0  ;;  %v9005_v33 = vmax.f32 %v8973_v11, 0.0  ;;  %v9129_v52 = vsel %vm17983_vm3, 1, %v19824_v55  ;;  %v8495_v50 = vadd.f32 %v19842_v18, %v8335_v13  ;;  %v19845_v4 = vld [vmem:[#allocation28_spill] sm:$0xff]  ;;  %v19846_v11 = vld [vmem:[#allocation3_spill] sm:$0xff] }
 0x4bc   : > { %v17990_v59 = vpop.permute.xlu1 %9530  ;;  %v8801_v20 = vpop.permute.xlu0 %8800  ;;  %v19844_v48 = vsel %vm17998_vm4, 4294967295, %v19843_v48  ;;  %v8336_v57 = vmul.f32 %v19846_v11, %v19845_v4  ;;  %v9068_v3 = vsub.f32 %v9036_v58, %v17988_v41  ;;  %v9130_v18 = vsel %vm17998_vm4, 1, %v19824_v55  ;;  %v19853_v4 = vld [vmem:[#allocation20_spill] sm:$0xff] }
 0x4bd   : > { %v8878_v16 = vsub.f32 %v8494_v9, %v8801_v20  ;;  %v8974_v5 = vadd.f32 %v8801_v20, %v8494_v9  ;;  %v18005_v9 = vmin.f32 %v8909_v0, 64.0  ;;  %v9037_v20 = vmin.f32 %v9005_v33, 64.0  ;;  %v19851_v33 = vld [vmem:[#allocation68_spill] sm:$0xff] }
 0x4be   : > { %vm18015_vm5 = vcmp.ge.f32.partialorder %v9067_v31, 0.001  ;;  %v19849_v0 = vmov 0  ;;  %v8496_v11 = vadd.f32 %v19853_v4, %v8336_v57  ;;  %vm18022_vm3 = vcmp.ge.f32.partialorder %v9068_v3, 0.001  ;;  %v19859_v3 = vld [vmem:[#allocation29_spill] sm:$0xff] }
 0x4bf   : > { %9174 = vrot.lane.b32.xlu1 %v9129_v52, %s12237_s22  ;;  %9915 = vrot.lane.b32.xlu0 %v9034_v61, %s12235_s17  ;;  %19847 = vst [vmem:[#allocation78_spill] sm:$0xff] %v18005_v9  ;;  %v8910_v22 = vmax.f32 %v8878_v16, 0.0  ;;  %v9006_v52 = vmax.f32 %v8974_v5, 0.0  ;;  %v19850_v0 = vsel %vm18015_vm5, 4294967295, %v19849_v0  ;;  %v19852_v16 = vld [vmem:[#allocation5_spill] sm:$0xff]  ;;  %v19854_v41 = vmov 0 }
 0x4c0   : > { %v8803_v62 = vpop.permute.xlu1 %8802  ;;  %v18008_v61 = vpop.permute.xlu0 %9532  ;;  %v8337_v5 = vmul.f32 %v19852_v16, %v19851_v33  ;;  %v19855_v41 = vsel %vm18022_vm3, 4294967295, %v19854_v41  ;;  %v9131_v57 = vsel %vm18015_vm5, 1, %v19824_v55  ;;  %v19860_v33 = vld [vmem:[#allocation4_spill] sm:$0xff]  ;;  %v19861_v16 = vld [vmem:[#allocation49_spill] sm:$0xff] }
 0x4c1   : > { %19848 = vst [vmem:[#allocation39_spill] sm:$0xff] %v18008_v61  ;;  %v8879_v13 = vsub.f32 %v8495_v50, %v8803_v62  ;;  %v8975_v2 = vadd.f32 %v8803_v62, %v8495_v50  ;;  %19856 = vst [vmem:[#allocation79_spill] sm:$0xff] %v19855_v41  ;;  %v9069_v62 = vsub.f32 %v9037_v20, %v18005_v9  ;;  %v18027_v50 = vmin.f32 %v8910_v22, 64.0 }
 0x4c2   : > { %v8338_v22 = vmul.f32 %v19860_v33, %v19859_v3  ;;  %v19864_v9 = vmov 0 }
 0x4c3   : > { %9917 = vrot.lane.b32.xlu1 %v9035_v47, %s12235_s17  ;;  %9176 = vrot.lane.b32.xlu0 %v9130_v18, %s12237_s22  ;;  %19857 = vst [vmem:[#allocation40_spill] sm:$0xff] %v18027_v50  ;;  %v9038_v47 = vmin.f32 %v9006_v52, 64.0  ;;  %v8911_v54 = vmax.f32 %v8879_v13, 0.0  ;;  %v9007_v18 = vmax.f32 %v8975_v2, 0.0  ;;  %v8497_v52 = vadd.f32 %v19861_v16, %v8337_v5 }
 0x4c4   : > { %v18029_v31 = vpop.permute.xlu1 %9534  ;;  %v8805_v39 = vpop.permute.xlu0 %8804  ;;  %v9132_v13 = vsel %vm18022_vm3, 1, %v19824_v55  ;;  %vm18046_vm5 = vcmp.ge.f32.partialorder %v9069_v62, 0.001 }
 0x4c5   : > { %19858 = vst [vmem:[#allocation81_spill] sm:$0xff] %v18029_v31  ;;  %v8880_v43 = vsub.f32 %v8496_v11, %v8805_v39  ;;  %v8976_v40 = vadd.f32 %v8805_v39, %v8496_v11  ;;  %v18042_v2 = vmin.f32 %v8911_v54, 64.0  ;;  %v9039_v39 = vmin.f32 %v9007_v18, 64.0  ;;  %v19867_v54 = vld [vmem:[#allocation2_spill] sm:$0xff]  ;;  %v19868_v18 = vld [vmem:[#allocation69_spill] sm:$0xff] }
 0x4c6   : > { %v19865_v9 = vsel %vm18046_vm5, 4294967295, %v19864_v9  ;;  %v8498_v16 = vadd.f32 %v19867_v54, %v8338_v22  ;;  %v8339_v56 = vmul.f32 %v19869_v63, %v19868_v18  ;;  %v19875_v54 = vld [vmem:[#allocation30_spill] sm:$0xff]  ;;  %v19876_v18 = vld [vmem:[#allocation7_spill] sm:$0xff] }
 0x4c7   : > { %9178 = vrot.lane.b32.xlu1 %v9131_v57, %s12237_s22  ;;  %9919 = vrot.lane.b32.xlu0 %v9036_v58, %s12235_s17  ;;  %19862 = vst [vmem:[#allocation41_spill] sm:$0xff] %v18042_v2  ;;  %19866 = vst [vmem:[#allocation42_spill] sm:$0xff] %v19865_v9  ;;  %v9070_v58 = vsub.f32 %v9038_v47, %v18027_v50  ;;  %v8912_v57 = vmax.f32 %v8880_v43, 0.0  ;;  %v9008_v3 = vmax.f32 %v8976_v40, 0.0  ;;  %v9133_v50 = vsel %vm18046_vm5, 1, %v19824_v55 }
 0x4c8   : > { %v8807_v4 = vpop.permute.xlu1 %8806  ;;  %v18044_v11 = vpop.permute.xlu0 %9536  ;;  %v19871_v40 = vmov 0  ;;  %v9071_v43 = vsub.f32 %v9039_v39, %v18042_v2 }
 0x4c9   : > { %19863 = vst [vmem:[#allocation82_spill] sm:$0xff] %v18044_v11  ;;  %v8881_v33 = vsub.f32 %v8497_v52, %v8807_v4  ;;  %v8977_v5 = vadd.f32 %v8807_v4, %v8497_v52  ;;  %vm18061_vm3 = vcmp.ge.f32.partialorder %v9070_v58, 0.001  ;;  %v9040_v52 = vmin.f32 %v9008_v3, 64.0  ;;  %v19877_v58 = vld [vmem:[#allocation21_spill] sm:$0xff] }
 0x4ca   : > { %v19872_v40 = vsel %vm18061_vm3, 4294967295, %v19871_v40  ;;  %v8499_v11 = vadd.f32 %v19877_v58, %v8339_v56  ;;  %vm18080_vm5 = vcmp.ge.f32.partialorder %v9071_v43, 0.001  ;;  %v19887_v43 = vld [vmem:[#allocation10_spill] sm:$0xff] }
 0x4cb   : > { %9921 = vrot.lane.b32.xlu1 %v9037_v20, %s12235_s17  ;;  %9180 = vrot.lane.b32.xlu0 %v9132_v13, %s12237_s22  ;;  %19873 = vst [vmem:[#allocation43_spill] sm:$0xff] %v19872_v40  ;;  %v18066_v20 = vmin.f32 %v8912_v57, 64.0  ;;  %v8913_v22 = vmax.f32 %v8881_v33, 0.0  ;;  %v9009_v13 = vmax.f32 %v8977_v5, 0.0  ;;  %v9134_v57 = vsel %vm18061_vm3, 1, %v19824_v55 }
 0x4cc   : > { %v18056_v49 = vpop.permute.xlu1 %9538  ;;  %v8809_v62 = vpop.permute.xlu0 %8808  ;;  %v19880_v5 = vmov 0 }
 0x4cd   : > { %19870 = vst [vmem:[#allocation84_spill] sm:$0xff] %v18056_v49  ;;  %19874 = vst [vmem:[#allocation85_spill] sm:$0xff] %v18066_v20  ;;  %v8882_v4 = vsub.f32 %v8498_v16, %v8809_v62  ;;  %v8978_v63 = vadd.f32 %v8809_v62, %v8498_v16  ;;  %v8340_v49 = vmul.f32 %v19876_v18, %v19875_v54  ;;  %v18078_v3 = vmin.f32 %v8913_v22, 64.0  ;;  %v19883_v54 = vld [vmem:[#allocation70_spill] sm:$0xff]  ;;  %v19884_v18 = vld [vmem:[#allocation8_spill] sm:$0xff] }
 0x4ce   : > { %v9041_v33 = vmin.f32 %v9009_v13, 64.0  ;;  %v19881_v5 = vsel %vm18080_vm5, 4294967295, %v19880_v5  ;;  %v8341_v58 = vmul.f32 %v19884_v18, %v19883_v54  ;;  %v19885_v22 = vld [vmem:[#allocation54_spill] sm:$0xff]  ;;  %v19886_v13 = vld [vmem:[#allocation31_spill] sm:$0xff] }
 0x4cf   : > { %9182 = vrot.lane.b32.xlu1 %v9133_v50, %s12237_s22  ;;  %9923 = vrot.lane.b32.xlu0 %v9038_v47, %s12235_s17  ;;  %19879 = vst [vmem:[#allocation86_spill] sm:$0xff] %v18078_v3  ;;  %19882 = vst [vmem:[#allocation45_spill] sm:$0xff] %v19881_v5  ;;  %v9072_v50 = vsub.f32 %v9040_v52, %v18066_v20  ;;  %v8914_v47 = vmax.f32 %v8882_v4, 0.0  ;;  %v9010_v16 = vmax.f32 %v8978_v63, 0.0  ;;  %v9135_v4 = vsel %vm18080_vm5, 1, %v19824_v55  ;;  %v19894_v5 = vld [vmem:[#allocation87_spill] sm:$0xff] }
 0x4d0   : > { %v8811_v31 = vpop.permute.xlu1 %8810  ;;  %v18073_v9 = vpop.permute.xlu0 %9540  ;;  %v8500_v2 = vadd.f32 %v19885_v22, %v8340_v49  ;;  %v9073_v63 = vsub.f32 %v9041_v33, %v18078_v3  ;;  %v19895_v3 = vld [vmem:[#allocation9_spill] sm:$0xff] }
 0x4d1   : > { %19878 = vst [vmem:[#allocation44_spill] sm:$0xff] %v18073_v9  ;;  %v8883_v62 = vsub.f32 %v8499_v11, %v8811_v31  ;;  %v8979_v56 = vadd.f32 %v8811_v31, %v8499_v11  ;;  %v8342_v9 = vmul.f32 %v19887_v43, %v19886_v13  ;;  %vm18097_vm3 = vcmp.ge.f32.partialorder %v9072_v50, 0.001  ;;  %v19892_v43 = vld [vmem:[#allocation55_spill] sm:$0xff]  ;;  %v19893_v50 = vld [vmem:[#allocation22_spill] sm:$0xff] }
 0x4d2   : > { %v9042_v49 = vmin.f32 %v9010_v16, 64.0  ;;  %v8501_v20 = vadd.f32 %v19892_v43, %v8341_v58  ;;  %vm18119_vm5 = vcmp.ge.f32.partialorder %v9073_v63, 0.001  ;;  %v19897_v58 = vmov 0  ;;  %v19901_v63 = vld [vmem:[#allocation23_spill] sm:$0xff] }
 0x4d3   : > { %9925 = vrot.lane.b32.xlu1 %v9039_v39, %s12235_s17  ;;  %9184 = vrot.lane.b32.xlu0 %v9134_v57, %s12237_s22  ;;  %v19889_v39 = vmov 0  ;;  %v18102_v57 = vmin.f32 %v8914_v47, 64.0  ;;  %v8915_v54 = vmax.f32 %v8883_v62, 0.0  ;;  %v9011_v18 = vmax.f32 %v8979_v56, 0.0 }
 0x4d4   : > { %v18092_v40 = vpop.permute.xlu1 %9542  ;;  %v8813_v61 = vpop.permute.xlu0 %8812  ;;  %v19890_v39 = vsel %vm18097_vm3, 4294967295, %v19889_v39  ;;  %v8343_v47 = vmul.f32 %v19895_v3, %v19894_v5  ;;  %v9136_v62 = vsel %vm18097_vm3, 1, %v19824_v55  ;;  %v19898_v58 = vsel %vm18119_vm5, 4294967295, %v19897_v58 }
 0x4d5   : > { %19888 = vst [vmem:[#allocation46_spill] sm:$0xff] %v18092_v40  ;;  %v8884_v31 = vsub.f32 %v8500_v2, %v8813_v61  ;;  %v8980_v11 = vadd.f32 %v8813_v61, %v8500_v2  ;;  %19891 = vst [vmem:[#allocation88_spill] sm:$0xff] %v18102_v57  ;;  %v8502_v40 = vadd.f32 %v19893_v50, %v8342_v9  ;;  %v18115_v56 = vmin.f32 %v8915_v54, 64.0 }
 0x4d6   : > { %v9074_v9 = vsub.f32 %v9042_v49, %v18102_v57  ;;  %v8503_v43 = vadd.f32 %v19901_v63, %v8343_v47 }
 0x4d7   : > { %9186 = vrot.lane.b32.xlu1 %v9135_v4, %s12237_s22  ;;  %9927 = vrot.lane.b32.xlu0 %v9040_v52, %s12235_s17  ;;  %v8916_v22 = vmax.f32 %v8884_v31, 0.0  ;;  %v9012_v13 = vmax.f32 %v8980_v11, 0.0  ;;  %19896 = vst [vmem:[#allocation89_spill] sm:$0xff] %v18115_v56  ;;  %v9043_v52 = vmin.f32 %v9011_v18, 64.0 }
 0x4d8   : > { %v8815_v61 = vpop.permute.xlu1 %8814  ;;  %v18107_v2 = vpop.permute.xlu0 %9544  ;;  %vm18134_vm3 = vcmp.ge.f32.partialorder %v9074_v9, 0.001 }
 0x4d9   : > { %v8885_v41 = vsub.f32 %v8501_v20, %v8815_v61  ;;  %v8981_v16 = vadd.f32 %v8815_v61, %v8501_v20  ;;  %v18124_v3 = vmin.f32 %v8916_v22, 64.0  ;;  %v9044_v20 = vmin.f32 %v9012_v13, 64.0  ;;  %v19904_v13 = vld [vmem:[#allocation71_spill] sm:$0xff] }
 0x4da   : > { %v19902_v22 = vmov 0  ;;  %v19905_v61 = vld [vmem:[#allocation11_spill] sm:$0xff]  ;;  %v9138_v63 = vsel %vm18134_vm3, 1, %v19824_v55 }
 0x4db   : > { %9929 = vrot.lane.b32.xlu1 %v9041_v33, %s12235_s17  ;;  %9188 = vrot.lane.b32.xlu0 %v9136_v62, %s12237_s22  ;;  %19899 = vst [vmem:[#allocation48_spill] sm:$0xff] %v18124_v3  ;;  %v8917_v5 = vmax.f32 %v8885_v41, 0.0  ;;  %v9013_v4 = vmax.f32 %v8981_v16, 0.0  ;;  %v9137_v33 = vsel %vm18119_vm5, 1, %v19824_v55  ;;  %v19903_v22 = vsel %vm18134_vm3, 4294967295, %v19902_v22 }
 0x4dc   : > { %v18126_v31 = vpop.permute.xlu1 %9546  ;;  %v8817_v11 = vpop.permute.xlu0 %8816  ;;  %v9075_v41 = vsub.f32 %v9043_v52, %v18115_v56  ;;  %v8344_v50 = vmul.f32 %v19905_v61, %v19904_v13  ;;  %v9076_v62 = vsub.f32 %v9044_v20, %v18124_v3  ;;  %v19912_v61 = vmov 0 }
 0x4dd   : > { %19900 = vst [vmem:[#allocation51_spill] sm:$0xff] %v18126_v31  ;;  %v8886_v54 = vsub.f32 %v8502_v40, %v8817_v11  ;;  %v8982_v18 = vadd.f32 %v8817_v11, %v8502_v40  ;;  %v18141_v40 = vmin.f32 %v8917_v5, 64.0  ;;  %v9045_v16 = vmin.f32 %v9013_v4, 64.0  ;;  %v19910_v4 = vld [vmem:[#allocation12_spill] sm:$0xff] }
 0x4de   : > { %vm18151_vm5 = vcmp.ge.f32.partialorder %v9075_v41, 0.001  ;;  %v19908_v5 = vmov 0  ;;  %vm18158_vm4 = vcmp.ge.f32.partialorder %v9076_v62, 0.001 }
 0x4df   : > { %9190 = vrot.lane.b32.xlu1 %v9137_v33, %s12237_s22  ;;  %9931 = vrot.lane.b32.xlu0 %v9042_v49, %s12235_s17  ;;  %19906 = vst [vmem:[#allocation62_spill] sm:$0xff] %v18141_v40  ;;  %v8918_v11 = vmax.f32 %v8886_v54, 0.0  ;;  %v9014_v33 = vmax.f32 %v8982_v18, 0.0  ;;  %v19909_v5 = vsel %vm18151_vm5, 4294967295, %v19908_v5  ;;  %v8345_v54 = vmul.f32 %v19910_v4, %v17694_v27  ;;  %v19911_v18 = vld [vmem:[#allocation57_spill] sm:$0xff] }
 0x4e0   : > { %v8819_v57 = vpop.permute.xlu1 %8818  ;;  %v8504_v13 = vadd.f32 %v19911_v18, %v8344_v50  ;;  %v19913_v61 = vsel %vm18158_vm4, 4294967295, %v19912_v61  ;;  %v9139_v27 = vsel %vm18151_vm5, 1, %v19824_v55  ;;  %v19915_v50 = vld [vmem:[#allocation13_spill] sm:$0xff] }
 0x4e1   : > { %v18144_v49 = vpop.permute.xlu0 %9548  ;;  %v8887_v47 = vsub.f32 %v8503_v43, %v8819_v57  ;;  %v8983_v9 = vadd.f32 %v8819_v57, %v8503_v43  ;;  %v9077_v57 = vsub.f32 %v9045_v16, %v18141_v40  ;;  %v18163_v43 = vmin.f32 %v8918_v11, 64.0  ;;  %v19916_v11 = vld [vmem:[#allocation58_spill] sm:$0xff] }
 0x4e2   : > { %19907 = vst [vmem:[#allocation56_spill] sm:$0xff] %v18144_v49  ;;  %v8346_v62 = vmul.f32 %v19915_v50, %v17703_v8 }
 0x4e3   : > { %9933 = vrot.lane.b32.xlu1 %v9043_v52, %s12235_s17  ;;  %9192 = vrot.lane.b32.xlu0 %v9138_v63, %s12237_s22  ;;  %19914 = vst [vmem:[#allocation14_spill] sm:$0xff] %v18163_v43  ;;  %v9046_v52 = vmin.f32 %v9014_v33, 64.0  ;;  %v8919_v3 = vmax.f32 %v8887_v47, 0.0  ;;  %v9015_v63 = vmax.f32 %v8983_v9, 0.0  ;;  %v8505_v33 = vadd.f32 %v19916_v11, %v8345_v54 }
 0x4e4   : > { %v18165_v41 = vpop.permute.xlu1 %9550  ;;  %v9140_v47 = vsel %vm18158_vm4, 1, %v19824_v55  ;;  %vm18182_vm5 = vcmp.ge.f32.partialorder %v9077_v57, 0.001 }
 0x4e5   : > { %v8821_v56 = vpop.permute.xlu0 %8820  ;;  %v18178_v9 = vmin.f32 %v8919_v3, 64.0  ;;  %v19921_v3 = vld [vmem:[#allocation24_spill] sm:$0xff] }
 0x4e6   : > { %v8888_v49 = vsub.f32 %v8504_v13, %v8821_v56  ;;  %v8984_v31 = vadd.f32 %v8821_v56, %v8504_v13  ;;  %v9047_v56 = vmin.f32 %v9015_v63, 64.0  ;;  %v19919_v13 = vmov 0  ;;  %v19922_v63 = vld [vmem:[#allocation80_spill] sm:$0xff] }
 0x4e7   : > { %9194 = vrot.lane.b32.xlu1 %v9139_v27, %s12237_s22  ;;  %9935 = vrot.lane.b32.xlu0 %v9044_v20, %s12235_s17  ;;  %19917 = vst [vmem:[#allocation83_spill] sm:$0xff] %v18178_v9  ;;  %v19920_v13 = vsel %vm18182_vm5, 4294967295, %v19919_v13  ;;  %v9078_v20 = vsub.f32 %v9046_v52, %v18163_v43  ;;  %v8506_v11 = vadd.f32 %v19921_v3, %v8346_v62  ;;  %v9141_v43 = vsel %vm18182_vm5, 1, %v19824_v55  ;;  %v19927_v3 = vld [vmem:[#allocation61_spill] sm:$0xff] }
 0x4e8   : > { %v8823_v4 = vpop.permute.xlu1 %8822  ;;  %v8920_v27 = vmax.f32 %v8888_v49, 0.0  ;;  %v9016_v8 = vmax.f32 %v8984_v31, 0.0  ;;  %v8347_v40 = vmul.f32 %v19922_v63, %v17708_v44  ;;  %v19924_v31 = vmov 0 }
 0x4e9   : > { %v18180_v18 = vpop.permute.xlu0 %9552  ;;  %v8889_v50 = vsub.f32 %v8505_v33, %v8823_v4  ;;  %v8985_v54 = vadd.f32 %v8823_v4, %v8505_v33  ;;  %vm18197_vm4 = vcmp.ge.f32.partialorder %v9078_v20, 0.001 }
 0x4ea   : > { %19918 = vst [vmem:[#allocation25_spill] sm:$0xff] %v18180_v18  ;;  %v19925_v31 = vsel %vm18197_vm4, 4294967295, %v19924_v31  ;;  %v18202_v49 = vmin.f32 %v8920_v27, 64.0  ;;  %v9048_v33 = vmin.f32 %v9016_v8, 64.0  ;;  %v8507_v63 = vadd.f32 %v19927_v3, %v8347_v40 }
 0x4eb   : > { %9937 = vrot.lane.b32.xlu1 %v9045_v16, %s12235_s17  ;;  %9196 = vrot.lane.b32.xlu0 %v9140_v47, %s12237_s22  ;;  %v9079_v16 = vsub.f32 %v9047_v56, %v18178_v9  ;;  %v8921_v62 = vmax.f32 %v8889_v50, 0.0  ;;  %v9017_v47 = vmax.f32 %v8985_v54, 0.0  ;;  %v9142_v9 = vsel %vm18197_vm4, 1, %v19824_v55 }
 0x4ec   : > { %19926 = vst [vmem:[#allocation66_spill] sm:$0xff] %v18202_v49  ;;  %v19928_v50 = vmov 0 }
 0x4ed   : > { %v18192_v18 = vpop.permute.xlu1 %9554  ;;  %v8825_v57 = vpop.permute.xlu0 %8824  ;;  %v18212_v27 = vmin.f32 %v8921_v62, 64.0  ;;  %v9049_v8 = vmin.f32 %v9017_v47, 64.0  ;;  %vm18214_vm5 = vcmp.ge.f32.partialorder %v9079_v16, 0.001  ;;  %v19930_v62 = vmov 0 }
 0x4ee   : > { %19923 = vst [vmem:[#allocation59_spill] sm:$0xff] %v18192_v18  ;;  %v8890_v4 = vsub.f32 %v8506_v11, %v8825_v57  ;;  %v8986_v44 = vadd.f32 %v8825_v57, %v8506_v11  ;;  %v19929_v50 = vsel %vm18214_vm5, 4294967295, %v19928_v50  ;;  %v9143_v16 = vsel %vm18214_vm5, 1, %v19824_v55 }
 0x4ef   : > { %9198 = vrot.lane.b32.xlu1 %v9141_v43, %s12237_s22  ;;  %9939 = vrot.lane.b32.xlu0 %v9046_v52, %s12235_s17  ;;  %v9080_v43 = vsub.f32 %v9048_v33, %v18202_v49  ;;  %v9081_v47 = vsub.f32 %v9049_v8, %v18212_v27 }
 0x4f0   : > { %v8922_v54 = vmax.f32 %v8890_v4, 0.0  ;;  %v9018_v52 = vmax.f32 %v8986_v44, 0.0 }
 0x4f1   : > { %v8827_v18 = vpop.permute.xlu1 %8826  ;;  %v18207_v20 = vpop.permute.xlu0 %9887  ;;  %vm18228_vm4 = vcmp.ge.f32.partialorder %v9080_v43, 0.001  ;;  %vm18252_vm2 = vcmp.ge.f32.partialorder %v9081_v47, 0.001 }
 0x4f2   : > { %v8891_v11 = vsub.f32 %v8507_v63, %v8827_v18  ;;  %v8987_v40 = vadd.f32 %v8827_v18, %v8507_v63  ;;  %v19931_v62 = vsel %vm18228_vm4, 4294967295, %v19930_v62  ;;  %v18233_v4 = vmin.f32 %v8922_v54, 64.0 }
 0x4f3   : > { %9941 = vrot.lane.b32.xlu1 %v9047_v56, %s12235_s17  ;;  %9200 = vrot.lane.b32.xlu0 %v9142_v9, %s12237_s22  ;;  %v18235_v18 = vmin.f32 %v9018_v52, 64.0  ;;  %v9144_v43 = vsel %vm18228_vm4, 1, %v19824_v55  ;;  %v9145_v17 = vsel %vm18252_vm2, 1, %v19824_v55 }
 0x4f4   : > { %v8923_v56 = vmax.f32 %v8891_v11, 0.0  ;;  %v9019_v9 = vmax.f32 %v8987_v40, 0.0 }
 0x4f5   : > { %v18221_v57 = vpop.permute.xlu1 %9889  ;;  %v18223_v3 = vpop.permute.xlu0 %9556  ;;  %v9082_v52 = vsub.f32 %v18235_v18, %v18233_v4 }
 0x4f6   : > { %v18244_v49 = vmin.f32 %v8923_v56, 64.0  ;;  %v18246_v54 = vmin.f32 %v9019_v9, 64.0 }
 0x4f7   : > { %9202 = vrot.lane.b32.xlu1 %v9143_v16, %s12237_s22  ;;  %9943 = vrot.lane.b32.xlu0 %v9048_v33, %s12235_s17 }
 0x4f8   : > { %v9083_v47 = vsub.f32 %v18246_v54, %v18244_v49 }
 0x4f9   : > { %v18239_v44 = vpop.permute.xlu1 %9558  ;;  %v9149_v63 = vpop.permute.xlu0 %9148 }
 0x4fa   : > { %vm9212_vm5 = vcmp.ne.s32.totalorder %v9149_v63, 0  ;;  %v19975_v63 = vld [vmem:[#allocation33_spill] sm:$0xff] }
 0x4fb   : > { %vm9244_vm3 = vmand %vm17753_vm6, %vm9212_vm5  ;;  %9945 = vrot.lane.b32.xlu1 %v9049_v8, %s12235_s17  ;;  %9204 = vrot.lane.b32.xlu0 %v9144_v43, %s12237_s22  ;;  %vm18268_vm5 = vcmp.ge.f32.partialorder %v9082_v52, 0.001  ;;  %v19934_v8 = vmov 0 }
 0x4fc   : > { %v9596_v16 = vsel %vm9244_vm3, %v17746_v35, -inf  ;;  %v19935_v8 = vsel %vm18268_vm5, 4294967295, %v19934_v8  ;;  %v9146_v19 = vsel %vm18268_vm5, 1, %v19824_v55 }
 0x4fd   : > { %v9151_v11 = vpop.permute.xlu1 %9150  ;;  %v18258_v40 = vpop.permute.xlu0 %9891 }
 0x4fe   : > { %vm9213_vm4 = vcmp.ne.s32.totalorder %v9151_v11, 0 }
 0x4ff   : > { %vm9245_vm6 = vmand %vm17765_vm7, %vm9213_vm4  ;;  %9206 = vrot.lane.b32.xlu1 %v9145_v17, %s12237_s22  ;;  %9660 = vrot.lane.b32.xlu0 %v9596_v16, %s12237_s22  ;;  %vm18284_vm7 = vcmp.ge.f32.partialorder %v9083_v47, 0.001 }
 0x500   : > { %v9597_v9 = vsel %vm9245_vm6, %v17751_v51, -inf  ;;  %v9147_v51 = vsel %vm18284_vm7, 1, %v19824_v55 }
 0x501   : > { %v18274_v35 = vpop.permute.xlu1 %9893  ;;  %v18276_v56 = vpop.permute.xlu0 %9560 }
 0x503   : > { %9662 = vrot.lane.b32.xlu1 %v9597_v9, %s12237_s22  ;;  %9208 = vrot.lane.b32.xlu0 %v9146_v19, %s12237_s22 }
 0x505   : > { %v18288_v43 = vpop.permute.xlu1 %9562  ;;  %v9153_v52 = vpop.permute.xlu0 %9152 }
 0x506   : > { %vm9214_vm3 = vcmp.ne.s32.totalorder %v9153_v52, 0 }
 0x507   : > { %vm9246_vm4 = vmand %vm17789_vm8, %vm9214_vm3  ;;  %9210 = vrot.lane.b32.xlu1 %v9147_v51, %s12237_s22 }
 0x508   : > { %v9598_v11 = vsel %vm9246_vm4, %v17774_v12, -inf }
 0x509   : > { %v9155_v16 = vpop.permute.xlu1 %9154  ;;  %9664 = vrot.lane.b32.xlu0 %v9598_v11, %s12237_s22  ;;  %v18298_v17 = vpop.permute.xlu0 %9895 }
 0x50a   : > { %vm9215_vm6 = vcmp.ne.s32.totalorder %v9155_v16, 0 }
 0x50b   : > { %vm9247_vm5 = vmand %vm17810_vm9, %vm9215_vm6 }
 0x50c   : > { %v9599_v47 = vsel %vm9247_vm5, %v17784_v30, -inf }
 0x50d   : > { %9666 = vrot.lane.b32.xlu1 %v9599_v47, %s12237_s22  ;;  %v18304_v55 = vpop.permute.xlu1 %9897  ;;  %v9157_v15 = vpop.permute.xlu0 %9156 }
 0x50e   : > { %vm9216_vm8 = vcmp.ne.s32.totalorder %v9157_v15, 0 }
 0x50f   : > { %vm9248_vm3 = vmand %vm17826_vm10, %vm9216_vm8 }
 0x510   : > { %v9600_v12 = vsel %vm9248_vm3, %v17800_v7, -inf }
 0x511   : > { %v9159_v9 = vpop.permute.xlu1 %9158  ;;  %9668 = vrot.lane.b32.xlu0 %v9600_v12, %s12237_s22  ;;  %v18310_v19 = vpop.permute.xlu0 %9899 }
 0x512   : > { %vm9217_vm4 = vcmp.ne.s32.totalorder %v9159_v9, 0 }
 0x513   : > { %vm9249_vm9 = vmand %vm17847_vm11, %vm9217_vm4 }
 0x514   : > { %v9601_v30 = vsel %vm9249_vm9, %v17817_v36, -inf }
 0x515   : > { %9670 = vrot.lane.b32.xlu1 %v9601_v30, %s12237_s22  ;;  %v18316_v32 = vpop.permute.xlu1 %9901  ;;  %v9161_v52 = vpop.permute.xlu0 %9160 }
 0x516   : > { %vm9218_vm5 = vcmp.ne.s32.totalorder %v9161_v52, 0 }
 0x517   : > { %vm9250_vm10 = vmand %vm17862_vm12, %vm9218_vm5 }
 0x518   : > { %v9602_v7 = vsel %vm9250_vm10, %v17835_v1, -inf }
 0x519   : > { %v9163_v46 = vpop.permute.xlu1 %9162  ;;  %9672 = vrot.lane.b32.xlu0 %v9602_v7, %s12237_s22  ;;  %v18322_v51 = vpop.permute.xlu0 %9903 }
 0x51a   : > { %vm9219_vm6 = vcmp.ne.s32.totalorder %v9163_v46, 0 }
 0x51b   : > { %vm9251_vm11 = vmand %vm17879_vm13, %vm9219_vm6 }
 0x51c   : > { %v9603_v36 = vsel %vm9251_vm11, %v17854_v34, -inf }
 0x51d   : > { %9674 = vrot.lane.b32.xlu1 %v9603_v36, %s12237_s22  ;;  %v18328_v42 = vpop.permute.xlu1 %9905  ;;  %v9165_v11 = vpop.permute.xlu0 %9164 }
 0x51e   : > { %vm9220_vm8 = vcmp.ne.s32.totalorder %v9165_v11, 0 }
 0x51f   : > { %vm9252_vm12 = vmand %vm17888_vm14, %vm9220_vm8 }
 0x520   : > { %v9604_v1 = vsel %vm9252_vm12, %v17872_v6, -inf  ;;  %vm19940_vm12 = vnez %v19844_v48  ;;  %v19942_v48 = vld [vmem:[#allocation79_spill] sm:$0xff] }
 0x521   : > { %v9167_v23 = vpop.permute.xlu1 %9166  ;;  %9676 = vrot.lane.b32.xlu0 %v9604_v1, %s12237_s22  ;;  %v18334_v16 = vpop.permute.xlu0 %9907 }
 0x522   : > { %vm9221_vm3 = vcmp.ne.s32.totalorder %v9167_v23, 0 }
 0x523   : > { %vm9253_vm13 = vmand %vm17910_vm15, %vm9221_vm3 }
 0x524   : > { %v9605_v34 = vsel %vm9253_vm13, %v17885_v26, -inf }
 0x525   : > { %9678 = vrot.lane.b32.xlu1 %v9605_v34, %s12237_s22  ;;  %v18340_v29 = vpop.permute.xlu1 %9909  ;;  %v9169_v47 = vpop.permute.xlu0 %9168 }
 0x526   : > { %vm9222_vm4 = vcmp.ne.s32.totalorder %v9169_v47, 0  ;;  %v19948_v47 = vld [vmem:[#allocation43_spill] sm:$0xff] }
 0x527   : > { %vm9254_vm14 = vmand %vm17925_vm0, %vm9222_vm4  ;;  %vm19938_vm0 = vnez %v19833_v10  ;;  %vm19941_vm4 = vnez %v19850_v0  ;;  %v19945_v0 = vld [vmem:[#allocation42_spill] sm:$0xff] }
 0x528   : > { %v9606_v6 = vsel %vm9254_vm14, %v17908_v21, -inf }
 0x529   : > { %v9171_v28 = vpop.permute.xlu1 %9170  ;;  %9680 = vrot.lane.b32.xlu0 %v9606_v6, %s12237_s22  ;;  %v18346_v15 = vpop.permute.xlu0 %9911  ;;  %v19950_v6 = vld [vmem:[#allocation82_spill] sm:$0xff] }
 0x52a   : > { %vm9223_vm9 = vcmp.ne.s32.totalorder %v9171_v28, 0 }
 0x52b   : > { %vm9255_vm15 = vmand %vm17946_vm1, %vm9223_vm9  ;;  %vm19939_vm1 = vnez %v19840_v24 }
 0x52c   : > { %v9607_v26 = vsel %vm9255_vm15, %v17917_v37, -inf  ;;  %vm19943_vm15 = vnez %v19942_v48 }
 0x52d   : > { %9682 = vrot.lane.b32.xlu1 %v9607_v26, %s12237_s22  ;;  %v18352_v60 = vpop.permute.xlu1 %9913  ;;  %v9173_v12 = vpop.permute.xlu0 %9172 }
 0x52e   : > { %vm9224_vm5 = vcmp.ne.s32.totalorder %v9173_v12, 0 }
 0x52f   : > { %vm9256_vm10 = vmand %vm19938_vm0, %vm9224_vm5 }
 0x530   : > { %v9608_v21 = vsel %vm9256_vm10, %v17939_v14, -inf  ;;  %vm19946_vm10 = vnez %v19945_v0 }
 0x531   : > { %v9175_v45 = vpop.permute.xlu1 %9174  ;;  %9684 = vrot.lane.b32.xlu0 %v9608_v21, %s12237_s22  ;;  %v18358_v9 = vpop.permute.xlu0 %9915  ;;  %v19951_v21 = vld [vmem:[#allocation45_spill] sm:$0xff] }
 0x532   : > { %vm9225_vm6 = vcmp.ne.s32.totalorder %v9175_v45, 0  ;;  %v19953_v45 = vld [vmem:[#allocation84_spill] sm:$0xff] }
 0x533   : > { %vm9257_vm11 = vmand %vm19939_vm1, %vm9225_vm6 }
 0x534   : > { %v9609_v37 = vsel %vm9257_vm11, %v17953_v38, -inf  ;;  %vm19949_vm11 = vnez %v19948_v47 }
 0x535   : > { %9686 = vrot.lane.b32.xlu1 %v9609_v37, %s12237_s22  ;;  %v18364_v53 = vpop.permute.xlu1 %9917  ;;  %v9177_v30 = vpop.permute.xlu0 %9176 }
 0x536   : > { %vm9226_vm8 = vcmp.ne.s32.totalorder %v9177_v30, 0 }
 0x537   : > { %vm9258_vm3 = vmand %vm19940_vm12, %vm9226_vm8 }
 0x538   : > { %v9610_v14 = vsel %vm9258_vm3, %v17971_v25, -inf  ;;  %v19944_v25 = vld [vmem:[#allocation39_spill] sm:$0xff]  ;;  %vm19952_vm3 = vnez %v19951_v21 }
 0x539   : > { %v9179_v10 = vpop.permute.xlu1 %9178  ;;  %9688 = vrot.lane.b32.xlu0 %v9610_v14, %s12237_s22  ;;  %v18370_v52 = vpop.permute.xlu0 %9919 }
 0x53a   : > { %vm9227_vm13 = vcmp.ne.s32.totalorder %v9179_v10, 0  ;;  %v19955_v10 = vld [vmem:[#allocation44_spill] sm:$0xff] }
 0x53b   : > { %vm9259_vm14 = vmand %vm19941_vm4, %vm9227_vm13 }
 0x53c   : > { %v9611_v38 = vsel %vm9259_vm14, %v17990_v59, -inf  ;;  %v19947_v59 = vld [vmem:[#allocation81_spill] sm:$0xff]  ;;  %vm19954_vm14 = vnez %v19890_v39 }
 0x53d   : > { %9690 = vrot.lane.b32.xlu1 %v9611_v38, %s12237_s22  ;;  %v18376_v24 = vpop.permute.xlu1 %9921  ;;  %v9181_v7 = vpop.permute.xlu0 %9180 }
 0x53e   : > { %vm9228_vm9 = vcmp.ne.s32.totalorder %v9181_v7, 0 }
 0x53f   : > { %vm9260_vm5 = vmand %vm19943_vm15, %vm9228_vm9 }
 0x540   : > { %v9612_v46 = vsel %vm9260_vm5, %v19944_v25, -inf  ;;  %vm19956_vm5 = vnez %v19898_v58  ;;  %v19957_v25 = vld [vmem:[#allocation46_spill] sm:$0xff]  ;;  %v19960_v58 = vld [vmem:[#allocation51_spill] sm:$0xff] }
 0x541   : > { %v9183_v36 = vpop.permute.xlu1 %9182  ;;  %9692 = vrot.lane.b32.xlu0 %v9612_v46, %s12237_s22  ;;  %v18382_v11 = vpop.permute.xlu0 %9923 }
 0x542   : > { %vm9229_vm0 = vcmp.ne.s32.totalorder %v9183_v36, 0 }
 0x543   : > { %vm9261_vm6 = vmand %vm19946_vm10, %vm9229_vm0 }
 0x544   : > { %v9613_v1 = vsel %vm9261_vm6, %v19947_v59, -inf  ;;  %vm19958_vm6 = vnez %v19903_v22 }
 0x545   : > { %9694 = vrot.lane.b32.xlu1 %v9613_v1, %s12237_s22  ;;  %v18388_v23 = vpop.permute.xlu1 %9925  ;;  %v9185_v34 = vpop.permute.xlu0 %9184 }
 0x546   : > { %vm9230_vm1 = vcmp.ne.s32.totalorder %v9185_v34, 0 }
 0x547   : > { %vm9262_vm8 = vmand %vm19949_vm11, %vm9230_vm1 }
 0x548   : > { %v9614_v28 = vsel %vm9262_vm8, %v19950_v6, -inf  ;;  %vm19959_vm8 = vnez %v19909_v5 }
 0x549   : > { %v9187_v26 = vpop.permute.xlu1 %9186  ;;  %9696 = vrot.lane.b32.xlu0 %v9614_v28, %s12237_s22  ;;  %v18394_v12 = vpop.permute.xlu0 %9927 }
 0x54a   : > { %vm9231_vm12 = vcmp.ne.s32.totalorder %v9187_v26, 0 }
 0x54b   : > { %vm9263_vm13 = vmand %vm19952_vm3, %vm9231_vm12 }
 0x54c   : > { %v9615_v37 = vsel %vm9263_vm13, %v19953_v45, -inf  ;;  %vm19961_vm13 = vnez %v19913_v61  ;;  %v19965_v45 = vld [vmem:[#allocation25_spill] sm:$0xff] }
 0x54d   : > { %9698 = vrot.lane.b32.xlu1 %v9615_v37, %s12237_s22  ;;  %v18400_v30 = vpop.permute.xlu1 %9929  ;;  %v9189_v14 = vpop.permute.xlu0 %9188 }
 0x54e   : > { %vm9232_vm4 = vcmp.ne.s32.totalorder %v9189_v14, 0 }
 0x54f   : > { %vm9264_vm9 = vmand %vm19954_vm14, %vm9232_vm4 }
 0x550   : > { %v9616_v38 = vsel %vm9264_vm9, %v19955_v10, -inf  ;;  %vm19963_vm9 = vnez %v19920_v13 }
 0x551   : > { %v9191_v7 = vpop.permute.xlu1 %9190  ;;  %9700 = vrot.lane.b32.xlu0 %v9616_v38, %s12237_s22  ;;  %v18406_v48 = vpop.permute.xlu0 %9931 }
 0x552   : > { %vm9233_vm15 = vcmp.ne.s32.totalorder %v9191_v7, 0 }
 0x553   : > { %vm9265_vm0 = vmand %vm19956_vm5, %vm9233_vm15 }
 0x554   : > { %v9617_v46 = vsel %vm9265_vm0, %v19957_v25, -inf  ;;  %vm19964_vm0 = vnez %v19925_v31  ;;  %v19969_v25 = vld [vmem:[#allocation47_spill] sm:$0xff] }
 0x555   : > { %9702 = vrot.lane.b32.xlu1 %v9617_v46, %s12237_s22  ;;  %v18412_v36 = vpop.permute.xlu1 %9933  ;;  %v9193_v0 = vpop.permute.xlu0 %9192 }
 0x556   : > { %vm9234_vm10 = vcmp.ne.s32.totalorder %v9193_v0, 0  ;;  %v19970_v0 = vld [vmem:[#allocation32_spill] sm:$0xff] }
 0x557   : > { %vm9266_vm1 = vmand %vm19958_vm6, %vm9234_vm10 }
 0x558   : > { %v9618_v39 = vsel %vm9266_vm1, %v18107_v2, -inf  ;;  %v19962_v2 = vld [vmem:[#allocation56_spill] sm:$0xff]  ;;  %vm19966_vm1 = vnez %v19929_v50 }
 0x559   : > { %v9195_v59 = vpop.permute.xlu1 %9194  ;;  %9704 = vrot.lane.b32.xlu0 %v9618_v39, %s12237_s22  ;;  %v18418_v1 = vpop.permute.xlu0 %9935 }
 0x55a   : > { %vm9235_vm11 = vcmp.ne.s32.totalorder %v9195_v59, 0  ;;  %v19972_v59 = vld [vmem:[#allocation50_spill] sm:$0xff] }
 0x55b   : > { %vm9267_vm12 = vmand %vm19959_vm8, %vm9235_vm11 }
 0x55c   : > { %v9619_v34 = vsel %vm9267_vm12, %v19960_v58, -inf  ;;  %vm19968_vm12 = vnez %v19931_v62  ;;  %v19977_v58 = vld [vmem:[#allocation73_spill] sm:$0xff] }
 0x55d   : > { %9706 = vrot.lane.b32.xlu1 %v9619_v34, %s12237_s22  ;;  %v18424_v47 = vpop.permute.xlu1 %9937  ;;  %v9197_v6 = vpop.permute.xlu0 %9196  ;;  %v19978_v34 = vld [vmem:[#allocation34_spill] sm:$0xff] }
 0x55e   : > { %vm9236_vm3 = vcmp.ne.s32.totalorder %v9197_v6, 0  ;;  %v19979_v6 = vld [vmem:[#allocation74_spill] sm:$0xff] }
 0x55f   : > { %vm9268_vm4 = vmand %vm19961_vm13, %vm9236_vm3  ;;  %vm9756_vm13 = vcmask 23552  }
 0x560   : > { %v9620_v22 = vsel %vm9268_vm4, %v19962_v2, -inf  ;;  %vm9789_vm4 = vcmask 48152   ;;  %v19980_v2 = vld [vmem:[#allocation35_spill] sm:$0xff] }
 0x561   : > { %v9199_v28 = vpop.permute.xlu1 %9198  ;;  %9708 = vrot.lane.b32.xlu0 %v9620_v22, %s12237_s22  ;;  %v18430_v26 = vpop.permute.xlu0 %9939  ;;  %v19981_v22 = vld [vmem:[#allocation75_spill] sm:$0xff] }
 0x562   : > { %vm9237_vm14 = vcmp.ne.s32.totalorder %v9199_v28, 0  ;;  %v19982_v28 = vld [vmem:[#allocation36_spill] sm:$0xff] }
 0x563   : > { %vm9269_vm15 = vmand %vm19963_vm9, %vm9237_vm14  ;;  %vm9822_vm14 = vcmask 72752  }
 0x564   : > { %v9621_v5 = vsel %vm9269_vm15, %v18165_v41, -inf  ;;  %v19967_v41 = vld [vmem:[#allocation59_spill] sm:$0xff]  ;;  %vm9983_vm15 = vcmask 97352  }
 0x565   : > { %9710 = vrot.lane.b32.xlu1 %v9621_v5, %s12237_s22  ;;  %v18436_v21 = vpop.permute.xlu1 %9941  ;;  %v9201_v61 = vpop.permute.xlu0 %9200  ;;  %v19983_v5 = vld [vmem:[#allocation76_spill] sm:$0xff] }
 0x566   : > { %vm9238_vm5 = vcmp.ne.s32.totalorder %v9201_v61, 0  ;;  %v19984_v61 = vld [vmem:[#allocation37_spill] sm:$0xff] }
 0x567   : > { %vm9270_vm10 = vmand %vm19964_vm0, %vm9238_vm5  ;;  %vm10016_vm0 = vcmask 121952  }
 0x568   : > { %v9622_v37 = vsel %vm9270_vm10, %v19965_v45, -inf  ;;  %vm10049_vm10 = vcmask 130168   ;;  %v19985_v45 = vld [vmem:[#allocation77_spill] sm:$0xff] }
 0x569   : > { %v9203_v14 = vpop.permute.xlu1 %9202  ;;  %9712 = vrot.lane.b32.xlu0 %v9622_v37, %s12237_s22  ;;  %v18442_v10 = vpop.permute.xlu0 %9943  ;;  %v19986_v37 = vld [vmem:[#allocation38_spill] sm:$0xff] }
 0x56a   : > { %vm9239_vm6 = vcmp.ne.s32.totalorder %v9203_v14, 0  ;;  %v19987_v14 = vld [vmem:[#allocation78_spill] sm:$0xff] }
 0x56b   : > { %vm9271_vm11 = vmand %vm19966_vm1, %vm9239_vm6  ;;  %vm19971_vm6 = vnez %v19935_v8 }
 0x56c   : > { %v9623_v13 = vsel %vm9271_vm11, %v19967_v41, -inf  ;;  %v19988_v41 = vld [vmem:[#allocation40_spill] sm:$0xff] }
 0x56d   : > { %9714 = vrot.lane.b32.xlu1 %v9623_v13, %s12237_s22  ;;  %v18449_v38 = vpop.permute.xlu1 %9945  ;;  %v9205_v31 = vpop.permute.xlu0 %9204  ;;  %v19989_v13 = vld [vmem:[#allocation41_spill] sm:$0xff] }
 0x56e   : > { %vm9240_vm8 = vcmp.ne.s32.totalorder %v9205_v31, 0  ;;  %v19990_v31 = vld [vmem:[#allocation85_spill] sm:$0xff] }
 0x56f   : > { %vm9272_vm3 = vmand %vm19968_vm12, %vm9240_vm8 }
 0x570   : > { %v9624_v50 = vsel %vm9272_vm3, %v18223_v3, -inf }
 0x571   : > { %v9207_v7 = vpop.permute.xlu1 %9206  ;;  %9716 = vrot.lane.b32.xlu0 %v9624_v50, %s12237_s22  ;;  %v9661_v62 = vpop.permute.xlu0 %9660  ;;  %v19991_v50 = vld [vmem:[#allocation86_spill] sm:$0xff] }
 0x572   : > { %vm9241_vm9 = vcmp.ne.s32.totalorder %v9207_v7, 0  ;;  %9757 = vst.msk [vmem:[%s18456_s23] sm:$0xff] %vm9756_vm13, %v9661_v62  ;;  %v19992_v7 = vld [vmem:[#allocation88_spill] sm:$0xff]  ;;  %v19993_v62 = vld [vmem:[#allocation89_spill] sm:$0xff] }
 0x573   : > { %vm9273_vm5 = vmand %vm18252_vm2, %vm9241_vm9  ;;  %9790 = vst.msk [vmem:[%s18456_s23] sm:$0xff] %vm9789_vm4, %v19969_v25 }
 0x574   : > { %v9625_v3 = vsel %vm9273_vm5, %v18239_v44, -inf  ;;  %9823 = vst.msk [vmem:[%s18456_s23] sm:$0xff] %vm9822_vm14, %v19969_v25  ;;  %v12240_v44 = vmov 0.0   ;;  %v19994_v25 = vld [vmem:[#allocation48_spill] sm:$0xff] }
 0x575   : > { %9984 = vst.msk [vmem:[%s18456_s23] sm:$0xff] %vm9983_vm15, %v18207_v20  ;;  %9718 = vrot.lane.b32.xlu1 %v9625_v3, %s12237_s22  ;;  %v9663_v33 = vpop.permute.xlu1 %9662  ;;  %v9209_v46 = vpop.permute.xlu0 %9208  ;;  %v19995_v3 = vld [vmem:[#allocation62_spill] sm:$0xff] }
 0x576   : > { %10017 = vst.msk [vmem:[%s18456_s23] sm:$0xff] %vm10016_vm0, %v18207_v20  ;;  %vm9242_vm2 = vcmp.ne.s32.totalorder %v9209_v46, 0  ;;  %v19997_v46 = vld [vmem:[#allocation83_spill] sm:$0xff] }
 0x577   : > { %9758 = vst.msk [vmem:[%s18456_s23 + $0x8] sm:$0xff] %vm9756_vm13, %v9663_v33  ;;  %vm9274_vm1 = vmand %vm19971_vm6, %vm9242_vm2  ;;  %v19996_v33 = vld [vmem:[#allocation14_spill] sm:$0xff] }
 0x578   : > { %10050 = vst.msk [vmem:[%s18456_s23] sm:$0xff] %vm10049_vm10, %v12240_v44  ;;  %v9626_v20 = vsel %vm9274_vm1, %v18276_v56, -inf }
 0x579   : > { %9791 = vst.msk [vmem:[%s18456_s23 + $0x8] sm:$0xff] %vm9789_vm4, %v19970_v0  ;;  %v9211_v39 = vpop.permute.xlu1 %9210  ;;  %9720 = vrot.lane.b32.xlu0 %v9626_v20, %s12237_s22 }
 0x57a   : > { %9824 = vst.msk [vmem:[%s18456_s23 + $0x8] sm:$0xff] %vm9822_vm14, %v19970_v0  ;;  %vm9243_vm11 = vcmp.ne.s32.totalorder %v9211_v39, 0  ;;  %v19998_v0 = vld [vmem:[#allocation66_spill] sm:$0xff] }
 0x57b   : > { %9985 = vst.msk [vmem:[%s18456_s23 + $0x8] sm:$0xff] %vm9983_vm15, %v18221_v57  ;;  %vm9275_vm8 = vmand %vm18284_vm7, %vm9243_vm11  ;;  %v9665_v8 = vpop.permute.xlu0 %9664 }
 0x57c   : > { %10018 = vst.msk [vmem:[%s18456_s23 + $0x8] sm:$0xff] %vm10016_vm0, %v18221_v57  ;;  %v9627_v56 = vsel %vm9275_vm8, %v18288_v43, -inf }
 0x57d   : > { %10051 = vst.msk [vmem:[%s18456_s23 + $0x8] sm:$0xff] %vm10049_vm10, %v12240_v44  ;;  %9722 = vrot.lane.b32.xlu1 %v9627_v56, %s12237_s22  ;;  %9947 = vrot.lane.b32.xlu0 %v18235_v18, %s12235_s17  ;;  %v19973_v18 = vld [vmem:[#allocation72_spill] sm:$0xff] }
 0x57e   : > { %9759 = vst.msk [vmem:[%s18456_s23 + $0x10] sm:$0xff] %vm9756_vm13, %v9665_v8 }
 0x57f   : > { %9792 = vst.msk [vmem:[%s18456_s23 + $0x10] sm:$0xff] %vm9789_vm4, %v19972_v59  ;;  %v9667_v57 = vpop.permute.xlu1 %9666 }
 0x580   : > { %9825 = vst.msk [vmem:[%s18456_s23 + $0x10] sm:$0xff] %vm9822_vm14, %v19972_v59 }
 0x581   : > { %9986 = vst.msk [vmem:[%s18456_s23 + $0x10] sm:$0xff] %vm9983_vm15, %v18258_v40  ;;  %9949 = vrot.lane.b32.xlu1 %v18246_v54, %s12235_s17  ;;  %v19974_v54 = vld [vmem:[#allocation52_spill] sm:$0xff] }
 0x582   : > { %10019 = vst.msk [vmem:[%s18456_s23 + $0x10] sm:$0xff] %vm10016_vm0, %v18258_v40 }
 0x583   : > { %9760 = vst.msk [vmem:[%s18456_s23 + $0x18] sm:$0xff] %vm9756_vm13, %v9667_v57  ;;  %v9669_v40 = vpop.permute.xlu0 %9668 }
 0x584   : > { %10052 = vst.msk [vmem:[%s18456_s23 + $0x10] sm:$0xff] %vm10049_vm10, %v12240_v44 }
 0x585   : > { %9793 = vst.msk [vmem:[%s18456_s23 + $0x18] sm:$0xff] %vm9789_vm4, %v19973_v18 }
 0x586   : > { %9826 = vst.msk [vmem:[%s18456_s23 + $0x18] sm:$0xff] %vm9822_vm14, %v19973_v18 }
 0x587   : > { %9987 = vst.msk [vmem:[%s18456_s23 + $0x18] sm:$0xff] %vm9983_vm15, %v18274_v35 }
 0x588   : > { %10020 = vst.msk [vmem:[%s18456_s23 + $0x18] sm:$0xff] %vm10016_vm0, %v18274_v35  ;;  %v9671_v35 = vpop.permute.xlu1 %9670 }
 0x589   : > { %9761 = vst.msk [vmem:[%s18456_s23 + $0x20] sm:$0xff] %vm9756_vm13, %v9669_v40  ;;  %9762 = vst.msk [vmem:[%s18456_s23 + $0x28] sm:$0xff] %vm9756_vm13, %v9671_v35 }
 0x58a   : > { %10053 = vst.msk [vmem:[%s18456_s23 + $0x18] sm:$0xff] %vm10049_vm10, %v12240_v44 }
 0x58b   : > { %9794 = vst.msk [vmem:[%s18456_s23 + $0x20] sm:$0xff] %vm9789_vm4, %v19974_v54  ;;  %9795 = vst.msk [vmem:[%s18456_s23 + $0x28] sm:$0xff] %vm9789_vm4, %v19975_v63  ;;  %v9673_v43 = vpop.permute.xlu0 %9672 }
 0x58c   : > { %9827 = vst.msk [vmem:[%s18456_s23 + $0x20] sm:$0xff] %vm9822_vm14, %v19974_v54  ;;  %9828 = vst.msk [vmem:[%s18456_s23 + $0x28] sm:$0xff] %vm9822_vm14, %v19975_v63 }
 0x58d   : > { %9988 = vst.msk [vmem:[%s18456_s23 + $0x20] sm:$0xff] %vm9983_vm15, %v18298_v17  ;;  %9989 = vst.msk [vmem:[%s18456_s23 + $0x28] sm:$0xff] %vm9983_vm15, %v18304_v55 }
 0x58e   : > { %10021 = vst.msk [vmem:[%s18456_s23 + $0x20] sm:$0xff] %vm10016_vm0, %v18298_v17  ;;  %10022 = vst.msk [vmem:[%s18456_s23 + $0x28] sm:$0xff] %vm10016_vm0, %v18304_v55  ;;  %v19976_v17 = vld [vmem:[#allocation53_spill] sm:$0xff] }
 0x58f   : > { %10054 = vst.msk [vmem:[%s18456_s23 + $0x20] sm:$0xff] %vm10049_vm10, %v12240_v44  ;;  %10055 = vst.msk [vmem:[%s18456_s23 + $0x28] sm:$0xff] %vm10049_vm10, %v12240_v44  ;;  %v9675_v55 = vpop.permute.xlu1 %9674 }
 0x590   : > { %9763 = vst.msk [vmem:[%s18456_s23 + $0x30] sm:$0xff] %vm9756_vm13, %v9673_v43  ;;  %9764 = vst.msk [vmem:[%s18456_s23 + $0x38] sm:$0xff] %vm9756_vm13, %v9675_v55 }
 0x591   : > { %9796 = vst.msk [vmem:[%s18456_s23 + $0x30] sm:$0xff] %vm9789_vm4, %v19976_v17  ;;  %9797 = vst.msk [vmem:[%s18456_s23 + $0x38] sm:$0xff] %vm9789_vm4, %v19977_v58 }
 0x592   : > { %9829 = vst.msk [vmem:[%s18456_s23 + $0x30] sm:$0xff] %vm9822_vm14, %v19976_v17  ;;  %9830 = vst.msk [vmem:[%s18456_s23 + $0x38] sm:$0xff] %vm9822_vm14, %v19977_v58 }
 0x593   : > { %9990 = vst.msk [vmem:[%s18456_s23 + $0x30] sm:$0xff] %vm9983_vm15, %v18310_v19  ;;  %9991 = vst.msk [vmem:[%s18456_s23 + $0x38] sm:$0xff] %vm9983_vm15, %v18316_v32 }
 0x594   : > { %10023 = vst.msk [vmem:[%s18456_s23 + $0x30] sm:$0xff] %vm10016_vm0, %v18310_v19  ;;  %v9677_v19 = vpop.permute.xlu0 %9676  ;;  %10024 = vst.msk [vmem:[%s18456_s23 + $0x38] sm:$0xff] %vm10016_vm0, %v18316_v32 }
 0x595   : > { %10056 = vst.msk [vmem:[%s18456_s23 + $0x30] sm:$0xff] %vm10049_vm10, %v12240_v44  ;;  %10057 = vst.msk [vmem:[%s18456_s23 + $0x38] sm:$0xff] %vm10049_vm10, %v12240_v44 }
 0x596   : > { %9765 = vst.msk [vmem:[%s18456_s23 + $0x40] sm:$0xff] %vm9756_vm13, %v9677_v19 }
 0x597   : > { %9798 = vst.msk [vmem:[%s18456_s23 + $0x40] sm:$0xff] %vm9789_vm4, %v19978_v34  ;;  %v9679_v32 = vpop.permute.xlu1 %9678 }
 0x598   : > { %9831 = vst.msk [vmem:[%s18456_s23 + $0x40] sm:$0xff] %vm9822_vm14, %v19978_v34 }
 0x599   : > { %9992 = vst.msk [vmem:[%s18456_s23 + $0x40] sm:$0xff] %vm9983_vm15, %v18322_v51 }
 0x59a   : > { %10025 = vst.msk [vmem:[%s18456_s23 + $0x40] sm:$0xff] %vm10016_vm0, %v18322_v51 }
 0x59b   : > { %9766 = vst.msk [vmem:[%s18456_s23 + $0x48] sm:$0xff] %vm9756_vm13, %v9679_v32  ;;  %v9681_v51 = vpop.permute.xlu0 %9680 }
 0x59c   : > { %10058 = vst.msk [vmem:[%s18456_s23 + $0x40] sm:$0xff] %vm10049_vm10, %v12240_v44 }
 0x59d   : > { %9799 = vst.msk [vmem:[%s18456_s23 + $0x48] sm:$0xff] %vm9789_vm4, %v19979_v6 }
 0x59e   : > { %9832 = vst.msk [vmem:[%s18456_s23 + $0x48] sm:$0xff] %vm9822_vm14, %v19979_v6 }
 0x59f   : > { %9993 = vst.msk [vmem:[%s18456_s23 + $0x48] sm:$0xff] %vm9983_vm15, %v18328_v42 }
 0x5a0   : > { %10026 = vst.msk [vmem:[%s18456_s23 + $0x48] sm:$0xff] %vm10016_vm0, %v18328_v42  ;;  %v9683_v42 = vpop.permute.xlu1 %9682 }
 0x5a1   : > { %9767 = vst.msk [vmem:[%s18456_s23 + $0x50] sm:$0xff] %vm9756_vm13, %v9681_v51  ;;  %9768 = vst.msk [vmem:[%s18456_s23 + $0x58] sm:$0xff] %vm9756_vm13, %v9683_v42 }
 0x5a2   : > { %10059 = vst.msk [vmem:[%s18456_s23 + $0x48] sm:$0xff] %vm10049_vm10, %v12240_v44 }
 0x5a3   : > { %9800 = vst.msk [vmem:[%s18456_s23 + $0x50] sm:$0xff] %vm9789_vm4, %v19980_v2  ;;  %9801 = vst.msk [vmem:[%s18456_s23 + $0x58] sm:$0xff] %vm9789_vm4, %v19981_v22 }
 0x5a4   : > { %9833 = vst.msk [vmem:[%s18456_s23 + $0x50] sm:$0xff] %vm9822_vm14, %v19980_v2  ;;  %9834 = vst.msk [vmem:[%s18456_s23 + $0x58] sm:$0xff] %vm9822_vm14, %v19981_v22 }
 0x5a5   : > { %9994 = vst.msk [vmem:[%s18456_s23 + $0x50] sm:$0xff] %vm9983_vm15, %v18334_v16  ;;  %9995 = vst.msk [vmem:[%s18456_s23 + $0x58] sm:$0xff] %vm9983_vm15, %v18340_v29 }
 0x5a6   : > { %10027 = vst.msk [vmem:[%s18456_s23 + $0x50] sm:$0xff] %vm10016_vm0, %v18334_v16  ;;  %v9685_v16 = vpop.permute.xlu0 %9684  ;;  %10028 = vst.msk [vmem:[%s18456_s23 + $0x58] sm:$0xff] %vm10016_vm0, %v18340_v29 }
 0x5a7   : > { %10060 = vst.msk [vmem:[%s18456_s23 + $0x50] sm:$0xff] %vm10049_vm10, %v12240_v44  ;;  %10061 = vst.msk [vmem:[%s18456_s23 + $0x58] sm:$0xff] %vm10049_vm10, %v12240_v44  ;;  %v9687_v29 = vpop.permute.xlu1 %9686 }
 0x5a8   : > { %9769 = vst.msk [vmem:[%s18456_s23 + $0x60] sm:$0xff] %vm9756_vm13, %v9685_v16  ;;  %9770 = vst.msk [vmem:[%s18456_s23 + $0x68] sm:$0xff] %vm9756_vm13, %v9687_v29 }
 0x5a9   : > { %9802 = vst.msk [vmem:[%s18456_s23 + $0x60] sm:$0xff] %vm9789_vm4, %v19982_v28  ;;  %9803 = vst.msk [vmem:[%s18456_s23 + $0x68] sm:$0xff] %vm9789_vm4, %v19983_v5 }
 0x5aa   : > { %9835 = vst.msk [vmem:[%s18456_s23 + $0x60] sm:$0xff] %vm9822_vm14, %v19982_v28  ;;  %9836 = vst.msk [vmem:[%s18456_s23 + $0x68] sm:$0xff] %vm9822_vm14, %v19983_v5 }
 0x5ab   : > { %9996 = vst.msk [vmem:[%s18456_s23 + $0x60] sm:$0xff] %vm9983_vm15, %v18346_v15  ;;  %9997 = vst.msk [vmem:[%s18456_s23 + $0x68] sm:$0xff] %vm9983_vm15, %v18352_v60 }
 0x5ac   : > { %10029 = vst.msk [vmem:[%s18456_s23 + $0x60] sm:$0xff] %vm10016_vm0, %v18346_v15  ;;  %v9689_v15 = vpop.permute.xlu0 %9688  ;;  %10030 = vst.msk [vmem:[%s18456_s23 + $0x68] sm:$0xff] %vm10016_vm0, %v18352_v60 }
 0x5ad   : > { %10062 = vst.msk [vmem:[%s18456_s23 + $0x60] sm:$0xff] %vm10049_vm10, %v12240_v44  ;;  %10063 = vst.msk [vmem:[%s18456_s23 + $0x68] sm:$0xff] %vm10049_vm10, %v12240_v44 }
 0x5ae   : > { %9771 = vst.msk [vmem:[%s18456_s23 + $0x70] sm:$0xff] %vm9756_vm13, %v9689_v15 }
 0x5af   : > { %9804 = vst.msk [vmem:[%s18456_s23 + $0x70] sm:$0xff] %vm9789_vm4, %v19984_v61  ;;  %v9691_v60 = vpop.permute.xlu1 %9690 }
 0x5b0   : > { %9837 = vst.msk [vmem:[%s18456_s23 + $0x70] sm:$0xff] %vm9822_vm14, %v19984_v61 }
 0x5b1   : > { %9998 = vst.msk [vmem:[%s18456_s23 + $0x70] sm:$0xff] %vm9983_vm15, %v18358_v9 }
 0x5b2   : > { %10031 = vst.msk [vmem:[%s18456_s23 + $0x70] sm:$0xff] %vm10016_vm0, %v18358_v9 }
 0x5b3   : > { %9772 = vst.msk [vmem:[%s18456_s23 + $0x78] sm:$0xff] %vm9756_vm13, %v9691_v60  ;;  %v9693_v9 = vpop.permute.xlu0 %9692 }
 0x5b4   : > { %10064 = vst.msk [vmem:[%s18456_s23 + $0x70] sm:$0xff] %vm10049_vm10, %v12240_v44 }
 0x5b5   : > { %9805 = vst.msk [vmem:[%s18456_s23 + $0x78] sm:$0xff] %vm9789_vm4, %v19985_v45 }
 0x5b6   : > { %9838 = vst.msk [vmem:[%s18456_s23 + $0x78] sm:$0xff] %vm9822_vm14, %v19985_v45 }
 0x5b7   : > { %9999 = vst.msk [vmem:[%s18456_s23 + $0x78] sm:$0xff] %vm9983_vm15, %v18364_v53 }
 0x5b8   : > { %10032 = vst.msk [vmem:[%s18456_s23 + $0x78] sm:$0xff] %vm10016_vm0, %v18364_v53  ;;  %v9695_v53 = vpop.permute.xlu1 %9694 }
 0x5b9   : > { %9773 = vst.msk [vmem:[%s18456_s23 + $0x80] sm:$0xff] %vm9756_vm13, %v9693_v9  ;;  %9774 = vst.msk [vmem:[%s18456_s23 + $0x88] sm:$0xff] %vm9756_vm13, %v9695_v53 }
 0x5ba   : > { %10065 = vst.msk [vmem:[%s18456_s23 + $0x78] sm:$0xff] %vm10049_vm10, %v12240_v44 }
 0x5bb   : > { %9806 = vst.msk [vmem:[%s18456_s23 + $0x80] sm:$0xff] %vm9789_vm4, %v19986_v37  ;;  %9807 = vst.msk [vmem:[%s18456_s23 + $0x88] sm:$0xff] %vm9789_vm4, %v19987_v14 }
 0x5bc   : > { %9839 = vst.msk [vmem:[%s18456_s23 + $0x80] sm:$0xff] %vm9822_vm14, %v19986_v37  ;;  %9840 = vst.msk [vmem:[%s18456_s23 + $0x88] sm:$0xff] %vm9822_vm14, %v19987_v14 }
 0x5bd   : > { %10000 = vst.msk [vmem:[%s18456_s23 + $0x80] sm:$0xff] %vm9983_vm15, %v18370_v52  ;;  %10001 = vst.msk [vmem:[%s18456_s23 + $0x88] sm:$0xff] %vm9983_vm15, %v18376_v24 }
 0x5be   : > { %10033 = vst.msk [vmem:[%s18456_s23 + $0x80] sm:$0xff] %vm10016_vm0, %v18370_v52  ;;  %v9697_v52 = vpop.permute.xlu0 %9696  ;;  %10034 = vst.msk [vmem:[%s18456_s23 + $0x88] sm:$0xff] %vm10016_vm0, %v18376_v24 }
 0x5bf   : > { %10066 = vst.msk [vmem:[%s18456_s23 + $0x80] sm:$0xff] %vm10049_vm10, %v12240_v44  ;;  %10067 = vst.msk [vmem:[%s18456_s23 + $0x88] sm:$0xff] %vm10049_vm10, %v12240_v44  ;;  %v9699_v24 = vpop.permute.xlu1 %9698 }
 0x5c0   : > { %9775 = vst.msk [vmem:[%s18456_s23 + $0x90] sm:$0xff] %vm9756_vm13, %v9697_v52  ;;  %9776 = vst.msk [vmem:[%s18456_s23 + $0x98] sm:$0xff] %vm9756_vm13, %v9699_v24 }
 0x5c1   : > { %9808 = vst.msk [vmem:[%s18456_s23 + $0x90] sm:$0xff] %vm9789_vm4, %v19988_v41  ;;  %9809 = vst.msk [vmem:[%s18456_s23 + $0x98] sm:$0xff] %vm9789_vm4, %v19989_v13 }
 0x5c2   : > { %9841 = vst.msk [vmem:[%s18456_s23 + $0x90] sm:$0xff] %vm9822_vm14, %v19988_v41  ;;  %9842 = vst.msk [vmem:[%s18456_s23 + $0x98] sm:$0xff] %vm9822_vm14, %v19989_v13 }
 0x5c3   : > { %10002 = vst.msk [vmem:[%s18456_s23 + $0x90] sm:$0xff] %vm9983_vm15, %v18382_v11  ;;  %10003 = vst.msk [vmem:[%s18456_s23 + $0x98] sm:$0xff] %vm9983_vm15, %v18388_v23 }
 0x5c4   : > { %10035 = vst.msk [vmem:[%s18456_s23 + $0x90] sm:$0xff] %vm10016_vm0, %v18382_v11  ;;  %v9701_v11 = vpop.permute.xlu0 %9700  ;;  %10036 = vst.msk [vmem:[%s18456_s23 + $0x98] sm:$0xff] %vm10016_vm0, %v18388_v23 }
 0x5c5   : > { %10068 = vst.msk [vmem:[%s18456_s23 + $0x90] sm:$0xff] %vm10049_vm10, %v12240_v44  ;;  %10069 = vst.msk [vmem:[%s18456_s23 + $0x98] sm:$0xff] %vm10049_vm10, %v12240_v44 }
 0x5c6   : > { %9777 = vst.msk [vmem:[%s18456_s23 + $0xa0] sm:$0xff] %vm9756_vm13, %v9701_v11 }
 0x5c7   : > { %9810 = vst.msk [vmem:[%s18456_s23 + $0xa0] sm:$0xff] %vm9789_vm4, %v19990_v31  ;;  %v9703_v23 = vpop.permute.xlu1 %9702 }
 0x5c8   : > { %9843 = vst.msk [vmem:[%s18456_s23 + $0xa0] sm:$0xff] %vm9822_vm14, %v19990_v31 }
 0x5c9   : > { %10004 = vst.msk [vmem:[%s18456_s23 + $0xa0] sm:$0xff] %vm9983_vm15, %v18394_v12 }
 0x5ca   : > { %10037 = vst.msk [vmem:[%s18456_s23 + $0xa0] sm:$0xff] %vm10016_vm0, %v18394_v12 }
 0x5cb   : > { %9778 = vst.msk [vmem:[%s18456_s23 + $0xa8] sm:$0xff] %vm9756_vm13, %v9703_v23  ;;  %v9705_v12 = vpop.permute.xlu0 %9704 }
 0x5cc   : > { %10070 = vst.msk [vmem:[%s18456_s23 + $0xa0] sm:$0xff] %vm10049_vm10, %v12240_v44 }
 0x5cd   : > { %9811 = vst.msk [vmem:[%s18456_s23 + $0xa8] sm:$0xff] %vm9789_vm4, %v19991_v50 }
 0x5ce   : > { %9844 = vst.msk [vmem:[%s18456_s23 + $0xa8] sm:$0xff] %vm9822_vm14, %v19991_v50 }
 0x5cf   : > { %10005 = vst.msk [vmem:[%s18456_s23 + $0xa8] sm:$0xff] %vm9983_vm15, %v18400_v30 }
 0x5d0   : > { %10038 = vst.msk [vmem:[%s18456_s23 + $0xa8] sm:$0xff] %vm10016_vm0, %v18400_v30  ;;  %v9707_v30 = vpop.permute.xlu1 %9706 }
 0x5d1   : > { %9779 = vst.msk [vmem:[%s18456_s23 + $0xb0] sm:$0xff] %vm9756_vm13, %v9705_v12  ;;  %9780 = vst.msk [vmem:[%s18456_s23 + $0xb8] sm:$0xff] %vm9756_vm13, %v9707_v30 }
 0x5d2   : > { %10071 = vst.msk [vmem:[%s18456_s23 + $0xa8] sm:$0xff] %vm10049_vm10, %v12240_v44 }
 0x5d3   : > { %9812 = vst.msk [vmem:[%s18456_s23 + $0xb0] sm:$0xff] %vm9789_vm4, %v19992_v7  ;;  %9813 = vst.msk [vmem:[%s18456_s23 + $0xb8] sm:$0xff] %vm9789_vm4, %v19993_v62 }
 0x5d4   : > { %9845 = vst.msk [vmem:[%s18456_s23 + $0xb0] sm:$0xff] %vm9822_vm14, %v19992_v7  ;;  %9846 = vst.msk [vmem:[%s18456_s23 + $0xb8] sm:$0xff] %vm9822_vm14, %v19993_v62 }
 0x5d5   : > { %10006 = vst.msk [vmem:[%s18456_s23 + $0xb0] sm:$0xff] %vm9983_vm15, %v18406_v48  ;;  %10007 = vst.msk [vmem:[%s18456_s23 + $0xb8] sm:$0xff] %vm9983_vm15, %v18412_v36 }
 0x5d6   : > { %10039 = vst.msk [vmem:[%s18456_s23 + $0xb0] sm:$0xff] %vm10016_vm0, %v18406_v48  ;;  %v9709_v48 = vpop.permute.xlu0 %9708  ;;  %10040 = vst.msk [vmem:[%s18456_s23 + $0xb8] sm:$0xff] %vm10016_vm0, %v18412_v36 }
 0x5d7   : > { %10072 = vst.msk [vmem:[%s18456_s23 + $0xb0] sm:$0xff] %vm10049_vm10, %v12240_v44  ;;  %10073 = vst.msk [vmem:[%s18456_s23 + $0xb8] sm:$0xff] %vm10049_vm10, %v12240_v44  ;;  %v9711_v36 = vpop.permute.xlu1 %9710 }
 0x5d8   : > { %9781 = vst.msk [vmem:[%s18456_s23 + $0xc0] sm:$0xff] %vm9756_vm13, %v9709_v48  ;;  %9782 = vst.msk [vmem:[%s18456_s23 + $0xc8] sm:$0xff] %vm9756_vm13, %v9711_v36 }
 0x5d9   : > { %9814 = vst.msk [vmem:[%s18456_s23 + $0xc0] sm:$0xff] %vm9789_vm4, %v19994_v25  ;;  %9815 = vst.msk [vmem:[%s18456_s23 + $0xc8] sm:$0xff] %vm9789_vm4, %v19995_v3 }
 0x5da   : > { %9847 = vst.msk [vmem:[%s18456_s23 + $0xc0] sm:$0xff] %vm9822_vm14, %v19994_v25  ;;  %9848 = vst.msk [vmem:[%s18456_s23 + $0xc8] sm:$0xff] %vm9822_vm14, %v19995_v3 }
 0x5db   : > { %10008 = vst.msk [vmem:[%s18456_s23 + $0xc0] sm:$0xff] %vm9983_vm15, %v18418_v1  ;;  %10009 = vst.msk [vmem:[%s18456_s23 + $0xc8] sm:$0xff] %vm9983_vm15, %v18424_v47 }
 0x5dc   : > { %10041 = vst.msk [vmem:[%s18456_s23 + $0xc0] sm:$0xff] %vm10016_vm0, %v18418_v1  ;;  %v9713_v1 = vpop.permute.xlu0 %9712  ;;  %10042 = vst.msk [vmem:[%s18456_s23 + $0xc8] sm:$0xff] %vm10016_vm0, %v18424_v47 }
 0x5dd   : > { %10074 = vst.msk [vmem:[%s18456_s23 + $0xc0] sm:$0xff] %vm10049_vm10, %v12240_v44  ;;  %10075 = vst.msk [vmem:[%s18456_s23 + $0xc8] sm:$0xff] %vm10049_vm10, %v12240_v44 }
 0x5de   : > { %9783 = vst.msk [vmem:[%s18456_s23 + $0xd0] sm:$0xff] %vm9756_vm13, %v9713_v1 }
 0x5df   : > { %9816 = vst.msk [vmem:[%s18456_s23 + $0xd0] sm:$0xff] %vm9789_vm4, %v19996_v33  ;;  %v9715_v47 = vpop.permute.xlu1 %9714 }
 0x5e0   : > { %9849 = vst.msk [vmem:[%s18456_s23 + $0xd0] sm:$0xff] %vm9822_vm14, %v19996_v33 }
 0x5e1   : > { %10010 = vst.msk [vmem:[%s18456_s23 + $0xd0] sm:$0xff] %vm9983_vm15, %v18430_v26 }
 0x5e2   : > { %10043 = vst.msk [vmem:[%s18456_s23 + $0xd0] sm:$0xff] %vm10016_vm0, %v18430_v26 }
 0x5e3   : > { %9784 = vst.msk [vmem:[%s18456_s23 + $0xd8] sm:$0xff] %vm9756_vm13, %v9715_v47  ;;  %v9717_v26 = vpop.permute.xlu0 %9716 }
 0x5e4   : > { %10076 = vst.msk [vmem:[%s18456_s23 + $0xd0] sm:$0xff] %vm10049_vm10, %v12240_v44 }
 0x5e5   : > { %9817 = vst.msk [vmem:[%s18456_s23 + $0xd8] sm:$0xff] %vm9789_vm4, %v19997_v46 }
 0x5e6   : > { %9850 = vst.msk [vmem:[%s18456_s23 + $0xd8] sm:$0xff] %vm9822_vm14, %v19997_v46 }
 0x5e7   : > { %10011 = vst.msk [vmem:[%s18456_s23 + $0xd8] sm:$0xff] %vm9983_vm15, %v18436_v21  ;;  %v9719_v20 = vpop.permute.xlu1 %9718 }
 0x5e8   : > { %10044 = vst.msk [vmem:[%s18456_s23 + $0xd8] sm:$0xff] %vm10016_vm0, %v18436_v21 }
 0x5e9   : > { %9785 = vst.msk [vmem:[%s18456_s23 + $0xe0] sm:$0xff] %vm9756_vm13, %v9717_v26  ;;  %9786 = vst.msk [vmem:[%s18456_s23 + $0xe8] sm:$0xff] %vm9756_vm13, %v9719_v20 }
 0x5ea   : > { %10077 = vst.msk [vmem:[%s18456_s23 + $0xd8] sm:$0xff] %vm10049_vm10, %v12240_v44 }
 0x5eb   : > { %9818 = vst.msk [vmem:[%s18456_s23 + $0xe0] sm:$0xff] %vm9789_vm4, %v19998_v0  ;;  %9819 = vst.msk [vmem:[%s18456_s23 + $0xe8] sm:$0xff] %vm9789_vm4, %v18212_v27  ;;  %v9721_v21 = vpop.permute.xlu0 %9720 }
 0x5ec   : > { %9851 = vst.msk [vmem:[%s18456_s23 + $0xe0] sm:$0xff] %vm9822_vm14, %v19998_v0  ;;  %9852 = vst.msk [vmem:[%s18456_s23 + $0xe8] sm:$0xff] %vm9822_vm14, %v18212_v27 }
 0x5ed   : > { %10012 = vst.msk [vmem:[%s18456_s23 + $0xe0] sm:$0xff] %vm9983_vm15, %v18442_v10  ;;  %10013 = vst.msk [vmem:[%s18456_s23 + $0xe8] sm:$0xff] %vm9983_vm15, %v18449_v38 }
 0x5ee   : > { %10045 = vst.msk [vmem:[%s18456_s23 + $0xe0] sm:$0xff] %vm10016_vm0, %v18442_v10  ;;  %10046 = vst.msk [vmem:[%s18456_s23 + $0xe8] sm:$0xff] %vm10016_vm0, %v18449_v38 }
 0x5ef   : > { %10078 = vst.msk [vmem:[%s18456_s23 + $0xe0] sm:$0xff] %vm10049_vm10, %v12240_v44  ;;  %10079 = vst.msk [vmem:[%s18456_s23 + $0xe8] sm:$0xff] %vm10049_vm10, %v12240_v44  ;;  %v9723_v27 = vpop.permute.xlu1 %9722  ;;  %v9948_v10 = vpop.permute.xlu0 %9947 }
 0x5f0   : > { %9787 = vst.msk [vmem:[%s18456_s23 + $0xf0] sm:$0xff] %vm9756_vm13, %v9721_v21  ;;  %9788 = vst.msk [vmem:[%s18456_s23 + $0xf8] sm:$0xff] %vm9756_vm13, %v9723_v27 }
 0x5f1   : > { %9820 = vst.msk [vmem:[%s18456_s23 + $0xf0] sm:$0xff] %vm9789_vm4, %v18233_v4  ;;  %9821 = vst.msk [vmem:[%s18456_s23 + $0xf8] sm:$0xff] %vm9789_vm4, %v18244_v49 }
 0x5f2   : > { %9853 = vst.msk [vmem:[%s18456_s23 + $0xf0] sm:$0xff] %vm9822_vm14, %v18233_v4  ;;  %9854 = vst.msk [vmem:[%s18456_s23 + $0xf8] sm:$0xff] %vm9822_vm14, %v18244_v49 }
 0x5f3   : > { %10014 = vst.msk [vmem:[%s18456_s23 + $0xf0] sm:$0xff] %vm9983_vm15, %v9948_v10  ;;  %v9950_v38 = vpop.permute.xlu1 %9949 }
 0x5f4   : > { %10047 = vst.msk [vmem:[%s18456_s23 + $0xf0] sm:$0xff] %vm10016_vm0, %v9948_v10 }
 0x5f5   : > { %10080 = vst.msk [vmem:[%s18456_s23 + $0xf0] sm:$0xff] %vm10049_vm10, %v12240_v44 }
 0x5f6   : > { %10015 = vst.msk [vmem:[%s18456_s23 + $0xf8] sm:$0xff] %vm9983_vm15, %v9950_v38 }
 0x5f7   : > { %10048 = vst.msk [vmem:[%s18456_s23 + $0xf8] sm:$0xff] %vm10016_vm0, %v9950_v38 }
 0x5f8   : > { %10081 = vst.msk [vmem:[%s18456_s23 + $0xf8] sm:$0xff] %vm10049_vm10, %v12240_v44 }
 0x5f9 PF: > { %s18_s29 = sadd.s32 1, %s12233_s29   ;;  %s19999_s27 = smov %s12229_s28 }
 0x5fa   : > { %p15_p5 = scmp.ge.s32.totalorder %s18_s29, 4   ;;  %s20000_s28 = smov %s20002_s30 }
 0x5fc   :  { %17 = sbr.rel (!%p15_p5) target bundleno = 2 (0x2), region = 99 }

</bundles_post_ra>
